<compile_context>
chip_gen: v7x
topology: tpu7x:2x2x1
jax: 0.10.0
libtpu: 0.0.40
codegen_flags: <defaults>
</compile_context>

<pallas_src>
import functools
import math

import jax
import jax.numpy as jnp
from jax import lax
from jax.experimental import pallas as pl
from jax.experimental.pallas import tpu as pltpu


def _round_up(x, m):
    return (x + m - 1) // m * m


# ------------------------------- kernels ----------------------------------- #

def _mlc_layer_kernel(x_ref, w_ref, b_ref, out_ref, patches_ref,
                      *, H, W, K, pad_out):
    """One fused MLC layer (conv + gate + shortcut for all nodes).

    x_ref       : (bt, H+2p, W+2p, cin_p)   spatially + channel padded NHWC
    w_ref       : (K*K*cin_p, 3*cout_p)     [conv | gate | shortcut] columns
    b_ref       : (1, 3*cout_p)
    out_ref     : (bt, H+2p, W+2p, cout_p)  if pad_out else (bt, H, W, cout_p)
    patches_ref : (bt*H*W, K*K*cin_p)       im2col VMEM scratch
    """
    bt = x_ref.shape[0]
    cin = x_ref.shape[3]
    cout = out_ref.shape[3]
    pad = K // 2
    m = bt * H * W

    # im2col: one shifted copy per tap (lane-tile aligned since cin is a
    # multiple of 128), then a single wide MXU matmul so the tap accumulation
    # happens inside the MXU (contraction depth K*K*cin).
    for kh in range(K):
        for kw in range(K):
            t = kh * K + kw
            patches_ref[:, t * cin:(t + 1) * cin] = (
                x_ref[:, kh:kh + H, kw:kw + W, :].reshape(m, cin))

    acc = jnp.dot(patches_ref[...], w_ref[...],
                  preferred_element_type=jnp.float32) + b_ref[...]

    main = jnp.maximum(acc[:, :cout], 0.0)             # ReLU(conv)
    gate = jax.nn.sigmoid(acc[:, cout:2 * cout])       # sigmoid(gate_conv)
    res = (main * gate + acc[:, 2 * cout:]).reshape(bt, H, W, cout)

    if pad_out:
        # Write a spatially pre-padded activation (zero halo) so the next
        # layer consumes it directly -- no XLA pad/reshape HBM round trip.
        out_ref[...] = jnp.zeros_like(out_ref)
        out_ref[:, pad:pad + H, pad:pad + W, :] = res
    else:
        out_ref[...] = res


def _gated_head_kernel(x_ref, w1g_ref, b1g_ref, w2_ref, b2_ref, out_ref,
                       acc_ref, *, hidden):
    """GatedClassifierHead, K-tiled over the fused contraction axis."""
    kk = pl.program_id(0)

    @pl.when(kk == 0)
    def _():
        acc_ref[...] = jnp.zeros_like(acc_ref)

    # fc1 and gate_layer fused into one N = 2*hidden matmul; bf16 weights are
    # cast to f32 in-kernel (halved HBM traffic, exact f32 accumulation).
    acc_ref[...] += jnp.dot(x_ref[...], w1g_ref[...].astype(jnp.float32),
                            preferred_element_type=jnp.float32)

    @pl.when(kk == pl.num_programs(0) - 1)
    def _():
        acc = acc_ref[...] + b1g_ref[...]
        h1 = jnp.maximum(acc[:, :hidden], 0.0)
        gate = jax.nn.sigmoid(acc[:, hidden:])
        out_ref[...] = (jnp.dot(h1 * gate, w2_ref[...],
                                preferred_element_type=jnp.float32)
                        + b2_ref[...])


# ------------------------------- wrappers ----------------------------------- #

def mlc_layer(xpad, layer, *, K, pad_out):
    B, Hp, Wp, cin_p = xpad.shape
    pad = K // 2
    H, W = Hp - 2 * pad, Wp - 2 * pad
    wf, bf = layer["wf"], layer["bf"]
    cout_p = wf.shape[1] // 3

    # Batch tile: as many images per step as keeps M = bt*H*W near the MXU row
    # budget; remaining batch tiles form a "parallel" grid axis (megacore).
    bt = 1
    for cand in range(B, 0, -1):
        if B % cand == 0 and cand * H * W <= 1024:
            bt = cand
            break
    grid = (B // bt,)

    if pad_out:
        out_shape = jax.ShapeDtypeStruct((B, Hp, Wp, cout_p), jnp.float32)
        out_spec = pl.BlockSpec((bt, Hp, Wp, cout_p), lambda b: (b, 0, 0, 0))
        out_elems = B * Hp * Wp * cout_p
    else:
        out_shape = jax.ShapeDtypeStruct((B, H, W, cout_p), jnp.float32)
        out_spec = pl.BlockSpec((bt, H, W, cout_p), lambda b: (b, 0, 0, 0))
        out_elems = B * H * W * cout_p

    kernel = functools.partial(_mlc_layer_kernel, H=H, W=W, K=K,
                               pad_out=pad_out)
    flops = 2 * B * H * W * (K * K * cin_p) * (3 * cout_p)
    bytes_accessed = 4 * (xpad.size + wf.size + bf.size + out_elems)

    return pl.pallas_call(
        kernel,
        out_shape=out_shape,
        grid=grid,
        in_specs=[
            pl.BlockSpec((bt, Hp, Wp, cin_p), lambda b: (b, 0, 0, 0)),
            pl.BlockSpec((K * K * cin_p, 3 * cout_p), lambda b: (0, 0)),
            pl.BlockSpec((1, 3 * cout_p), lambda b: (0, 0)),
        ],
        out_specs=out_spec,
        scratch_shapes=[pltpu.VMEM((bt * H * W, K * K * cin_p), jnp.float32)],
        compiler_params=pltpu.CompilerParams(
            dimension_semantics=("parallel",)),
        cost_estimate=pl.CostEstimate(
            flops=flops,
            transcendentals=B * H * W * cout_p,
            bytes_accessed=bytes_accessed),
    )(xpad, wf, bf)


def gated_classifier_head(flat, head):
    """flat is NHWC-flat (padded channels); NCHW Flatten lives in w1g's rows."""
    B, in_feats_p = flat.shape
    hidden = head["w2"].shape[0]
    nc = head["w2"].shape[1]

    tk = in_feats_p
    for cand in (4096, 2048, 1024, 512, 256, 128):
        if in_feats_p % cand == 0:
            tk = cand
            break
    nk = in_feats_p // tk

    kernel = functools.partial(_gated_head_kernel, hidden=hidden)
    flops = 4 * B * in_feats_p * hidden + 2 * B * hidden * nc
    bytes_accessed = (4 * flat.size + 2 * head["w1g"].size
                      + 4 * (head["b1g"].size + head["w2"].size
                             + head["b2"].size + B * nc))

    return pl.pallas_call(
        kernel,
        out_shape=jax.ShapeDtypeStruct((B, nc), jnp.float32),
        grid=(nk,),
        in_specs=[
            pl.BlockSpec((B, tk), lambda k: (0, k)),
            pl.BlockSpec((tk, 2 * hidden), lambda k: (k, 0)),
            pl.BlockSpec((1, 2 * hidden), lambda k: (0, 0)),
            pl.BlockSpec((hidden, nc), lambda k: (0, 0)),
            pl.BlockSpec((1, nc), lambda k: (0, 0)),
        ],
        out_specs=pl.BlockSpec((B, nc), lambda k: (0, 0)),
        scratch_shapes=[pltpu.VMEM((B, 2 * hidden), jnp.float32)],
        compiler_params=pltpu.CompilerParams(
            dimension_semantics=("arbitrary",)),
        cost_estimate=pl.CostEstimate(
            flops=flops,
            transcendentals=B * hidden,
            bytes_accessed=bytes_accessed),
    )(flat, head["w1g"], head["b1g"], head["w2"], head["b2"])


# ------------------------------ parameters ---------------------------------- #

def init_params(key, input_channels, num_classes, num_mlc_layers,
                nodes_per_layer, initial_filters, k, hidden, hw):
    H, W = hw
    layers = []
    cin = input_channels
    cin_p = _round_up(cin, 128)
    for i in range(num_mlc_layers):
        filters = initial_filters * (2 ** i)
        cout = filters * nodes_per_layer
        cout_p = _round_up(cout, 128)
        identity = (cin == filters)

        node_list = []
        for _ in range(nodes_per_layer):
            key, k1, k2, k3, k4, k5, k6 = jax.random.split(key, 7)
            fan_in = cin * k * k
            bound = 1.0 / math.sqrt(fan_in)
            node = {
                "w_conv": jax.random.uniform(k1, (k * k, cin, filters),
                                             jnp.float32, -bound, bound),
                "b_conv": jax.random.uniform(k2, (filters,),
                                             jnp.float32, -bound, bound),
                "w_gate": jax.random.uniform(k3, (k * k, cin, filters),
                                             jnp.float32, -bound, bound),
                "b_gate": jax.random.uniform(k4, (filters,),
                                             jnp.float32, -bound, bound),
            }
            if not identity:
                sb = 1.0 / math.sqrt(cin)
                node["w_sc"] = jax.random.uniform(k5, (cin, filters),
                                                  jnp.float32, -sb, sb)
                node["b_sc"] = jax.random.uniform(k6, (filters,),
                                                  jnp.float32, -sb, sb)
            node_list.append(node)

        w_conv = jnp.concatenate([n["w_conv"] for n in node_list], axis=-1)
        w_gate = jnp.concatenate([n["w_gate"] for n in node_list], axis=-1)
        b_conv = jnp.concatenate([n["b_conv"] for n in node_list])
        b_gate = jnp.concatenate([n["b_gate"] for n in node_list])
        if identity:
            w_sc = jnp.concatenate([jnp.eye(cin, dtype=jnp.float32)]
                                   * nodes_per_layer, axis=-1)
            b_sc = jnp.zeros((cout,), jnp.float32)
        else:
            w_sc = jnp.concatenate([n["w_sc"] for n in node_list], axis=-1)
            b_sc = jnp.concatenate([n["b_sc"] for n in node_list])

        # Fused, channel-padded weight: columns = [conv | gate | shortcut],
        # each group zero-padded to lane-dense cout_p; rows = tap*cin_p + ci
        # with zero rows for padded input channels.  The 1x1 shortcut
        # (projection or identity) occupies the center-tap rows only.
        center = (k // 2) * k + (k // 2)
        wf3 = jnp.zeros((k * k, cin_p, 3 * cout_p), jnp.float32)
        wf3 = wf3.at[:, :cin, 0:cout].set(w_conv)
        wf3 = wf3.at[:, :cin, cout_p:cout_p + cout].set(w_gate)
        wf3 = wf3.at[center, :cin, 2 * cout_p:2 * cout_p + cout].set(w_sc)
        bf = jnp.zeros((1, 3 * cout_p), jnp.float32)
        bf = bf.at[0, 0:cout].set(b_conv)
        bf = bf.at[0, cout_p:cout_p + cout].set(b_gate)
        bf = bf.at[0, 2 * cout_p:2 * cout_p + cout].set(b_sc)

        layers.append({"nodes": node_list,     # kept for the pure-JAX reference
                       "wf": wf3.reshape(k * k * cin_p, 3 * cout_p),
                       "bf": bf})
        cin, cin_p = cout, cout_p

    # ---- gated classifier head (built eagerly; torch builds it lazily) ----
    in_feats = cin * H * W            # torch (real-channel, NCHW) feature count
    in_feats_p = cin_p * H * W        # kernel (padded-channel, NHWC) flatten
    key, k1, k2, k3, k4, k5, k6 = jax.random.split(key, 7)
    b1b = 1.0 / math.sqrt(in_feats)
    b2b = 1.0 / math.sqrt(hidden)
    # Quantize fc1/gate weights to bf16 once; both the kernel (bf16 storage)
    # and the f32 reference use the same values, keeping the check tight.
    w1 = jax.random.uniform(k1, (in_feats, hidden), jnp.float32, -b1b, b1b)
    wg = jax.random.uniform(k3, (in_feats, hidden), jnp.float32, -b1b, b1b)
    w1 = w1.astype(jnp.bfloat16).astype(jnp.float32)
    wg = wg.astype(jnp.bfloat16).astype(jnp.float32)

    # Fold torch's NCHW Flatten into the fused head-weight rows: kernel-flat
    # index i = hw*cin_p + c consumes torch row j = c*H*W + hw (zero row when
    # c is a pad channel).
    i = jnp.arange(in_feats_p)
    c = i % cin_p
    hw_idx = i // cin_p
    valid = c < cin
    j = jnp.where(valid, c * (H * W) + hw_idx, 0)
    w1_rows = jnp.where(valid[:, None], w1[j], 0.0)
    wg_rows = jnp.where(valid[:, None], wg[j], 0.0)

    head = {
        "w1": w1,
        "b1": jax.random.uniform(k2, (1, hidden), jnp.float32, -b1b, b1b),
        "wg": wg,
        "bg": jax.random.uniform(k4, (1, hidden), jnp.float32, -b1b, b1b),
        "w2": jax.random.uniform(k5, (hidden, num_classes), jnp.float32,
                                 -b2b, b2b),
        "b2": jax.random.uniform(k6, (1, num_classes), jnp.float32,
                                 -b2b, b2b),
    }
    head["w1g"] = jnp.concatenate([w1_rows, wg_rows],
                                  axis=1).astype(jnp.bfloat16)
    head["b1g"] = jnp.concatenate([head["b1"], head["bg"]], axis=1)
    return {"layers": layers, "head": head}


# -------------------------------- forward ----------------------------------- #

def forward(params, x_nchw, K):
    pad = K // 2
    B = x_nchw.shape[0]
    layers = params["layers"]
    x = jnp.transpose(x_nchw, (0, 2, 3, 1))            # NCHW -> NHWC, once
    cin = x.shape[-1]
    cin_p = layers[0]["wf"].shape[0] // (K * K)
    # Single XLA pad for the whole network: spatial halo + channel pad to a
    # lane-dense multiple of 128.  Every later halo is written by the kernels.
    x = jnp.pad(x, ((0, 0), (pad, pad), (pad, pad), (0, cin_p - cin)))
    n = len(layers)
    for li, layer in enumerate(layers):
        x = mlc_layer(x, layer, K=K, pad_out=(li < n - 1))
    flat = x.reshape(B, -1)
    return gated_classifier_head(flat, params["head"])


# Pure-JAX reference (lax.conv + torch-layout head) to validate the kernels.
def ref_forward(params, x_nchw, k):
    pad = k // 2
    bsz = x_nchw.shape[0]
    x = jnp.transpose(x_nchw, (0, 2, 3, 1))
    dn = ("NHWC", "HWIO", "NHWC")
    for layer in params["layers"]:
        cin = x.shape[-1]
        outs = []
        for node in layer["nodes"]:
            cout = node["w_conv"].shape[-1]
            wc = node["w_conv"].reshape(k, k, cin, cout)
            wg = node["w_gate"].reshape(k, k, cin, cout)
            main = lax.conv_general_dilated(
                x, wc, (1, 1), [(pad, pad)] * 2,
                dimension_numbers=dn) + node["b_conv"]
            main = jnp.maximum(main, 0.0)
            gate = jax.nn.sigmoid(
                lax.conv_general_dilated(
                    x, wg, (1, 1), [(pad, pad)] * 2,
                    dimension_numbers=dn) + node["b_gate"])
            if "w_sc" in node:
                shortcut = (jnp.einsum("bhwc,cf->bhwf", x, node["w_sc"])
                            + node["b_sc"])
            else:
                shortcut = x
            outs.append(main * gate + shortcut)
        x = jnp.concatenate(outs, axis=-1)
    flat = jnp.transpose(x, (0, 3, 1, 2)).reshape(bsz, -1)   # torch Flatten
    h = params["head"]
    h1 = jnp.maximum(flat @ h["w1"] + h["b1"], 0.0)
    g = jax.nn.sigmoid(flat @ h["wg"] + h["bg"])
    return (h1 * g) @ h["w2"] + h["b2"]


# --------------------------------- main -------------------------------------- #

def _run_check(*, input_channels, initial_filters, nodes, num_layers,
               batch, H, W, num_classes=10, hidden=128, K=3, seed=0):
    key = jax.random.PRNGKey(seed)
    pkey, xkey = jax.random.split(key)
    params = init_params(pkey, input_channels, num_classes, num_layers,
                         nodes, initial_filters, K, hidden, (H, W))
    x = jax.random.normal(xkey, (batch, input_channels, H, W), jnp.float32)

    fwd = jax.jit(lambda inp: forward(params, inp, K))
    out = jax.block_until_ready(fwd(x))
    ref = ref_forward(params, x, K)

    assert out.shape == (batch, num_classes), out.shape
    assert bool(jnp.allclose(out, ref, atol=2e-3, rtol=2e-3)), (
        "max abs diff %g" % float(jnp.max(jnp.abs(out - ref))))


if __name__ == "__main__":
    # Module-default config (projection shortcuts in both layers):
    # layer widths 96 -> 192 real channels (padded to 128 / 256 lanes).
    _run_check(input_channels=4, initial_filters=32, nodes=3, num_layers=2,
               batch=2, H=8, W=8, seed=0)
    # Identity-shortcut path (in_channels == filters in both layers), which
    # the review flagged as previously unverified.
    _run_check(input_channels=32, initial_filters=32, nodes=2, num_layers=2,
               batch=2, H=8, W=8, seed=1)
    print("KERNEL_OK")
</pallas_src>

<mosaic_0001>
module attributes {stable_mosaic.version = 11 : i64} {
  func.func @_mlc_layer_kernel(%arg0: i32, %arg1: memref<2x10x10x128xf32, #tpu.memory_space<vmem>>, %arg2: memref<1152x384xf32, #tpu.memory_space<vmem>>, %arg3: memref<1x384xf32, #tpu.memory_space<vmem>>, %arg4: memref<2x10x10x128xf32, #tpu.memory_space<vmem>>, %arg5: memref<128x1152xf32, #tpu.memory_space<vmem>>) attributes {dimension_semantics = [#tpu.dimension_semantics<parallel>], iteration_bounds = array<i64: 1>, scalar_prefetch = 0 : i64, scratch_operands = 1 : i64, tpu.core_type = #tpu.core_type<tc>, window_params = [{transform_indices = @transform_0, window_bounds = array<i64: 2, 10, 10, 128>}, {pipeline_mode = #tpu.pipeline_mode<synchronous>, transform_indices = @transform_1, window_bounds = array<i64: 1152, 384>}, {pipeline_mode = #tpu.pipeline_mode<synchronous>, transform_indices = @transform_2, window_bounds = array<i64: 1, 384>}, {transform_indices = @transform_3, window_bounds = array<i64: 2, 10, 10, 128>}]} {
    %c0 = arith.constant 0 : index
    %c0_0 = arith.constant 0 : index
    %c0_1 = arith.constant 0 : index
    %c0_2 = arith.constant 0 : index
    %0 = vector.load %arg1[%c0, %c0_0, %c0_1, %c0_2] : memref<2x10x10x128xf32, #tpu.memory_space<vmem>>, vector<2x8x8x128xf32>
    %1 = vector.shape_cast %0 : vector<2x8x8x128xf32> to vector<128x128xf32>
    %c0_3 = arith.constant 0 : index
    %c0_4 = arith.constant 0 : index
    %2 = vector.load %arg5[%c0_3, %c0_4] : memref<128x1152xf32, #tpu.memory_space<vmem>>, vector<128x128xf32>
    tpu.vector_store %arg5[%c0_3, %c0_4], %1 {strides = array<i32>} : memref<128x1152xf32, #tpu.memory_space<vmem>>, vector<128x128xf32>,
    %c0_5 = arith.constant 0 : index
    %c0_6 = arith.constant 0 : index
    %c1 = arith.constant 1 : index
    %c0_7 = arith.constant 0 : index
    %3 = vector.load %arg1[%c0_5, %c0_6, %c1, %c0_7] : memref<2x10x10x128xf32, #tpu.memory_space<vmem>>, vector<2x8x8x128xf32>
    %4 = vector.shape_cast %3 : vector<2x8x8x128xf32> to vector<128x128xf32>
    %c0_8 = arith.constant 0 : index
    %c128 = arith.constant 128 : index
    %5 = vector.load %arg5[%c0_8, %c128] : memref<128x1152xf32, #tpu.memory_space<vmem>>, vector<128x128xf32>
    tpu.vector_store %arg5[%c0_8, %c128], %4 {strides = array<i32>} : memref<128x1152xf32, #tpu.memory_space<vmem>>, vector<128x128xf32>,
    %c0_9 = arith.constant 0 : index
    %c0_10 = arith.constant 0 : index
    %c2 = arith.constant 2 : index
    %c0_11 = arith.constant 0 : index
    %6 = vector.load %arg1[%c0_9, %c0_10, %c2, %c0_11] : memref<2x10x10x128xf32, #tpu.memory_space<vmem>>, vector<2x8x8x128xf32>
    %7 = vector.shape_cast %6 : vector<2x8x8x128xf32> to vector<128x128xf32>
    %c0_12 = arith.constant 0 : index
    %c256 = arith.constant 256 : index
    %8 = vector.load %arg5[%c0_12, %c256] : memref<128x1152xf32, #tpu.memory_space<vmem>>, vector<128x128xf32>
    tpu.vector_store %arg5[%c0_12, %c256], %7 {strides = array<i32>} : memref<128x1152xf32, #tpu.memory_space<vmem>>, vector<128x128xf32>,
    %c0_13 = arith.constant 0 : index
    %c1_14 = arith.constant 1 : index
    %c0_15 = arith.constant 0 : index
    %c0_16 = arith.constant 0 : index
    %9 = vector.load %arg1[%c0_13, %c1_14, %c0_15, %c0_16] : memref<2x10x10x128xf32, #tpu.memory_space<vmem>>, vector<2x8x8x128xf32>
    %10 = vector.shape_cast %9 : vector<2x8x8x128xf32> to vector<128x128xf32>
    %c0_17 = arith.constant 0 : index
    %c384 = arith.constant 384 : index
    %11 = vector.load %arg5[%c0_17, %c384] : memref<128x1152xf32, #tpu.memory_space<vmem>>, vector<128x128xf32>
    tpu.vector_store %arg5[%c0_17, %c384], %10 {strides = array<i32>} : memref<128x1152xf32, #tpu.memory_space<vmem>>, vector<128x128xf32>,
    %c0_18 = arith.constant 0 : index
    %c1_19 = arith.constant 1 : index
    %c1_20 = arith.constant 1 : index
    %c0_21 = arith.constant 0 : index
    %12 = vector.load %arg1[%c0_18, %c1_19, %c1_20, %c0_21] : memref<2x10x10x128xf32, #tpu.memory_space<vmem>>, vector<2x8x8x128xf32>
    %13 = vector.shape_cast %12 : vector<2x8x8x128xf32> to vector<128x128xf32>
    %c0_22 = arith.constant 0 : index
    %c512 = arith.constant 512 : index
    %14 = vector.load %arg5[%c0_22, %c512] : memref<128x1152xf32, #tpu.memory_space<vmem>>, vector<128x128xf32>
    tpu.vector_store %arg5[%c0_22, %c512], %13 {strides = array<i32>} : memref<128x1152xf32, #tpu.memory_space<vmem>>, vector<128x128xf32>,
    %c0_23 = arith.constant 0 : index
    %c1_24 = arith.constant 1 : index
    %c2_25 = arith.constant 2 : index
    %c0_26 = arith.constant 0 : index
    %15 = vector.load %arg1[%c0_23, %c1_24, %c2_25, %c0_26] : memref<2x10x10x128xf32, #tpu.memory_space<vmem>>, vector<2x8x8x128xf32>
    %16 = vector.shape_cast %15 : vector<2x8x8x128xf32> to vector<128x128xf32>
    %c0_27 = arith.constant 0 : index
    %c640 = arith.constant 640 : index
    %17 = vector.load %arg5[%c0_27, %c640] : memref<128x1152xf32, #tpu.memory_space<vmem>>, vector<128x128xf32>
    tpu.vector_store %arg5[%c0_27, %c640], %16 {strides = array<i32>} : memref<128x1152xf32, #tpu.memory_space<vmem>>, vector<128x128xf32>,
    %c0_28 = arith.constant 0 : index
    %c2_29 = arith.constant 2 : index
    %c0_30 = arith.constant 0 : index
    %c0_31 = arith.constant 0 : index
    %18 = vector.load %arg1[%c0_28, %c2_29, %c0_30, %c0_31] : memref<2x10x10x128xf32, #tpu.memory_space<vmem>>, vector<2x8x8x128xf32>
    %19 = vector.shape_cast %18 : vector<2x8x8x128xf32> to vector<128x128xf32>
    %c0_32 = arith.constant 0 : index
    %c768 = arith.constant 768 : index
    %20 = vector.load %arg5[%c0_32, %c768] : memref<128x1152xf32, #tpu.memory_space<vmem>>, vector<128x128xf32>
    tpu.vector_store %arg5[%c0_32, %c768], %19 {strides = array<i32>} : memref<128x1152xf32, #tpu.memory_space<vmem>>, vector<128x128xf32>,
    %c0_33 = arith.constant 0 : index
    %c2_34 = arith.constant 2 : index
    %c1_35 = arith.constant 1 : index
    %c0_36 = arith.constant 0 : index
    %21 = vector.load %arg1[%c0_33, %c2_34, %c1_35, %c0_36] : memref<2x10x10x128xf32, #tpu.memory_space<vmem>>, vector<2x8x8x128xf32>
    %22 = vector.shape_cast %21 : vector<2x8x8x128xf32> to vector<128x128xf32>
    %c0_37 = arith.constant 0 : index
    %c896 = arith.constant 896 : index
    %23 = vector.load %arg5[%c0_37, %c896] : memref<128x1152xf32, #tpu.memory_space<vmem>>, vector<128x128xf32>
    tpu.vector_store %arg5[%c0_37, %c896], %22 {strides = array<i32>} : memref<128x1152xf32, #tpu.memory_space<vmem>>, vector<128x128xf32>,
    %c0_38 = arith.constant 0 : index
    %c2_39 = arith.constant 2 : index
    %c2_40 = arith.constant 2 : index
    %c0_41 = arith.constant 0 : index
    %24 = vector.load %arg1[%c0_38, %c2_39, %c2_40, %c0_41] : memref<2x10x10x128xf32, #tpu.memory_space<vmem>>, vector<2x8x8x128xf32>
    %25 = vector.shape_cast %24 : vector<2x8x8x128xf32> to vector<128x128xf32>
    %c0_42 = arith.constant 0 : index
    %c1024 = arith.constant 1024 : index
    %26 = vector.load %arg5[%c0_42, %c1024] : memref<128x1152xf32, #tpu.memory_space<vmem>>, vector<128x128xf32>
    tpu.vector_store %arg5[%c0_42, %c1024], %25 {strides = array<i32>} : memref<128x1152xf32, #tpu.memory_space<vmem>>, vector<128x128xf32>,
    %c0_43 = arith.constant 0 : index
    %c0_44 = arith.constant 0 : index
    %27 = vector.load %arg5[%c0_43, %c0_44] : memref<128x1152xf32, #tpu.memory_space<vmem>>, vector<128x1152xf32>
    %c0_45 = arith.constant 0 : index
    %c0_46 = arith.constant 0 : index
    %28 = vector.load %arg2[%c0_45, %c0_46] : memref<1152x384xf32, #tpu.memory_space<vmem>>, vector<1152x384xf32>
    %cst = arith.constant dense<0.000000e+00> : vector<128x384xf32>
    %29 = tpu.matmul %27, %28, %cst {dimension_numbers = #tpu.dot_dimension_numbers<[1], [0], [0], [1], [0, 0, 1, 1], [], []>} : vector<128x1152xf32>, vector<1152x384xf32>, vector<128x384xf32> -> vector<128x384xf32>
    %c0_47 = arith.constant 0 : index
    %c0_48 = arith.constant 0 : index
    %30 = vector.load %arg3[%c0_47, %c0_48] : memref<1x384xf32, #tpu.memory_space<vmem>>, vector<1x384xf32>
    %31 = vector.broadcast %30 : vector<1x384xf32> to vector<128x384xf32>
    %32 = arith.addf %29, %31 : vector<128x384xf32>
    %33 = vector.extract_strided_slice %32 {offsets = [0, 0], sizes = [128, 128], strides = [1, 1]} : vector<128x384xf32> to vector<128x128xf32>
    %cst_49 = arith.constant 0.000000e+00 : f32
    %34 = vector.broadcast %cst_49 : f32 to vector<128x128xf32>
    %35 = arith.maximumf %33, %34 : vector<128x128xf32>
    %36 = vector.extract_strided_slice %32 {offsets = [0, 128], sizes = [128, 128], strides = [1, 1]} : vector<128x384xf32> to vector<128x128xf32>
    %37 = arith.negf %36 : vector<128x128xf32>
    %38 = math.exp %37 : vector<128x128xf32>
    %cst_50 = arith.constant 1.000000e+00 : f32
    %39 = vector.broadcast %cst_50 : f32 to vector<128x128xf32>
    %40 = arith.addf %39, %38 : vector<128x128xf32>
    %41 = arith.divf %39, %40 : vector<128x128xf32>
    %42 = arith.mulf %35, %41 : vector<128x128xf32>
    %43 = vector.extract_strided_slice %32 {offsets = [0, 256], sizes = [128, 128], strides = [1, 1]} : vector<128x384xf32> to vector<128x128xf32>
    %44 = arith.addf %42, %43 : vector<128x128xf32>
    %45 = vector.shape_cast %44 : vector<128x128xf32> to vector<2x8x8x128xf32>
    %cst_51 = arith.constant 0.000000e+00 : f32
    %46 = vector.broadcast %cst_51 : f32 to vector<2x10x10x128xf32>
    %c0_52 = arith.constant 0 : index
    %c0_53 = arith.constant 0 : index
    %c0_54 = arith.constant 0 : index
    %c0_55 = arith.constant 0 : index
    %47 = vector.load %arg4[%c0_52, %c0_53, %c0_54, %c0_55] : memref<2x10x10x128xf32, #tpu.memory_space<vmem>>, vector<2x10x10x128xf32>
    tpu.vector_store %arg4[%c0_52, %c0_53, %c0_54, %c0_55], %46 {strides = array<i32>} : memref<2x10x10x128xf32, #tpu.memory_space<vmem>>, vector<2x10x10x128xf32>,
    %c0_56 = arith.constant 0 : index
    %c1_57 = arith.constant 1 : index
    %c1_58 = arith.constant 1 : index
    %c0_59 = arith.constant 0 : index
    %48 = vector.load %arg4[%c0_56, %c1_57, %c1_58, %c0_59] : memref<2x10x10x128xf32, #tpu.memory_space<vmem>>, vector<2x8x8x128xf32>
    tpu.vector_store %arg4[%c0_56, %c1_57, %c1_58, %c0_59], %45 {strides = array<i32>} : memref<2x10x10x128xf32, #tpu.memory_space<vmem>>, vector<2x8x8x128xf32>,
    return
  }
  func.func @transform_0(%arg0: i32) -> (i32, i32, i32, i32) {
    %c0_i32 = arith.constant 0 : i32
    %c0_i32_0 = arith.constant 0 : i32
    %c0_i32_1 = arith.constant 0 : i32
    %c0_i32_2 = arith.constant 0 : i32
    return %arg0, %c0_i32, %c0_i32_0, %c0_i32_1 : i32, i32, i32, i32
  }
  func.func @transform_1(%arg0: i32) -> (i32, i32) {
    %c0_i32 = arith.constant 0 : i32
    %c0_i32_0 = arith.constant 0 : i32
    %c0_i32_1 = arith.constant 0 : i32
    return %c0_i32, %c0_i32_0 : i32, i32
  }
  func.func @transform_2(%arg0: i32) -> (i32, i32) {
    %c0_i32 = arith.constant 0 : i32
    %c0_i32_0 = arith.constant 0 : i32
    %c0_i32_1 = arith.constant 0 : i32
    return %c0_i32, %c0_i32_0 : i32, i32
  }
  func.func @transform_3(%arg0: i32) -> (i32, i32, i32, i32) {
    %c0_i32 = arith.constant 0 : i32
    %c0_i32_0 = arith.constant 0 : i32
    %c0_i32_1 = arith.constant 0 : i32
    %c0_i32_2 = arith.constant 0 : i32
    return %arg0, %c0_i32, %c0_i32_0, %c0_i32_1 : i32, i32, i32, i32
  }
}

module attributes {stable_mosaic.version = 11 : i64} {
  func.func @_mlc_layer_kernel(%arg0: i32, %arg1: memref<2x10x10x128xf32, #tpu.memory_space<vmem>>, %arg2: memref<1152x768xf32, #tpu.memory_space<vmem>>, %arg3: memref<1x768xf32, #tpu.memory_space<vmem>>, %arg4: memref<2x8x8x256xf32, #tpu.memory_space<vmem>>, %arg5: memref<128x1152xf32, #tpu.memory_space<vmem>>) attributes {dimension_semantics = [#tpu.dimension_semantics<parallel>], iteration_bounds = array<i64: 1>, scalar_prefetch = 0 : i64, scratch_operands = 1 : i64, tpu.core_type = #tpu.core_type<tc>, window_params = [{transform_indices = @transform_0, window_bounds = array<i64: 2, 10, 10, 128>}, {pipeline_mode = #tpu.pipeline_mode<synchronous>, transform_indices = @transform_1, window_bounds = array<i64: 1152, 768>}, {pipeline_mode = #tpu.pipeline_mode<synchronous>, transform_indices = @transform_2, window_bounds = array<i64: 1, 768>}, {transform_indices = @transform_3, window_bounds = array<i64: 2, 8, 8, 256>}]} {
    %c0 = arith.constant 0 : index
    %c0_0 = arith.constant 0 : index
    %c0_1 = arith.constant 0 : index
    %c0_2 = arith.constant 0 : index
    %0 = vector.load %arg1[%c0, %c0_0, %c0_1, %c0_2] : memref<2x10x10x128xf32, #tpu.memory_space<vmem>>, vector<2x8x8x128xf32>
    %1 = vector.shape_cast %0 : vector<2x8x8x128xf32> to vector<128x128xf32>
    %c0_3 = arith.constant 0 : index
    %c0_4 = arith.constant 0 : index
    %2 = vector.load %arg5[%c0_3, %c0_4] : memref<128x1152xf32, #tpu.memory_space<vmem>>, vector<128x128xf32>
    tpu.vector_store %arg5[%c0_3, %c0_4], %1 {strides = array<i32>} : memref<128x1152xf32, #tpu.memory_space<vmem>>, vector<128x128xf32>,
    %c0_5 = arith.constant 0 : index
    %c0_6 = arith.constant 0 : index
    %c1 = arith.constant 1 : index
    %c0_7 = arith.constant 0 : index
    %3 = vector.load %arg1[%c0_5, %c0_6, %c1, %c0_7] : memref<2x10x10x128xf32, #tpu.memory_space<vmem>>, vector<2x8x8x128xf32>
    %4 = vector.shape_cast %3 : vector<2x8x8x128xf32> to vector<128x128xf32>
    %c0_8 = arith.constant 0 : index
    %c128 = arith.constant 128 : index
    %5 = vector.load %arg5[%c0_8, %c128] : memref<128x1152xf32, #tpu.memory_space<vmem>>, vector<128x128xf32>
    tpu.vector_store %arg5[%c0_8, %c128], %4 {strides = array<i32>} : memref<128x1152xf32, #tpu.memory_space<vmem>>, vector<128x128xf32>,
    %c0_9 = arith.constant 0 : index
    %c0_10 = arith.constant 0 : index
    %c2 = arith.constant 2 : index
    %c0_11 = arith.constant 0 : index
    %6 = vector.load %arg1[%c0_9, %c0_10, %c2, %c0_11] : memref<2x10x10x128xf32, #tpu.memory_space<vmem>>, vector<2x8x8x128xf32>
    %7 = vector.shape_cast %6 : vector<2x8x8x128xf32> to vector<128x128xf32>
    %c0_12 = arith.constant 0 : index
    %c256 = arith.constant 256 : index
    %8 = vector.load %arg5[%c0_12, %c256] : memref<128x1152xf32, #tpu.memory_space<vmem>>, vector<128x128xf32>
    tpu.vector_store %arg5[%c0_12, %c256], %7 {strides = array<i32>} : memref<128x1152xf32, #tpu.memory_space<vmem>>, vector<128x128xf32>,
    %c0_13 = arith.constant 0 : index
    %c1_14 = arith.constant 1 : index
    %c0_15 = arith.constant 0 : index
    %c0_16 = arith.constant 0 : index
    %9 = vector.load %arg1[%c0_13, %c1_14, %c0_15, %c0_16] : memref<2x10x10x128xf32, #tpu.memory_space<vmem>>, vector<2x8x8x128xf32>
    %10 = vector.shape_cast %9 : vector<2x8x8x128xf32> to vector<128x128xf32>
    %c0_17 = arith.constant 0 : index
    %c384 = arith.constant 384 : index
    %11 = vector.load %arg5[%c0_17, %c384] : memref<128x1152xf32, #tpu.memory_space<vmem>>, vector<128x128xf32>
    tpu.vector_store %arg5[%c0_17, %c384], %10 {strides = array<i32>} : memref<128x1152xf32, #tpu.memory_space<vmem>>, vector<128x128xf32>,
    %c0_18 = arith.constant 0 : index
    %c1_19 = arith.constant 1 : index
    %c1_20 = arith.constant 1 : index
    %c0_21 = arith.constant 0 : index
    %12 = vector.load %arg1[%c0_18, %c1_19, %c1_20, %c0_21] : memref<2x10x10x128xf32, #tpu.memory_space<vmem>>, vector<2x8x8x128xf32>
    %13 = vector.shape_cast %12 : vector<2x8x8x128xf32> to vector<128x128xf32>
    %c0_22 = arith.constant 0 : index
    %c512 = arith.constant 512 : index
    %14 = vector.load %arg5[%c0_22, %c512] : memref<128x1152xf32, #tpu.memory_space<vmem>>, vector<128x128xf32>
    tpu.vector_store %arg5[%c0_22, %c512], %13 {strides = array<i32>} : memref<128x1152xf32, #tpu.memory_space<vmem>>, vector<128x128xf32>,
    %c0_23 = arith.constant 0 : index
    %c1_24 = arith.constant 1 : index
    %c2_25 = arith.constant 2 : index
    %c0_26 = arith.constant 0 : index
    %15 = vector.load %arg1[%c0_23, %c1_24, %c2_25, %c0_26] : memref<2x10x10x128xf32, #tpu.memory_space<vmem>>, vector<2x8x8x128xf32>
    %16 = vector.shape_cast %15 : vector<2x8x8x128xf32> to vector<128x128xf32>
    %c0_27 = arith.constant 0 : index
    %c640 = arith.constant 640 : index
    %17 = vector.load %arg5[%c0_27, %c640] : memref<128x1152xf32, #tpu.memory_space<vmem>>, vector<128x128xf32>
    tpu.vector_store %arg5[%c0_27, %c640], %16 {strides = array<i32>} : memref<128x1152xf32, #tpu.memory_space<vmem>>, vector<128x128xf32>,
    %c0_28 = arith.constant 0 : index
    %c2_29 = arith.constant 2 : index
    %c0_30 = arith.constant 0 : index
    %c0_31 = arith.constant 0 : index
    %18 = vector.load %arg1[%c0_28, %c2_29, %c0_30, %c0_31] : memref<2x10x10x128xf32, #tpu.memory_space<vmem>>, vector<2x8x8x128xf32>
    %19 = vector.shape_cast %18 : vector<2x8x8x128xf32> to vector<128x128xf32>
    %c0_32 = arith.constant 0 : index
    %c768 = arith.constant 768 : index
    %20 = vector.load %arg5[%c0_32, %c768] : memref<128x1152xf32, #tpu.memory_space<vmem>>, vector<128x128xf32>
    tpu.vector_store %arg5[%c0_32, %c768], %19 {strides = array<i32>} : memref<128x1152xf32, #tpu.memory_space<vmem>>, vector<128x128xf32>,
    %c0_33 = arith.constant 0 : index
    %c2_34 = arith.constant 2 : index
    %c1_35 = arith.constant 1 : index
    %c0_36 = arith.constant 0 : index
    %21 = vector.load %arg1[%c0_33, %c2_34, %c1_35, %c0_36] : memref<2x10x10x128xf32, #tpu.memory_space<vmem>>, vector<2x8x8x128xf32>
    %22 = vector.shape_cast %21 : vector<2x8x8x128xf32> to vector<128x128xf32>
    %c0_37 = arith.constant 0 : index
    %c896 = arith.constant 896 : index
    %23 = vector.load %arg5[%c0_37, %c896] : memref<128x1152xf32, #tpu.memory_space<vmem>>, vector<128x128xf32>
    tpu.vector_store %arg5[%c0_37, %c896], %22 {strides = array<i32>} : memref<128x1152xf32, #tpu.memory_space<vmem>>, vector<128x128xf32>,
    %c0_38 = arith.constant 0 : index
    %c2_39 = arith.constant 2 : index
    %c2_40 = arith.constant 2 : index
    %c0_41 = arith.constant 0 : index
    %24 = vector.load %arg1[%c0_38, %c2_39, %c2_40, %c0_41] : memref<2x10x10x128xf32, #tpu.memory_space<vmem>>, vector<2x8x8x128xf32>
    %25 = vector.shape_cast %24 : vector<2x8x8x128xf32> to vector<128x128xf32>
    %c0_42 = arith.constant 0 : index
    %c1024 = arith.constant 1024 : index
    %26 = vector.load %arg5[%c0_42, %c1024] : memref<128x1152xf32, #tpu.memory_space<vmem>>, vector<128x128xf32>
    tpu.vector_store %arg5[%c0_42, %c1024], %25 {strides = array<i32>} : memref<128x1152xf32, #tpu.memory_space<vmem>>, vector<128x128xf32>,
    %c0_43 = arith.constant 0 : index
    %c0_44 = arith.constant 0 : index
    %27 = vector.load %arg5[%c0_43, %c0_44] : memref<128x1152xf32, #tpu.memory_space<vmem>>, vector<128x1152xf32>
    %c0_45 = arith.constant 0 : index
    %c0_46 = arith.constant 0 : index
    %28 = vector.load %arg2[%c0_45, %c0_46] : memref<1152x768xf32, #tpu.memory_space<vmem>>, vector<1152x768xf32>
    %cst = arith.constant dense<0.000000e+00> : vector<128x768xf32>
    %29 = tpu.matmul %27, %28, %cst {dimension_numbers = #tpu.dot_dimension_numbers<[1], [0], [0], [1], [0, 0, 1, 1], [], []>} : vector<128x1152xf32>, vector<1152x768xf32>, vector<128x768xf32> -> vector<128x768xf32>
    %c0_47 = arith.constant 0 : index
    %c0_48 = arith.constant 0 : index
    %30 = vector.load %arg3[%c0_47, %c0_48] : memref<1x768xf32, #tpu.memory_space<vmem>>, vector<1x768xf32>
    %31 = vector.broadcast %30 : vector<1x768xf32> to vector<128x768xf32>
    %32 = arith.addf %29, %31 : vector<128x768xf32>
    %33 = vector.extract_strided_slice %32 {offsets = [0, 0], sizes = [128, 256], strides = [1, 1]} : vector<128x768xf32> to vector<128x256xf32>
    %cst_49 = arith.constant 0.000000e+00 : f32
    %34 = vector.broadcast %cst_49 : f32 to vector<128x256xf32>
    %35 = arith.maximumf %33, %34 : vector<128x256xf32>
    %36 = vector.extract_strided_slice %32 {offsets = [0, 256], sizes = [128, 256], strides = [1, 1]} : vector<128x768xf32> to vector<128x256xf32>
    %37 = arith.negf %36 : vector<128x256xf32>
    %38 = math.exp %37 : vector<128x256xf32>
    %cst_50 = arith.constant 1.000000e+00 : f32
    %39 = vector.broadcast %cst_50 : f32 to vector<128x256xf32>
    %40 = arith.addf %39, %38 : vector<128x256xf32>
    %41 = arith.divf %39, %40 : vector<128x256xf32>
    %42 = arith.mulf %35, %41 : vector<128x256xf32>
    %43 = vector.extract_strided_slice %32 {offsets = [0, 512], sizes = [128, 256], strides = [1, 1]} : vector<128x768xf32> to vector<128x256xf32>
    %44 = arith.addf %42, %43 : vector<128x256xf32>
    %45 = vector.shape_cast %44 : vector<128x256xf32> to vector<2x8x8x256xf32>
    %c0_51 = arith.constant 0 : index
    %c0_52 = arith.constant 0 : index
    %c0_53 = arith.constant 0 : index
    %c0_54 = arith.constant 0 : index
    %46 = vector.load %arg4[%c0_51, %c0_52, %c0_53, %c0_54] : memref<2x8x8x256xf32, #tpu.memory_space<vmem>>, vector<2x8x8x256xf32>
    tpu.vector_store %arg4[%c0_51, %c0_52, %c0_53, %c0_54], %45 {strides = array<i32>} : memref<2x8x8x256xf32, #tpu.memory_space<vmem>>, vector<2x8x8x256xf32>,
    return
  }
  func.func @transform_0(%arg0: i32) -> (i32, i32, i32, i32) {
    %c0_i32 = arith.constant 0 : i32
    %c0_i32_0 = arith.constant 0 : i32
    %c0_i32_1 = arith.constant 0 : i32
    %c0_i32_2 = arith.constant 0 : i32
    return %arg0, %c0_i32, %c0_i32_0, %c0_i32_1 : i32, i32, i32, i32
  }
  func.func @transform_1(%arg0: i32) -> (i32, i32) {
    %c0_i32 = arith.constant 0 : i32
    %c0_i32_0 = arith.constant 0 : i32
    %c0_i32_1 = arith.constant 0 : i32
    return %c0_i32, %c0_i32_0 : i32, i32
  }
  func.func @transform_2(%arg0: i32) -> (i32, i32) {
    %c0_i32 = arith.constant 0 : i32
    %c0_i32_0 = arith.constant 0 : i32
    %c0_i32_1 = arith.constant 0 : i32
    return %c0_i32, %c0_i32_0 : i32, i32
  }
  func.func @transform_3(%arg0: i32) -> (i32, i32, i32, i32) {
    %c0_i32 = arith.constant 0 : i32
    %c0_i32_0 = arith.constant 0 : i32
    %c0_i32_1 = arith.constant 0 : i32
    %c0_i32_2 = arith.constant 0 : i32
    return %arg0, %c0_i32, %c0_i32_0, %c0_i32_1 : i32, i32, i32, i32
  }
}

module attributes {stable_mosaic.version = 11 : i64} {
  func.func @_gated_head_kernel(%arg0: i32, %arg1: memref<2x4096xf32, #tpu.memory_space<vmem>>, %arg2: memref<4096x256xbf16, #tpu.memory_space<vmem>>, %arg3: memref<1x256xf32, #tpu.memory_space<vmem>>, %arg4: memref<128x10xf32, #tpu.memory_space<vmem>>, %arg5: memref<1x10xf32, #tpu.memory_space<vmem>>, %arg6: memref<2x10xf32, #tpu.memory_space<vmem>>, %arg7: memref<2x256xf32, #tpu.memory_space<vmem>>) attributes {dimension_semantics = [#tpu.dimension_semantics<arbitrary>], iteration_bounds = array<i64: 4>, scalar_prefetch = 0 : i64, scratch_operands = 1 : i64, tpu.core_type = #tpu.core_type<tc>, window_params = [{transform_indices = @transform_0, window_bounds = array<i64: 2, 4096>}, {transform_indices = @transform_1, window_bounds = array<i64: 4096, 256>}, {pipeline_mode = #tpu.pipeline_mode<synchronous>, transform_indices = @transform_2, window_bounds = array<i64: 1, 256>}, {pipeline_mode = #tpu.pipeline_mode<synchronous>, transform_indices = @transform_3, window_bounds = array<i64: 128, 10>}, {pipeline_mode = #tpu.pipeline_mode<synchronous>, transform_indices = @transform_4, window_bounds = array<i64: 1, 10>}, {pipeline_mode = #tpu.pipeline_mode<synchronous>, transform_indices = @transform_5, window_bounds = array<i64: 2, 10>}]} {
    %c0_i32 = arith.constant 0 : i32
    %0 = arith.cmpi eq, %arg0, %c0_i32 : i32
    %1 = arith.extui %0 : i1 to i32
    %c0_i32_0 = arith.constant 0 : i32
    %2 = arith.cmpi ne, %1, %c0_i32_0 : i32
    scf.if %2 {
      %cst_9 = arith.constant 0.000000e+00 : f32
      %13 = vector.broadcast %cst_9 : f32 to vector<2x256xf32>
      %c0_10 = arith.constant 0 : index
      %c0_11 = arith.constant 0 : index
      %14 = vector.load %arg7[%c0_10, %c0_11] : memref<2x256xf32, #tpu.memory_space<vmem>>, vector<2x256xf32>
      tpu.vector_store %arg7[%c0_10, %c0_11], %13 {strides = array<i32>} : memref<2x256xf32, #tpu.memory_space<vmem>>, vector<2x256xf32>,
    } else {
    }
    %c0 = arith.constant 0 : index
    %c0_1 = arith.constant 0 : index
    %3 = vector.load %arg7[%c0, %c0_1] : memref<2x256xf32, #tpu.memory_space<vmem>>, vector<2x256xf32>
    %c0_2 = arith.constant 0 : index
    %c0_3 = arith.constant 0 : index
    %4 = vector.load %arg1[%c0_2, %c0_3] : memref<2x4096xf32, #tpu.memory_space<vmem>>, vector<2x4096xf32>
    %c0_4 = arith.constant 0 : index
    %c0_5 = arith.constant 0 : index
    %5 = vector.load %arg2[%c0_4, %c0_5] : memref<4096x256xbf16, #tpu.memory_space<vmem>>, vector<4096x256xbf16>
    %6 = arith.extf %5 : vector<4096x256xbf16> to vector<4096x256xf32>
    %cst = arith.constant dense<0.000000e+00> : vector<2x256xf32>
    %7 = tpu.matmul %4, %6, %cst {dimension_numbers = #tpu.dot_dimension_numbers<[1], [0], [0], [1], [0, 0, 1, 1], [], []>} : vector<2x4096xf32>, vector<4096x256xf32>, vector<2x256xf32> -> vector<2x256xf32>
    %8 = arith.addf %3, %7 : vector<2x256xf32>
    %c0_6 = arith.constant 0 : index
    %c0_7 = arith.constant 0 : index
    %9 = vector.load %arg7[%c0_6, %c0_7] : memref<2x256xf32, #tpu.memory_space<vmem>>, vector<2x256xf32>
    tpu.vector_store %arg7[%c0_6, %c0_7], %8 {strides = array<i32>} : memref<2x256xf32, #tpu.memory_space<vmem>>, vector<2x256xf32>,
    %c3_i32 = arith.constant 3 : i32
    %10 = arith.cmpi eq, %arg0, %c3_i32 : i32
    %11 = arith.extui %10 : i1 to i32
    %c0_i32_8 = arith.constant 0 : i32
    %12 = arith.cmpi ne, %11, %c0_i32_8 : i32
    scf.if %12 {
      %c0_9 = arith.constant 0 : index
      %c0_10 = arith.constant 0 : index
      %13 = vector.load %arg7[%c0_9, %c0_10] : memref<2x256xf32, #tpu.memory_space<vmem>>, vector<2x256xf32>
      %c0_11 = arith.constant 0 : index
      %c0_12 = arith.constant 0 : index
      %14 = vector.load %arg3[%c0_11, %c0_12] : memref<1x256xf32, #tpu.memory_space<vmem>>, vector<1x256xf32>
      %15 = vector.broadcast %14 : vector<1x256xf32> to vector<2x256xf32>
      %16 = arith.addf %13, %15 : vector<2x256xf32>
      %17 = vector.extract_strided_slice %16 {offsets = [0, 0], sizes = [2, 128], strides = [1, 1]} : vector<2x256xf32> to vector<2x128xf32>
      %cst_13 = arith.constant 0.000000e+00 : f32
      %18 = vector.broadcast %cst_13 : f32 to vector<2x128xf32>
      %19 = arith.maximumf %17, %18 : vector<2x128xf32>
      %20 = vector.extract_strided_slice %16 {offsets = [0, 128], sizes = [2, 128], strides = [1, 1]} : vector<2x256xf32> to vector<2x128xf32>
      %21 = arith.negf %20 : vector<2x128xf32>
      %22 = math.exp %21 : vector<2x128xf32>
      %cst_14 = arith.constant 1.000000e+00 : f32
      %23 = vector.broadcast %cst_14 : f32 to vector<2x128xf32>
      %24 = arith.addf %23, %22 : vector<2x128xf32>
      %25 = arith.divf %23, %24 : vector<2x128xf32>
      %26 = arith.mulf %19, %25 : vector<2x128xf32>
      %c0_15 = arith.constant 0 : index
      %c0_16 = arith.constant 0 : index
      %27 = vector.load %arg4[%c0_15, %c0_16] : memref<128x10xf32, #tpu.memory_space<vmem>>, vector<128x10xf32>
      %cst_17 = arith.constant dense<0.000000e+00> : vector<2x10xf32>
      %28 = tpu.matmul %26, %27, %cst_17 {dimension_numbers = #tpu.dot_dimension_numbers<[1], [0], [0], [1], [0, 0, 1, 1], [], []>} : vector<2x128xf32>, vector<128x10xf32>, vector<2x10xf32> -> vector<2x10xf32>
      %c0_18 = arith.constant 0 : index
      %c0_19 = arith.constant 0 : index
      %29 = vector.load %arg5[%c0_18, %c0_19] : memref<1x10xf32, #tpu.memory_space<vmem>>, vector<1x10xf32>
      %30 = vector.broadcast %29 : vector<1x10xf32> to vector<2x10xf32>
      %31 = arith.addf %28, %30 : vector<2x10xf32>
      %c0_20 = arith.constant 0 : index
      %c0_21 = arith.constant 0 : index
      %32 = vector.load %arg6[%c0_20, %c0_21] : memref<2x10xf32, #tpu.memory_space<vmem>>, vector<2x10xf32>
      tpu.vector_store %arg6[%c0_20, %c0_21], %31 {strides = array<i32>} : memref<2x10xf32, #tpu.memory_space<vmem>>, vector<2x10xf32>,
    } else {
    }
    return
  }
  func.func @transform_0(%arg0: i32) -> (i32, i32) {
    %c0_i32 = arith.constant 0 : i32
    %c0_i32_0 = arith.constant 0 : i32
    return %c0_i32, %arg0 : i32, i32
  }
  func.func @transform_1(%arg0: i32) -> (i32, i32) {
    %c0_i32 = arith.constant 0 : i32
    %c0_i32_0 = arith.constant 0 : i32
    return %arg0, %c0_i32 : i32, i32
  }
  func.func @transform_2(%arg0: i32) -> (i32, i32) {
    %c0_i32 = arith.constant 0 : i32
    %c0_i32_0 = arith.constant 0 : i32
    %c0_i32_1 = arith.constant 0 : i32
    return %c0_i32, %c0_i32_0 : i32, i32
  }
  func.func @transform_3(%arg0: i32) -> (i32, i32) {
    %c0_i32 = arith.constant 0 : i32
    %c0_i32_0 = arith.constant 0 : i32
    %c0_i32_1 = arith.constant 0 : i32
    return %c0_i32, %c0_i32_0 : i32, i32
  }
  func.func @transform_4(%arg0: i32) -> (i32, i32) {
    %c0_i32 = arith.constant 0 : i32
    %c0_i32_0 = arith.constant 0 : i32
    %c0_i32_1 = arith.constant 0 : i32
    return %c0_i32, %c0_i32_0 : i32, i32
  }
  func.func @transform_5(%arg0: i32) -> (i32, i32) {
    %c0_i32 = arith.constant 0 : i32
    %c0_i32_0 = arith.constant 0 : i32
    %c0_i32_1 = arith.constant 0 : i32
    return %c0_i32, %c0_i32_0 : i32, i32
  }
}

</mosaic_0001>

<bundles_post_ra>
// kernel: _lambda_.3
= control target key start
LH: loop header
LB: loop body
LE: loop exit
PB: predicated region body
PF: predicated region fallthrough
CT: control target
= control target key end

     0   :  { %8 = vsyncpa [#allocation4], 0  ;;  %s5266_s0 = inlined_call_operand.vmem [shape: f32[2,10,10,128], index: 0, kind: input, shape index: {}]   ;;  %s5267_s1 = inlined_call_operand.hbm [shape: f32[1152,384], index: 1, kind: input, shape index: {}]   ;;  %s5268_s2 = inlined_call_operand.hbm [shape: f32[1,384], index: 2, kind: input, shape index: {}]   ;;  %s5269_s3 = inlined_call_operand.vmem [shape: f32[2,10,10,128], index: 3, kind: output, shape index: {}]  }
   0x1   :  { %9 = vsyncpa [#allocation6], 0  ;;  %s3946_s12 = smov [#allocation3]   ;;  %s3898_s16 = scalar_lea.hbm %s5267_s1, 55296 }
   0x2   :  { %s17_s13 = sshll.u32 %s3946_s12, 4  ;;  %p3899_p0 = scmp.ne.s32.totalorder %s5267_s1, %s3898_s16  ;;  %s18_s13 = int_to_ptr.vmem [resolvable:$true] %s17_s13 }
   0x3   :  { %p3902_p1 = scmp.lt.u32.totalorder %s3898_s16, %s5267_s1 }
   0x5   :  { %p3904_p2 = pnand %p3902_p1, %p3899_p0 }
   0x7   :  { %3907 = shalt.err (!%p3904_p2)
}
   0x8   :  { %s3908_s21 = scalar_lea.vmem %s18_s13, 55296  ;;  %p3913_p4 = scmp.lt.s32.totalorder %s18_s13, %s18_s13 }
   0x9   :  { %p3909_p3 = scmp.ne.s32.totalorder %s18_s13, %s3908_s21  ;;  %p3914_p5 = scmp.lt.s32.totalorder %s3908_s21, %s3908_s21 }
   0xb   :  { %p3915_p6 = por %p3914_p5, %p3913_p4 }
   0xd   :  { %p3916_p7 = pnand %p3915_p6, %p3909_p3 }
   0xf   :  { %3919 = shalt.err (!%p3916_p7)
}
  0x10   :  { %s3947_s22 = smov 384   ;;  %s3948_s23 = smov 24  }
  0x11   :  { %23 = dma.hbm_to_vmem [thread:$0]  %s5267_s1, 55296, %s18_s13, [#allocation4], %s3947_s22, %s3947_s22, %s3948_s23  }
  0x12   :  { %s3949_s26 = smov [#allocation5]   ;;  %s3920_s30 = scalar_lea.hbm %s5268_s2, 48 }
  0x13   :  { %s30_s27 = sshll.u32 %s3949_s26, 4  ;;  %p3921_p8 = scmp.ne.s32.totalorder %s5268_s2, %s3920_s30  ;;  %s31_s27 = int_to_ptr.vmem [resolvable:$true] %s30_s27 }
  0x14   :  { %p3924_p9 = scmp.lt.u32.totalorder %s3920_s30, %s5268_s2 }
  0x16   :  { %p3926_p10 = pnand %p3924_p9, %p3921_p8 }
  0x18   :  { %3929 = shalt.err (!%p3926_p10)
}
  0x19   :  { %s3930_s8 = scalar_lea.vmem %s31_s27, 48  ;;  %s3934_s1 = scalar_lea.vmem %s31_s27, 64 }
  0x1a   :  { %p3931_p11 = scmp.ne.s32.totalorder %s31_s27, %s3930_s8  ;;  %p3935_p12 = scmp.lt.s32.totalorder %s31_s27, %s31_s27 }
  0x1b   :  { %p3936_p13 = scmp.lt.s32.totalorder %s3934_s1, %s3930_s8 }
  0x1d   :  { %p3937_p0 = por %p3936_p13, %p3935_p12 }
  0x1f   :  { %p3938_p1 = pnand %p3937_p0, %p3931_p11 }
  0x21   :  { %3941 = shalt.err (!%p3938_p1)
}
  0x22   :  { %33 = dma.hbm_to_vmem [thread:$0]  %s5268_s2, 48, %s31_s27, [#allocation6]  }
  0x23   :  { %3942 = dma.done.wait [#allocation4], 55296  }
  0x24   :  { %3943 = vsyncadd [#allocation4], 4294912000 }
  0x25   :  { %3944 = dma.done.wait [#allocation6], 48  }
  0x26   :  { %3945 = vsyncadd [#allocation6], 4294967248  ;;  %v3950_v0 = vmov 0.0   ;;  %v475_v1 = vld [vmem:[#allocation3 + $0x8] sm:$0xff]  ;;  %v478_v2 = vld [vmem:[#allocation3 + $0x20] sm:$0xff] }
  0x27   :  { %2597 = vst [vmem:[%s5269_s3] sm:$0xff] %v3950_v0  ;;  %2598 = vst [vmem:[%s5269_s3 + $0x8] sm:$0x3] %v3950_v0  ;;  %1679 = vmatprep.mubr.f32.mxu1 %v3950_v0  ;;  %v859_v3 = vld [vmem:[#allocation3 + $0xc08] sm:$0xff]  ;;  %v3196_v4 = vpack.c.bf16 %v478_v2, %v475_v1  ;;  %v862_v5 = vld [vmem:[#allocation3 + $0xc20] sm:$0xff] }
  0x28   :  { %2615 = vst [vmem:[%s5269_s3 + $0x90] sm:$0xff] %v3950_v0  ;;  %2616 = vst [vmem:[%s5269_s3 + $0x98] sm:$0x3] %v3950_v0  ;;  %v474_v6 = vld [vmem:[#allocation3] sm:$0xff]  ;;  %v477_v7 = vld [vmem:[#allocation3 + $0x18] sm:$0xff]  ;;  %v4156_v8 = vpack.c.bf16 %v862_v5, %v859_v3 }
  0x29   :  { %2617 = vst [vmem:[%s5269_s3 + $0xa0] sm:$0xff] %v3950_v0  ;;  %2618 = vst [vmem:[%s5269_s3 + $0xa8] sm:$0x3] %v3950_v0  ;;  %v3198_v9 = vpack.c.bf16 %v477_v7, %v474_v6  ;;  %v858_v10 = vld [vmem:[#allocation3 + $0xc00] sm:$0xff]  ;;  %v861_v11 = vld [vmem:[#allocation3 + $0xc18] sm:$0xff]  ;;  %3197 = vmatprep.subr.bf16.mxu0 %v3196_v4 }
  0x2a   :  { %2635 = vst [vmem:[%s5269_s3 + $0x130] sm:$0xff] %v3950_v0  ;;  %2636 = vst [vmem:[%s5269_s3 + $0x138] sm:$0x3] %v3950_v0  ;;  %v481_v12 = vld [vmem:[#allocation3 + $0x38] sm:$0xff]  ;;  %v4158_v13 = vpack.c.bf16 %v861_v11, %v858_v10  ;;  %v484_v14 = vld [vmem:[#allocation3 + $0x50] sm:$0xff]  ;;  %3644 = vmatprep.subr.bf16.mxu1 %v4156_v8 }
  0x2b   :  { %2599 = vst [vmem:[%s5269_s3 + $0x10] sm:$0xff] %v3950_v0  ;;  %2600 = vst [vmem:[%s5269_s3 + $0x18] sm:$0x3] %v3950_v0  ;;  %v865_v15 = vld [vmem:[#allocation3 + $0xc38] sm:$0xff]  ;;  %v868_v16 = vld [vmem:[#allocation3 + $0xc50] sm:$0xff]  ;;  %3199 = vmatpush1.bf16.msra.mxu0 %v3198_v9  ;;  %v3200_v17 = vpack.c.bf16 %v484_v14, %v481_v12 }
  0x2c   :  { %2601 = vst [vmem:[%s5269_s3 + $0x20] sm:$0xff] %v3950_v0  ;;  %2602 = vst [vmem:[%s5269_s3 + $0x28] sm:$0x3] %v3950_v0  ;;  %v4161_v18 = vpack.c.bf16 %v868_v16, %v865_v15  ;;  %v480_v19 = vld [vmem:[#allocation3 + $0x30] sm:$0xff]  ;;  %v483_v20 = vld [vmem:[#allocation3 + $0x48] sm:$0xff]  ;;  %3652 = vmatpush1.bf16.msra.mxu1 %v4158_v13 }
  0x2d   :  { %2603 = vst [vmem:[%s5269_s3 + $0x30] sm:$0xff] %v3950_v0  ;;  %2604 = vst [vmem:[%s5269_s3 + $0x38] sm:$0x3] %v3950_v0  ;;  %v864_v21 = vld [vmem:[#allocation3 + $0xc30] sm:$0xff]  ;;  %v3202_v22 = vpack.c.bf16 %v483_v20, %v480_v19  ;;  %v867_v23 = vld [vmem:[#allocation3 + $0xc48] sm:$0xff]  ;;  %3201 = vmatprep.subr.bf16.mxu0 %v3200_v17 }
  0x2e   :  { %2605 = vst [vmem:[%s5269_s3 + $0x40] sm:$0xff] %v3950_v0  ;;  %2606 = vst [vmem:[%s5269_s3 + $0x48] sm:$0x3] %v3950_v0  ;;  %v487_v24 = vld [vmem:[#allocation3 + $0x68] sm:$0xff]  ;;  %v490_v25 = vld [vmem:[#allocation3 + $0x80] sm:$0xff]  ;;  %3645 = vmatprep.subr.bf16.mxu1 %v4161_v18  ;;  %v4165_v26 = vpack.c.bf16 %v867_v23, %v864_v21 }
  0x2f   :  { %2607 = vst [vmem:[%s5269_s3 + $0x50] sm:$0xff] %v3950_v0  ;;  %2608 = vst [vmem:[%s5269_s3 + $0x58] sm:$0x3] %v3950_v0  ;;  %v3204_v27 = vpack.c.bf16 %v490_v25, %v487_v24  ;;  %v871_v28 = vld [vmem:[#allocation3 + $0xc68] sm:$0xff]  ;;  %v874_v29 = vld [vmem:[#allocation3 + $0xc80] sm:$0xff]  ;;  %3203 = vmatpush1.bf16.msra.mxu0 %v3202_v22 }
  0x30   :  { %2609 = vst [vmem:[%s5269_s3 + $0x60] sm:$0xff] %v3950_v0  ;;  %2610 = vst [vmem:[%s5269_s3 + $0x68] sm:$0x3] %v3950_v0  ;;  %v486_v30 = vld [vmem:[#allocation3 + $0x60] sm:$0xff]  ;;  %v4167_v31 = vpack.c.bf16 %v874_v29, %v871_v28  ;;  %v489_v32 = vld [vmem:[#allocation3 + $0x78] sm:$0xff]  ;;  %3653 = vmatpush1.bf16.msra.mxu1 %v4165_v26 }
  0x31   :  { %2611 = vst [vmem:[%s5269_s3 + $0x70] sm:$0xff] %v3950_v0  ;;  %2612 = vst [vmem:[%s5269_s3 + $0x78] sm:$0x3] %v3950_v0  ;;  %v870_v33 = vld [vmem:[#allocation3 + $0xc60] sm:$0xff]  ;;  %v873_v34 = vld [vmem:[#allocation3 + $0xc78] sm:$0xff]  ;;  %v3206_v35 = vpack.c.bf16 %v489_v32, %v486_v30  ;;  %3205 = vmatprep.subr.bf16.mxu0 %v3204_v27 }
  0x32   :  { %2613 = vst [vmem:[%s5269_s3 + $0x80] sm:$0xff] %v3950_v0  ;;  %2614 = vst [vmem:[%s5269_s3 + $0x88] sm:$0x3] %v3950_v0  ;;  %v493_v36 = vld [vmem:[#allocation3 + $0x98] sm:$0xff]  ;;  %v496_v37 = vld [vmem:[#allocation3 + $0xb0] sm:$0xff]  ;;  %v4170_v39 = vpack.c.bf16 %v873_v34, %v870_v33  ;;  %3646 = vmatprep.subr.bf16.mxu1 %v4167_v31 }
  0x33   :  { %2619 = vst [vmem:[%s5269_s3 + $0xb0] sm:$0xff] %v3950_v0  ;;  %2620 = vst [vmem:[%s5269_s3 + $0xb8] sm:$0x3] %v3950_v0  ;;  %v877_v38 = vld [vmem:[#allocation3 + $0xc98] sm:$0xff]  ;;  %v3208_v40 = vpack.c.bf16 %v496_v37, %v493_v36  ;;  %v880_v41 = vld [vmem:[#allocation3 + $0xcb0] sm:$0xff]  ;;  %3207 = vmatpush1.bf16.msra.mxu0 %v3206_v35 }
  0x34   :  { %2621 = vst [vmem:[%s5269_s3 + $0xc0] sm:$0xff] %v3950_v0  ;;  %2622 = vst [vmem:[%s5269_s3 + $0xc8] sm:$0x3] %v3950_v0  ;;  %v492_v42 = vld [vmem:[#allocation3 + $0x90] sm:$0xff]  ;;  %v495_v43 = vld [vmem:[#allocation3 + $0xa8] sm:$0xff]  ;;  %v4173_v44 = vpack.c.bf16 %v880_v41, %v877_v38  ;;  %3654 = vmatpush1.bf16.msra.mxu1 %v4170_v39 }
  0x35   :  { %2623 = vst [vmem:[%s5269_s3 + $0xd0] sm:$0xff] %v3950_v0  ;;  %2624 = vst [vmem:[%s5269_s3 + $0xd8] sm:$0x3] %v3950_v0  ;;  %v876_v45 = vld [vmem:[#allocation3 + $0xc90] sm:$0xff]  ;;  %v879_v46 = vld [vmem:[#allocation3 + $0xca8] sm:$0xff]  ;;  %v3210_v51 = vpack.c.bf16 %v495_v43, %v492_v42  ;;  %3209 = vmatprep.subr.bf16.mxu0 %v3208_v40 }
  0x36   :  { %2625 = vst [vmem:[%s5269_s3 + $0xe0] sm:$0xff] %v3950_v0  ;;  %2626 = vst [vmem:[%s5269_s3 + $0xe8] sm:$0x3] %v3950_v0  ;;  %v499_v47 = vld [vmem:[#allocation3 + $0xc8] sm:$0xff]  ;;  %v502_v48 = vld [vmem:[#allocation3 + $0xe0] sm:$0xff]  ;;  %v4176_v52 = vpack.c.bf16 %v879_v46, %v876_v45  ;;  %3647 = vmatprep.subr.bf16.mxu1 %v4173_v44 }
  0x37   :  { %2627 = vst [vmem:[%s5269_s3 + $0xf0] sm:$0xff] %v3950_v0  ;;  %2628 = vst [vmem:[%s5269_s3 + $0xf8] sm:$0x3] %v3950_v0  ;;  %v883_v49 = vld [vmem:[#allocation3 + $0xcc8] sm:$0xff]  ;;  %v886_v50 = vld [vmem:[#allocation3 + $0xce0] sm:$0xff]  ;;  %v3212_v53 = vpack.c.bf16 %v502_v48, %v499_v47  ;;  %3211 = vmatpush1.bf16.msra.mxu0 %v3210_v51 }
  0x38   :  { %2629 = vst [vmem:[%s5269_s3 + $0x100] sm:$0xff] %v3950_v0  ;;  %2630 = vst [vmem:[%s5269_s3 + $0x108] sm:$0x3] %v3950_v0  ;;  %v498_v54 = vld [vmem:[#allocation3 + $0xc0] sm:$0xff]  ;;  %v501_v55 = vld [vmem:[#allocation3 + $0xd8] sm:$0xff]  ;;  %v4179_v57 = vpack.c.bf16 %v886_v50, %v883_v49  ;;  %3655 = vmatpush1.bf16.msra.mxu1 %v4176_v52 }
  0x39   :  { %2631 = vst [vmem:[%s5269_s3 + $0x110] sm:$0xff] %v3950_v0  ;;  %2632 = vst [vmem:[%s5269_s3 + $0x118] sm:$0x3] %v3950_v0  ;;  %v882_v56 = vld [vmem:[#allocation3 + $0xcc0] sm:$0xff]  ;;  %v885_v58 = vld [vmem:[#allocation3 + $0xcd8] sm:$0xff]  ;;  %v3214_v63 = vpack.c.bf16 %v501_v55, %v498_v54  ;;  %3213 = vmatprep.subr.bf16.mxu0 %v3212_v53 }
  0x3a   :  { %2633 = vst [vmem:[%s5269_s3 + $0x120] sm:$0xff] %v3950_v0  ;;  %2634 = vst [vmem:[%s5269_s3 + $0x128] sm:$0x3] %v3950_v0  ;;  %v505_v59 = vld [vmem:[#allocation3 + $0xf8] sm:$0xff]  ;;  %v508_v60 = vld [vmem:[#allocation3 + $0x110] sm:$0xff]  ;;  %v4182_v1 = vpack.c.bf16 %v885_v58, %v882_v56  ;;  %3648 = vmatprep.subr.bf16.mxu1 %v4179_v57 }
  0x3b   :  { %v889_v61 = vld [vmem:[#allocation3 + $0xcf8] sm:$0xff]  ;;  %v892_v62 = vld [vmem:[#allocation3 + $0xd10] sm:$0xff]  ;;  %v3216_v2 = vpack.c.bf16 %v508_v60, %v505_v59  ;;  %v507_v4 = vld [vmem:[#allocation3 + $0x108] sm:$0xff]  ;;  %3215 = vmatpush1.bf16.msra.mxu0 %v3214_v63 }
  0x3c   :  { %v504_v3 = vld [vmem:[#allocation3 + $0xf0] sm:$0xff]  ;;  %v4185_v6 = vpack.c.bf16 %v892_v62, %v889_v61  ;;  %v891_v7 = vld [vmem:[#allocation3 + $0xd08] sm:$0xff]  ;;  %v514_v10 = vld [vmem:[#allocation3 + $0x140] sm:$0xff]  ;;  %3656 = vmatpush1.bf16.msra.mxu1 %v4182_v1 }
  0x3d   :  { %v888_v5 = vld [vmem:[#allocation3 + $0xcf0] sm:$0xff]  ;;  %v511_v9 = vld [vmem:[#allocation3 + $0x128] sm:$0xff]  ;;  %v898_v12 = vld [vmem:[#allocation3 + $0xd40] sm:$0xff]  ;;  %v3218_v14 = vpack.c.bf16 %v507_v4, %v504_v3  ;;  %3217 = vmatprep.subr.bf16.mxu0 %v3216_v2 }
  0x3e   :  { %v895_v11 = vld [vmem:[#allocation3 + $0xd28] sm:$0xff]  ;;  %v4188_v15 = vpack.c.bf16 %v891_v7, %v888_v5  ;;  %v3220_v16 = vpack.c.bf16 %v514_v10, %v511_v9  ;;  %v510_v17 = vld [vmem:[#allocation3 + $0x120] sm:$0xff]  ;;  %v513_v19 = vld [vmem:[#allocation3 + $0x138] sm:$0xff]  ;;  %3649 = vmatprep.subr.bf16.mxu1 %v4185_v6 }
  0x3f   :  { %v894_v20 = vld [vmem:[#allocation3 + $0xd20] sm:$0xff]  ;;  %v4191_v21 = vpack.c.bf16 %v898_v12, %v895_v11  ;;  %v897_v22 = vld [vmem:[#allocation3 + $0xd38] sm:$0xff]  ;;  %v520_v24 = vld [vmem:[#allocation3 + $0x170] sm:$0xff]  ;;  %3219 = vmatpush1.bf16.msra.mxu0 %v3218_v14  ;;  %v3222_v28 = vpack.c.bf16 %v513_v19, %v510_v17 }
  0x40   :  { %v517_v23 = vld [vmem:[#allocation3 + $0x158] sm:$0xff]  ;;  %v904_v27 = vld [vmem:[#allocation3 + $0xd70] sm:$0xff]  ;;  %3657 = vmatpush1.bf16.msra.mxu1 %v4188_v15  ;;  %3221 = vmatprep.subr.bf16.mxu0 %v3220_v16  ;;  %v4194_v29 = vpack.c.bf16 %v897_v22, %v894_v20  ;;  %v519_v33 = vld [vmem:[#allocation3 + $0x168] sm:$0xff] }
  0x41   :  { %v901_v25 = vld [vmem:[#allocation3 + $0xd58] sm:$0xff]  ;;  %v3224_v30 = vpack.c.bf16 %v520_v24, %v517_v23  ;;  %v516_v32 = vld [vmem:[#allocation3 + $0x150] sm:$0xff]  ;;  %3650 = vmatprep.subr.bf16.mxu1 %v4191_v21  ;;  %v903_v36 = vld [vmem:[#allocation3 + $0xd68] sm:$0xff] }
  0x42   :  { %v900_v34 = vld [vmem:[#allocation3 + $0xd50] sm:$0xff]  ;;  %v4197_v35 = vpack.c.bf16 %v904_v27, %v901_v25  ;;  %v523_v37 = vld [vmem:[#allocation3 + $0x188] sm:$0xff]  ;;  %v526_v38 = vld [vmem:[#allocation3 + $0x1a0] sm:$0xff]  ;;  %v3226_v42 = vpack.c.bf16 %v519_v33, %v516_v32 }
  0x43   :  { %v524_v40 = vld [vmem:[#allocation3 + $0x190] sm:$0xff]  ;;  %v527_v41 = vld [vmem:[#allocation3 + $0x1a8] sm:$0xff]  ;;  %3223 = vmatpush1.bf16.msra.mxu0 %v3222_v28  ;;  %v4200_v43 = vpack.c.bf16 %v903_v36, %v900_v34  ;;  %v3228_v45 = vpack.c.bf16 %v526_v38, %v523_v37  ;;  %v522_v46 = vld [vmem:[#allocation3 + $0x180] sm:$0xff] }
  0x44   :  { %3658 = vmatpush1.bf16.msra.mxu1 %v4194_v29  ;;  %3225 = vmatprep.subr.bf16.mxu0 %v3224_v30  ;;  %v525_v47 = vld [vmem:[#allocation3 + $0x198] sm:$0xff]  ;;  %v3484_v48 = vpack.c.bf16 %v527_v41, %v524_v40  ;;  %v476_v49 = vld [vmem:[#allocation3 + $0x10] sm:$0xff]  ;;  %v479_v50 = vld [vmem:[#allocation3 + $0x28] sm:$0xff] }
  0x45   :  { %3651 = vmatprep.subr.bf16.mxu1 %v4197_v35  ;;  %v529_v51 = vld [vmem:[#allocation3 + $0x1b8] sm:$0xff]  ;;  %v532_v53 = vld [vmem:[#allocation3 + $0x1d0] sm:$0xff]  ;;  %v530_v54 = vld [vmem:[#allocation3 + $0x1c0] sm:$0xff]  ;;  %v3230_v56 = vpack.c.bf16 %v525_v47, %v522_v46  ;;  %v3486_v59 = vpack.c.bf16 %v479_v50, %v476_v49 }
  0x46   :  { %v533_v55 = vld [vmem:[#allocation3 + $0x1d8] sm:$0xff]  ;;  %v2748_v58 = vld [vmem:[%s5266_s0 + $0xc2] sm:$0xff]  ;;  %v528_v60 = vld [vmem:[#allocation3 + $0x1b0] sm:$0xff]  ;;  %v3232_v62 = vpack.c.bf16 %v532_v53, %v529_v51 }
  0x47   :  { %3227 = vmatpush1.bf16.msra.mxu0 %v3226_v42  ;;  %v531_v61 = vld [vmem:[#allocation3 + $0x1c8] sm:$0xff]  ;;  %v3488_v63 = vpack.c.bf16 %v533_v55, %v530_v54  ;;  %v482_v2 = vld [vmem:[#allocation3 + $0x40] sm:$0xff]  ;;  %v485_v3 = vld [vmem:[#allocation3 + $0x58] sm:$0xff] }
  0x48   :  { %3659 = vmatpush1.bf16.msra.mxu1 %v4200_v43  ;;  %3229 = vmatprep.subr.bf16.mxu0 %v3228_v45  ;;  %v535_v4 = vld [vmem:[#allocation3 + $0x1e8] sm:$0xff]  ;;  %v538_v5 = vld [vmem:[#allocation3 + $0x200] sm:$0xff]  ;;  %v536_v7 = vld [vmem:[#allocation3 + $0x1f0] sm:$0xff]  ;;  %v3234_v10 = vpack.c.bf16 %v531_v61, %v528_v60  ;;  %v3490_v12 = vpack.c.bf16 %v485_v3, %v482_v2 }
  0x49   :  { %3485 = vmatprep.subr.bf16.mxu1 %v3484_v48  ;;  %v539_v9 = vld [vmem:[#allocation3 + $0x208] sm:$0xff]  ;;  %v2749_v11 = vld [vmem:[%s5266_s0 + $0xd2] sm:$0xff]  ;;  %v534_v14 = vld [vmem:[#allocation3 + $0x1e0] sm:$0xff]  ;;  %v3236_v17 = vpack.c.bf16 %v538_v5, %v535_v4 }
  0x4a   :  { %v537_v16 = vld [vmem:[#allocation3 + $0x1f8] sm:$0xff]  ;;  %v3492_v19 = vpack.c.bf16 %v539_v9, %v536_v7  ;;  %v488_v20 = vld [vmem:[#allocation3 + $0x70] sm:$0xff]  ;;  %v491_v22 = vld [vmem:[#allocation3 + $0x88] sm:$0xff] }
  0x4b   :  { %1680 = vmatmul.mubr.f32.vlgmr.msra.gmra.mrb[0].mxu1 %v2748_v58  ;;  %3231 = vmatpush1.bf16.msra.mxu0 %v3230_v56  ;;  %v541_v23 = vld [vmem:[#allocation3 + $0x218] sm:$0xff]  ;;  %v544_v24 = vld [vmem:[#allocation3 + $0x230] sm:$0xff]  ;;  %v542_v25 = vld [vmem:[#allocation3 + $0x220] sm:$0xff]  ;;  %v3238_v28 = vpack.c.bf16 %v537_v16, %v534_v14  ;;  %v3494_v32 = vpack.c.bf16 %v491_v22, %v488_v20 }
  0x4c   :  { %3487 = vmatpush3.bf16.msra.mxu1 %v3486_v59  ;;  %1685 = vmatprep.mubr.f32.mxu1 %v3950_v0  ;;  %v545_v27 = vld [vmem:[#allocation3 + $0x238] sm:$0xff]  ;;  %v2750_v30 = vld [vmem:[%s5266_s0 + $0xe2] sm:$0xff]  ;;  %v540_v33 = vld [vmem:[#allocation3 + $0x210] sm:$0xff]  ;;  %v3240_v36 = vpack.c.bf16 %v544_v24, %v541_v23 }
  0x4d   :  { %3233 = vmatprep.subr.bf16.mxu0 %v3232_v62  ;;  %3489 = vmatprep.subr.bf16.mxu1 %v3488_v63  ;;  %v543_v34 = vld [vmem:[#allocation3 + $0x228] sm:$0xff]  ;;  %v3496_v37 = vpack.c.bf16 %v545_v27, %v542_v25  ;;  %v494_v38 = vld [vmem:[#allocation3 + $0xa0] sm:$0xff]  ;;  %v497_v40 = vld [vmem:[#allocation3 + $0xb8] sm:$0xff] }
  0x4e   :  { %v547_v41 = vld [vmem:[#allocation3 + $0x248] sm:$0xff]  ;;  %v550_v42 = vld [vmem:[#allocation3 + $0x260] sm:$0xff]  ;;  %v548_v45 = vld [vmem:[#allocation3 + $0x250] sm:$0xff]  ;;  %v3242_v48 = vpack.c.bf16 %v543_v34, %v540_v33  ;;  %v3498_v49 = vpack.c.bf16 %v497_v40, %v494_v38 }
  0x4f   :  { %1686 = vmatmul.mubr.f32.gmra.mrb[2].mxu1 %v2749_v11  ;;  %3235 = vmatpush1.bf16.msra.mxu0 %v3234_v10  ;;  %v551_v46 = vld [vmem:[#allocation3 + $0x268] sm:$0xff]  ;;  %v2751_v47 = vld [vmem:[%s5266_s0 + $0xf2] sm:$0xff]  ;;  %v546_v50 = vld [vmem:[#allocation3 + $0x240] sm:$0xff]  ;;  %v3244_v54 = vpack.c.bf16 %v550_v42, %v547_v41 }
  0x50   :  { %3491 = vmatpush3.bf16.msra.mxu1 %v3490_v12  ;;  %1691 = vmatprep.mubr.f32.mxu1 %v3950_v0  ;;  %v549_v51 = vld [vmem:[#allocation3 + $0x258] sm:$0xff]  ;;  %v4222_v53 = vld [vmem:[%s5266_s0 + $0x1] sm:$0xff]  ;;  %v3500_v55 = vpack.c.bf16 %v551_v46, %v548_v45  ;;  %v500_v56 = vld [vmem:[#allocation3 + $0xd0] sm:$0xff] }
  0x51   :  { %3237 = vmatprep.subr.bf16.mxu0 %v3236_v17  ;;  %3493 = vmatprep.subr.bf16.mxu1 %v3492_v19  ;;  %v503_v58 = vld [vmem:[#allocation3 + $0xe8] sm:$0xff]  ;;  %v553_v59 = vld [vmem:[#allocation3 + $0x278] sm:$0xff]  ;;  %v556_v60 = vld [vmem:[#allocation3 + $0x290] sm:$0xff]  ;;  %v3246_v63 = vpack.c.bf16 %v549_v51, %v546_v50 }
  0x52   :  { %v554_v61 = vld [vmem:[#allocation3 + $0x280] sm:$0xff]  ;;  %v557_v62 = vld [vmem:[#allocation3 + $0x298] sm:$0xff]  ;;  %987 = vmatprep.mubr.f32.mxu0 %v4222_v53  ;;  %v3502_v3 = vpack.c.bf16 %v503_v58, %v500_v56  ;;  %v552_v4 = vld [vmem:[#allocation3 + $0x270] sm:$0xff]  ;;  %v3248_v7 = vpack.c.bf16 %v556_v60, %v553_v59 }
  0x53   :  { %1692 = vmatmul.mubr.f32.gmra.mrb[4].mxu1 %v2750_v30  ;;  %3239 = vmatpush1.bf16.msra.mxu0 %v3238_v28  ;;  %v2752_v2 = vld [vmem:[%s5266_s0 + $0x102] sm:$0xff]  ;;  %v3504_v9 = vpack.c.bf16 %v557_v62, %v554_v61  ;;  %v509_v11 = vld [vmem:[#allocation3 + $0x118] sm:$0xff]  ;;  %v560_v16 = vld [vmem:[#allocation3 + $0x2b0] sm:$0xff] }
  0x54   :  { %3495 = vmatpush3.bf16.msra.mxu1 %v3494_v32  ;;  %1697 = vmatprep.mubr.f32.mxu1 %v3950_v0  ;;  %v555_v5 = vld [vmem:[#allocation3 + $0x288] sm:$0xff]  ;;  %v506_v10 = vld [vmem:[#allocation3 + $0x100] sm:$0xff]  ;;  %v2753_v20 = vld [vmem:[%s5266_s0 + $0x112] sm:$0xff] }
  0x55   :  { %3241 = vmatprep.subr.bf16.mxu0 %v3240_v36  ;;  %3497 = vmatprep.subr.bf16.mxu1 %v3496_v37  ;;  %v559_v12 = vld [vmem:[#allocation3 + $0x2a8] sm:$0xff]  ;;  %v562_v14 = vld [vmem:[#allocation3 + $0x2c0] sm:$0xff]  ;;  %v3250_v19 = vpack.c.bf16 %v555_v5, %v552_v4  ;;  %v3506_v22 = vpack.c.bf16 %v509_v11, %v506_v10  ;;  %v561_v24 = vld [vmem:[#allocation3 + $0x2b8] sm:$0xff] }
  0x56   :  { %v563_v17 = vld [vmem:[#allocation3 + $0x2c8] sm:$0xff]  ;;  %v558_v23 = vld [vmem:[#allocation3 + $0x2a0] sm:$0xff]  ;;  %v3252_v25 = vpack.c.bf16 %v562_v14, %v559_v12  ;;  %v512_v28 = vld [vmem:[#allocation3 + $0x130] sm:$0xff] }
  0x57   :  { %1698 = vmatmul.mubr.f32.gmra.mrb[6].mxu1 %v2751_v47  ;;  %3243 = vmatpush1.bf16.msra.mxu0 %v3242_v48  ;;  %v3508_v27 = vpack.c.bf16 %v563_v17, %v560_v16  ;;  %v515_v30 = vld [vmem:[#allocation3 + $0x148] sm:$0xff]  ;;  %v565_v32 = vld [vmem:[#allocation3 + $0x2d8] sm:$0xff]  ;;  %v568_v33 = vld [vmem:[#allocation3 + $0x2f0] sm:$0xff]  ;;  %v3254_v37 = vpack.c.bf16 %v561_v24, %v558_v23 }
  0x58   :  { %3499 = vmatpush3.bf16.msra.mxu1 %v3498_v49  ;;  %1703 = vmatprep.mubr.f32.mxu1 %v3950_v0  ;;  %v566_v34 = vld [vmem:[#allocation3 + $0x2e0] sm:$0xff]  ;;  %v569_v36 = vld [vmem:[#allocation3 + $0x2f8] sm:$0xff]  ;;  %v3510_v40 = vpack.c.bf16 %v515_v30, %v512_v28  ;;  %v564_v41 = vld [vmem:[#allocation3 + $0x2d0] sm:$0xff]  ;;  %v3256_v45 = vpack.c.bf16 %v568_v33, %v565_v32 }
  0x59   :  { %3245 = vmatprep.subr.bf16.mxu0 %v3244_v54  ;;  %3501 = vmatprep.subr.bf16.mxu1 %v3500_v55  ;;  %v2754_v38 = vld [vmem:[%s5266_s0 + $0x122] sm:$0xff]  ;;  %v3512_v46 = vpack.c.bf16 %v569_v36, %v566_v34  ;;  %v521_v48 = vld [vmem:[#allocation3 + $0x178] sm:$0xff]  ;;  %v620_v55 = vld [vmem:[#allocation3 + $0x490] sm:$0xff] }
  0x5a   :  { %v567_v42 = vld [vmem:[#allocation3 + $0x2e8] sm:$0xff]  ;;  %v518_v47 = vld [vmem:[#allocation3 + $0x160] sm:$0xff]  ;;  %v2755_v51 = vld [vmem:[%s5266_s0 + $0x132] sm:$0xff] }
  0x5b   :  { %1704 = vmatmul.mubr.f32.gmra.mrb[8].mxu1 %v2752_v2  ;;  %3247 = vmatpush1.bf16.msra.mxu0 %v3246_v63  ;;  %v571_v49 = vld [vmem:[#allocation3 + $0x308] sm:$0xff]  ;;  %v574_v50 = vld [vmem:[#allocation3 + $0x320] sm:$0xff]  ;;  %v3258_v54 = vpack.c.bf16 %v567_v42, %v564_v41  ;;  %v3514_v56 = vpack.c.bf16 %v521_v48, %v518_v47  ;;  %v573_v59 = vld [vmem:[#allocation3 + $0x318] sm:$0xff] }
  0x5c   :  { %3503 = vmatpush3.bf16.msra.mxu1 %v3502_v3  ;;  %1709 = vmatprep.mubr.f32.mxu1 %v3950_v0  ;;  %v570_v58 = vld [vmem:[#allocation3 + $0x300] sm:$0xff]  ;;  %v623_v60 = vld [vmem:[#allocation3 + $0x4a8] sm:$0xff]  ;;  %v3260_v61 = vpack.c.bf16 %v574_v50, %v571_v49  ;;  %v577_v62 = vld [vmem:[#allocation3 + $0x338] sm:$0xff] }
  0x5d   :  { %3249 = vmatprep.subr.bf16.mxu0 %v3248_v7  ;;  %3505 = vmatprep.subr.bf16.mxu1 %v3504_v9  ;;  %v3516_v63 = vpack.c.bf16 %v623_v60, %v620_v55  ;;  %v580_v2 = vld [vmem:[#allocation3 + $0x350] sm:$0xff]  ;;  %v575_v4 = vld [vmem:[#allocation3 + $0x328] sm:$0xff]  ;;  %v40_v5 = vld [vmem:[%s5266_s0] sm:$0xff]  ;;  %v3262_v7 = vpack.c.bf16 %v573_v59, %v570_v58 }
  0x5e   :  { %v572_v3 = vld [vmem:[#allocation3 + $0x310] sm:$0xff]  ;;  %v579_v10 = vld [vmem:[#allocation3 + $0x348] sm:$0xff]  ;;  %v3264_v11 = vpack.c.bf16 %v580_v2, %v577_v62  ;;  %v626_v16 = vld [vmem:[#allocation3 + $0x4c0] sm:$0xff] }
  0x5f   :  { %1710 = vmatmul.mubr.f32.gmra.mrb[10].mxu1 %v2753_v20  ;;  %3251 = vmatpush1.bf16.msra.mxu0 %v3250_v19  ;;  %v576_v9 = vld [vmem:[#allocation3 + $0x330] sm:$0xff]  ;;  %v583_v12 = vld [vmem:[#allocation3 + $0x368] sm:$0xff]  ;;  %v3518_v14 = vpack.c.bf16 %v575_v4, %v572_v3  ;;  %v629_v17 = vld [vmem:[#allocation3 + $0x4d8] sm:$0xff] }
  0x60   :  { %3507 = vmatpush3.bf16.msra.mxu1 %v3506_v22  ;;  %1715 = vmatprep.mubr.f32.mxu1 %v3950_v0  ;;  %v586_v19 = vld [vmem:[#allocation3 + $0x380] sm:$0xff]  ;;  %v3520_v20 = vpack.c.bf16 %v629_v17, %v626_v16  ;;  %v581_v23 = vld [vmem:[#allocation3 + $0x358] sm:$0xff]  ;;  %v3266_v24 = vpack.c.bf16 %v579_v10, %v576_v9  ;;  %v632_v28 = vld [vmem:[#allocation3 + $0x4f0] sm:$0xff] }
  0x61   :  { %3253 = vmatprep.subr.bf16.mxu0 %v3252_v25  ;;  %3509 = vmatprep.subr.bf16.mxu1 %v3508_v27  ;;  %v578_v22 = vld [vmem:[#allocation3 + $0x340] sm:$0xff]  ;;  %v585_v27 = vld [vmem:[#allocation3 + $0x378] sm:$0xff]  ;;  %v635_v30 = vld [vmem:[#allocation3 + $0x508] sm:$0xff]  ;;  %v3268_v33 = vpack.c.bf16 %v586_v19, %v583_v12 }
  0x62   :  { %v582_v25 = vld [vmem:[#allocation3 + $0x360] sm:$0xff]  ;;  %v589_v34 = vld [vmem:[#allocation3 + $0x398] sm:$0xff]  ;;  %v3522_v36 = vpack.c.bf16 %v581_v23, %v578_v22  ;;  %v587_v41 = vld [vmem:[#allocation3 + $0x388] sm:$0xff] }
  0x63   :  { %1716 = vmatmul.mubr.f32.gmra.mrb[12].mxu1 %v2754_v38  ;;  %3255 = vmatpush1.bf16.msra.mxu0 %v3254_v37  ;;  %v74_v32 = vld [vmem:[%s5266_s0 + $0x21] sm:$0xff]  ;;  %v592_v37 = vld [vmem:[#allocation3 + $0x3b0] sm:$0xff]  ;;  %v3524_v38 = vpack.c.bf16 %v635_v30, %v632_v28  ;;  %v641_v49 = vld [vmem:[#allocation3 + $0x538] sm:$0xff] }
  0x64   :  { %3511 = vmatpush3.bf16.msra.mxu1 %v3510_v40  ;;  %1721 = vmatprep.mubr.f32.mxu1 %v3950_v0  ;;  %v73_v0 = vld [vmem:[%s5266_s0 + $0x11] sm:$0xff]  ;;  %v4261_v42 = vld [vmem:[%s5266_s0 + $0x20] sm:$0xff]  ;;  %v591_v48 = vld [vmem:[#allocation3 + $0x3a8] sm:$0xff] }
  0x65   :  { %3257 = vmatprep.subr.bf16.mxu0 %v3256_v45  ;;  %3513 = vmatprep.subr.bf16.mxu1 %v3512_v46  ;;  %v584_v40 = vld [vmem:[#allocation3 + $0x370] sm:$0xff]  ;;  %v3270_v45 = vpack.c.bf16 %v585_v27, %v582_v25  ;;  %v638_v46 = vld [vmem:[#allocation3 + $0x520] sm:$0xff]  ;;  %v593_v60 = vld [vmem:[#allocation3 + $0x3b8] sm:$0xff] }
  0x66   :  { %v588_v47 = vld [vmem:[#allocation3 + $0x390] sm:$0xff]  ;;  %v3526_v55 = vpack.c.bf16 %v587_v41, %v584_v40  ;;  %v3528_v58 = vpack.c.bf16 %v641_v49, %v638_v46  ;;  %v590_v59 = vld [vmem:[#allocation3 + $0x3a0] sm:$0xff]  ;;  %v647_v2 = vld [vmem:[#allocation3 + $0x568] sm:$0xff] }
  0x67   :  { %1722 = vmatmul.mubr.f32.gmra.mrb[14].mxu1 %v2755_v51  ;;  %3259 = vmatpush1.bf16.msra.mxu0 %v3258_v54  ;;  %v75_v50 = vld [vmem:[%s5266_s0 + $0x31] sm:$0xff]  ;;  %v3272_v51 = vpack.c.bf16 %v592_v37, %v589_v34  ;;  %v595_v54 = vld [vmem:[#allocation3 + $0x3c8] sm:$0xff]  ;;  %v3274_v62 = vpack.c.bf16 %v591_v48, %v588_v47  ;;  %v594_v3 = vld [vmem:[#allocation3 + $0x3c0] sm:$0xff]  ;;  %v3530_v9 = vpack.c.bf16 %v593_v60, %v590_v59 }
  0x68   :  { %3515 = vmatpush3.bf16.msra.mxu1 %v3514_v56  ;;  %1792 = vmatprep.mubr.f32.mxu1 %v4222_v53  ;;  %v4251_v53 = vld [vmem:[%s5266_s0 + $0x10] sm:$0xff]  ;;  %v598_v56 = vld [vmem:[#allocation3 + $0x3e0] sm:$0xff]  ;;  %v597_v4 = vld [vmem:[#allocation3 + $0x3d8] sm:$0xff] }
  0x69   :  { %3261 = vmatprep.subr.bf16.mxu0 %v3260_v61  ;;  %3517 = vmatprep.subr.bf16.mxu1 %v3516_v63  ;;  %v4271_v61 = vld [vmem:[%s5266_s0 + $0x30] sm:$0xff]  ;;  %v4281_v16 = vld [vmem:[%s5266_s0 + $0x40] sm:$0xff]  ;;  %v3278_v17 = vpack.c.bf16 %v597_v4, %v594_v3  ;;  %v603_v23 = vld [vmem:[#allocation3 + $0x408] sm:$0xff] }
  0x6a   :  { %988 = vmatmul.mubr.f32.vlgmr.msra.gmra.mrb[0].mxu0 %v40_v5  ;;  %v644_v63 = vld [vmem:[#allocation3 + $0x550] sm:$0xff]  ;;  %v650_v19 = vld [vmem:[#allocation3 + $0x580] sm:$0xff]  ;;  %v607_v27 = vld [vmem:[#allocation3 + $0x428] sm:$0xff] }
  0x6b   :  { %1793 = vmatmul.mubr.f32.vlgmr.msra.gmra.mrb[16].mxu1 %v40_v5  ;;  %3263 = vmatpush1.bf16.msra.mxu0 %v3262_v7  ;;  %v76_v5 = vld [vmem:[%s5266_s0 + $0x41] sm:$0xff]  ;;  %v3276_v7 = vpack.c.bf16 %v598_v56, %v595_v54  ;;  %v604_v10 = vld [vmem:[#allocation3 + $0x410] sm:$0xff]  ;;  %v605_v34 = vld [vmem:[#allocation3 + $0x418] sm:$0xff] }
  0x6c   :  { %993 = vmatprep.mubr.f32.mxu0 %v73_v0  ;;  %1797 = vmatprep.mubr.f32.mxu1 %v73_v0  ;;  %v601_v0 = vld [vmem:[#allocation3 + $0x3f8] sm:$0xff]  ;;  %v596_v12 = vld [vmem:[#allocation3 + $0x3d0] sm:$0xff]  ;;  %v610_v30 = vld [vmem:[#allocation3 + $0x440] sm:$0xff] }
  0x6d   :  { %3265 = vmatprep.subr.bf16.mxu0 %v3264_v11  ;;  %3519 = vmatpush3.bf16.msra.mxu1 %v3518_v14  ;;  %v3532_v11 = vpack.c.bf16 %v647_v2, %v644_v63  ;;  %v599_v14 = vld [vmem:[#allocation3 + $0x3e8] sm:$0xff]  ;;  %v600_v22 = vld [vmem:[#allocation3 + $0x3f0] sm:$0xff]  ;;  %v3280_v25 = vpack.c.bf16 %v604_v10, %v601_v0  ;;  %v606_v41 = vld [vmem:[#allocation3 + $0x420] sm:$0xff]  ;;  %v3284_v47 = vpack.c.bf16 %v610_v30, %v607_v27 }
  0x6e   :  { %994 = vmatmul.mubr.f32.gmra.mrb[2].mxu0 %v4251_v53  ;;  %3521 = vmatprep.subr.bf16.mxu1 %v3520_v20  ;;  %v653_v20 = vld [vmem:[#allocation3 + $0x598] sm:$0xff]  ;;  %v3534_v28 = vpack.c.bf16 %v599_v14, %v596_v12  ;;  %v3282_v37 = vpack.c.bf16 %v603_v23, %v600_v22  ;;  %v659_v40 = vld [vmem:[#allocation3 + $0x5c8] sm:$0xff]  ;;  %v608_v54 = vld [vmem:[#allocation3 + $0x430] sm:$0xff] }
  0x6f   :  { %1798 = vmatmul.mubr.f32.gmra.mrb[18].mxu1 %v4251_v53  ;;  %3267 = vmatpush1.bf16.msra.mxu0 %v3266_v24  ;;  %v77_v24 = vld [vmem:[%s5266_s0 + $0x51] sm:$0xff]  ;;  %v78_v46 = vld [vmem:[%s5266_s0 + $0x61] sm:$0xff] }
  0x70   :  { %999 = vmatprep.mubr.f32.mxu0 %v74_v32  ;;  %1802 = vmatprep.mubr.f32.mxu1 %v74_v32  ;;  %v3536_v32 = vpack.c.bf16 %v653_v20, %v650_v19  ;;  %v613_v48 = vld [vmem:[#allocation3 + $0x458] sm:$0xff]  ;;  %v4301_v56 = vld [vmem:[%s5266_s0 + $0x60] sm:$0xff]  ;;  %v615_v63 = vld [vmem:[#allocation3 + $0x468] sm:$0xff] }
  0x71   :  { %3269 = vmatprep.subr.bf16.mxu0 %v3268_v33  ;;  %3523 = vmatpush3.bf16.msra.mxu1 %v3522_v36  ;;  %v602_v33 = vld [vmem:[#allocation3 + $0x400] sm:$0xff]  ;;  %v4291_v36 = vld [vmem:[%s5266_s0 + $0x50] sm:$0xff]  ;;  %v665_v60 = vld [vmem:[#allocation3 + $0x5f8] sm:$0xff] }
  0x72   :  { %1000 = vmatmul.mubr.f32.gmra.mrb[4].mxu0 %v4261_v42  ;;  %3525 = vmatprep.subr.bf16.mxu1 %v3524_v38  ;;  %v656_v38 = vld [vmem:[#allocation3 + $0x5b0] sm:$0xff]  ;;  %v3538_v49 = vpack.c.bf16 %v605_v34, %v602_v33  ;;  %v662_v59 = vld [vmem:[#allocation3 + $0x5e0] sm:$0xff]  ;;  %v619_v4 = vld [vmem:[#allocation3 + $0x488] sm:$0xff] }
  0x73   :  { %1803 = vmatmul.mubr.f32.gmra.mrb[20].mxu1 %v4261_v42  ;;  %3271 = vmatpush1.bf16.msra.mxu0 %v3270_v45  ;;  %v609_v45 = vld [vmem:[#allocation3 + $0x438] sm:$0xff]  ;;  %v3544_v0 = vpack.c.bf16 %v665_v60, %v662_v59  ;;  %v618_v14 = vld [vmem:[#allocation3 + $0x480] sm:$0xff]  ;;  %v627_v30 = vld [vmem:[#allocation3 + $0x4c8] sm:$0xff] }
  0x74   :  { %1005 = vmatprep.mubr.f32.mxu0 %v75_v50  ;;  %1807 = vmatprep.mubr.f32.mxu1 %v75_v50  ;;  %v616_v50 = vld [vmem:[#allocation3 + $0x470] sm:$0xff]  ;;  %v617_v10 = vld [vmem:[#allocation3 + $0x478] sm:$0xff]  ;;  %v80_v19 = vld [vmem:[%s5266_s0 + $0xa1] sm:$0xff] }
  0x75   :  { %3273 = vmatprep.subr.bf16.mxu0 %v3272_v51  ;;  %3527 = vmatpush3.bf16.msra.mxu1 %v3526_v55  ;;  %v3540_v51 = vpack.c.bf16 %v659_v40, %v656_v38  ;;  %v611_v55 = vld [vmem:[#allocation3 + $0x448] sm:$0xff]  ;;  %v79_v2 = vld [vmem:[%s5266_s0 + $0x71] sm:$0xff]  ;;  %v3288_v3 = vpack.c.bf16 %v616_v50, %v613_v48 }
  0x76   :  { %1006 = vmatmul.mubr.f32.gmra.mrb[6].mxu0 %v4271_v61  ;;  %3529 = vmatprep.subr.bf16.mxu1 %v3528_v58  ;;  %v3286_v58 = vpack.c.bf16 %v609_v45, %v606_v41  ;;  %v625_v23 = vld [vmem:[#allocation3 + $0x4b8] sm:$0xff]  ;;  %v631_v34 = vld [vmem:[#allocation3 + $0x4e8] sm:$0xff]  ;;  %v4327_v38 = vld [vmem:[%s5266_s0 + $0xb0] sm:$0xff] }
  0x77   :  { %1808 = vmatmul.mubr.f32.gmra.mrb[22].mxu1 %v4271_v61  ;;  %3275 = vmatpush1.bf16.msra.mxu0 %v3274_v62  ;;  %v612_v62 = vld [vmem:[#allocation3 + $0x450] sm:$0xff]  ;;  %v630_v41 = vld [vmem:[#allocation3 + $0x4e0] sm:$0xff]  ;;  %v633_v45 = vld [vmem:[#allocation3 + $0x4f8] sm:$0xff] }
  0x78   :  { %1011 = vmatprep.mubr.f32.mxu0 %v76_v5  ;;  %1812 = vmatprep.mubr.f32.mxu1 %v76_v5  ;;  %v3542_v5 = vpack.c.bf16 %v611_v55, %v608_v54  ;;  %v3290_v12 = vpack.c.bf16 %v615_v63, %v612_v62  ;;  %v82_v48 = vld [vmem:[%s5266_s0 + $0xc1] sm:$0xff]  ;;  %v640_v54 = vld [vmem:[#allocation3 + $0x530] sm:$0xff] }
  0x79   :  { %3277 = vmatprep.subr.bf16.mxu0 %v3276_v7  ;;  %3531 = vmatpush3.bf16.msra.mxu1 %v3530_v9  ;;  %v622_v7 = vld [vmem:[#allocation3 + $0x4a0] sm:$0xff]  ;;  %v636_v59 = vld [vmem:[#allocation3 + $0x510] sm:$0xff]  ;;  %v639_v60 = vld [vmem:[#allocation3 + $0x528] sm:$0xff] }
  0x7a   :  { %1012 = vmatmul.mubr.f32.gmra.mrb[8].mxu0 %v4281_v16  ;;  %3533 = vmatprep.subr.bf16.mxu1 %v3532_v11  ;;  %v614_v9 = vld [vmem:[#allocation3 + $0x460] sm:$0xff]  ;;  %v4311_v11 = vld [vmem:[%s5266_s0 + $0x70] sm:$0xff]  ;;  %v3292_v20 = vpack.c.bf16 %v622_v7, %v619_v4 }
  0x7b   :  { %1813 = vmatmul.mubr.f32.gmra.mrb[24].mxu1 %v4281_v16  ;;  %3279 = vmatpush1.bf16.msra.mxu0 %v3278_v17  ;;  %v621_v17 = vld [vmem:[#allocation3 + $0x498] sm:$0xff]  ;;  %v3546_v22 = vpack.c.bf16 %v617_v10, %v614_v9  ;;  %v4337_v55 = vld [vmem:[%s5266_s0 + $0xc0] sm:$0xff]  ;;  %v4347_v4 = vld [vmem:[%s5266_s0 + $0xd0] sm:$0xff] }
  0x7c   :  { %1017 = vmatprep.mubr.f32.mxu0 %v77_v24  ;;  %1817 = vmatprep.mubr.f32.mxu1 %v77_v24  ;;  %v628_v24 = vld [vmem:[#allocation3 + $0x4d0] sm:$0xff]  ;;  %v3294_v27 = vpack.c.bf16 %v621_v17, %v618_v14  ;;  %v642_v7 = vld [vmem:[#allocation3 + $0x540] sm:$0xff] }
  0x7d   :  { %3281 = vmatprep.subr.bf16.mxu0 %v3280_v25  ;;  %3535 = vmatpush3.bf16.msra.mxu1 %v3534_v28  ;;  %v48_v25 = vld [vmem:[%s5266_s0 + $0xa0] sm:$0xff]  ;;  %v624_v28 = vld [vmem:[#allocation3 + $0x4b0] sm:$0xff]  ;;  %v3296_v33 = vpack.c.bf16 %v628_v24, %v625_v23 }
  0x7e   :  { %1018 = vmatmul.mubr.f32.gmra.mrb[10].mxu0 %v4291_v36  ;;  %3537 = vmatprep.subr.bf16.mxu1 %v3536_v32  ;;  %v81_v32 = vld [vmem:[%s5266_s0 + $0xb1] sm:$0xff]  ;;  %v3298_v40 = vpack.c.bf16 %v627_v30, %v624_v28  ;;  %v84_v9 = vld [vmem:[%s5266_s0 + $0xe1] sm:$0xff] }
  0x7f   :  { %1818 = vmatmul.mubr.f32.gmra.mrb[26].mxu1 %v4291_v36  ;;  %3283 = vmatpush1.bf16.msra.mxu0 %v3282_v37  ;;  %v634_v37 = vld [vmem:[#allocation3 + $0x500] sm:$0xff]  ;;  %v83_v62 = vld [vmem:[%s5266_s0 + $0xd1] sm:$0xff] }
  0x80   :  { %1023 = vmatprep.mubr.f32.mxu0 %v78_v46  ;;  %1822 = vmatprep.mubr.f32.mxu1 %v78_v46  ;;  %v716_v46 = vld [vmem:[#allocation3 + $0x790] sm:$0xff]  ;;  %v4357_v17 = vld [vmem:[%s5266_s0 + $0xe0] sm:$0xff] }
  0x81   :  { %3285 = vmatprep.subr.bf16.mxu0 %v3284_v47  ;;  %3539 = vmatpush3.bf16.msra.mxu1 %v3538_v49  ;;  %v719_v47 = vld [vmem:[#allocation3 + $0x7a8] sm:$0xff]  ;;  %v3300_v49 = vpack.c.bf16 %v634_v37, %v631_v34  ;;  %v652_v14 = vld [vmem:[#allocation3 + $0x590] sm:$0xff] }
  0x82   :  { %1024 = vmatmul.mubr.f32.gmra.mrb[12].mxu0 %v4301_v56  ;;  %3541 = vmatprep.subr.bf16.mxu1 %v3540_v51  ;;  %v3548_v50 = vpack.c.bf16 %v719_v47, %v716_v46  ;;  %v637_v51 = vld [vmem:[#allocation3 + $0x518] sm:$0xff]  ;;  %v4367_v28 = vld [vmem:[%s5266_s0 + $0xf0] sm:$0xff]  ;;  %v86_v34 = vld [vmem:[%s5266_s0 + $0x101] sm:$0xff] }
  0x83   :  { %1823 = vmatmul.mubr.f32.gmra.mrb[28].mxu1 %v4301_v56  ;;  %3287 = vmatpush1.bf16.msra.mxu0 %v3286_v58  ;;  %v3302_v58 = vpack.c.bf16 %v633_v45, %v630_v41  ;;  %v3304_v63 = vpack.c.bf16 %v640_v54, %v637_v51  ;;  %v85_v23 = vld [vmem:[%s5266_s0 + $0xf1] sm:$0xff]  ;;  %v4377_v45 = vld [vmem:[%s5266_s0 + $0x100] sm:$0xff]  ;;  %v667_v51 = vld [vmem:[#allocation3 + $0x608] sm:$0xff] }
  0x84   :  { %1029 = vmatprep.mubr.f32.mxu0 %v79_v2  ;;  %1827 = vmatprep.mubr.f32.mxu1 %v79_v2  ;;  %v643_v2 = vld [vmem:[#allocation3 + $0x548] sm:$0xff]  ;;  %v664_v41 = vld [vmem:[#allocation3 + $0x5f0] sm:$0xff]  ;;  %v670_v54 = vld [vmem:[#allocation3 + $0x620] sm:$0xff] }
  0x85   :  { %3289 = vmatprep.subr.bf16.mxu0 %v3288_v3  ;;  %3543 = vmatpush3.bf16.msra.mxu1 %v3542_v5  ;;  %v646_v3 = vld [vmem:[#allocation3 + $0x560] sm:$0xff]  ;;  %v3306_v5 = vpack.c.bf16 %v639_v60, %v636_v59  ;;  %v660_v47 = vld [vmem:[#allocation3 + $0x5d0] sm:$0xff] }
  0x86   :  { %1030 = vmatmul.mubr.f32.gmra.mrb[14].mxu0 %v4311_v11  ;;  %3545 = vmatprep.subr.bf16.mxu1 %v3544_v0  ;;  %v645_v0 = vld [vmem:[#allocation3 + $0x558] sm:$0xff]  ;;  %v3308_v10 = vpack.c.bf16 %v646_v3, %v643_v2  ;;  %v666_v60 = vld [vmem:[#allocation3 + $0x600] sm:$0xff]  ;;  %v676_v3 = vld [vmem:[#allocation3 + $0x650] sm:$0xff] }
  0x87   :  { %1828 = vmatmul.mubr.f32.gmra.mrb[30].mxu1 %v4311_v11  ;;  %3291 = vmatpush1.bf16.msra.mxu0 %v3290_v12  ;;  %v649_v12 = vld [vmem:[#allocation3 + $0x578] sm:$0xff] }
  0x88   :  { %1035 = vmatprep.mubr.f32.mxu0 %v80_v19  ;;  %1832 = vmatprep.mubr.f32.mxu1 %v80_v19  ;;  %v3310_v19 = vpack.c.bf16 %v645_v0, %v642_v7  ;;  %v3312_v24 = vpack.c.bf16 %v652_v14, %v649_v12  ;;  %v673_v2 = vld [vmem:[#allocation3 + $0x638] sm:$0xff]  ;;  %v671_v7 = vld [vmem:[#allocation3 + $0x628] sm:$0xff]  ;;  %v672_v14 = vld [vmem:[#allocation3 + $0x630] sm:$0xff] }
  0x89   :  { %3293 = vmatprep.subr.bf16.mxu0 %v3292_v20  ;;  %3547 = vmatpush3.bf16.msra.mxu1 %v3546_v22  ;;  %v648_v20 = vld [vmem:[#allocation3 + $0x570] sm:$0xff]  ;;  %v651_v22 = vld [vmem:[#allocation3 + $0x588] sm:$0xff]  ;;  %v725_v12 = vld [vmem:[#allocation3 + $0x7d8] sm:$0xff] }
  0x8a   :  { %1036 = vmatmul.mubr.f32.gmra.mrb[16].mxu0 %v48_v25  ;;  %3549 = vmatprep.subr.bf16.mxu1 %v3548_v50  ;;  %v3314_v30 = vpack.c.bf16 %v651_v22, %v648_v20  ;;  %v104_v0 = vld [vmem:[%s5266_s0 + $0x2] sm:$0xff]  ;;  %v3328_v20 = vpack.c.bf16 %v676_v3, %v673_v2 }
  0x8b   :  { %1833 = vmatmul.mubr.f32.gmra.mrb[32].mxu1 %v48_v25  ;;  %3295 = vmatpush1.bf16.msra.mxu0 %v3294_v27  ;;  %v655_v25 = vld [vmem:[#allocation3 + $0x5a8] sm:$0xff]  ;;  %v658_v27 = vld [vmem:[#allocation3 + $0x5c0] sm:$0xff] }
  0x8c   :  { %1041 = vmatprep.mubr.f32.mxu0 %v81_v32  ;;  %1837 = vmatprep.mubr.f32.mxu1 %v81_v32  ;;  %v654_v32 = vld [vmem:[#allocation3 + $0x5a0] sm:$0xff]  ;;  %v3316_v37 = vpack.c.bf16 %v658_v27, %v655_v25  ;;  %v679_v22 = vld [vmem:[#allocation3 + $0x668] sm:$0xff] }
  0x8d   :  { %3297 = vmatprep.subr.bf16.mxu0 %v3296_v33  ;;  %v657_v33 = vld [vmem:[#allocation3 + $0x5b8] sm:$0xff]  ;;  %v674_v27 = vld [vmem:[#allocation3 + $0x640] sm:$0xff]  ;;  %v691_v3 = vld [vmem:[#allocation3 + $0x6c8] sm:$0xff] }
  0x8e   :  { %1042 = vmatmul.mubr.f32.gmra.mrb[18].mxu0 %v4327_v38  ;;  %v3318_v46 = vpack.c.bf16 %v657_v33, %v654_v32  ;;  %v4399_v32 = vld [vmem:[%s5266_s0 + $0x12] sm:$0xff] }
  0x8f   :  { %1838 = vmatmul.mubr.f32.gmra.mrb[34].mxu1 %v4327_v38  ;;  %3299 = vmatpush1.bf16.msra.mxu0 %v3298_v40  ;;  %v661_v40 = vld [vmem:[#allocation3 + $0x5d8] sm:$0xff] }
  0x90   :  { %1047 = vmatprep.mubr.f32.mxu0 %v82_v48  ;;  %1842 = vmatprep.mubr.f32.mxu1 %v82_v48  ;;  %v663_v48 = vld [vmem:[#allocation3 + $0x5e8] sm:$0xff]  ;;  %v3320_v50 = vpack.c.bf16 %v664_v41, %v661_v40  ;;  %v681_v40 = vld [vmem:[#allocation3 + $0x678] sm:$0xff] }
  0x91   :  { %3301 = vmatprep.subr.bf16.mxu0 %v3300_v49  ;;  %v87_v49 = vld [vmem:[%s5266_s0 + $0x111] sm:$0xff]  ;;  %v3322_v59 = vpack.c.bf16 %v663_v48, %v660_v47 }
  0x92   :  { %1048 = vmatmul.mubr.f32.gmra.mrb[20].mxu0 %v4337_v55  ;;  %v688_v48 = vld [vmem:[#allocation3 + $0x6b0] sm:$0xff] }
  0x93   :  { %1843 = vmatmul.mubr.f32.gmra.mrb[36].mxu1 %v4337_v55  ;;  %3303 = vmatpush1.bf16.msra.mxu0 %v3302_v58  ;;  %v4387_v58 = vld [vmem:[%s5266_s0 + $0x110] sm:$0xff] }
  0x94   :  { %1053 = vmatprep.mubr.f32.mxu0 %v83_v62  ;;  %1847 = vmatprep.mubr.f32.mxu1 %v83_v62  ;;  %v669_v62 = vld [vmem:[#allocation3 + $0x618] sm:$0xff] }
  0x95   :  { %3305 = vmatprep.subr.bf16.mxu0 %v3304_v63  ;;  %v3324_v63 = vpack.c.bf16 %v670_v54, %v667_v51  ;;  %v683_v51 = vld [vmem:[#allocation3 + $0x688] sm:$0xff] }
  0x96   :  { %1054 = vmatmul.mubr.f32.gmra.mrb[22].mxu0 %v4347_v4 }
  0x97   :  { %1848 = vmatmul.mubr.f32.gmra.mrb[38].mxu1 %v4347_v4  ;;  %3307 = vmatpush1.bf16.msra.mxu0 %v3306_v5  ;;  %v668_v5 = vld [vmem:[#allocation3 + $0x610] sm:$0xff] }
  0x98   :  { %1059 = vmatprep.mubr.f32.mxu0 %v84_v9  ;;  %1852 = vmatprep.mubr.f32.mxu1 %v84_v9  ;;  %v3326_v9 = vpack.c.bf16 %v669_v62, %v666_v60  ;;  %v737_v60 = vld [vmem:[#allocation3 + $0x838] sm:$0xff]  ;;  %v684_v62 = vld [vmem:[#allocation3 + $0x690] sm:$0xff] }
  0x99   :  { %3309 = vmatprep.subr.bf16.mxu0 %v3308_v10  ;;  %v722_v10 = vld [vmem:[#allocation3 + $0x7c0] sm:$0xff] }
  0x9a   :  { %1060 = vmatmul.mubr.f32.gmra.mrb[24].mxu0 %v4357_v17  ;;  %v3552_v25 = vpack.c.bf16 %v725_v12, %v722_v10  ;;  %v689_v10 = vld [vmem:[#allocation3 + $0x6b8] sm:$0xff] }
  0x9b   :  { %1853 = vmatmul.mubr.f32.gmra.mrb[40].mxu1 %v4357_v17  ;;  %3311 = vmatpush1.bf16.msra.mxu0 %v3310_v19  ;;  %v675_v19 = vld [vmem:[#allocation3 + $0x648] sm:$0xff] }
  0x9c   :  { %1065 = vmatprep.mubr.f32.mxu0 %v85_v23  ;;  %1857 = vmatprep.mubr.f32.mxu1 %v85_v23  ;;  %v3550_v23 = vpack.c.bf16 %v671_v7, %v668_v5  ;;  %v3330_v33 = vpack.c.bf16 %v675_v19, %v672_v14  ;;  %v694_v7 = vld [vmem:[#allocation3 + $0x6e0] sm:$0xff]  ;;  %v740_v14 = vld [vmem:[#allocation3 + $0x850] sm:$0xff]  ;;  %v743_v19 = vld [vmem:[#allocation3 + $0x868] sm:$0xff] }
  0x9d   :  { %3313 = vmatprep.subr.bf16.mxu0 %v3312_v24  ;;  %v682_v24 = vld [vmem:[#allocation3 + $0x680] sm:$0xff] }
  0x9e   :  { %1066 = vmatmul.mubr.f32.gmra.mrb[26].mxu0 %v4367_v28  ;;  %v3332_v41 = vpack.c.bf16 %v682_v24, %v679_v22  ;;  %v693_v22 = vld [vmem:[#allocation3 + $0x6d8] sm:$0xff] }
  0x9f   :  { %1858 = vmatmul.mubr.f32.gmra.mrb[42].mxu1 %v4367_v28  ;;  %3315 = vmatpush1.bf16.msra.mxu0 %v3314_v30  ;;  %v677_v30 = vld [vmem:[#allocation3 + $0x658] sm:$0xff] }
  0xa0   :  { %1071 = vmatprep.mubr.f32.mxu0 %v86_v34  ;;  %1862 = vmatprep.mubr.f32.mxu1 %v86_v34  ;;  %v731_v34 = vld [vmem:[#allocation3 + $0x808] sm:$0xff]  ;;  %v3554_v47 = vpack.c.bf16 %v677_v30, %v674_v27  ;;  %v697_v24 = vld [vmem:[#allocation3 + $0x6f8] sm:$0xff]  ;;  %v700_v27 = vld [vmem:[#allocation3 + $0x710] sm:$0xff]  ;;  %v3564_v30 = vpack.c.bf16 %v743_v19, %v740_v14 }
  0xa1   :  { %3317 = vmatprep.subr.bf16.mxu0 %v3316_v37  ;;  %v678_v37 = vld [vmem:[#allocation3 + $0x660] sm:$0xff]  ;;  %v707_v14 = vld [vmem:[#allocation3 + $0x748] sm:$0xff] }
  0xa2   :  { %1072 = vmatmul.mubr.f32.gmra.mrb[28].mxu0 %v4377_v45  ;;  %v3334_v54 = vpack.c.bf16 %v681_v40, %v678_v37  ;;  %v746_v37 = vld [vmem:[#allocation3 + $0x880] sm:$0xff]  ;;  %v749_v40 = vld [vmem:[#allocation3 + $0x898] sm:$0xff] }
  0xa3   :  { %1863 = vmatmul.mubr.f32.gmra.mrb[44].mxu1 %v4377_v45  ;;  %3319 = vmatpush1.bf16.msra.mxu0 %v3318_v46  ;;  %v685_v46 = vld [vmem:[#allocation3 + $0x698] sm:$0xff] }
  0xa4   :  { %1077 = vmatprep.mubr.f32.mxu0 %v87_v49  ;;  %1867 = vmatprep.mubr.f32.mxu1 %v87_v49  ;;  %v3336_v2 = vpack.c.bf16 %v688_v48, %v685_v46  ;;  %v699_v46 = vld [vmem:[#allocation3 + $0x708] sm:$0xff] }
  0xa5   :  { %3321 = vmatprep.subr.bf16.mxu0 %v3320_v50  ;;  %v680_v50 = vld [vmem:[#allocation3 + $0x670] sm:$0xff]  ;;  %v703_v48 = vld [vmem:[#allocation3 + $0x728] sm:$0xff] }
  0xa6   :  { %1078 = vmatmul.mubr.f32.gmra.mrb[30].mxu0 %v4387_v58  ;;  %v3558_v5 = vpack.c.bf16 %v683_v51, %v680_v50  ;;  %v706_v50 = vld [vmem:[#allocation3 + $0x740] sm:$0xff]  ;;  %v3568_v51 = vpack.c.bf16 %v749_v40, %v746_v37  ;;  %v713_v40 = vld [vmem:[#allocation3 + $0x778] sm:$0xff] }
  0xa7   :  { %1868 = vmatmul.mubr.f32.gmra.mrb[46].mxu1 %v4387_v58  ;;  %3323 = vmatpush1.bf16.msra.mxu0 %v3322_v59  ;;  %v734_v59 = vld [vmem:[#allocation3 + $0x820] sm:$0xff] }
  0xa8   :  { %1148 = vmatprep.mubr.f32.mxu0 %v4251_v53  ;;  %1937 = vmatprep.mubr.f32.mxu1 %v4251_v53  ;;  %v728_v53 = vld [vmem:[#allocation3 + $0x7f0] sm:$0xff]  ;;  %v710_v37 = vld [vmem:[#allocation3 + $0x760] sm:$0xff] }
  0xa9   :  { %3325 = vmatprep.subr.bf16.mxu0 %v3324_v63  ;;  %v3556_v49 = vpack.c.bf16 %v731_v34, %v728_v53  ;;  %v687_v63 = vld [vmem:[#allocation3 + $0x6a8] sm:$0xff] }
  0xaa   :  { %1149 = vmatmul.mubr.f32.vlgmr.msra.gmra.mrb[0].mxu0 %v104_v0  ;;  %v3338_v12 = vpack.c.bf16 %v687_v63, %v684_v62  ;;  %v695_v53 = vld [vmem:[#allocation3 + $0x6e8] sm:$0xff]  ;;  %v752_v62 = vld [vmem:[#allocation3 + $0x8b0] sm:$0xff] }
  0xab   :  { %1938 = vmatmul.mubr.f32.vlgmr.msra.gmra.mrb[48].mxu1 %v104_v0  ;;  %3327 = vmatpush1.bf16.msra.mxu0 %v3326_v9  ;;  %v3560_v0 = vpack.c.bf16 %v737_v60, %v734_v59  ;;  %v686_v9 = vld [vmem:[#allocation3 + $0x6a0] sm:$0xff]  ;;  %v701_v59 = vld [vmem:[#allocation3 + $0x718] sm:$0xff]  ;;  %v755_v63 = vld [vmem:[#allocation3 + $0x8c8] sm:$0xff] }
  0xac   :  { %1154 = vmatprep.mubr.f32.mxu0 %v4261_v42  ;;  %1942 = vmatprep.mubr.f32.mxu1 %v4261_v42  ;;  %v4408_v42 = vld [vmem:[%s5266_s0 + $0x22] sm:$0xff] }
  0xad   :  { %3329 = vmatprep.subr.bf16.mxu0 %v3328_v20  ;;  %3551 = vmatpush3.bf16.msra.mxu1 %v3550_v23  ;;  %v690_v20 = vld [vmem:[#allocation3 + $0x6c0] sm:$0xff]  ;;  %v3340_v23 = vpack.c.bf16 %v694_v7, %v691_v3  ;;  %v705_v3 = vld [vmem:[#allocation3 + $0x738] sm:$0xff] }
  0xae   :  { %1155 = vmatmul.mubr.f32.gmra.mrb[2].mxu0 %v4399_v32  ;;  %3553 = vmatprep.subr.bf16.mxu1 %v3552_v25  ;;  %v3562_v25 = vpack.c.bf16 %v689_v10, %v686_v9  ;;  %v3342_v34 = vpack.c.bf16 %v693_v22, %v690_v20  ;;  %v709_v7 = vld [vmem:[#allocation3 + $0x758] sm:$0xff]  ;;  %v712_v9 = vld [vmem:[#allocation3 + $0x770] sm:$0xff]  ;;  %v3572_v10 = vpack.c.bf16 %v755_v63, %v752_v62  ;;  %v758_v20 = vld [vmem:[#allocation3 + $0x8e0] sm:$0xff] }
  0xaf   :  { %1943 = vmatmul.mubr.f32.gmra.mrb[50].mxu1 %v4399_v32  ;;  %3331 = vmatpush1.bf16.msra.mxu0 %v3330_v33  ;;  %v692_v33 = vld [vmem:[#allocation3 + $0x6d0] sm:$0xff]  ;;  %v761_v22 = vld [vmem:[#allocation3 + $0x8f8] sm:$0xff]  ;;  %v112_v62 = vld [vmem:[%s5266_s0 + $0xa2] sm:$0xff] }
  0xb0   :  { %1160 = vmatprep.mubr.f32.mxu0 %v4271_v61  ;;  %1947 = vmatprep.mubr.f32.mxu1 %v4271_v61  ;;  %v4417_v61 = vld [vmem:[%s5266_s0 + $0x32] sm:$0xff] }
  0xb1   :  { %3333 = vmatprep.subr.bf16.mxu0 %v3332_v41  ;;  %3555 = vmatpush3.bf16.msra.mxu1 %v3554_v47  ;;  %v696_v41 = vld [vmem:[#allocation3 + $0x6f0] sm:$0xff]  ;;  %v3344_v47 = vpack.c.bf16 %v700_v27, %v697_v24  ;;  %v711_v24 = vld [vmem:[#allocation3 + $0x768] sm:$0xff]  ;;  %v3352_v27 = vpack.c.bf16 %v712_v9, %v709_v7 }
  0xb2   :  { %1161 = vmatmul.mubr.f32.gmra.mrb[4].mxu0 %v4408_v42  ;;  %3557 = vmatprep.subr.bf16.mxu1 %v3556_v49  ;;  %v3566_v49 = vpack.c.bf16 %v695_v53, %v692_v33  ;;  %v3346_v60 = vpack.c.bf16 %v699_v46, %v696_v41  ;;  %v718_v53 = vld [vmem:[#allocation3 + $0x7a0] sm:$0xff]  ;;  %v812_v46 = vld [vmem:[#allocation3 + $0xa90] sm:$0xff]  ;;  %v727_v7 = vld [vmem:[#allocation3 + $0x7e8] sm:$0xff] }
  0xb3   :  { %1948 = vmatmul.mubr.f32.gmra.mrb[52].mxu1 %v4408_v42  ;;  %3335 = vmatpush1.bf16.msra.mxu0 %v3334_v54  ;;  %v698_v54 = vld [vmem:[#allocation3 + $0x700] sm:$0xff]  ;;  %v4468_v9 = vld [vmem:[%s5266_s0 + $0xb2] sm:$0xff] }
  0xb4   :  { %1166 = vmatprep.mubr.f32.mxu0 %v4281_v16  ;;  %1952 = vmatprep.mubr.f32.mxu1 %v4281_v16  ;;  %v4426_v16 = vld [vmem:[%s5266_s0 + $0x42] sm:$0xff] }
  0xb5   :  { %3337 = vmatprep.subr.bf16.mxu0 %v3336_v2  ;;  %3559 = vmatpush3.bf16.msra.mxu1 %v3558_v5  ;;  %v702_v2 = vld [vmem:[#allocation3 + $0x720] sm:$0xff]  ;;  %v3348_v5 = vpack.c.bf16 %v706_v50, %v703_v48 }
  0xb6   :  { %1167 = vmatmul.mubr.f32.gmra.mrb[6].mxu0 %v4417_v61  ;;  %3561 = vmatprep.subr.bf16.mxu1 %v3560_v0  ;;  %v3570_v0 = vpack.c.bf16 %v701_v59, %v698_v54  ;;  %v3350_v19 = vpack.c.bf16 %v705_v3, %v702_v2  ;;  %v714_v48 = vld [vmem:[#allocation3 + $0x780] sm:$0xff]  ;;  %v721_v54 = vld [vmem:[#allocation3 + $0x7b8] sm:$0xff]  ;;  %v724_v59 = vld [vmem:[#allocation3 + $0x7d0] sm:$0xff] }
  0xb7   :  { %1953 = vmatmul.mubr.f32.gmra.mrb[54].mxu1 %v4417_v61  ;;  %3339 = vmatpush1.bf16.msra.mxu0 %v3338_v12  ;;  %v704_v12 = vld [vmem:[#allocation3 + $0x730] sm:$0xff]  ;;  %v723_v3 = vld [vmem:[#allocation3 + $0x7c8] sm:$0xff] }
  0xb8   :  { %1172 = vmatprep.mubr.f32.mxu0 %v4291_v36  ;;  %1957 = vmatprep.mubr.f32.mxu1 %v4291_v36  ;;  %v4435_v36 = vld [vmem:[%s5266_s0 + $0x52] sm:$0xff]  ;;  %v3574_v33 = vpack.c.bf16 %v707_v14, %v704_v12 }
  0xb9   :  { %3341 = vmatprep.subr.bf16.mxu0 %v3340_v23  ;;  %3563 = vmatpush3.bf16.msra.mxu1 %v3562_v25  ;;  %v708_v23 = vld [vmem:[#allocation3 + $0x750] sm:$0xff]  ;;  %v2667_v25 = vld [vmem:[%s5266_s0 + $0x80] sm:$0xff]  ;;  %v729_v12 = vld [vmem:[#allocation3 + $0x7f8] sm:$0xff] }
  0xba   :  { %1173 = vmatmul.mubr.f32.gmra.mrb[8].mxu0 %v4426_v16  ;;  %3565 = vmatprep.subr.bf16.mxu1 %v3564_v30  ;;  %v715_v30 = vld [vmem:[#allocation3 + $0x788] sm:$0xff]  ;;  %v3354_v41 = vpack.c.bf16 %v711_v24, %v708_v23  ;;  %v720_v2 = vld [vmem:[#allocation3 + $0x7b0] sm:$0xff] }
  0xbb   :  { %1958 = vmatmul.mubr.f32.gmra.mrb[56].mxu1 %v4426_v16  ;;  %3343 = vmatpush1.bf16.msra.mxu0 %v3342_v34  ;;  %v3576_v34 = vpack.c.bf16 %v761_v22, %v758_v20  ;;  %v3356_v50 = vpack.c.bf16 %v718_v53, %v715_v30  ;;  %v736_v20 = vld [vmem:[#allocation3 + $0x830] sm:$0xff]  ;;  %v4477_v22 = vld [vmem:[%s5266_s0 + $0xc2] sm:$0xff] }
  0xbc   :  { %1178 = vmatprep.mubr.f32.mxu0 %v4301_v56  ;;  %1962 = vmatprep.mubr.f32.mxu1 %v4301_v56  ;;  %v4444_v56 = vld [vmem:[%s5266_s0 + $0x62] sm:$0xff] }
  0xbd   :  { %3345 = vmatprep.subr.bf16.mxu0 %v3344_v47  ;;  %3567 = vmatpush3.bf16.msra.mxu1 %v3566_v49  ;;  %v815_v47 = vld [vmem:[#allocation3 + $0xaa8] sm:$0xff]  ;;  %v717_v49 = vld [vmem:[#allocation3 + $0x798] sm:$0xff]  ;;  %v742_v30 = vld [vmem:[#allocation3 + $0x860] sm:$0xff] }
  0xbe   :  { %1179 = vmatmul.mubr.f32.gmra.mrb[10].mxu0 %v4435_v36  ;;  %3569 = vmatprep.subr.bf16.mxu1 %v3568_v51  ;;  %v3578_v51 = vpack.c.bf16 %v713_v40, %v710_v37  ;;  %v3358_v63 = vpack.c.bf16 %v717_v49, %v714_v48  ;;  %v735_v24 = vld [vmem:[#allocation3 + $0x828] sm:$0xff]  ;;  %v745_v40 = vld [vmem:[#allocation3 + $0x878] sm:$0xff] }
  0xbf   :  { %1963 = vmatmul.mubr.f32.gmra.mrb[58].mxu1 %v4435_v36  ;;  %3347 = vmatpush1.bf16.msra.mxu0 %v3346_v60  ;;  %v3580_v60 = vpack.c.bf16 %v815_v47, %v812_v46  ;;  %v4495_v46 = vld [vmem:[%s5266_s0 + $0xe2] sm:$0xff] }
  0xc0   :  { %1184 = vmatprep.mubr.f32.mxu0 %v4311_v11  ;;  %1967 = vmatprep.mubr.f32.mxu1 %v4311_v11  ;;  %v4456_v11 = vld [vmem:[%s5266_s0 + $0x72] sm:$0xff]  ;;  %v747_v48 = vld [vmem:[#allocation3 + $0x888] sm:$0xff] }
  0xc1   :  { %3349 = vmatprep.subr.bf16.mxu0 %v3348_v5  ;;  %3571 = vmatpush3.bf16.msra.mxu1 %v3570_v0  ;;  %v3360_v5 = vpack.c.bf16 %v724_v59, %v721_v54  ;;  %v730_v0 = vld [vmem:[#allocation3 + $0x800] sm:$0xff]  ;;  %v4504_v54 = vld [vmem:[%s5266_s0 + $0xf2] sm:$0xff] }
  0xc2   :  { %1185 = vmatmul.mubr.f32.gmra.mrb[12].mxu0 %v4444_v56  ;;  %3573 = vmatprep.subr.bf16.mxu1 %v3572_v10  ;;  %v3362_v10 = vpack.c.bf16 %v723_v3, %v720_v2  ;;  %v3364_v14 = vpack.c.bf16 %v730_v0, %v727_v7  ;;  %v760_v2 = vld [vmem:[#allocation3 + $0x8f0] sm:$0xff]  ;;  %v4513_v3 = vld [vmem:[%s5266_s0 + $0x102] sm:$0xff] }
  0xc3   :  { %1968 = vmatmul.mubr.f32.gmra.mrb[60].mxu1 %v4444_v56  ;;  %3351 = vmatpush1.bf16.msra.mxu0 %v3350_v19  ;;  %v733_v19 = vld [vmem:[#allocation3 + $0x818] sm:$0xff]  ;;  %v759_v7 = vld [vmem:[#allocation3 + $0x8e8] sm:$0xff]  ;;  %v4520_v0 = vld [vmem:[%s5266_s0 + $0x120] sm:$0xff] }
  0xc4   :  { %1190 = vmatprep.mubr.f32.mxu0 %v2667_v25  ;;  %1972 = vmatprep.mubr.f32.mxu1 %v2667_v25  ;;  %v3368_v25 = vpack.c.bf16 %v736_v20, %v733_v19  ;;  %v762_v19 = vld [vmem:[#allocation3 + $0x900] sm:$0xff]  ;;  %v765_v20 = vld [vmem:[#allocation3 + $0x918] sm:$0xff] }
  0xc5   :  { %3353 = vmatprep.subr.bf16.mxu0 %v3352_v27  ;;  %3575 = vmatpush3.bf16.msra.mxu1 %v3574_v33  ;;  %v739_v27 = vld [vmem:[#allocation3 + $0x848] sm:$0xff]  ;;  %v4486_v33 = vld [vmem:[%s5266_s0 + $0xd2] sm:$0xff] }
  0xc6   :  { %1191 = vmatmul.mubr.f32.gmra.mrb[14].mxu0 %v4456_v11  ;;  %3577 = vmatprep.subr.bf16.mxu1 %v3576_v34  ;;  %v741_v34 = vld [vmem:[#allocation3 + $0x858] sm:$0xff]  ;;  %v3372_v37 = vpack.c.bf16 %v742_v30, %v739_v27  ;;  %v767_v27 = vld [vmem:[#allocation3 + $0x928] sm:$0xff] }
  0xc7   :  { %1973 = vmatmul.mubr.f32.gmra.mrb[62].mxu1 %v4456_v11  ;;  %3355 = vmatpush1.bf16.msra.mxu0 %v3354_v41  ;;  %v748_v41 = vld [vmem:[#allocation3 + $0x890] sm:$0xff] }
  0xc8   :  { %1196 = vmatprep.mubr.f32.mxu0 %v4327_v38  ;;  %1977 = vmatprep.mubr.f32.mxu1 %v4327_v38  ;;  %v726_v38 = vld [vmem:[#allocation3 + $0x7e0] sm:$0xff]  ;;  %v3376_v49 = vpack.c.bf16 %v748_v41, %v745_v40  ;;  %v2676_v30 = vld [vmem:[%s5266_s0 + $0x11] sm:$0xff]  ;;  %v771_v40 = vld [vmem:[#allocation3 + $0x948] sm:$0xff] }
  0xc9   :  { %3357 = vmatprep.subr.bf16.mxu0 %v3356_v50  ;;  %3579 = vmatpush3.bf16.msra.mxu1 %v3578_v51  ;;  %v3366_v23 = vpack.c.bf16 %v729_v12, %v726_v38  ;;  %v751_v50 = vld [vmem:[#allocation3 + $0x8a8] sm:$0xff]  ;;  %v754_v51 = vld [vmem:[#allocation3 + $0x8c0] sm:$0xff] }
  0xca   :  { %1197 = vmatmul.mubr.f32.gmra.mrb[16].mxu0 %v112_v62  ;;  %3581 = vmatprep.subr.bf16.mxu1 %v3580_v60  ;;  %v753_v60 = vld [vmem:[#allocation3 + $0x8b8] sm:$0xff]  ;;  %v763_v38 = vld [vmem:[#allocation3 + $0x908] sm:$0xff]  ;;  %v766_v12 = vld [vmem:[#allocation3 + $0x920] sm:$0xff] }
  0xcb   :  { %1978 = vmatmul.mubr.f32.gmra.mrb[64].mxu1 %v112_v62  ;;  %3359 = vmatpush1.bf16.msra.mxu0 %v3358_v63  ;;  %v3380_v62 = vpack.c.bf16 %v754_v51, %v751_v50  ;;  %v757_v63 = vld [vmem:[#allocation3 + $0x8d8] sm:$0xff]  ;;  %v770_v50 = vld [vmem:[#allocation3 + $0x940] sm:$0xff] }
  0xcc   :  { %1202 = vmatprep.mubr.f32.mxu0 %v4337_v55  ;;  %1982 = vmatprep.mubr.f32.mxu1 %v4337_v55  ;;  %v732_v55 = vld [vmem:[#allocation3 + $0x810] sm:$0xff]  ;;  %v773_v51 = vld [vmem:[#allocation3 + $0x958] sm:$0xff] }
  0xcd   :  { %3361 = vmatprep.subr.bf16.mxu0 %v3360_v5  ;;  %v3370_v53 = vpack.c.bf16 %v735_v24, %v732_v55  ;;  %v769_v55 = vld [vmem:[#allocation3 + $0x938] sm:$0xff]  ;;  %v772_v24 = vld [vmem:[#allocation3 + $0x950] sm:$0xff] }
  0xce   :  { %1203 = vmatmul.mubr.f32.gmra.mrb[18].mxu0 %v4468_v9  ;;  %v3392_v41 = vpack.c.bf16 %v772_v24, %v769_v55  ;;  %v783_v55 = vld [vmem:[#allocation3 + $0x9a8] sm:$0xff] }
  0xcf   :  { %1983 = vmatmul.mubr.f32.gmra.mrb[66].mxu1 %v4468_v9  ;;  %3363 = vmatpush1.bf16.msra.mxu0 %v3362_v10  ;;  %v3384_v10 = vpack.c.bf16 %v760_v2, %v757_v63  ;;  %v777_v63 = vld [vmem:[#allocation3 + $0x978] sm:$0xff] }
  0xd0   :  { %1208 = vmatprep.mubr.f32.mxu0 %v4347_v4  ;;  %1987 = vmatprep.mubr.f32.mxu1 %v4347_v4  ;;  %v738_v4 = vld [vmem:[#allocation3 + $0x840] sm:$0xff] }
  0xd1   :  { %3365 = vmatprep.subr.bf16.mxu0 %v3364_v14  ;;  %v3374_v47 = vpack.c.bf16 %v741_v34, %v738_v4  ;;  %v818_v4 = vld [vmem:[#allocation3 + $0xac0] sm:$0xff]  ;;  %v821_v34 = vld [vmem:[#allocation3 + $0xad8] sm:$0xff] }
  0xd2   :  { %1209 = vmatmul.mubr.f32.gmra.mrb[20].mxu0 %v4477_v22 }
  0xd3   :  { %1988 = vmatmul.mubr.f32.gmra.mrb[68].mxu1 %v4477_v22  ;;  %3367 = vmatpush1.bf16.msra.mxu0 %v3366_v23  ;;  %v3388_v23 = vpack.c.bf16 %v766_v12, %v763_v38  ;;  %v776_v38 = vld [vmem:[#allocation3 + $0x970] sm:$0xff]  ;;  %v779_v12 = vld [vmem:[#allocation3 + $0x988] sm:$0xff] }
  0xd4   :  { %1214 = vmatprep.mubr.f32.mxu0 %v4357_v17  ;;  %1992 = vmatprep.mubr.f32.mxu1 %v4357_v17  ;;  %v744_v17 = vld [vmem:[#allocation3 + $0x870] sm:$0xff] }
  0xd5   :  { %3369 = vmatprep.subr.bf16.mxu0 %v3368_v25  ;;  %v3378_v59 = vpack.c.bf16 %v747_v48, %v744_v17  ;;  %v764_v25 = vld [vmem:[#allocation3 + $0x910] sm:$0xff]  ;;  %v778_v48 = vld [vmem:[#allocation3 + $0x980] sm:$0xff] }
  0xd6   :  { %1215 = vmatmul.mubr.f32.gmra.mrb[22].mxu0 %v4486_v33  ;;  %v3582_v17 = vpack.c.bf16 %v767_v27, %v764_v25  ;;  %v787_v25 = vld [vmem:[#allocation3 + $0x9c8] sm:$0xff]  ;;  %v3590_v27 = vpack.c.bf16 %v779_v12, %v776_v38  ;;  %v802_v12 = vld [vmem:[#allocation3 + $0xa40] sm:$0xff] }
  0xd7   :  { %1993 = vmatmul.mubr.f32.gmra.mrb[70].mxu1 %v4486_v33  ;;  %3371 = vmatpush1.bf16.msra.mxu0 %v3370_v53  ;;  %v3390_v53 = vpack.c.bf16 %v765_v20, %v762_v19  ;;  %v830_v19 = vld [vmem:[#allocation3 + $0xb20] sm:$0xff]  ;;  %v833_v20 = vld [vmem:[#allocation3 + $0xb38] sm:$0xff] }
  0xd8   :  { %1220 = vmatprep.mubr.f32.mxu0 %v4367_v28  ;;  %1997 = vmatprep.mubr.f32.mxu1 %v4367_v28  ;;  %v750_v28 = vld [vmem:[#allocation3 + $0x8a0] sm:$0xff] }
  0xd9   :  { %3373 = vmatprep.subr.bf16.mxu0 %v3372_v37  ;;  %v3382_v5 = vpack.c.bf16 %v753_v60, %v750_v28  ;;  %v768_v37 = vld [vmem:[#allocation3 + $0x930] sm:$0xff]  ;;  %v827_v60 = vld [vmem:[#allocation3 + $0xb08] sm:$0xff] }
  0xda   :  { %1221 = vmatmul.mubr.f32.gmra.mrb[24].mxu0 %v4495_v46  ;;  %v3394_v28 = vpack.c.bf16 %v771_v40, %v768_v37  ;;  %v836_v40 = vld [vmem:[#allocation3 + $0xb50] sm:$0xff] }
  0xdb   :  { %1998 = vmatmul.mubr.f32.gmra.mrb[72].mxu1 %v4495_v46  ;;  %3375 = vmatpush1.bf16.msra.mxu0 %v3374_v47  ;;  %v775_v47 = vld [vmem:[#allocation3 + $0x968] sm:$0xff] }
  0xdc   :  { %1226 = vmatprep.mubr.f32.mxu0 %v4377_v45  ;;  %2002 = vmatprep.mubr.f32.mxu1 %v4377_v45  ;;  %v756_v45 = vld [vmem:[#allocation3 + $0x8d0] sm:$0xff]  ;;  %v3396_v2 = vpack.c.bf16 %v778_v48, %v775_v47  ;;  %v786_v47 = vld [vmem:[#allocation3 + $0x9c0] sm:$0xff] }
  0xdd   :  { %3377 = vmatprep.subr.bf16.mxu0 %v3376_v49  ;;  %v3386_v14 = vpack.c.bf16 %v759_v7, %v756_v45  ;;  %v3584_v49 = vpack.c.bf16 %v821_v34, %v818_v4  ;;  %v3586_v45 = vpack.c.bf16 %v773_v51, %v770_v50  ;;  %v784_v7 = vld [vmem:[#allocation3 + $0x9b0] sm:$0xff]  ;;  %v782_v4 = vld [vmem:[#allocation3 + $0x9a0] sm:$0xff]  ;;  %v785_v34 = vld [vmem:[#allocation3 + $0x9b8] sm:$0xff] }
  0xde   :  { %1227 = vmatmul.mubr.f32.gmra.mrb[26].mxu0 %v4504_v54  ;;  %v3594_v50 = vpack.c.bf16 %v785_v34, %v782_v4  ;;  %v796_v51 = vld [vmem:[#allocation3 + $0xa10] sm:$0xff] }
  0xdf   :  { %2003 = vmatmul.mubr.f32.gmra.mrb[74].mxu1 %v4504_v54  ;;  %3379 = vmatpush1.bf16.msra.mxu0 %v3378_v59  ;;  %v4541_v59 = vld [vmem:[%s5266_s0 + $0x21] sm:$0xff]  ;;  %v808_v34 = vld [vmem:[#allocation3 + $0xa70] sm:$0xff] }
  0xe0   :  { %1232 = vmatprep.mubr.f32.mxu0 %v4387_v58  ;;  %2007 = vmatprep.mubr.f32.mxu1 %v4387_v58  ;;  %v4527_v58 = vld [vmem:[%s5266_s0 + $0x112] sm:$0xff] }
  0xe1   :  { %3381 = vmatprep.subr.bf16.mxu0 %v3380_v62  ;;  %v774_v62 = vld [vmem:[#allocation3 + $0x960] sm:$0xff] }
  0xe2   :  { %1233 = vmatmul.mubr.f32.gmra.mrb[28].mxu0 %v4513_v3 }
  0xe3   :  { %2008 = vmatmul.mubr.f32.gmra.mrb[76].mxu1 %v4513_v3  ;;  %3383 = vmatpush1.bf16.msra.mxu0 %v3382_v5  ;;  %v781_v5 = vld [vmem:[#allocation3 + $0x998] sm:$0xff] }
  0xe4   :  { %1238 = vmatprep.mubr.f32.mxu0 %v4520_v0  ;;  %2012 = vmatprep.mubr.f32.mxu1 %v4520_v0  ;;  %v3400_v24 = vpack.c.bf16 %v784_v7, %v781_v5  ;;  %v792_v5 = vld [vmem:[#allocation3 + $0x9f0] sm:$0xff] }
  0xe5   :  { %3385 = vmatprep.subr.bf16.mxu0 %v3384_v10 }
  0xe6   :  { %1239 = vmatmul.mubr.f32.gmra.mrb[30].mxu0 %v4527_v58 }
  0xe7   :  { %2013 = vmatmul.mubr.f32.gmra.mrb[78].mxu1 %v4527_v58  ;;  %3387 = vmatpush1.bf16.msra.mxu0 %v3386_v14  ;;  %v3398_v14 = vpack.c.bf16 %v777_v63, %v774_v62  ;;  %v842_v63 = vld [vmem:[#allocation3 + $0xb80] sm:$0xff] }
  0xe8   :  { %1309 = vmatprep.mubr.f32.mxu0 %v4399_v32  ;;  %2082 = vmatprep.mubr.f32.mxu1 %v4399_v32  ;;  %v824_v32 = vld [vmem:[#allocation3 + $0xaf0] sm:$0xff] }
  0xe9   :  { %3389 = vmatprep.subr.bf16.mxu0 %v3388_v23  ;;  %v3588_v10 = vpack.c.bf16 %v827_v60, %v824_v32  ;;  %v780_v23 = vld [vmem:[#allocation3 + $0x990] sm:$0xff]  ;;  %v791_v60 = vld [vmem:[#allocation3 + $0x9e8] sm:$0xff] }
  0xea   :  { %1310 = vmatmul.mubr.f32.vlgmr.msra.gmra.mrb[0].mxu0 %v2676_v30  ;;  %v3402_v37 = vpack.c.bf16 %v783_v55, %v780_v23  ;;  %v788_v32 = vld [vmem:[#allocation3 + $0x9d0] sm:$0xff] }
  0xeb   :  { %2083 = vmatmul.mubr.f32.vlgmr.msra.gmra.mrb[80].mxu1 %v2676_v30  ;;  %3391 = vmatpush1.bf16.msra.mxu0 %v3390_v53  ;;  %v790_v30 = vld [vmem:[#allocation3 + $0x9e0] sm:$0xff]  ;;  %v3592_v53 = vpack.c.bf16 %v833_v20, %v830_v19  ;;  %v3598_v38 = vpack.c.bf16 %v791_v60, %v788_v32  ;;  %v797_v20 = vld [vmem:[#allocation3 + $0xa18] sm:$0xff]  ;;  %v848_v55 = vld [vmem:[#allocation3 + $0xbb0] sm:$0xff] }
  0xec   :  { %1315 = vmatprep.mubr.f32.mxu0 %v4408_v42  ;;  %2087 = vmatprep.mubr.f32.mxu1 %v4408_v42  ;;  %v4550_v42 = vld [vmem:[%s5266_s0 + $0x31] sm:$0xff]  ;;  %v3404_v48 = vpack.c.bf16 %v790_v30, %v787_v25  ;;  %v794_v19 = vld [vmem:[#allocation3 + $0xa00] sm:$0xff]  ;;  %v811_v32 = vld [vmem:[#allocation3 + $0xa88] sm:$0xff] }
  0xed   :  { %3393 = vmatprep.subr.bf16.mxu0 %v3392_v41  ;;  %3583 = vmatpush3.bf16.msra.mxu1 %v3582_v17  ;;  %v839_v41 = vld [vmem:[#allocation3 + $0xb68] sm:$0xff]  ;;  %v789_v17 = vld [vmem:[#allocation3 + $0x9d8] sm:$0xff]  ;;  %v798_v25 = vld [vmem:[#allocation3 + $0xa20] sm:$0xff]  ;;  %v3602_v4 = vpack.c.bf16 %v797_v20, %v794_v19 }
  0xee   :  { %1316 = vmatmul.mubr.f32.gmra.mrb[2].mxu0 %v4541_v59  ;;  %3585 = vmatprep.subr.bf16.mxu1 %v3584_v49  ;;  %v793_v49 = vld [vmem:[#allocation3 + $0x9f8] sm:$0xff]  ;;  %v3406_v62 = vpack.c.bf16 %v789_v17, %v786_v47  ;;  %v854_v17 = vld [vmem:[#allocation3 + $0xbe0] sm:$0xff] }
  0xef   :  { %2088 = vmatmul.mubr.f32.gmra.mrb[82].mxu1 %v4541_v59  ;;  %3395 = vmatpush1.bf16.msra.mxu0 %v3394_v28  ;;  %v3596_v28 = vpack.c.bf16 %v839_v41, %v836_v40  ;;  %v3408_v7 = vpack.c.bf16 %v796_v51, %v793_v49  ;;  %v800_v40 = vld [vmem:[#allocation3 + $0xa30] sm:$0xff]  ;;  %v803_v41 = vld [vmem:[#allocation3 + $0xa48] sm:$0xff]  ;;  %v817_v20 = vld [vmem:[#allocation3 + $0xab8] sm:$0xff] }
  0xf0   :  { %1321 = vmatprep.mubr.f32.mxu0 %v4417_v61  ;;  %2092 = vmatprep.mubr.f32.mxu1 %v4417_v61  ;;  %v4559_v61 = vld [vmem:[%s5266_s0 + $0x41] sm:$0xff]  ;;  %v804_v49 = vld [vmem:[#allocation3 + $0xa50] sm:$0xff]  ;;  %v3606_v60 = vpack.c.bf16 %v803_v41, %v800_v40  ;;  %v825_v41 = vld [vmem:[#allocation3 + $0xaf8] sm:$0xff] }
  0xf1   :  { %3397 = vmatprep.subr.bf16.mxu0 %v3396_v2  ;;  %3587 = vmatpush3.bf16.msra.mxu1 %v3586_v45  ;;  %v845_v2 = vld [vmem:[#allocation3 + $0xb98] sm:$0xff]  ;;  %v795_v45 = vld [vmem:[#allocation3 + $0xa08] sm:$0xff] }
  0xf2   :  { %1322 = vmatmul.mubr.f32.gmra.mrb[4].mxu0 %v4550_v42  ;;  %3589 = vmatprep.subr.bf16.mxu1 %v3588_v10  ;;  %v799_v10 = vld [vmem:[#allocation3 + $0xa28] sm:$0xff]  ;;  %v3410_v23 = vpack.c.bf16 %v795_v45, %v792_v5  ;;  %v809_v5 = vld [vmem:[#allocation3 + $0xa78] sm:$0xff] }
  0xf3   :  { %2093 = vmatmul.mubr.f32.gmra.mrb[84].mxu1 %v4550_v42  ;;  %3399 = vmatpush1.bf16.msra.mxu0 %v3398_v14  ;;  %v3600_v14 = vpack.c.bf16 %v845_v2, %v842_v63  ;;  %v3412_v30 = vpack.c.bf16 %v802_v12, %v799_v10  ;;  %v4593_v51 = vld [vmem:[%s5266_s0 + $0x82] sm:$0xff]  ;;  %v813_v12 = vld [vmem:[#allocation3 + $0xa98] sm:$0xff] }
  0xf4   :  { %1327 = vmatprep.mubr.f32.mxu0 %v4426_v16  ;;  %2097 = vmatprep.mubr.f32.mxu1 %v4426_v16  ;;  %v4568_v16 = vld [vmem:[%s5266_s0 + $0x51] sm:$0xff]  ;;  %v806_v2 = vld [vmem:[#allocation3 + $0xa60] sm:$0xff]  ;;  %v863_v10 = vld [vmem:[#allocation3 + $0xc28] sm:$0xff] }
  0xf5   :  { %3401 = vmatprep.subr.bf16.mxu0 %v3400_v24  ;;  %3591 = vmatpush3.bf16.msra.mxu1 %v3590_v27  ;;  %v851_v24 = vld [vmem:[#allocation3 + $0xbc8] sm:$0xff]  ;;  %v801_v27 = vld [vmem:[#allocation3 + $0xa38] sm:$0xff]  ;;  %v3610_v19 = vpack.c.bf16 %v809_v5, %v806_v2 }
  0xf6   :  { %1328 = vmatmul.mubr.f32.gmra.mrb[6].mxu0 %v4559_v61  ;;  %3593 = vmatprep.subr.bf16.mxu1 %v3592_v53  ;;  %v805_v53 = vld [vmem:[#allocation3 + $0xa58] sm:$0xff]  ;;  %v3414_v47 = vpack.c.bf16 %v801_v27, %v798_v25  ;;  %v816_v27 = vld [vmem:[#allocation3 + $0xab0] sm:$0xff] }
  0xf7   :  { %2098 = vmatmul.mubr.f32.gmra.mrb[86].mxu1 %v4559_v61  ;;  %3403 = vmatpush1.bf16.msra.mxu0 %v3402_v37  ;;  %v3604_v37 = vpack.c.bf16 %v851_v24, %v848_v55  ;;  %v2684_v24 = vld [vmem:[%s5266_s0 + $0xb1] sm:$0xff] }
  0xf8   :  { %1333 = vmatprep.mubr.f32.mxu0 %v4435_v36  ;;  %2102 = vmatprep.mubr.f32.mxu1 %v4435_v36  ;;  %v4577_v36 = vld [vmem:[%s5266_s0 + $0x61] sm:$0xff]  ;;  %v837_v5 = vld [vmem:[#allocation3 + $0xb58] sm:$0xff] }
  0xf9   :  { %3405 = vmatprep.subr.bf16.mxu0 %v3404_v48  ;;  %3595 = vmatpush3.bf16.msra.mxu1 %v3594_v50  ;;  %v857_v48 = vld [vmem:[#allocation3 + $0xbf8] sm:$0xff]  ;;  %v807_v50 = vld [vmem:[#allocation3 + $0xa68] sm:$0xff] }
  0xfa   :  { %1334 = vmatmul.mubr.f32.gmra.mrb[8].mxu0 %v4568_v16  ;;  %3597 = vmatprep.subr.bf16.mxu1 %v3596_v28  ;;  %v3416_v28 = vpack.c.bf16 %v808_v34, %v805_v53  ;;  %v3608_v63 = vpack.c.bf16 %v857_v48, %v854_v17  ;;  %v3418_v45 = vpack.c.bf16 %v807_v50, %v804_v49  ;;  %v826_v34 = vld [vmem:[#allocation3 + $0xb00] sm:$0xff]  ;;  %v829_v17 = vld [vmem:[#allocation3 + $0xb18] sm:$0xff]  ;;  %v832_v48 = vld [vmem:[#allocation3 + $0xb30] sm:$0xff] }
  0xfb   :  { %2103 = vmatmul.mubr.f32.gmra.mrb[88].mxu1 %v4568_v16  ;;  %3407 = vmatpush1.bf16.msra.mxu0 %v3406_v62  ;;  %v814_v62 = vld [vmem:[#allocation3 + $0xaa0] sm:$0xff]  ;;  %v4626_v49 = vld [vmem:[%s5266_s0 + $0xd1] sm:$0xff] }
  0xfc   :  { %1339 = vmatprep.mubr.f32.mxu0 %v4444_v56  ;;  %2107 = vmatprep.mubr.f32.mxu1 %v4444_v56  ;;  %v4586_v56 = vld [vmem:[%s5266_s0 + $0x71] sm:$0xff] }
  0xfd   :  { %3409 = vmatprep.subr.bf16.mxu0 %v3408_v7  ;;  %3599 = vmatpush3.bf16.msra.mxu1 %v3598_v38  ;;  %v860_v7 = vld [vmem:[#allocation3 + $0xc10] sm:$0xff]  ;;  %v810_v38 = vld [vmem:[#allocation3 + $0xa80] sm:$0xff] }
  0xfe   :  { %1340 = vmatmul.mubr.f32.gmra.mrb[10].mxu0 %v4577_v36  ;;  %3601 = vmatprep.subr.bf16.mxu1 %v3600_v14  ;;  %v3420_v14 = vpack.c.bf16 %v814_v62, %v811_v32  ;;  %v4605_v55 = vpack.c.bf16 %v863_v10, %v860_v7  ;;  %v3422_v25 = vpack.c.bf16 %v813_v12, %v810_v38  ;;  %v838_v62 = vld [vmem:[#allocation3 + $0xb60] sm:$0xff]  ;;  %v841_v7 = vld [vmem:[#allocation3 + $0xb78] sm:$0xff]  ;;  %v844_v10 = vld [vmem:[#allocation3 + $0xb90] sm:$0xff] }
  0xff   :  { %2108 = vmatmul.mubr.f32.gmra.mrb[90].mxu1 %v4577_v36  ;;  %3411 = vmatpush1.bf16.msra.mxu0 %v3410_v23  ;;  %v820_v23 = vld [vmem:[#allocation3 + $0xad0] sm:$0xff]  ;;  %v3432_v32 = vpack.c.bf16 %v832_v48, %v829_v17  ;;  %v2707_v17 = vld [vmem:[%s5266_s0 + $0x122] sm:$0xff] }
 0x100   :  { %1345 = vmatprep.mubr.f32.mxu0 %v4456_v11  ;;  %2112 = vmatprep.mubr.f32.mxu1 %v4456_v11  ;;  %v4600_v11 = vld [vmem:[%s5266_s0 + $0x81] sm:$0xff]  ;;  %v3424_v53 = vpack.c.bf16 %v820_v23, %v817_v20  ;;  %v4644_v38 = vld [vmem:[%s5266_s0 + $0xf1] sm:$0xff] }
 0x101   :  { %3413 = vmatprep.subr.bf16.mxu0 %v3412_v30  ;;  %3603 = vmatpush3.bf16.msra.mxu1 %v3602_v4  ;;  %v819_v30 = vld [vmem:[#allocation3 + $0xac8] sm:$0xff]  ;;  %v850_v23 = vld [vmem:[#allocation3 + $0xbc0] sm:$0xff] }
 0x102   :  { %1346 = vmatmul.mubr.f32.gmra.mrb[12].mxu0 %v4586_v56  ;;  %3605 = vmatprep.subr.bf16.mxu1 %v3604_v37  ;;  %v823_v4 = vld [vmem:[#allocation3 + $0xae8] sm:$0xff]  ;;  %v3426_v40 = vpack.c.bf16 %v819_v30, %v816_v27  ;;  %v849_v27 = vld [vmem:[#allocation3 + $0xbb8] sm:$0xff] }
 0x103   :  { %2113 = vmatmul.mubr.f32.gmra.mrb[92].mxu1 %v4586_v56  ;;  %3415 = vmatpush1.bf16.msra.mxu0 %v3414_v47  ;;  %v4617_v37 = vld [vmem:[%s5266_s0 + $0xc1] sm:$0xff]  ;;  %v3428_v47 = vpack.c.bf16 %v826_v34, %v823_v4  ;;  %v856_v4 = vld [vmem:[#allocation3 + $0xbf0] sm:$0xff] }
 0x104   :  { %1351 = vmatprep.mubr.f32.mxu0 %v4593_v51  ;;  %2117 = vmatprep.mubr.f32.mxu1 %v4593_v51  ;;  %v847_v20 = vld [vmem:[#allocation3 + $0xba8] sm:$0xff] }
 0x105   :  { %3417 = vmatprep.subr.bf16.mxu0 %v3416_v28  ;;  %3607 = vmatpush3.bf16.msra.mxu1 %v3606_v60  ;;  %v831_v28 = vld [vmem:[#allocation3 + $0xb28] sm:$0xff]  ;;  %v3444_v30 = vpack.c.bf16 %v850_v23, %v847_v20  ;;  %v2711_v20 = vld [vmem:[%s5266_s0 + $0x50] sm:$0xff] }
 0x106   :  { %1352 = vmatmul.mubr.f32.gmra.mrb[14].mxu0 %v4600_v11  ;;  %3609 = vmatprep.subr.bf16.mxu1 %v3608_v63  ;;  %v835_v60 = vld [vmem:[#allocation3 + $0xb48] sm:$0xff] }
 0x107   :  { %2118 = vmatmul.mubr.f32.gmra.mrb[94].mxu1 %v4600_v11  ;;  %3419 = vmatpush1.bf16.msra.mxu0 %v3418_v45  ;;  %v4635_v63 = vld [vmem:[%s5266_s0 + $0xe1] sm:$0xff]  ;;  %v3436_v45 = vpack.c.bf16 %v838_v62, %v835_v60 }
 0x108   :  { %1357 = vmatprep.mubr.f32.mxu0 %v4468_v9  ;;  %2122 = vmatprep.mubr.f32.mxu1 %v4468_v9  ;;  %v822_v9 = vld [vmem:[#allocation3 + $0xae0] sm:$0xff] }
 0x109   :  { %3421 = vmatprep.subr.bf16.mxu0 %v3420_v14  ;;  %3611 = vmatpush3.bf16.msra.mxu1 %v3610_v19  ;;  %v3430_v50 = vpack.c.bf16 %v825_v41, %v822_v9  ;;  %v843_v14 = vld [vmem:[#allocation3 + $0xb88] sm:$0xff]  ;;  %v3440_v19 = vpack.c.bf16 %v844_v10, %v841_v7  ;;  %v852_v41 = vld [vmem:[#allocation3 + $0xbd0] sm:$0xff]  ;;  %v2708_v60 = vld [vmem:[%s5266_s0 + $0x20] sm:$0xff] }
 0x10a   :  { %1358 = vmatmul.mubr.f32.gmra.mrb[16].mxu0 %v2684_v24  ;;  %3613 = vmatprep.subr.bf16.mxu1 %v4605_v55  ;;  %v2709_v7 = vld [vmem:[%s5266_s0 + $0x30] sm:$0xff] }
 0x10b   :  { %2123 = vmatmul.mubr.f32.gmra.mrb[96].mxu1 %v2684_v24  ;;  %3423 = vmatpush1.bf16.msra.mxu0 %v3422_v25  ;;  %v4653_v24 = vld [vmem:[%s5266_s0 + $0x101] sm:$0xff] }
 0x10c   :  { %1363 = vmatprep.mubr.f32.mxu0 %v4477_v22  ;;  %2127 = vmatprep.mubr.f32.mxu1 %v4477_v22  ;;  %v828_v22 = vld [vmem:[#allocation3 + $0xb10] sm:$0xff] }
 0x10d   :  { %3425 = vmatprep.subr.bf16.mxu0 %v3424_v53  ;;  %v3434_v2 = vpack.c.bf16 %v831_v28, %v828_v22  ;;  %v853_v53 = vld [vmem:[#allocation3 + $0xbd8] sm:$0xff]  ;;  %v4680_v22 = vld [vmem:[%s5266_s0 + $0x121] sm:$0xff] }
 0x10e   :  { %1364 = vmatmul.mubr.f32.gmra.mrb[18].mxu0 %v4617_v37  ;;  %v3448_v48 = vpack.c.bf16 %v856_v4, %v853_v53  ;;  %v2713_v53 = vld [vmem:[%s5266_s0 + $0x70] sm:$0xff] }
 0x10f   :  { %2128 = vmatmul.mubr.f32.gmra.mrb[98].mxu1 %v4617_v37  ;;  %3427 = vmatpush1.bf16.msra.mxu0 %v3426_v40  ;;  %v4664_v40 = vld [vmem:[%s5266_s0 + $0x111] sm:$0xff] }
 0x110   :  { %1369 = vmatprep.mubr.f32.mxu0 %v4486_v33  ;;  %2132 = vmatprep.mubr.f32.mxu1 %v4486_v33  ;;  %v834_v33 = vld [vmem:[#allocation3 + $0xb40] sm:$0xff] }
 0x111   :  { %3429 = vmatprep.subr.bf16.mxu0 %v3428_v47  ;;  %v3438_v12 = vpack.c.bf16 %v837_v5, %v834_v33  ;;  %v855_v47 = vld [vmem:[#allocation3 + $0xbe8] sm:$0xff]  ;;  %v869_v33 = vld [vmem:[#allocation3 + $0xc58] sm:$0xff] }
 0x112   :  { %1370 = vmatmul.mubr.f32.gmra.mrb[20].mxu0 %v4626_v49 }
 0x113   :  { %2133 = vmatmul.mubr.f32.gmra.mrb[100].mxu1 %v4626_v49  ;;  %3431 = vmatpush1.bf16.msra.mxu0 %v3430_v50 }
 0x114   :  { %1375 = vmatprep.mubr.f32.mxu0 %v4495_v46  ;;  %2137 = vmatprep.mubr.f32.mxu1 %v4495_v46  ;;  %v840_v46 = vld [vmem:[#allocation3 + $0xb70] sm:$0xff] }
 0x115   :  { %3433 = vmatprep.subr.bf16.mxu0 %v3432_v32  ;;  %v3442_v25 = vpack.c.bf16 %v843_v14, %v840_v46  ;;  %v875_v46 = vld [vmem:[#allocation3 + $0xc88] sm:$0xff] }
 0x116   :  { %1376 = vmatmul.mubr.f32.gmra.mrb[22].mxu0 %v4635_v63 }
 0x117   :  { %2138 = vmatmul.mubr.f32.gmra.mrb[102].mxu1 %v4635_v63  ;;  %3435 = vmatpush1.bf16.msra.mxu0 %v3434_v2  ;;  %v866_v2 = vld [vmem:[#allocation3 + $0xc40] sm:$0xff] }
 0x118   :  { %1381 = vmatprep.mubr.f32.mxu0 %v4504_v54  ;;  %2142 = vmatprep.mubr.f32.mxu1 %v4504_v54  ;;  %v846_v54 = vld [vmem:[#allocation3 + $0xba0] sm:$0xff] }
 0x119   :  { %3437 = vmatprep.subr.bf16.mxu0 %v3436_v45  ;;  %v3446_v9 = vpack.c.bf16 %v849_v27, %v846_v54  ;;  %v3616_v45 = vpack.c.bf16 %v869_v33, %v866_v2  ;;  %v2712_v54 = vld [vmem:[%s5266_s0 + $0x60] sm:$0xff] }
 0x11a   :  { %1382 = vmatmul.mubr.f32.gmra.mrb[24].mxu0 %v4644_v38  ;;  %v2716_v2 = vld [vmem:[%s5266_s0 + $0xc0] sm:$0xff] }
 0x11b   :  { %2143 = vmatmul.mubr.f32.gmra.mrb[104].mxu1 %v4644_v38  ;;  %3439 = vmatpush1.bf16.msra.mxu0 %v3438_v12  ;;  %v872_v12 = vld [vmem:[#allocation3 + $0xc70] sm:$0xff] }
 0x11c   :  { %1387 = vmatprep.mubr.f32.mxu0 %v4513_v3  ;;  %2147 = vmatprep.mubr.f32.mxu1 %v4513_v3 }
 0x11d   :  { %3441 = vmatprep.subr.bf16.mxu0 %v3440_v19  ;;  %v878_v19 = vld [vmem:[#allocation3 + $0xca0] sm:$0xff] }
 0x11e   :  { %1388 = vmatmul.mubr.f32.gmra.mrb[26].mxu0 %v4653_v24  ;;  %v4658_v34 = vpop.f32.mrb[0].mxu1 }
 0x11f   :  { %2148 = vmatmul.mubr.f32.gmra.mrb[106].mxu1 %v4653_v24  ;;  %3443 = vmatpush1.bf16.msra.mxu0 %v3442_v25  ;;  %v4666_v3 = vpop.f32.mrb[1].mxu1  ;;  %v887_v25 = vld [vmem:[#allocation3 + $0xce8] sm:$0xff] }
 0x120   :  { %1393 = vmatprep.mubr.f32.mxu0 %v4527_v58  ;;  %2152 = vmatprep.mubr.f32.mxu1 %v4527_v58  ;;  %v3450_v58 = vpack.c.bf16 %v855_v47, %v852_v41  ;;  %v2714_v41 = vld [vmem:[%s5266_s0 + $0x80] sm:$0xff] }
 0x121   :  { %3445 = vmatprep.subr.bf16.mxu0 %v3444_v30  ;;  %v893_v30 = vld [vmem:[#allocation3 + $0xd18] sm:$0xff] }
 0x122   :  { %1394 = vmatmul.mubr.f32.gmra.mrb[28].mxu0 %v4664_v40  ;;  %v4674_v50 = vpop.f32.mrb[2].mxu1 }
 0x123   :  { %2153 = vmatmul.mubr.f32.gmra.mrb[108].mxu1 %v4664_v40  ;;  %3447 = vmatpush1.bf16.msra.mxu0 %v3446_v9  ;;  %v4682_v28 = vpop.f32.mrb[3].mxu1  ;;  %v899_v9 = vld [vmem:[#allocation3 + $0xd48] sm:$0xff] }
 0x124   :  { %1399 = vmatprep.mubr.f32.mxu0 %v2707_v17  ;;  %2157 = vmatprep.mubr.f32.mxu1 %v2707_v17  ;;  %v902_v17 = vld [vmem:[#allocation3 + $0xd60] sm:$0xff] }
 0x125   :  { %3449 = vmatprep.subr.bf16.mxu0 %v3448_v48  ;;  %v905_v48 = vld [vmem:[#allocation3 + $0xd78] sm:$0xff] }
 0x126   :  { %1400 = vmatmul.mubr.f32.gmra.mrb[30].mxu0 %v4680_v22  ;;  %v4685_v32 = vpop.f32.mrb[4].mxu1 }
 0x127   :  { %2158 = vmatmul.mubr.f32.gmra.mrb[110].mxu1 %v4680_v22  ;;  %3451 = vmatpush1.bf16.msra.mxu0 %v3450_v58  ;;  %v4691_v62 = vpop.f32.mrb[5].mxu1  ;;  %v3640_v58 = vpack.c.bf16 %v905_v48, %v902_v17  ;;  %v2742_v17 = vld [vmem:[%s5266_s0 + $0x42] sm:$0xff] }
 0x128   :  { %1470 = vmatprep.mubr.f32.mxu0 %v4541_v59  ;;  %2227 = vmatprep.mubr.f32.mxu1 %v4541_v59  ;;  %v2710_v59 = vld [vmem:[%s5266_s0 + $0x40] sm:$0xff] }
 0x129   :  { %3453 = vmatprep.subr.bf16.mxu0 %v4156_v8 }
 0x12a   :  { %1471 = vmatmul.mubr.f32.vlgmr.msra.gmra.mrb[0].mxu0 %v2708_v60  ;;  %v4696_v5 = vpop.f32.mrb[6].mxu1 }
 0x12b   :  { %2228 = vmatmul.mubr.f32.vlgmr.msra.gmra.mrb[112].mxu1 %v2708_v60  ;;  %3455 = vmatpush1.bf16.msra.mxu0 %v4158_v13  ;;  %v4702_v10 = vpop.f32.mrb[7].mxu1  ;;  %v3620_v13 = vpack.c.bf16 %v875_v46, %v872_v12 }
 0x12c   :  { %1476 = vmatprep.mubr.f32.mxu0 %v4550_v42  ;;  %2232 = vmatprep.mubr.f32.mxu1 %v4550_v42  ;;  %v881_v42 = vld [vmem:[#allocation3 + $0xcb8] sm:$0xff] }
 0x12d   :  { %3457 = vmatprep.subr.bf16.mxu0 %v4161_v18  ;;  %3615 = vmatpush3.bf16.msra.mxu1 %v4605_v55  ;;  %v3624_v55 = vpack.c.bf16 %v881_v42, %v878_v19 }
 0x12e   :  { %1477 = vmatmul.mubr.f32.gmra.mrb[2].mxu0 %v2709_v7  ;;  %v4708_v8 = vpop.f32.mrb[8].mxu1  ;;  %3617 = vmatprep.subr.bf16.mxu1 %v3616_v45 }
 0x12f   :  { %2233 = vmatmul.mubr.f32.gmra.mrb[114].mxu1 %v2709_v7  ;;  %1482 = vmatprep.mubr.f32.mxu0 %v4559_v61  ;;  %v4714_v14 = vpop.f32.mrb[9].mxu1 }
 0x130   :  { %2237 = vmatprep.mubr.f32.mxu1 %v4559_v61  ;;  %3459 = vmatpush1.bf16.msra.mxu0 %v4165_v26  ;;  %v884_v61 = vld [vmem:[#allocation3 + $0xcd0] sm:$0xff] }
 0x131   :  { %3461 = vmatprep.subr.bf16.mxu0 %v4167_v31  ;;  %3619 = vmatpush3.bf16.msra.mxu1 %v3616_v45  ;;  %v3628_v31 = vpack.c.bf16 %v887_v25, %v884_v61 }
 0x132   :  { %1483 = vmatmul.mubr.f32.gmra.mrb[4].mxu0 %v2710_v59  ;;  %v4719_v18 = vpop.f32.mrb[10].mxu1  ;;  %3621 = vmatprep.subr.bf16.mxu1 %v3620_v13 }
 0x133   :  { %2238 = vmatmul.mubr.f32.gmra.mrb[116].mxu1 %v2710_v59  ;;  %1488 = vmatprep.mubr.f32.mxu0 %v4568_v16  ;;  %v4725_v23 = vpop.f32.mrb[11].mxu1 }
 0x134   :  { %2242 = vmatprep.mubr.f32.mxu1 %v4568_v16  ;;  %3463 = vmatpush1.bf16.msra.mxu0 %v4170_v39  ;;  %v890_v16 = vld [vmem:[#allocation3 + $0xd00] sm:$0xff] }
 0x135   :  { %3465 = vmatprep.subr.bf16.mxu0 %v4173_v44  ;;  %3623 = vmatpush3.bf16.msra.mxu1 %v3620_v13  ;;  %v3632_v44 = vpack.c.bf16 %v893_v30, %v890_v16  ;;  %v2739_v30 = vld [vmem:[%s5266_s0 + $0x131] sm:$0xff] }
 0x136   :  { %1489 = vmatmul.mubr.f32.gmra.mrb[6].mxu0 %v2711_v20  ;;  %v4730_v26 = vpop.f32.mrb[12].mxu1  ;;  %3625 = vmatprep.subr.bf16.mxu1 %v3624_v55 }
 0x137   :  { %2243 = vmatmul.mubr.f32.gmra.mrb[118].mxu1 %v2711_v20  ;;  %1494 = vmatprep.mubr.f32.mxu0 %v4577_v36  ;;  %v4736_v27 = vpop.f32.mrb[13].mxu1 }
 0x138   :  { %2247 = vmatprep.mubr.f32.mxu1 %v4577_v36  ;;  %3467 = vmatpush1.bf16.msra.mxu0 %v4176_v52  ;;  %v896_v36 = vld [vmem:[#allocation3 + $0xd30] sm:$0xff] }
 0x139   :  { %3469 = vmatprep.subr.bf16.mxu0 %v4179_v57  ;;  %3627 = vmatpush3.bf16.msra.mxu1 %v3624_v55  ;;  %v3636_v57 = vpack.c.bf16 %v899_v9, %v896_v36 }
 0x13a   :  { %1495 = vmatmul.mubr.f32.gmra.mrb[8].mxu0 %v2712_v54  ;;  %v4741_v39 = vpop.f32.mrb[14].mxu1  ;;  %3629 = vmatprep.subr.bf16.mxu1 %v3628_v31 }
 0x13b   :  { %2248 = vmatmul.mubr.f32.gmra.mrb[120].mxu1 %v2712_v54  ;;  %1500 = vmatprep.mubr.f32.mxu0 %v4586_v56  ;;  %v4747_v4 = vpop.f32.mrb[15].mxu1 }
 0x13c   :  { %2252 = vmatprep.mubr.f32.mxu1 %v4586_v56  ;;  %3471 = vmatpush1.bf16.msra.mxu0 %v4182_v1  ;;  %v2731_v1 = vld [vmem:[%s5266_s0 + $0x91] sm:$0xff] }
 0x13d   :  { %3473 = vmatprep.subr.bf16.mxu0 %v4185_v6  ;;  %3631 = vmatpush3.bf16.msra.mxu1 %v3628_v31 }
 0x13e   :  { %1501 = vmatmul.mubr.f32.gmra.mrb[10].mxu0 %v2713_v53  ;;  %v2820_v52 = vpop.f32.mrb[16].mxu1  ;;  %3633 = vmatprep.subr.bf16.mxu1 %v3632_v44 }
 0x13f   :  { %2253 = vmatmul.mubr.f32.gmra.mrb[122].mxu1 %v2713_v53  ;;  %1506 = vmatprep.mubr.f32.mxu0 %v4600_v11  ;;  %v2821_v47 = vpop.f32.mrb[17].mxu1 }
 0x140   :  { %2257 = vmatprep.mubr.f32.mxu1 %v4600_v11  ;;  %3475 = vmatpush1.bf16.msra.mxu0 %v4188_v15  ;;  %v4761_v6 = vadd.f32 %v2821_v47, %v2820_v52  ;;  %v2715_v11 = vld [vmem:[%s5266_s0 + $0x90] sm:$0xff] }
 0x141   :  { %3477 = vmatprep.subr.bf16.mxu0 %v4191_v21  ;;  %3635 = vmatpush3.bf16.msra.mxu1 %v3632_v44 }
 0x142   :  { %1507 = vmatmul.mubr.f32.gmra.mrb[12].mxu0 %v2714_v41  ;;  %v2823_v56 = vpop.f32.mrb[18].mxu1  ;;  %3637 = vmatprep.subr.bf16.mxu1 %v3636_v57 }
 0x143   :  { %2258 = vmatmul.mubr.f32.gmra.mrb[124].mxu1 %v2714_v41  ;;  %1512 = vmatprep.mubr.f32.mxu0 %v2731_v1  ;;  %v2824_v60 = vpop.f32.mrb[19].mxu1  ;;  %v2741_v41 = vld [vmem:[%s5266_s0 + $0x32] sm:$0xff] }
 0x144   :  { %2262 = vmatprep.mubr.f32.mxu1 %v2731_v1  ;;  %3479 = vmatpush1.bf16.msra.mxu0 %v4194_v29  ;;  %v4768_v15 = vadd.f32 %v2824_v60, %v2823_v56  ;;  %v2743_v56 = vld [vmem:[%s5266_s0 + $0x52] sm:$0xff] }
 0x145   :  { %3481 = vmatprep.subr.bf16.mxu0 %v4197_v35  ;;  %3639 = vmatpush3.bf16.msra.mxu1 %v3636_v57  ;;  %v2717_v35 = vld [vmem:[%s5266_s0 + $0xd0] sm:$0xff] }
 0x146   :  { %1513 = vmatmul.mubr.f32.gmra.mrb[14].mxu0 %v2715_v11  ;;  %v2826_v21 = vpop.f32.mrb[20].mxu1  ;;  %3641 = vmatprep.subr.bf16.mxu1 %v3640_v58 }
 0x147   :  { %2263 = vmatmul.mubr.f32.gmra.mrb[126].mxu1 %v2715_v11  ;;  %1518 = vmatprep.mubr.f32.mxu0 %v4617_v37  ;;  %v2827_v33 = vpop.f32.mrb[21].mxu1  ;;  %v2744_v11 = vld [vmem:[%s5266_s0 + $0x62] sm:$0xff] }
 0x148   :  { %2267 = vmatprep.mubr.f32.mxu1 %v4617_v37  ;;  %v4776_v45 = vadd.f32 %v2827_v33, %v2826_v21  ;;  %3483 = vmatpush1.bf16.msra.mxu0 %v4200_v43  ;;  %v2718_v43 = vld [vmem:[%s5266_s0 + $0xe0] sm:$0xff]  ;;  %v2745_v33 = vld [vmem:[%s5266_s0 + $0x72] sm:$0xff] }
 0x149   :  { %3643 = vmatpush3.bf16.msra.mxu1 %v3640_v58 }
 0x14a   :  { %1519 = vmatmul.mubr.f32.gmra.mrb[16].mxu0 %v2716_v2  ;;  %v2829_v29 = vpop.f32.mrb[22].mxu1 }
 0x14b   :  { %2268 = vmatmul.mubr.f32.gmra.mrb[128].mxu1 %v2716_v2  ;;  %1524 = vmatprep.mubr.f32.mxu0 %v4626_v49  ;;  %v2830_v7 = vpop.f32.mrb[23].mxu1  ;;  %v908_v2 = vlaneseq }
 0x14c   :  { %2272 = vmatprep.mubr.f32.mxu1 %v4626_v49  ;;  %v4784_v12 = vadd.f32 %v2830_v7, %v2829_v29  ;;  %v2719_v49 = vld [vmem:[%s5266_s0 + $0xf0] sm:$0xff] }
 0x14e   :  { %1525 = vmatmul.mubr.f32.gmra.mrb[18].mxu0 %v2717_v35  ;;  %v2832_v37 = vpop.f32.mrb[24].mxu1 }
 0x14f   :  { %2273 = vmatmul.mubr.f32.gmra.mrb[130].mxu1 %v2717_v35  ;;  %1530 = vmatprep.mubr.f32.mxu0 %v4635_v63  ;;  %v2833_v46 = vpop.f32.mrb[25].mxu1 }
 0x150   :  { %2277 = vmatprep.mubr.f32.mxu1 %v4635_v63  ;;  %v4791_v13 = vadd.f32 %v2833_v46, %v2832_v37  ;;  %v2720_v63 = vld [vmem:[%s5266_s0 + $0x100] sm:$0xff]  ;;  %v4861_v37 = vshrl.u32 %v908_v2, 7  ;;  %v3897_v2 = vld [vmem:[%s5266_s0 + $0x132] sm:$0xff] }
 0x152   :  { %1531 = vmatmul.mubr.f32.gmra.mrb[20].mxu0 %v2718_v43  ;;  %v2835_v59 = vpop.f32.mrb[26].mxu1 }
 0x153   :  { %2278 = vmatmul.mubr.f32.gmra.mrb[132].mxu1 %v2718_v43  ;;  %1536 = vmatprep.mubr.f32.mxu0 %v4644_v38  ;;  %v2836_v19 = vpop.f32.mrb[27].mxu1  ;;  %v2747_v43 = vld [vmem:[%s5266_s0 + $0x92] sm:$0xff] }
 0x154   :  { %2282 = vmatprep.mubr.f32.mxu1 %v4644_v38  ;;  %v4798_v42 = vadd.f32 %v2836_v19, %v2835_v59  ;;  %v2721_v38 = vld [vmem:[%s5266_s0 + $0x110] sm:$0xff]  ;;  %v918_v19 = vsub.s32 2, %v4861_v37 }
 0x156   :  { %1537 = vmatmul.mubr.f32.gmra.mrb[22].mxu0 %v2719_v49  ;;  %v2838_v55 = vpop.f32.mrb[28].mxu1 }
 0x157   :  { %2283 = vmatmul.mubr.f32.gmra.mrb[134].mxu1 %v2719_v49  ;;  %1542 = vmatprep.mubr.f32.mxu0 %v4653_v24  ;;  %v2839_v20 = vpop.f32.mrb[29].mxu1 }
 0x158   :  { %2287 = vmatprep.mubr.f32.mxu1 %v4653_v24  ;;  %v4805_v61 = vadd.f32 %v2839_v20, %v2838_v55  ;;  %v3890_v55 = vld [vmem:[%s5266_s0 + $0xc2] sm:$0xff] }
 0x159   :  { %v4876_v20 = vld [vmem:[#allocation5] sm:$0x7] }
 0x15a   :  { %1543 = vmatmul.mubr.f32.gmra.mrb[24].mxu0 %v2720_v63  ;;  %v2841_v25 = vpop.f32.mrb[30].mxu1 }
 0x15b   :  { %2288 = vmatmul.mubr.f32.gmra.mrb[136].mxu1 %v2720_v63  ;;  %1548 = vmatprep.mubr.f32.mxu0 %v4664_v40  ;;  %v2842_v31 = vpop.f32.mrb[31].mxu1 }
 0x15c   :  { %2292 = vmatprep.mubr.f32.mxu1 %v4664_v40  ;;  %v4812_v54 = vadd.f32 %v2842_v31, %v2841_v25  ;;  %v2723_v40 = vld [vmem:[%s5266_s0 + $0x130] sm:$0xff] }
 0x15e   :  { %1549 = vmatmul.mubr.f32.gmra.mrb[26].mxu0 %v2721_v38  ;;  %v2844_v16 = vpop.f32.mrb[32].mxu1 }
 0x15f   :  { %2293 = vmatmul.mubr.f32.gmra.mrb[138].mxu1 %v2721_v38  ;;  %1554 = vmatprep.mubr.f32.mxu0 %v4680_v22  ;;  %v2845_v24 = vpop.f32.mrb[33].mxu1  ;;  %v3891_v38 = vld [vmem:[%s5266_s0 + $0xd2] sm:$0xff] }
 0x160   :  { %2297 = vmatprep.mubr.f32.mxu1 %v4680_v22  ;;  %v4819_v44 = vadd.f32 %v2845_v24, %v2844_v16  ;;  %v2740_v22 = vld [vmem:[%s5266_s0 + $0x22] sm:$0xff]  ;;  %v4883_v16 = vrot.slane %v4876_v20, %v918_v19 }
 0x162   :  { %1555 = vmatmul.mubr.f32.gmra.mrb[28].mxu0 %v4520_v0  ;;  %v2847_v53 = vpop.f32.mrb[34].mxu1 }
 0x163   :  { %2298 = vmatmul.mubr.f32.gmra.mrb[140].mxu1 %v4520_v0  ;;  %1560 = vmatprep.mubr.f32.mxu0 %v2739_v30  ;;  %v2848_v36 = vpop.f32.mrb[35].mxu1  ;;  %v4834_v0 = vld [vmem:[%s5269_s3] sm:$0xff] }
 0x164   :  { %2302 = vmatprep.mubr.f32.mxu1 %v2739_v30  ;;  %v4826_v9 = vadd.f32 %v2848_v36, %v2847_v53  ;;  %v3892_v30 = vld [vmem:[%s5266_s0 + $0xe2] sm:$0xff]  ;;  %v3893_v36 = vld [vmem:[%s5266_s0 + $0xf2] sm:$0xff] }
 0x166   :  { %1561 = vmatmul.mubr.f32.gmra.mrb[30].mxu0 %v2723_v40  ;;  %v2850_v52 = vpop.f32.mrb[36].mxu1 }
 0x167   :  { %2303 = vmatmul.mubr.f32.gmra.mrb[142].mxu1 %v2723_v40  ;;  %1631 = vmatprep.mubr.f32.mxu0 %v4834_v0  ;;  %v2851_v57 = vpop.f32.mrb[37].mxu1 }
 0x168   :  { %3172 = vmatprep.mubr.f32.mxu1 %v2740_v22  ;;  %v4840_v47 = vadd.f32 %v2851_v57, %v2850_v52  ;;  %v3894_v57 = vld [vmem:[%s5266_s0 + $0x102] sm:$0xff] }
 0x16a   :  { %1632 = vmatmul.mubr.f32.vlgmr.msra.gmra.mrb[0].mxu0 %v2740_v22  ;;  %v2853_v48 = vpop.f32.mrb[38].mxu1  ;;  %v1795_v22 = vadd.f32 %v4761_v6, %v4883_v16  ;;  %v1800_v6 = vadd.f32 %v4768_v15, %v4883_v16 }
 0x16b   :  { %3173 = vmatmul.mubr.f32.vlgmr.msra.gmra.mrb[144].mxu1 %v2741_v41  ;;  %1637 = vmatprep.mubr.f32.mxu0 %v4834_v0  ;;  %v2854_v1 = vpop.f32.mrb[39].mxu1 }
 0x16c   :  { %3175 = vmatprep.mubr.f32.mxu1 %v2742_v17  ;;  %v4849_v58 = vadd.f32 %v2854_v1, %v2853_v48  ;;  %v3895_v1 = vld [vmem:[%s5266_s0 + $0x112] sm:$0xff] }
 0x16e   :  { %1638 = vmatmul.mubr.f32.gmra.mrb[2].mxu0 %v2741_v41  ;;  %v2856_v60 = vpop.f32.mrb[40].mxu1 }
 0x16f   :  { %3176 = vmatmul.mubr.f32.gmra.mrb[146].mxu1 %v2743_v56  ;;  %1643 = vmatprep.mubr.f32.mxu0 %v4834_v0  ;;  %v2857_v21 = vpop.f32.mrb[41].mxu1 }
 0x170   :  { %3178 = vmatprep.mubr.f32.mxu1 %v2744_v11  ;;  %v4858_v29 = vadd.f32 %v2857_v21, %v2856_v60 }
 0x172   :  { %1644 = vmatmul.mubr.f32.gmra.mrb[4].mxu0 %v2742_v17  ;;  %v2859_v35 = vpop.f32.mrb[42].mxu1 }
 0x173   :  { %3179 = vmatmul.mubr.f32.gmra.mrb[148].mxu1 %v2745_v33  ;;  %1649 = vmatprep.mubr.f32.mxu0 %v4834_v0  ;;  %v2860_v7 = vpop.f32.mrb[43].mxu1 }
 0x174   :  { %3181 = vmatprep.mubr.f32.mxu1 %v4593_v51  ;;  %v4867_v46 = vadd.f32 %v2860_v7, %v2859_v35 }
 0x176   :  { %1650 = vmatmul.mubr.f32.gmra.mrb[6].mxu0 %v2743_v56  ;;  %v2862_v59 = vpop.f32.mrb[44].mxu1 }
 0x177   :  { %3182 = vmatmul.mubr.f32.gmra.mrb[150].mxu1 %v2747_v43  ;;  %1655 = vmatprep.mubr.f32.mxu0 %v4834_v0  ;;  %v2863_v49 = vpop.f32.mrb[45].mxu1 }
 0x178   :  { %3184 = vmatprep.mubr.f32.mxu1 %v3890_v55  ;;  %v4874_v63 = vadd.f32 %v2863_v49, %v2862_v59  ;;  %v1810_v59 = vadd.f32 %v4784_v12, %v4883_v16 }
 0x17a   :  { %1656 = vmatmul.mubr.f32.gmra.mrb[8].mxu0 %v2744_v11  ;;  %v2865_v25 = vpop.f32.mrb[46].mxu1  ;;  %v3896_v11 = vld [vmem:[%s5266_s0 + $0x122] sm:$0xff] }
 0x17b   :  { %3185 = vmatmul.mubr.f32.gmra.mrb[152].mxu1 %v3891_v38  ;;  %v2866_v31 = vpop.f32.mrb[47].mxu1  ;;  %1661 = vmatprep.mubr.f32.mxu0 %v4834_v0 }
 0x17c   :  { %v4885_v24 = vadd.f32 %v2866_v31, %v2865_v25  ;;  %3187 = vmatprep.mubr.f32.mxu1 %v3892_v30  ;;  %v1815_v25 = vadd.f32 %v4791_v13, %v4883_v16 }
 0x17e   :  { %v2900_v53 = vpop.f32.mrb[48].mxu1  ;;  %1662 = vmatmul.mubr.f32.gmra.mrb[10].mxu0 %v2745_v33 }
 0x17f   :  { %v2901_v40 = vpop.f32.mrb[49].mxu1  ;;  %3188 = vmatmul.mubr.f32.gmra.mrb[154].mxu1 %v3893_v36  ;;  %1667 = vmatprep.mubr.f32.mxu0 %v4834_v0 }
 0x180   :  { %v2902_v52 = vadd.f32 %v2901_v40, %v2900_v53  ;;  %3190 = vmatprep.mubr.f32.mxu1 %v3894_v57  ;;  %v1820_v53 = vadd.f32 %v4798_v42, %v4883_v16 }
 0x182   :  { %v4899_v41 = vadd.f32 %v2902_v52, %v1795_v22  ;;  %v2903_v17 = vpop.f32.mrb[50].mxu1  ;;  %1668 = vmatmul.mubr.f32.gmra.mrb[12].mxu0 %v4593_v51  ;;  %v1825_v52 = vadd.f32 %v4805_v61, %v4883_v16 }
 0x183   :  { %v2904_v48 = vpop.f32.mrb[51].mxu1  ;;  %3191 = vmatmul.mubr.f32.gmra.mrb[156].mxu1 %v3895_v1  ;;  %1673 = vmatprep.mubr.f32.mxu0 %v4834_v0  ;;  %v1805_v0 = vadd.f32 %v4776_v45, %v4883_v16  ;;  %v1830_v1 = vadd.f32 %v4812_v54, %v4883_v16 }
 0x184   :  { %v2905_v56 = vadd.f32 %v2904_v48, %v2903_v17  ;;  %3193 = vmatprep.mubr.f32.mxu1 %v3896_v11 }
 0x186   :  { %v4911_v60 = vadd.f32 %v2905_v56, %v1800_v6  ;;  %v2906_v51 = vpop.f32.mrb[52].mxu1  ;;  %1674 = vmatmul.mubr.f32.gmra.mrb[14].mxu0 %v2747_v43 }
 0x187   :  { %v2907_v21 = vpop.f32.mrb[53].mxu1  ;;  %3194 = vmatmul.mubr.f32.gmra.mrb[158].mxu1 %v3897_v2 }
 0x188   :  { %v2908_v15 = vadd.f32 %v2907_v21, %v2906_v51  ;;  %v1835_v51 = vadd.f32 %v4819_v44, %v4883_v16 }
 0x18a   :  { %v4918_v33 = vadd.f32 %v2908_v15, %v1805_v0  ;;  %v2909_v35 = vpop.f32.mrb[54].mxu1  ;;  %v1840_v15 = vadd.f32 %v4826_v9, %v4883_v16 }
 0x18b   :  { %v2910_v7 = vpop.f32.mrb[55].mxu1 }
 0x18c   :  { %v2911_v49 = vadd.f32 %v2910_v7, %v2909_v35 }
 0x18e   :  { %v4922_v19 = vadd.f32 %v2911_v49, %v1810_v59  ;;  %v2912_v43 = vpop.f32.mrb[56].mxu1  ;;  %v1845_v49 = vadd.f32 %v4840_v47, %v4883_v16 }
 0x18f   :  { %v2913_v55 = vpop.f32.mrb[57].mxu1 }
 0x190   :  { %v2914_v38 = vadd.f32 %v2913_v55, %v2912_v43 }
 0x192   :  { %v4926_v31 = vadd.f32 %v2914_v38, %v1815_v25  ;;  %v2915_v45 = vpop.f32.mrb[58].mxu1  ;;  %v1850_v38 = vadd.f32 %v4849_v58, %v4883_v16 }
 0x193   :  { %v2916_v30 = vpop.f32.mrb[59].mxu1 }
 0x194   :  { %v2917_v40 = vadd.f32 %v2916_v30, %v2915_v45 }
 0x196   :  { %v4930_v36 = vadd.f32 %v2917_v40, %v1820_v53  ;;  %v2918_v12 = vpop.f32.mrb[60].mxu1  ;;  %v1855_v40 = vadd.f32 %v4858_v29, %v4883_v16 }
 0x197   :  { %v2919_v22 = vpop.f32.mrb[61].mxu1 }
 0x198   :  { %v2920_v57 = vadd.f32 %v2919_v22, %v2918_v12 }
 0x19a   :  { %v4934_v17 = vadd.f32 %v2920_v57, %v1825_v52  ;;  %v2921_v13 = vpop.f32.mrb[62].mxu1  ;;  %v1860_v57 = vadd.f32 %v4867_v46, %v4883_v16 }
 0x19b   :  { %v2922_v48 = vpop.f32.mrb[63].mxu1 }
 0x19c   :  { %v2923_v6 = vadd.f32 %v2922_v48, %v2921_v13 }
 0x19e   :  { %v4938_v56 = vadd.f32 %v2923_v6, %v1830_v1  ;;  %v2924_v42 = vpop.f32.mrb[64].mxu1  ;;  %v1865_v6 = vadd.f32 %v4874_v63, %v4883_v16 }
 0x19f   :  { %v2925_v11 = vpop.f32.mrb[65].mxu1 }
 0x1a0   :  { %v2926_v21 = vadd.f32 %v2925_v11, %v2924_v42 }
 0x1a2   :  { %v4942_v2 = vadd.f32 %v2926_v21, %v1835_v51  ;;  %v2927_v61 = vpop.f32.mrb[66].mxu1  ;;  %v1870_v21 = vadd.f32 %v4885_v24, %v4883_v16 }
 0x1a3   :  { %v2928_v0 = vpop.f32.mrb[67].mxu1 }
 0x1a4   :  { %v2929_v35 = vadd.f32 %v2928_v0, %v2927_v61 }
 0x1a6   :  { %v4946_v7 = vadd.f32 %v2929_v35, %v1840_v15  ;;  %v2930_v54 = vpop.f32.mrb[68].mxu1 }
 0x1a7   :  { %v2931_v59 = vpop.f32.mrb[69].mxu1 }
 0x1a8   :  { %v2932_v43 = vadd.f32 %v2931_v59, %v2930_v54 }
 0x1aa   :  { %v4950_v55 = vadd.f32 %v2932_v43, %v1845_v49  ;;  %v2933_v44 = vpop.f32.mrb[70].mxu1 }
 0x1ab   :  { %v2934_v25 = vpop.f32.mrb[71].mxu1 }
 0x1ac   :  { %v2935_v45 = vadd.f32 %v2934_v25, %v2933_v44 }
 0x1ae   :  { %v4954_v30 = vadd.f32 %v2935_v45, %v1850_v38  ;;  %v2936_v9 = vpop.f32.mrb[72].mxu1 }
 0x1af   :  { %v2937_v53 = vpop.f32.mrb[73].mxu1 }
 0x1b0   :  { %v2938_v12 = vadd.f32 %v2937_v53, %v2936_v9 }
 0x1b2   :  { %v4958_v22 = vadd.f32 %v2938_v12, %v1855_v40  ;;  %v2939_v47 = vpop.f32.mrb[74].mxu1 }
 0x1b3   :  { %v2940_v52 = vpop.f32.mrb[75].mxu1 }
 0x1b4   :  { %v2941_v13 = vadd.f32 %v2940_v52, %v2939_v47 }
 0x1b6   :  { %v4962_v48 = vadd.f32 %v2941_v13, %v1860_v57  ;;  %v2942_v58 = vpop.f32.mrb[76].mxu1 }
 0x1b7   :  { %v2943_v1 = vpop.f32.mrb[77].mxu1 }
 0x1b8   :  { %v2944_v42 = vadd.f32 %v2943_v1, %v2942_v58 }
 0x1ba   :  { %v4966_v11 = vadd.f32 %v2944_v42, %v1865_v6  ;;  %v2945_v29 = vpop.f32.mrb[78].mxu1 }
 0x1bb   :  { %v2946_v51 = vpop.f32.mrb[79].mxu1 }
 0x1bc   :  { %v2947_v61 = vadd.f32 %v2946_v51, %v2945_v29 }
 0x1be   :  { %v4970_v0 = vadd.f32 %v2947_v61, %v1870_v21  ;;  %v2980_v46 = vpop.f32.mrb[80].mxu1 }
 0x1bf   :  { %v2981_v15 = vpop.f32.mrb[81].mxu1 }
 0x1c0   :  { %v2982_v35 = vadd.f32 %v2981_v15, %v2980_v46 }
 0x1c2   :  { %v4973_v54 = vadd.f32 %v2982_v35, %v4899_v41  ;;  %v2983_v59 = vpop.f32.mrb[82].mxu1 }
 0x1c3   :  { %v2984_v49 = vpop.f32.mrb[83].mxu1 }
 0x1c4   :  { %v2985_v63 = vadd.f32 %v2984_v49, %v2983_v59 }
 0x1c6   :  { %v4976_v43 = vadd.f32 %v2985_v63, %v4911_v60  ;;  %v2986_v44 = vpop.f32.mrb[84].mxu1 }
 0x1c7   :  { %v2987_v25 = vpop.f32.mrb[85].mxu1 }
 0x1c8   :  { %v2988_v38 = vadd.f32 %v2987_v25, %v2986_v44 }
 0x1ca   :  { %v4979_v16 = vadd.f32 %v2988_v38, %v4918_v33  ;;  %v2989_v24 = vpop.f32.mrb[86].mxu1 }
 0x1cb   :  { %v2990_v45 = vpop.f32.mrb[87].mxu1 }
 0x1cc   :  { %v2991_v9 = vadd.f32 %v2990_v45, %v2989_v24 }
 0x1ce   :  { %v4982_v53 = vadd.f32 %v2991_v9, %v4922_v19  ;;  %v2992_v41 = vpop.f32.mrb[88].mxu1 }
 0x1cf   :  { %v2993_v40 = vpop.f32.mrb[89].mxu1 }
 0x1d0   :  { %v2994_v12 = vadd.f32 %v2993_v40, %v2992_v41 }
 0x1d2   :  { %v4985_v47 = vadd.f32 %v2994_v12, %v4926_v31  ;;  %v2995_v60 = vpop.f32.mrb[90].mxu1 }
 0x1d3   :  { %v2996_v52 = vpop.f32.mrb[91].mxu1 }
 0x1d4   :  { %v2997_v57 = vadd.f32 %v2996_v52, %v2995_v60 }
 0x1d6   :  { %v4988_v13 = vadd.f32 %v2997_v57, %v4930_v36  ;;  %v2998_v33 = vpop.f32.mrb[92].mxu1 }
 0x1d7   :  { %v2999_v58 = vpop.f32.mrb[93].mxu1 }
 0x1d8   :  { %v3000_v1 = vadd.f32 %v2999_v58, %v2998_v33 }
 0x1da   :  { %v4991_v6 = vadd.f32 %v3000_v1, %v4934_v17  ;;  %v3001_v19 = vpop.f32.mrb[94].mxu1 }
 0x1db   :  { %v3002_v42 = vpop.f32.mrb[95].mxu1 }
 0x1dc   :  { %v3003_v29 = vadd.f32 %v3002_v42, %v3001_v19 }
 0x1de   :  { %v4994_v51 = vadd.f32 %v3003_v29, %v4938_v56  ;;  %v3004_v31 = vpop.f32.mrb[96].mxu1 }
 0x1df   :  { %v3005_v21 = vpop.f32.mrb[97].mxu1 }
 0x1e0   :  { %v3006_v61 = vadd.f32 %v3005_v21, %v3004_v31 }
 0x1e2   :  { %v4997_v46 = vadd.f32 %v3006_v61, %v4942_v2  ;;  %v3007_v36 = vpop.f32.mrb[98].mxu1 }
 0x1e3   :  { %v3008_v15 = vpop.f32.mrb[99].mxu1 }
 0x1e4   :  { %v3009_v35 = vadd.f32 %v3008_v15, %v3007_v36 }
 0x1e6   :  { %v5000_v59 = vadd.f32 %v3009_v35, %v4946_v7  ;;  %v3010_v17 = vpop.f32.mrb[100].mxu1 }
 0x1e7   :  { %v3011_v49 = vpop.f32.mrb[101].mxu1 }
 0x1e8   :  { %v3012_v63 = vadd.f32 %v3011_v49, %v3010_v17 }
 0x1ea   :  { %v5003_v44 = vadd.f32 %v3012_v63, %v4950_v55  ;;  %v3013_v56 = vpop.f32.mrb[102].mxu1 }
 0x1eb   :  { %v3014_v25 = vpop.f32.mrb[103].mxu1 }
 0x1ec   :  { %v3015_v38 = vadd.f32 %v3014_v25, %v3013_v56 }
 0x1ee   :  { %v5006_v24 = vadd.f32 %v3015_v38, %v4954_v30  ;;  %v3016_v2 = vpop.f32.mrb[104].mxu1 }
 0x1ef   :  { %v3017_v45 = vpop.f32.mrb[105].mxu1 }
 0x1f0   :  { %v3018_v9 = vadd.f32 %v3017_v45, %v3016_v2 }
 0x1f2   :  { %v5009_v41 = vadd.f32 %v3018_v9, %v4958_v22  ;;  %v3019_v7 = vpop.f32.mrb[106].mxu1 }
 0x1f3   :  { %v3020_v40 = vpop.f32.mrb[107].mxu1 }
 0x1f4   :  { %v3021_v12 = vadd.f32 %v3020_v40, %v3019_v7  ;;  %v910_v40 = vsub.s32 0, %v4861_v37 }
 0x1f6   :  { %v5012_v60 = vadd.f32 %v3021_v12, %v4962_v48  ;;  %v3022_v55 = vpop.f32.mrb[108].mxu1 }
 0x1f7   :  { %v3023_v52 = vpop.f32.mrb[109].mxu1 }
 0x1f8   :  { %v3024_v57 = vadd.f32 %v3023_v52, %v3022_v55  ;;  %v914_v55 = vsub.s32 1, %v4861_v37 }
 0x1fa   :  { %v5015_v33 = vadd.f32 %v3024_v57, %v4966_v11  ;;  %v3025_v30 = vpop.f32.mrb[110].mxu1  ;;  %v5041_v57 = vrot.slane %v4876_v20, %v910_v40 }
 0x1fb   :  { %v3026_v58 = vpop.f32.mrb[111].mxu1 }
 0x1fc   :  { %v3027_v1 = vadd.f32 %v3026_v58, %v3025_v30  ;;  %v5047_v58 = vrot.slane %v4876_v20, %v914_v55 }
 0x1fe   :  { %v5018_v19 = vadd.f32 %v3027_v1, %v4970_v0  ;;  %v3060_v22 = vpop.f32.mrb[112].mxu1 }
 0x1ff   :  { %v3061_v42 = vpop.f32.mrb[113].mxu1 }
 0x200   :  { %v3062_v29 = vadd.f32 %v3061_v42, %v3060_v22 }
 0x202   :  { %v3063_v31 = vpop.f32.mrb[114].mxu1  ;;  %v5021_v21 = vadd.f32 %v3062_v29, %v4973_v54 }
 0x203   :  { %v3064_v48 = vpop.f32.mrb[115].mxu1 }
 0x204   :  { %v3065_v61 = vadd.f32 %v3064_v48, %v3063_v31 }
 0x206   :  { %v3066_v36 = vpop.f32.mrb[116].mxu1  ;;  %v5024_v15 = vadd.f32 %v3065_v61, %v4976_v43 }
 0x207   :  { %v3067_v11 = vpop.f32.mrb[117].mxu1 }
 0x208   :  { %v3068_v35 = vadd.f32 %v3067_v11, %v3066_v36 }
 0x20a   :  { %v3069_v17 = vpop.f32.mrb[118].mxu1  ;;  %v5027_v49 = vadd.f32 %v3068_v35, %v4979_v16 }
 0x20b   :  { %v3070_v0 = vpop.f32.mrb[119].mxu1 }
 0x20c   :  { %v3071_v63 = vadd.f32 %v3070_v0, %v3069_v17 }
 0x20e   :  { %v3072_v56 = vpop.f32.mrb[120].mxu1  ;;  %v5030_v25 = vadd.f32 %v3071_v63, %v4982_v53 }
 0x20f   :  { %v3073_v54 = vpop.f32.mrb[121].mxu1 }
 0x210   :  { %v3074_v38 = vadd.f32 %v3073_v54, %v3072_v56 }
 0x212   :  { %v3075_v2 = vpop.f32.mrb[122].mxu1  ;;  %v5033_v45 = vadd.f32 %v3074_v38, %v4985_v47 }
 0x213   :  { %v3076_v43 = vpop.f32.mrb[123].mxu1 }
 0x214   :  { %v3077_v9 = vadd.f32 %v3076_v43, %v3075_v2 }
 0x216   :  { %v3078_v7 = vpop.f32.mrb[124].mxu1  ;;  %v5037_v16 = vadd.f32 %v3077_v9, %v4988_v13 }
 0x217   :  { %v3079_v12 = vpop.f32.mrb[125].mxu1 }
 0x218   :  { %v3080_v52 = vadd.f32 %v3079_v12, %v3078_v7 }
 0x21a   :  { %v3081_v53 = vpop.f32.mrb[126].mxu1  ;;  %v5044_v30 = vadd.f32 %v3080_v52, %v4991_v6 }
 0x21b   :  { %v3082_v47 = vpop.f32.mrb[127].mxu1 }
 0x21c   :  { %v3083_v1 = vadd.f32 %v3082_v47, %v3081_v53 }
 0x21d   :  { %v1520_v22 = vpop.f32.mrb[16].mxu0 }
 0x21e   :  { %v3676_v13 = vadd.f32 %v1520_v22, %v5041_v57  ;;  %v3084_v42 = vpop.f32.mrb[128].mxu1  ;;  %v1522_v29 = vpop.f32.mrb[17].mxu0  ;;  %v5051_v37 = vadd.f32 %v3083_v1, %v4994_v51 }
 0x21f   :  { %v3678_v31 = vadd.f32 %v1522_v29, %v5047_v58  ;;  %v3085_v48 = vpop.f32.mrb[129].mxu1 }
 0x220   :  { %v5055_v61 = vadd.f32 %v3676_v13, %v4658_v34  ;;  %v3086_v6 = vadd.f32 %v3085_v48, %v3084_v42 }
 0x221   :  { %v3679_v36 = vadd.f32 %v3678_v31, %v4666_v3  ;;  %v1526_v20 = vpop.f32.mrb[18].mxu0 }
 0x222   :  { %v3680_v11 = vadd.f32 %v1526_v20, %v5041_v57  ;;  %v3087_v35 = vpop.f32.mrb[130].mxu1  ;;  %v1528_v17 = vpop.f32.mrb[19].mxu0  ;;  %v5060_v0 = vadd.f32 %v3086_v6, %v4997_v46 }
 0x223   :  { %v2764_v63 = vmul.f32 -1.442695, %v3679_v36  ;;  %v3682_v51 = vadd.f32 %v1528_v17, %v5047_v58  ;;  %v3088_v56 = vpop.f32.mrb[131].mxu1 }
 0x224   :  { %v5064_v54 = vadd.f32 %v3680_v11, %v4674_v50  ;;  %v3089_v34 = vadd.f32 %v3088_v56, %v3087_v35 }
 0x225   :  { %3825 = vpow2.f32 %v2764_v63  ;;  %v3683_v38 = vadd.f32 %v3682_v51, %v4682_v28  ;;  %v1532_v3 = vpop.f32.mrb[20].mxu0 }
 0x226   :  { %v3684_v2 = vadd.f32 %v1532_v3, %v5041_v57  ;;  %v3090_v43 = vpop.f32.mrb[132].mxu1  ;;  %v1534_v9 = vpop.f32.mrb[21].mxu0  ;;  %v5069_v7 = vadd.f32 %v3089_v34, %v5000_v59 }
 0x227   :  { %v2765_v46 = vmul.f32 -1.442695, %v3683_v38  ;;  %v3686_v40 = vadd.f32 %v1534_v9, %v5047_v58  ;;  %v3091_v12 = vpop.f32.mrb[133].mxu1 }
 0x228   :  { %v5073_v55 = vadd.f32 %v3684_v2, %v4685_v32  ;;  %v3092_v50 = vadd.f32 %v3091_v12, %v3090_v43 }
 0x229   :  { %3827 = vpow2.f32 %v2765_v46  ;;  %v3687_v52 = vadd.f32 %v3686_v40, %v4691_v62  ;;  %v1538_v28 = vpop.f32.mrb[22].mxu0 }
 0x22a   :  { %v3688_v53 = vadd.f32 %v1538_v28, %v5041_v57  ;;  %v3093_v47 = vpop.f32.mrb[134].mxu1  ;;  %v1540_v1 = vpop.f32.mrb[23].mxu0  ;;  %v5078_v22 = vadd.f32 %v3092_v50, %v5003_v44 }
 0x22b   :  { %v2766_v59 = vmul.f32 -1.442695, %v3687_v52  ;;  %v3690_v13 = vadd.f32 %v1540_v1, %v5047_v58  ;;  %v3094_v42 = vpop.f32.mrb[135].mxu1 }
 0x22c   :  { %v5082_v29 = vadd.f32 %v3688_v53, %v4696_v5  ;;  %v3095_v32 = vadd.f32 %v3094_v42, %v3093_v47 }
 0x22d   :  { %3829 = vpow2.f32 %v2766_v59  ;;  %v3691_v31 = vadd.f32 %v3690_v13, %v4702_v10  ;;  %v1544_v62 = vpop.f32.mrb[24].mxu0 }
 0x22e   :  { %v3692_v48 = vadd.f32 %v1544_v62, %v5041_v57  ;;  %v3096_v6 = vpop.f32.mrb[136].mxu1  ;;  %v1546_v36 = vpop.f32.mrb[25].mxu0  ;;  %v5087_v20 = vadd.f32 %v3095_v32, %v5006_v24 }
 0x22f   :  { %v3826_v44 = vpop.eup %3825  ;;  %v2767_v11 = vmul.f32 -1.442695, %v3691_v31  ;;  %v3694_v35 = vadd.f32 %v1546_v36, %v5047_v58  ;;  %v3097_v17 = vpop.f32.mrb[137].mxu1 }
 0x230   :  { %v2525_v63 = vadd.f32 1.0, %v3826_v44  ;;  %v5091_v5 = vadd.f32 %v3692_v48, %v4708_v8  ;;  %v3098_v51 = vadd.f32 %v3097_v17, %v3096_v6  ;;  %v2461_v44 = vmax.f32 %v5055_v61, 0.0 }
 0x231   :  { %3831 = vpow2.f32 %v2767_v11  ;;  %v3695_v10 = vadd.f32 %v3694_v35, %v4714_v14  ;;  %v1550_v56 = vpop.f32.mrb[26].mxu0 }
 0x232   :  { %3833 = vrcp.f32 %v2525_v63  ;;  %v3696_v34 = vadd.f32 %v1550_v56, %v5041_v57  ;;  %v3099_v38 = vpop.f32.mrb[138].mxu1  ;;  %v1552_v24 = vpop.f32.mrb[27].mxu0  ;;  %v5096_v3 = vadd.f32 %v3098_v51, %v5009_v41 }
 0x233   :  { %v3828_v2 = vpop.eup %3827  ;;  %v2768_v43 = vmul.f32 -1.442695, %v3695_v10  ;;  %v3698_v9 = vadd.f32 %v1552_v24, %v5047_v58  ;;  %v3100_v46 = vpop.f32.mrb[139].mxu1 }
 0x234   :  { %v2526_v8 = vadd.f32 1.0, %v3828_v2  ;;  %v5100_v40 = vadd.f32 %v3696_v34, %v4719_v18  ;;  %v3101_v12 = vadd.f32 %v3100_v46, %v3099_v38  ;;  %v2462_v2 = vmax.f32 %v5064_v54, 0.0 }
 0x235   :  { %3835 = vpow2.f32 %v2768_v43  ;;  %v3699_v14 = vadd.f32 %v3698_v9, %v4725_v23  ;;  %v1556_v50 = vpop.f32.mrb[28].mxu0 }
 0x236   :  { %3837 = vrcp.f32 %v2526_v8  ;;  %v3700_v52 = vadd.f32 %v1556_v50, %v5041_v57  ;;  %v3102_v28 = vpop.f32.mrb[140].mxu1  ;;  %v1558_v41 = vpop.f32.mrb[29].mxu0  ;;  %v5105_v53 = vadd.f32 %v3101_v12, %v5012_v60 }
 0x237   :  { %v3830_v47 = vpop.eup %3829  ;;  %v2769_v1 = vmul.f32 -1.442695, %v3699_v14  ;;  %v3702_v59 = vadd.f32 %v1558_v41, %v5047_v58  ;;  %v3103_v13 = vpop.f32.mrb[141].mxu1 }
 0x238   :  { %v2527_v18 = vadd.f32 1.0, %v3830_v47  ;;  %v5109_v42 = vadd.f32 %v3700_v52, %v4730_v26  ;;  %v3104_v32 = vadd.f32 %v3103_v13, %v3102_v28 }
 0x239   :  { %3839 = vpow2.f32 %v2769_v1  ;;  %v3703_v23 = vadd.f32 %v3702_v59, %v4736_v27  ;;  %v1562_v31 = vpop.f32.mrb[30].mxu0 }
 0x23a   :  { %3841 = vrcp.f32 %v2527_v18  ;;  %v3704_v62 = vadd.f32 %v1562_v31, %v5041_v57  ;;  %v3105_v48 = vpop.f32.mrb[142].mxu1  ;;  %v1564_v60 = vpop.f32.mrb[31].mxu0  ;;  %v5114_v6 = vadd.f32 %v3104_v32, %v5015_v33 }
 0x23b   :  { %v3832_v36 = vpop.eup %3831  ;;  %v2770_v11 = vmul.f32 -1.442695, %v3703_v23  ;;  %v3706_v26 = vadd.f32 %v1564_v60, %v5047_v58  ;;  %v3106_v35 = vpop.f32.mrb[143].mxu1 }
 0x23c   :  { %v3834_v17 = vpop.eup %3833  ;;  %v2528_v63 = vadd.f32 1.0, %v3832_v36  ;;  %v5119_v27 = vadd.f32 %v3704_v62, %v4741_v39  ;;  %v3107_v51 = vadd.f32 %v3106_v35, %v3105_v48 }
 0x23d   :  { %3843 = vpow2.f32 %v2770_v11  ;;  %v3707_v10 = vadd.f32 %v3706_v26, %v4747_v4  ;;  %v5122_v56 = vpop.f32.mrb[0].mxu0  ;;  %v5124_v33 = vmul.f32 %v3834_v17, %v2461_v44 }
 0x23e   :  { %3845 = vrcp.f32 %v2528_v63  ;;  %v3174_v34 = vpop.f32.mrb[144].mxu1  ;;  %v1635_v61 = vpop.f32.mrb[1].mxu0  ;;  %v5127_v38 = vadd.f32 %v3107_v51, %v5018_v19 }
 0x23f   :  { %v3836_v24 = vpop.eup %3835  ;;  %v2771_v43 = vmul.f32 -1.442695, %v3707_v10  ;;  %v5131_v39 = vadd.f32 %v3174_v34, %v5024_v15  ;;  %v3661_v9 = vadd.f32 %v1635_v61, %v5047_v58  ;;  %v2374_v4 = vpop.f32.mrb[145].mxu1  ;;  %v2463_v15 = vmax.f32 %v5073_v55, 0.0 }
 0x240   :  { %v3838_v46 = vpop.eup %3837  ;;  %v2529_v8 = vadd.f32 1.0, %v3836_v24  ;;  %v5135_v12 = vadd.f32 %v2374_v4, %v5021_v21  ;;  %v2465_v10 = vmax.f32 %v5091_v5, 0.0 }
 0x241   :  { %3847 = vpow2.f32 %v2771_v43  ;;  %v2756_v14 = vmul.f32 -1.442695, %v3661_v9  ;;  %v5137_v50 = vpop.f32.mrb[2].mxu0  ;;  %v2574_v19 = vmul.f32 %v3838_v46, %v2462_v2 }
 0x242   :  { %3849 = vrcp.f32 %v2529_v8  ;;  %v3177_v52 = vpop.f32.mrb[146].mxu1  ;;  %v1641_v54 = vpop.f32.mrb[3].mxu0 }
 0x243   :  { %v3840_v28 = vpop.eup %3839  ;;  %3851 = vpow2.f32 %v2756_v14  ;;  %v5141_v41 = vadd.f32 %v3177_v52, %v5030_v25  ;;  %v3663_v47 = vadd.f32 %v1641_v54, %v5047_v58  ;;  %v2384_v1 = vpop.f32.mrb[147].mxu1  ;;  %v2464_v25 = vmax.f32 %v5082_v29, 0.0 }
 0x244   :  { %v3842_v21 = vpop.eup %3841  ;;  %v2530_v59 = vadd.f32 1.0, %v3840_v28  ;;  %v5145_v13 = vadd.f32 %v2384_v1, %v5027_v49 }
 0x245   :  { %v2757_v18 = vmul.f32 -1.442695, %v3663_v47  ;;  %v5147_v32 = vpop.f32.mrb[4].mxu0  ;;  %v5149_v23 = vmul.f32 %v3842_v21, %v2463_v15 }
 0x246   :  { %3853 = vrcp.f32 %v2530_v59  ;;  %v3180_v31 = vpop.f32.mrb[148].mxu1  ;;  %v1647_v55 = vpop.f32.mrb[5].mxu0 }
 0x247   :  { %v3844_v62 = vpop.eup %3843  ;;  %3855 = vpow2.f32 %v2757_v18  ;;  %v5153_v48 = vadd.f32 %v3180_v31, %v5037_v16  ;;  %v3665_v60 = vadd.f32 %v1647_v55, %v5047_v58  ;;  %v2394_v36 = vpop.f32.mrb[149].mxu1 }
 0x248   :  { %v3846_v49 = vpop.eup %3845  ;;  %v2531_v44 = vadd.f32 1.0, %v3844_v62  ;;  %v5157_v11 = vadd.f32 %v2394_v36, %v5033_v45 }
 0x249   :  { %v2758_v26 = vmul.f32 -1.442695, %v3665_v60  ;;  %v5159_v35 = vpop.f32.mrb[6].mxu0  ;;  %v2576_v17 = vmul.f32 %v3846_v49, %v2464_v25 }
 0x24a   :  { %3857 = vrcp.f32 %v2531_v44  ;;  %v3183_v63 = vpop.f32.mrb[150].mxu1  ;;  %v1653_v51 = vpop.f32.mrb[7].mxu0 }
 0x24b   :  { %v3848_v29 = vpop.eup %3847  ;;  %3859 = vpow2.f32 %v2758_v26  ;;  %v5163_v16 = vadd.f32 %v3183_v63, %v5051_v37  ;;  %v3667_v34 = vadd.f32 %v1653_v51, %v5047_v58  ;;  %v2404_v61 = vpop.f32.mrb[151].mxu1  ;;  %v2466_v37 = vmax.f32 %v5100_v40, 0.0 }
 0x24c   :  { %v3850_v24 = vpop.eup %3849  ;;  %v2532_v45 = vadd.f32 1.0, %v3848_v29  ;;  %v5167_v2 = vadd.f32 %v2404_v61, %v5044_v30 }
 0x24d   :  { %v3852_v43 = vpop.eup %3851  ;;  %v2759_v9 = vmul.f32 -1.442695, %v3667_v34  ;;  %v5169_v4 = vpop.f32.mrb[8].mxu0  ;;  %v2577_v46 = vmul.f32 %v3850_v24, %v2465_v10  ;;  %v2468_v34 = vmax.f32 %v5119_v27, 0.0  ;;  %v3662_v24 = vadd.f32 %v5137_v50, %v5041_v57 }
 0x24e   :  { %3861 = vrcp.f32 %v2532_v45  ;;  %v2517_v8 = vadd.f32 1.0, %v3852_v43  ;;  %v3186_v5 = vpop.f32.mrb[152].mxu1  ;;  %v1659_v14 = vpop.f32.mrb[9].mxu0 }
 0x24f   :  { %3863 = vpow2.f32 %v2759_v9  ;;  %v2420_v52 = vadd.f32 %v3186_v5, %v5069_v7  ;;  %v3669_v54 = vadd.f32 %v1659_v14, %v5047_v58  ;;  %v2414_v28 = vpop.f32.mrb[153].mxu1  ;;  %v2467_v7 = vmax.f32 %v5109_v42, 0.0 }
 0x250   :  { %v3854_v15 = vpop.eup %3853  ;;  %3865 = vrcp.f32 %v2517_v8  ;;  %v2415_v30 = vadd.f32 %v2414_v28, %v5060_v0  ;;  %v3660_v42 = vadd.f32 %v5122_v56, %v5041_v57 }
 0x251   :  { %v3856_v47 = vpop.eup %3855  ;;  %v2590_v1 = vadd.f32 %v2574_v19, %v2420_v52  ;;  %v2760_v21 = vmul.f32 -1.442695, %v3669_v54  ;;  %v5175_v59 = vpop.f32.mrb[10].mxu0  ;;  %v2578_v18 = vmul.f32 %v3854_v15, %v2466_v37 }
 0x252   :  { %v2518_v31 = vadd.f32 1.0, %v3856_v47  ;;  %v2589_v55 = vadd.f32 %v5124_v33, %v2415_v30  ;;  %v3189_v40 = vpop.f32.mrb[154].mxu1  ;;  %v1665_v62 = vpop.f32.mrb[11].mxu0  ;;  %v2453_v45 = vmax.f32 %v3660_v42, 0.0  ;;  %v2454_v30 = vmax.f32 %v3662_v24, 0.0 }
 0x253   :  { %2781 = vst [vmem:[%s5269_s3 + $0xc1] sm:$0xff] %v2590_v1  ;;  %3867 = vpow2.f32 %v2760_v21  ;;  %v2430_v0 = vadd.f32 %v3189_v40, %v5087_v20  ;;  %v3671_v19 = vadd.f32 %v1665_v62, %v5047_v58  ;;  %v2424_v25 = vpop.f32.mrb[155].mxu1  ;;  %v3664_v21 = vadd.f32 %v5147_v32, %v5041_v57 }
 0x254   :  { %v3858_v60 = vpop.eup %3857  ;;  %3869 = vrcp.f32 %v2518_v31  ;;  %2780 = vst [vmem:[%s5269_s3 + $0xb1] sm:$0xff] %v2589_v55  ;;  %v2425_v33 = vadd.f32 %v2424_v25, %v5078_v22  ;;  %v3666_v62 = vadd.f32 %v5159_v35, %v5041_v57 }
 0x255   :  { %v3860_v36 = vpop.eup %3859  ;;  %v2592_v49 = vadd.f32 %v2576_v17, %v2430_v0  ;;  %v2761_v44 = vmul.f32 -1.442695, %v3671_v19  ;;  %v5190_v26 = vpop.f32.mrb[12].mxu0  ;;  %v2579_v20 = vmul.f32 %v3858_v60, %v2467_v7  ;;  %v2455_v32 = vmax.f32 %v3664_v21, 0.0 }
 0x256   :  { %v2519_v63 = vadd.f32 1.0, %v3860_v36  ;;  %v2591_v51 = vadd.f32 %v5149_v23, %v2425_v33  ;;  %v3192_v29 = vpop.f32.mrb[156].mxu1  ;;  %v1671_v10 = vpop.f32.mrb[13].mxu0  ;;  %v2456_v33 = vmax.f32 %v3666_v62, 0.0  ;;  %v3668_v36 = vadd.f32 %v5169_v4, %v5041_v57 }
 0x257   :  { %2783 = vst [vmem:[%s5269_s3 + $0xe1] sm:$0xff] %v2592_v49  ;;  %3871 = vpow2.f32 %v2761_v44  ;;  %v2440_v22 = vadd.f32 %v3192_v29, %v5105_v53  ;;  %v3673_v56 = vadd.f32 %v1671_v10, %v5047_v58  ;;  %v2434_v17 = vpop.f32.mrb[157].mxu1 }
 0x258   :  { %v3862_v61 = vpop.eup %3861  ;;  %3873 = vrcp.f32 %v2519_v63  ;;  %2782 = vst [vmem:[%s5269_s3 + $0xd1] sm:$0xff] %v2591_v51  ;;  %v2435_v27 = vadd.f32 %v2434_v17, %v5096_v3  ;;  %v3670_v63 = vadd.f32 %v5175_v59, %v5041_v57 }
 0x259   :  { %v3864_v23 = vpop.eup %3863  ;;  %v2594_v43 = vadd.f32 %v2578_v18, %v2440_v22  ;;  %v2762_v9 = vmul.f32 -1.442695, %v3673_v56  ;;  %v5205_v8 = vpop.f32.mrb[14].mxu0  ;;  %v2580_v53 = vmul.f32 %v3862_v61, %v2468_v34  ;;  %v3672_v34 = vadd.f32 %v5190_v26, %v5041_v57 }
 0x25a   :  { %v3866_v5 = vpop.eup %3865  ;;  %v2520_v14 = vadd.f32 1.0, %v3864_v23  ;;  %v2593_v37 = vadd.f32 %v2577_v46, %v2435_v27  ;;  %v3195_v52 = vpop.f32.mrb[158].mxu1  ;;  %v2458_v10 = vmax.f32 %v3670_v63, 0.0  ;;  %v3674_v17 = vadd.f32 %v5205_v8, %v5041_v57 }
 0x25b   :  { %v1677_v54 = vpop.f32.mrb[15].mxu0  ;;  %v2565_v50 = vmul.f32 %v3866_v5, %v2453_v45  ;;  %2785 = vst [vmem:[%s5269_s3 + $0x101] sm:$0xff] %v2594_v43  ;;  %3875 = vpow2.f32 %v2762_v9  ;;  %v2450_v3 = vadd.f32 %v3195_v52, %v5127_v38  ;;  %v2444_v15 = vpop.f32.mrb[159].mxu1  ;;  %v2459_v56 = vmax.f32 %v3672_v34, 0.0 }
 0x25c   :  { %v3675_v28 = vadd.f32 %v1677_v54, %v5047_v58  ;;  %3877 = vrcp.f32 %v2520_v14  ;;  %2784 = vst [vmem:[%s5269_s3 + $0xf1] sm:$0xff] %v2593_v37  ;;  %v2445_v46 = vadd.f32 %v2444_v15, %v5114_v6  ;;  %v2460_v24 = vmax.f32 %v3674_v17, 0.0 }
 0x25d   :  { %v3868_v47 = vpop.eup %3867  ;;  %v2581_v1 = vadd.f32 %v2565_v50, %v5135_v12  ;;  %v2596_v18 = vadd.f32 %v2580_v53, %v2450_v3 }
 0x25e   :  { %v2763_v31 = vmul.f32 -1.442695, %v3675_v28  ;;  %v3870_v38 = vpop.eup %3869  ;;  %v2521_v55 = vadd.f32 1.0, %v3868_v47  ;;  %v2595_v58 = vadd.f32 %v2579_v20, %v2445_v46  ;;  %v2457_v20 = vmax.f32 %v3668_v36, 0.0 }
 0x25f   :  { %2772 = vst [vmem:[%s5269_s3 + $0x11] sm:$0xff] %v2581_v1  ;;  %v2566_v40 = vmul.f32 %v3870_v38, %v2454_v30  ;;  %2787 = vst [vmem:[%s5269_s3 + $0x121] sm:$0xff] %v2596_v18 }
 0x260   :  { %3879 = vpow2.f32 %v2763_v31  ;;  %2786 = vst [vmem:[%s5269_s3 + $0x111] sm:$0xff] %v2595_v58 }
 0x261   :  { %3881 = vrcp.f32 %v2521_v55  ;;  %v3872_v6 = vpop.eup %3871  ;;  %v2582_v12 = vadd.f32 %v2566_v40, %v5131_v39 }
 0x262   :  { %v3874_v7 = vpop.eup %3873  ;;  %v2522_v0 = vadd.f32 1.0, %v3872_v6 }
 0x263   :  { %2773 = vst [vmem:[%s5269_s3 + $0x21] sm:$0xff] %v2582_v12  ;;  %v2567_v19 = vmul.f32 %v3874_v7, %v2455_v32 }
 0x264   :  { %3883 = vrcp.f32 %v2522_v0 }
 0x265   :  { %v3876_v25 = vpop.eup %3875  ;;  %v2583_v60 = vadd.f32 %v2567_v19, %v5145_v13 }
 0x266   :  { %v3878_v39 = vpop.eup %3877  ;;  %v2523_v42 = vadd.f32 1.0, %v3876_v25 }
 0x267   :  { %2774 = vst [vmem:[%s5269_s3 + $0x31] sm:$0xff] %v2583_v60  ;;  %v2568_v35 = vmul.f32 %v3878_v39, %v2456_v33 }
 0x268   :  { %3885 = vrcp.f32 %v2523_v42 }
 0x269   :  { %v2584_v44 = vadd.f32 %v2568_v35, %v5141_v41 }
 0x26a   :  { %v3880_v49 = vpop.eup %3879 }
 0x26b   :  { %v3882_v13 = vpop.eup %3881  ;;  %v2524_v51 = vadd.f32 1.0, %v3880_v49  ;;  %2775 = vst [vmem:[%s5269_s3 + $0x41] sm:$0xff] %v2584_v44 }
 0x26c   :  { %v2569_v4 = vmul.f32 %v3882_v13, %v2457_v20 }
 0x26d   :  { %3887 = vrcp.f32 %v2524_v51 }
 0x26e   :  { %v2585_v29 = vadd.f32 %v2569_v4, %v5157_v11  ;;  %v3884_v22 = vpop.eup %3883 }
 0x26f   :  { %v2570_v41 = vmul.f32 %v3884_v22, %v2458_v10 }
 0x270   :  { %2776 = vst [vmem:[%s5269_s3 + $0x51] sm:$0xff] %v2585_v29 }
 0x271   :  { %v2586_v59 = vadd.f32 %v2570_v41, %v5153_v48 }
 0x272   :  { %v3886_v61 = vpop.eup %3885 }
 0x273   :  { %2777 = vst [vmem:[%s5269_s3 + $0x61] sm:$0xff] %v2586_v59  ;;  %v2571_v11 = vmul.f32 %v3886_v61, %v2459_v56 }
 0x275   :  { %v2587_v26 = vadd.f32 %v2571_v11, %v5167_v2 }
 0x277   :  { %v3888_v27 = vpop.eup %3887  ;;  %2778 = vst [vmem:[%s5269_s3 + $0x71] sm:$0xff] %v2587_v26 }
 0x278   :  { %v2572_v23 = vmul.f32 %v3888_v27, %v2460_v24 }
 0x27a   :  { %v2588_v48 = vadd.f32 %v2572_v23, %v5163_v16 }
 0x27c   :  { %2779 = vst [vmem:[%s5269_s3 + $0x81] sm:$0xff] %v2588_v48 }
 0x27d   :  { %2658 = vsyncpa [#allocation4], 1 }
 0x27e   :  { %2659 = vsyncpa [#allocation6], 1 }

// kernel: _lambda_.5
= control target key start
LH: loop header
LB: loop body
LE: loop exit
PB: predicated region body
PF: predicated region fallthrough
CT: control target
= control target key end

     0   :  { %10 = vsyncpa [#allocation4], 0  ;;  %s5836_s18 = smov 0   ;;  %s6585_s0 = inlined_call_operand.vmem [shape: f32[2,16384], index: 0, kind: input, shape index: {}]   ;;  %s6586_s1 = inlined_call_operand.vmem [shape: bf16[16384,256], index: 1, kind: input, shape index: {}]   ;;  %s6587_s2 = inlined_call_operand.vmem [shape: f32[1,256], index: 2, kind: input, shape index: {}]   ;;  %s6588_s3 = inlined_call_operand.vmem [shape: f32[128,10], index: 3, kind: input, shape index: {}]   ;;  %s6589_s4 = inlined_call_operand.vmem [shape: f32[1,10], index: 4, kind: input, shape index: {}]   ;;  %s6590_s5 = inlined_call_operand.hbm [shape: f32[2,10], index: 5, kind: output, shape index: {}]  }
   0x1 LB: > { %s5842_s19 = sadd.s32 4294967295, %s5798_s18   ;;  %p3305_p0 = scmp.ge.s32.totalorder %s5798_s18, 1  ;;  %s5798_s18 = sphi %s5836_s18, %s16_s18  }
   0x2   : > { %p196_p1 = scmp.lt.s32.totalorder %s5798_s18, 5 }
   0x4   : > { %p197_p2 = pnand %p3305_p0, %p196_p1 }
   0x5   : > { %s3306_s20 = sshll.u32 (!%p197_p2), %s5842_s19, 5  ;;  %s3308_s21 = sshll.u32 (!%p197_p2), %s5842_s19, 9 }
   0x6   : > { %200 = sbr.rel (%p197_p2) target bundleno = 1038 (0x40e), region = 40  ;;  %p226_p3 = scmp.lt.s32.totalorder (!%p197_p2), %s3306_s20, 127 }
   0x7   : > { %p232_p4 = scmp.lt.s32.totalorder (!%p197_p2), %s3308_s21, 2047  ;;  %p3311_p5 = scmp.ne.s32.totalorder (!%p197_p2), %s5842_s19, 0 }
   0xd   : > { %s6592_s20 = smov (!%p226_p3, %s3306_s20), 127  ;;  %s6594_s21 = smov (!%p232_p4, %s3308_s21), 2047 }
   0xe   : > { %s3307_s22 = sshll.u32 %s6592_s20, 1  ;;  %s3319_s26 = sshll.u32 %s6594_s21, 3  ;;  %v5800_v0 = vmov (!%p3311_p5), 0.0  }
   0xf   : > { %s5851_s25 = scalar_lea.vmem %s6585_s0, %s3307_s22  ;;  %s5856_s29 = scalar_lea.vmem %s6586_s1, %s3319_s26  ;;  %242 = vst [vmem:[#allocation2] sm:$0xf] (!%p3311_p5), %v5800_v0 }
  0x10   : > { %241 = sbr.rel (%p3311_p5) target bundleno = 23 (0x17), region = 44 }
  0x17 PF: > { %v4982_v1 = vld [vmem:[%s5856_s29 + $0x4] ss:$8 sps:$4 sm:$0xff]   ;;  %v4986_v3 = vld [vmem:[%s5856_s29] ss:$8 sps:$4 sm:$0xff]   ;;  %v4988_v5 = vld [vmem:[%s5856_s29 + $0x14] ss:$8 sps:$4 sm:$0xff]   ;;  %v1800_v39 = vlaneseq }
  0x18   : > { %v4984_v2 = vld [vmem:[%s5856_s29 + $0x804] ss:$8 sps:$4 sm:$0xff]   ;;  %3373 = vmatprep.subr.bf16.mxu1 %v4982_v1  ;;  %v4987_v4 = vld [vmem:[%s5856_s29 + $0x800] ss:$8 sps:$4 sm:$0xff]   ;;  %v4990_v6 = vld [vmem:[%s5856_s29 + $0x814] ss:$8 sps:$4 sm:$0xff]  }
  0x19   : > { %3885 = vmatprep.subr.bf16.mxu0 %v4984_v2  ;;  %3375 = vmatpush1.bf16.msra.mxu1 %v4986_v3  ;;  %v4992_v7 = vld [vmem:[%s5856_s29 + $0x10] ss:$8 sps:$4 sm:$0xff]   ;;  %v4994_v9 = vld [vmem:[%s5856_s29 + $0x24] ss:$8 sps:$4 sm:$0xff]   ;;  %v4998_v11 = vld [vmem:[%s5856_s29 + $0x20] ss:$8 sps:$4 sm:$0xff]  }
  0x1a   : > { %3887 = vmatpush1.bf16.msra.mxu0 %v4987_v4  ;;  %3377 = vmatprep.subr.bf16.mxu1 %v4988_v5  ;;  %v4993_v8 = vld [vmem:[%s5856_s29 + $0x810] ss:$8 sps:$4 sm:$0xff]   ;;  %v4996_v10 = vld [vmem:[%s5856_s29 + $0x824] ss:$8 sps:$4 sm:$0xff]   ;;  %v4999_v12 = vld [vmem:[%s5856_s29 + $0x820] ss:$8 sps:$4 sm:$0xff]  }
  0x1b   : > { %3889 = vmatprep.subr.bf16.mxu0 %v4990_v6  ;;  %v5000_v13 = vld [vmem:[%s5856_s29 + $0x34] ss:$8 sps:$4 sm:$0xff]   ;;  %v5004_v15 = vld [vmem:[%s5856_s29 + $0x30] ss:$8 sps:$4 sm:$0xff]   ;;  %v5006_v17 = vld [vmem:[%s5856_s29 + $0x44] ss:$8 sps:$4 sm:$0xff]  }
  0x1c   : > { %v5002_v14 = vld [vmem:[%s5856_s29 + $0x834] ss:$8 sps:$4 sm:$0xff]   ;;  %v5005_v16 = vld [vmem:[%s5856_s29 + $0x830] ss:$8 sps:$4 sm:$0xff]   ;;  %v5008_v18 = vld [vmem:[%s5856_s29 + $0x844] ss:$8 sps:$4 sm:$0xff]  }
  0x1d   : > { %3379 = vmatpush1.bf16.msra.mxu1 %v4992_v7  ;;  %v5010_v19 = vld [vmem:[%s5856_s29 + $0x40] ss:$8 sps:$4 sm:$0xff]   ;;  %v5012_v21 = vld [vmem:[%s5856_s29 + $0x54] ss:$8 sps:$4 sm:$0xff]   ;;  %v5016_v23 = vld [vmem:[%s5856_s29 + $0x50] ss:$8 sps:$4 sm:$0xff]  }
  0x1e   : > { %3891 = vmatpush1.bf16.msra.mxu0 %v4993_v8  ;;  %3381 = vmatprep.subr.bf16.mxu1 %v4994_v9  ;;  %v5011_v20 = vld [vmem:[%s5856_s29 + $0x840] ss:$8 sps:$4 sm:$0xff]   ;;  %v5014_v22 = vld [vmem:[%s5856_s29 + $0x854] ss:$8 sps:$4 sm:$0xff]   ;;  %v5017_v24 = vld [vmem:[%s5856_s29 + $0x850] ss:$8 sps:$4 sm:$0xff]  }
  0x1f   : > { %3893 = vmatprep.subr.bf16.mxu0 %v4996_v10  ;;  %v5018_v25 = vld [vmem:[%s5856_s29 + $0x64] ss:$8 sps:$4 sm:$0xff]   ;;  %v5022_v27 = vld [vmem:[%s5856_s29 + $0x60] ss:$8 sps:$4 sm:$0xff]   ;;  %v5024_v29 = vld [vmem:[%s5856_s29 + $0x74] ss:$8 sps:$4 sm:$0xff]  }
  0x20   : > { %v5020_v26 = vld [vmem:[%s5856_s29 + $0x864] ss:$8 sps:$4 sm:$0xff]   ;;  %v5023_v28 = vld [vmem:[%s5856_s29 + $0x860] ss:$8 sps:$4 sm:$0xff]   ;;  %v5026_v30 = vld [vmem:[%s5856_s29 + $0x874] ss:$8 sps:$4 sm:$0xff]  }
  0x21   : > { %3383 = vmatpush1.bf16.msra.mxu1 %v4998_v11  ;;  %v5028_v31 = vld [vmem:[%s5856_s29 + $0x70] ss:$8 sps:$4 sm:$0xff]   ;;  %v5030_v33 = vld [vmem:[%s5856_s29 + $0x84] ss:$8 sps:$4 sm:$0xff]   ;;  %v5034_v35 = vld [vmem:[%s5856_s29 + $0x80] ss:$8 sps:$4 sm:$0xff]  }
  0x22   : > { %3895 = vmatpush1.bf16.msra.mxu0 %v4999_v12  ;;  %3385 = vmatprep.subr.bf16.mxu1 %v5000_v13  ;;  %v5029_v32 = vld [vmem:[%s5856_s29 + $0x870] ss:$8 sps:$4 sm:$0xff]   ;;  %v5032_v34 = vld [vmem:[%s5856_s29 + $0x884] ss:$8 sps:$4 sm:$0xff]   ;;  %v5035_v36 = vld [vmem:[%s5856_s29 + $0x880] ss:$8 sps:$4 sm:$0xff]  }
  0x23   : > { %3897 = vmatprep.subr.bf16.mxu0 %v5002_v14  ;;  %v5801_v37 = vmov 1983009808   ;;  %v5036_v40 = vld [vmem:[%s5856_s29 + $0x94] ss:$8 sps:$4 sm:$0xff]   ;;  %v5040_v42 = vld [vmem:[%s5856_s29 + $0x90] ss:$8 sps:$4 sm:$0xff]  }
  0x24   : > { %v1798_v38 = vunpack.c.l.s4 %v5801_v37  ;;  %v5038_v41 = vld [vmem:[%s5856_s29 + $0x894] ss:$8 sps:$4 sm:$0xff]   ;;  %v5898_v44 = vshrl.u32 %v1800_v39, 7  ;;  %v5041_v45 = vld [vmem:[%s5856_s29 + $0x890] ss:$8 sps:$4 sm:$0xff]   ;;  %v244_v53 = vld [vmem:[%s5851_s25] sm:$0xff] }
  0x25   : > { %3387 = vmatpush1.bf16.msra.mxu1 %v5004_v15  ;;  %v5042_v46 = vld [vmem:[%s5856_s29 + $0xa4] ss:$8 sps:$4 sm:$0xff]   ;;  %v5046_v48 = vld [vmem:[%s5856_s29 + $0xa0] ss:$8 sps:$4 sm:$0xff]   ;;  %v5048_v51 = vld [vmem:[%s5856_s29 + $0xb4] ss:$8 sps:$4 sm:$0xff]   ;;  %v1796_v11 = vcombine.high %v244_v53, %v244_v53 }
  0x26   : > { %3899 = vmatpush1.bf16.msra.mxu0 %v5005_v16  ;;  %3389 = vmatprep.subr.bf16.mxu1 %v5006_v17  ;;  %v1799_v43 = vunpack.c.0.s8 %v1798_v38  ;;  %v5044_v47 = vld [vmem:[%s5856_s29 + $0x8a4] ss:$8 sps:$4 sm:$0xff]   ;;  %v5047_v49 = vld [vmem:[%s5856_s29 + $0x8a0] ss:$8 sps:$4 sm:$0xff]   ;;  %v5050_v52 = vld [vmem:[%s5856_s29 + $0x8b4] ss:$8 sps:$4 sm:$0xff]  }
  0x27   : > { %3901 = vmatprep.subr.bf16.mxu0 %v5008_v18  ;;  %v5052_v54 = vld [vmem:[%s5856_s29 + $0xb0] ss:$8 sps:$4 sm:$0xff]   ;;  %v248_v57 = vld [vmem:[%s5851_s25 + $0x20] sm:$0xff]  ;;  %v5060_v1 = vld [vmem:[%s5856_s29 + $0xd4] ss:$8 sps:$4 sm:$0xff]   ;;  %p3312_p6 = scmp.ne.s32.totalorder %s5842_s19, 3 }
  0x28   : > { %v5906_v50 = vsub.s32 %v1799_v43, %v5898_v44  ;;  %v5053_v56 = vld [vmem:[%s5856_s29 + $0x8b0] ss:$8 sps:$4 sm:$0xff]   ;;  %v5054_v58 = vld [vmem:[%s5856_s29 + $0xc4] ss:$8 sps:$4 sm:$0xff]   ;;  %v5058_v63 = vld [vmem:[%s5856_s29 + $0xc0] ss:$8 sps:$4 sm:$0xff]   ;;  %v1864_v12 = vcombine.high %v248_v57, %v248_v57 }
  0x29   : > { %3391 = vmatpush1.bf16.msra.mxu1 %v5010_v19  ;;  %v5056_v59 = vld [vmem:[%s5856_s29 + $0x8c4] ss:$8 sps:$4 sm:$0xff]   ;;  %v5059_v0 = vld [vmem:[%s5856_s29 + $0x8c0] ss:$8 sps:$4 sm:$0xff]   ;;  %v5062_v2 = vld [vmem:[%s5856_s29 + $0x8d4] ss:$8 sps:$4 sm:$0xff]  }
  0x2a   : > { %3903 = vmatpush1.bf16.msra.mxu0 %v5011_v20  ;;  %3393 = vmatprep.subr.bf16.mxu1 %v5012_v21  ;;  %v1803_v55 = vrot.slane %v244_v53, %v5906_v50  ;;  %v1871_v61 = vrot.slane %v248_v57, %v5906_v50  ;;  %v5064_v3 = vld [vmem:[%s5856_s29 + $0xd0] ss:$8 sps:$4 sm:$0xff]   ;;  %v5066_v5 = vld [vmem:[%s5856_s29 + $0xe4] ss:$8 sps:$4 sm:$0xff]   ;;  %v5070_v7 = vld [vmem:[%s5856_s29 + $0xe0] ss:$8 sps:$4 sm:$0xff]   ;;  %v5935_v17 = vrot.slane %v1796_v11, %v5906_v50 }
  0x2b   : > { %3905 = vmatprep.subr.bf16.mxu0 %v5014_v22  ;;  %v5065_v4 = vld [vmem:[%s5856_s29 + $0x8d0] ss:$8 sps:$4 sm:$0xff]   ;;  %v5068_v6 = vld [vmem:[%s5856_s29 + $0x8e4] ss:$8 sps:$4 sm:$0xff]   ;;  %v5071_v8 = vld [vmem:[%s5856_s29 + $0x8e0] ss:$8 sps:$4 sm:$0xff]   ;;  %v5938_v18 = vrot.slane %v1864_v12, %v5906_v50 }
  0x2c   : > { %v1811_v60 = vcombine.high %v1803_v55, %v1803_v55  ;;  %v1879_v62 = vcombine.high %v1871_v61, %v1871_v61  ;;  %v5072_v9 = vld [vmem:[%s5856_s29 + $0xf4] ss:$8 sps:$4 sm:$0xff]   ;;  %v5076_v13 = vld [vmem:[%s5856_s29 + $0xf0] ss:$8 sps:$4 sm:$0xff]   ;;  %v5079_v15 = vld [vmem:[%s5856_s29 + $0x104] ss:$8 sps:$4 sm:$0xff]  }
  0x2d   : > { %3395 = vmatpush1.bf16.msra.mxu1 %v5016_v23  ;;  %v5074_v10 = vld [vmem:[%s5856_s29 + $0x8f4] ss:$8 sps:$4 sm:$0xff]   ;;  %v5077_v14 = vld [vmem:[%s5856_s29 + $0x8f0] ss:$8 sps:$4 sm:$0xff]   ;;  %v5083_v16 = vld [vmem:[%s5856_s29 + $0x904] ss:$8 sps:$4 sm:$0xff]   ;;  %v1812_v23 = vcombine.high %v5935_v17, %v5935_v17 }
  0x2e   : > { %3907 = vmatpush1.bf16.msra.mxu0 %v5017_v24  ;;  %3397 = vmatprep.subr.bf16.mxu1 %v5018_v25  ;;  %v5081_v19 = vld [vmem:[%s5856_s29 + $0x100] ss:$8 sps:$4 sm:$0xff]   ;;  %v5086_v21 = vld [vmem:[%s5856_s29 + $0x114] ss:$8 sps:$4 sm:$0xff]   ;;  %v1880_v24 = vcombine.high %v5938_v18, %v5938_v18  ;;  %v5088_v25 = vld [vmem:[%s5856_s29 + $0x110] ss:$8 sps:$4 sm:$0xff]  }
  0x2f   : > { %3909 = vmatprep.subr.bf16.mxu0 %v5020_v26  ;;  %2028 = vmatprep.mubr.f32.mxu1 %v1811_v60  ;;  %v5085_v20 = vld [vmem:[%s5856_s29 + $0x900] ss:$8 sps:$4 sm:$0xff]   ;;  %v5089_v22 = vld [vmem:[%s5856_s29 + $0x914] ss:$8 sps:$4 sm:$0xff]   ;;  %v5091_v26 = vld [vmem:[%s5856_s29 + $0x910] ss:$8 sps:$4 sm:$0xff]  }
  0x30   : > { %2596 = vmatprep.mubr.f32.mxu0 %v1879_v62  ;;  %v5106_v37 = vld [vmem:[%s5856_s29 + $0x140] ss:$8 sps:$4 sm:$0xff]   ;;  %v5110_v39 = vld [vmem:[%s5856_s29 + $0x154] ss:$8 sps:$4 sm:$0xff]   ;;  %v5116_v43 = vld [vmem:[%s5856_s29 + $0x164] ss:$8 sps:$4 sm:$0xff]  }
  0x31   : > { %3399 = vmatpush1.bf16.msra.mxu1 %v5022_v27  ;;  %v5092_v27 = vld [vmem:[%s5856_s29 + $0x124] ss:$8 sps:$4 sm:$0xff]   ;;  %v5109_v38 = vld [vmem:[%s5856_s29 + $0x940] ss:$8 sps:$4 sm:$0xff]   ;;  %v5134_v57 = vld [vmem:[%s5856_s29 + $0x194] ss:$8 sps:$4 sm:$0xff]  }
  0x32   : > { %3911 = vmatpush1.bf16.msra.mxu0 %v5023_v28  ;;  %3401 = vmatprep.subr.bf16.mxu1 %v5024_v29  ;;  %v5095_v28 = vld [vmem:[%s5856_s29 + $0x924] ss:$8 sps:$4 sm:$0xff]   ;;  %v5094_v29 = vld [vmem:[%s5856_s29 + $0x120] ss:$8 sps:$4 sm:$0xff]   ;;  %v5139_v60 = vld [vmem:[%s5856_s29 + $0x990] ss:$8 sps:$4 sm:$0xff]  }
  0x33   : > { %3913 = vmatprep.subr.bf16.mxu0 %v5026_v30  ;;  %v5097_v30 = vld [vmem:[%s5856_s29 + $0x920] ss:$8 sps:$4 sm:$0xff]   ;;  %v5128_v53 = vld [vmem:[%s5856_s29 + $0x184] ss:$8 sps:$4 sm:$0xff]   ;;  %v5160_v11 = vld [vmem:[%s5856_s29 + $0x1d0] ss:$8 sps:$4 sm:$0xff]  }
  0x34   : > { %v5143_v62 = vld [vmem:[%s5856_s29 + $0x9a4] ss:$8 sps:$4 sm:$0xff]   ;;  %v5163_v12 = vld [vmem:[%s5856_s29 + $0x9d0] ss:$8 sps:$4 sm:$0xff]   ;;  %vm5803_vm0 = vmmov (!%p3312_p6), 0   ;;  %vm3242_vm1 = vcmask (!%p3312_p6), 74752  }
  0x35   : > { %3403 = vmatpush1.bf16.msra.mxu1 %v5028_v31  ;;  %v5098_v31 = vld [vmem:[%s5856_s29 + $0x134] ss:$8 sps:$4 sm:$0xff]  }
  0x36   : > { %3915 = vmatpush1.bf16.msra.mxu0 %v5029_v32  ;;  %3405 = vmatprep.subr.bf16.mxu1 %v5030_v33  ;;  %v5101_v32 = vld [vmem:[%s5856_s29 + $0x934] ss:$8 sps:$4 sm:$0xff]   ;;  %v5100_v33 = vld [vmem:[%s5856_s29 + $0x130] ss:$8 sps:$4 sm:$0xff]  }
  0x37   : > { %3917 = vmatprep.subr.bf16.mxu0 %v5032_v34  ;;  %v5103_v34 = vld [vmem:[%s5856_s29 + $0x930] ss:$8 sps:$4 sm:$0xff]  }
  0x39   : > { %3407 = vmatpush1.bf16.msra.mxu1 %v5034_v35  ;;  %v5104_v35 = vld [vmem:[%s5856_s29 + $0x144] ss:$8 sps:$4 sm:$0xff]  }
  0x3a   : > { %3919 = vmatpush1.bf16.msra.mxu0 %v5035_v36  ;;  %3409 = vmatprep.subr.bf16.mxu1 %v5036_v40  ;;  %v5107_v36 = vld [vmem:[%s5856_s29 + $0x944] ss:$8 sps:$4 sm:$0xff]   ;;  %v5113_v40 = vld [vmem:[%s5856_s29 + $0x954] ss:$8 sps:$4 sm:$0xff]  }
  0x3b   : > { %3921 = vmatprep.subr.bf16.mxu0 %v5038_v41  ;;  %v5112_v41 = vld [vmem:[%s5856_s29 + $0x150] ss:$8 sps:$4 sm:$0xff]  }
  0x3d   : > { %3411 = vmatpush1.bf16.msra.mxu1 %v5040_v42  ;;  %v5115_v42 = vld [vmem:[%s5856_s29 + $0x950] ss:$8 sps:$4 sm:$0xff]  }
  0x3e   : > { %3923 = vmatpush1.bf16.msra.mxu0 %v5041_v45  ;;  %3413 = vmatprep.subr.bf16.mxu1 %v5042_v46  ;;  %v5119_v45 = vld [vmem:[%s5856_s29 + $0x964] ss:$8 sps:$4 sm:$0xff]   ;;  %v5118_v46 = vld [vmem:[%s5856_s29 + $0x160] ss:$8 sps:$4 sm:$0xff]  }
  0x3f   : > { %3925 = vmatprep.subr.bf16.mxu0 %v5044_v47  ;;  %v5121_v47 = vld [vmem:[%s5856_s29 + $0x960] ss:$8 sps:$4 sm:$0xff]  }
  0x41   : > { %3415 = vmatpush1.bf16.msra.mxu1 %v5046_v48  ;;  %v5122_v48 = vld [vmem:[%s5856_s29 + $0x174] ss:$8 sps:$4 sm:$0xff]  }
  0x42   : > { %3927 = vmatpush1.bf16.msra.mxu0 %v5047_v49  ;;  %3417 = vmatprep.subr.bf16.mxu1 %v5048_v51  ;;  %v5125_v49 = vld [vmem:[%s5856_s29 + $0x974] ss:$8 sps:$4 sm:$0xff]   ;;  %v5124_v51 = vld [vmem:[%s5856_s29 + $0x170] ss:$8 sps:$4 sm:$0xff]  }
  0x43   : > { %3929 = vmatprep.subr.bf16.mxu0 %v5050_v52  ;;  %v5127_v52 = vld [vmem:[%s5856_s29 + $0x970] ss:$8 sps:$4 sm:$0xff]  }
  0x45   : > { %3419 = vmatpush1.bf16.msra.mxu1 %v5052_v54  ;;  %v5131_v54 = vld [vmem:[%s5856_s29 + $0x984] ss:$8 sps:$4 sm:$0xff]  }
  0x46   : > { %3931 = vmatpush1.bf16.msra.mxu0 %v5053_v56  ;;  %3421 = vmatprep.subr.bf16.mxu1 %v5054_v58  ;;  %v5133_v56 = vld [vmem:[%s5856_s29 + $0x980] ss:$8 sps:$4 sm:$0xff]   ;;  %v5137_v58 = vld [vmem:[%s5856_s29 + $0x994] ss:$8 sps:$4 sm:$0xff]  }
  0x47   : > { %3933 = vmatprep.subr.bf16.mxu0 %v5056_v59  ;;  %v5136_v59 = vld [vmem:[%s5856_s29 + $0x190] ss:$8 sps:$4 sm:$0xff]  }
  0x49   : > { %3423 = vmatpush1.bf16.msra.mxu1 %v5058_v63  ;;  %v5142_v63 = vld [vmem:[%s5856_s29 + $0x1a0] ss:$8 sps:$4 sm:$0xff]  }
  0x4a   : > { %3935 = vmatpush1.bf16.msra.mxu0 %v5059_v0  ;;  %3425 = vmatprep.subr.bf16.mxu1 %v5060_v1  ;;  %v5145_v0 = vld [vmem:[%s5856_s29 + $0x9a0] ss:$8 sps:$4 sm:$0xff]   ;;  %v5146_v1 = vld [vmem:[%s5856_s29 + $0x1b4] ss:$8 sps:$4 sm:$0xff]  }
  0x4b   : > { %3937 = vmatprep.subr.bf16.mxu0 %v5062_v2  ;;  %v5149_v2 = vld [vmem:[%s5856_s29 + $0x9b4] ss:$8 sps:$4 sm:$0xff]  }
  0x4d   : > { %3427 = vmatpush1.bf16.msra.mxu1 %v5064_v3  ;;  %v5148_v3 = vld [vmem:[%s5856_s29 + $0x1b0] ss:$8 sps:$4 sm:$0xff]  }
  0x4e   : > { %3939 = vmatpush1.bf16.msra.mxu0 %v5065_v4  ;;  %3429 = vmatprep.subr.bf16.mxu1 %v5066_v5  ;;  %v5151_v4 = vld [vmem:[%s5856_s29 + $0x9b0] ss:$8 sps:$4 sm:$0xff]   ;;  %v5152_v5 = vld [vmem:[%s5856_s29 + $0x1c4] ss:$8 sps:$4 sm:$0xff]  }
  0x4f   : > { %3941 = vmatprep.subr.bf16.mxu0 %v5068_v6  ;;  %v5155_v6 = vld [vmem:[%s5856_s29 + $0x9c4] ss:$8 sps:$4 sm:$0xff]  }
  0x51   : > { %3431 = vmatpush1.bf16.msra.mxu1 %v5070_v7  ;;  %v5154_v7 = vld [vmem:[%s5856_s29 + $0x1c0] ss:$8 sps:$4 sm:$0xff]  }
  0x52   : > { %3943 = vmatpush1.bf16.msra.mxu0 %v5071_v8  ;;  %3433 = vmatprep.subr.bf16.mxu1 %v5072_v9  ;;  %v5157_v8 = vld [vmem:[%s5856_s29 + $0x9c0] ss:$8 sps:$4 sm:$0xff]   ;;  %v5158_v9 = vld [vmem:[%s5856_s29 + $0x1d4] ss:$8 sps:$4 sm:$0xff]  }
  0x53   : > { %3945 = vmatprep.subr.bf16.mxu0 %v5074_v10  ;;  %v5161_v10 = vld [vmem:[%s5856_s29 + $0x9d4] ss:$8 sps:$4 sm:$0xff]  }
  0x55   : > { %3435 = vmatpush1.bf16.msra.mxu1 %v5076_v13  ;;  %v5164_v13 = vld [vmem:[%s5856_s29 + $0x1e4] ss:$8 sps:$4 sm:$0xff]  }
  0x56   : > { %3947 = vmatpush1.bf16.msra.mxu0 %v5077_v14  ;;  %3437 = vmatprep.subr.bf16.mxu1 %v5079_v15  ;;  %v5167_v14 = vld [vmem:[%s5856_s29 + $0x9e4] ss:$8 sps:$4 sm:$0xff]   ;;  %v5166_v15 = vld [vmem:[%s5856_s29 + $0x1e0] ss:$8 sps:$4 sm:$0xff]  }
  0x57   : > { %3949 = vmatprep.subr.bf16.mxu0 %v5083_v16  ;;  %v5169_v16 = vld [vmem:[%s5856_s29 + $0x9e0] ss:$8 sps:$4 sm:$0xff]  }
  0x58   : > { %2029 = vmatmul.mubr.f32.vlgmr.msra.gmra.mrb[0].mxu1 %v1803_v55  ;;  %v5130_v55 = vld [vmem:[%s5856_s29 + $0x180] ss:$8 sps:$4 sm:$0xff]  }
  0x59   : > { %2597 = vmatmul.mubr.f32.vlgmr.msra.gmra.mrb[0].mxu0 %v1871_v61  ;;  %3439 = vmatpush1.bf16.msra.mxu1 %v5081_v19  ;;  %v5140_v61 = vld [vmem:[%s5856_s29 + $0x1a4] ss:$8 sps:$4 sm:$0xff]   ;;  %v5170_v19 = vld [vmem:[%s5856_s29 + $0x1f4] ss:$8 sps:$4 sm:$0xff]  }
  0x5a   : > { %3951 = vmatpush1.bf16.msra.mxu0 %v5085_v20  ;;  %3441 = vmatprep.subr.bf16.mxu1 %v5086_v21  ;;  %v5173_v20 = vld [vmem:[%s5856_s29 + $0x9f4] ss:$8 sps:$4 sm:$0xff]   ;;  %v5172_v21 = vld [vmem:[%s5856_s29 + $0x1f0] ss:$8 sps:$4 sm:$0xff]  }
  0x5b   : > { %3953 = vmatprep.subr.bf16.mxu0 %v5089_v22  ;;  %2099 = vmatprep.mubr.f32.mxu1 %v1812_v23  ;;  %v5175_v22 = vld [vmem:[%s5856_s29 + $0x9f0] ss:$8 sps:$4 sm:$0xff]   ;;  %v5176_v23 = vld [vmem:[%s5856_s29 + $0x204] ss:$8 sps:$4 sm:$0xff]  }
  0x5c   : > { %2667 = vmatprep.mubr.f32.mxu0 %v1880_v24  ;;  %v5179_v24 = vld [vmem:[%s5856_s29 + $0xa04] ss:$8 sps:$4 sm:$0xff]  }
  0x5d   : > { %3443 = vmatpush1.bf16.msra.mxu1 %v5088_v25  ;;  %v5178_v25 = vld [vmem:[%s5856_s29 + $0x200] ss:$8 sps:$4 sm:$0xff]  }
  0x5e   : > { %3955 = vmatpush1.bf16.msra.mxu0 %v5091_v26  ;;  %3445 = vmatprep.subr.bf16.mxu1 %v5092_v27  ;;  %v5181_v26 = vld [vmem:[%s5856_s29 + $0xa00] ss:$8 sps:$4 sm:$0xff]   ;;  %v5182_v27 = vld [vmem:[%s5856_s29 + $0x214] ss:$8 sps:$4 sm:$0xff]  }
  0x5f   : > { %3957 = vmatprep.subr.bf16.mxu0 %v5095_v28  ;;  %v6012_v28 = vld [vmem:[%s5851_s25 + $0x8] sm:$0xff] }
  0x61   : > { %3447 = vmatpush1.bf16.msra.mxu1 %v5094_v29  ;;  %v5185_v29 = vld [vmem:[%s5856_s29 + $0xa14] ss:$8 sps:$4 sm:$0xff]  }
  0x62   : > { %3959 = vmatpush1.bf16.msra.mxu0 %v5097_v30  ;;  %3449 = vmatprep.subr.bf16.mxu1 %v5098_v31  ;;  %v6017_v30 = vrot.slane %v6012_v28, %v5906_v50  ;;  %v6020_v31 = vld [vmem:[%s5851_s25 + $0x28] sm:$0xff] }
  0x63   : > { %3961 = vmatprep.subr.bf16.mxu0 %v5101_v32  ;;  %v5184_v32 = vld [vmem:[%s5856_s29 + $0x210] ss:$8 sps:$4 sm:$0xff]  }
  0x65   : > { %3451 = vmatpush1.bf16.msra.mxu1 %v5100_v33  ;;  %v5187_v33 = vld [vmem:[%s5856_s29 + $0xa10] ss:$8 sps:$4 sm:$0xff]  }
  0x66   : > { %3963 = vmatpush1.bf16.msra.mxu0 %v5103_v34  ;;  %3453 = vmatprep.subr.bf16.mxu1 %v5104_v35  ;;  %v1828_v34 = vcombine.high %v6017_v30, %v6017_v30  ;;  %v6030_v35 = vrot.slane %v6020_v31, %v5906_v50 }
  0x67   : > { %3965 = vmatprep.subr.bf16.mxu0 %v5107_v36  ;;  %v5188_v36 = vld [vmem:[%s5856_s29 + $0x224] ss:$8 sps:$4 sm:$0xff]  }
  0x69   : > { %3455 = vmatpush1.bf16.msra.mxu1 %v5106_v37  ;;  %v5190_v37 = vld [vmem:[%s5856_s29 + $0x220] ss:$8 sps:$4 sm:$0xff]  }
  0x6a   : > { %3967 = vmatpush1.bf16.msra.mxu0 %v5109_v38  ;;  %3457 = vmatprep.subr.bf16.mxu1 %v5110_v39  ;;  %v5193_v38 = vld [vmem:[%s5856_s29 + $0xa20] ss:$8 sps:$4 sm:$0xff]   ;;  %v5194_v39 = vld [vmem:[%s5856_s29 + $0x234] ss:$8 sps:$4 sm:$0xff]  }
  0x6b   : > { %3969 = vmatprep.subr.bf16.mxu0 %v5113_v40  ;;  %v5197_v40 = vld [vmem:[%s5856_s29 + $0xa34] ss:$8 sps:$4 sm:$0xff]  }
  0x6d   : > { %3459 = vmatpush1.bf16.msra.mxu1 %v5112_v41  ;;  %v5196_v41 = vld [vmem:[%s5856_s29 + $0x230] ss:$8 sps:$4 sm:$0xff]  }
  0x6e   : > { %3971 = vmatpush1.bf16.msra.mxu0 %v5115_v42  ;;  %3461 = vmatprep.subr.bf16.mxu1 %v5116_v43  ;;  %v5199_v42 = vld [vmem:[%s5856_s29 + $0xa30] ss:$8 sps:$4 sm:$0xff]   ;;  %v5200_v43 = vld [vmem:[%s5856_s29 + $0x244] ss:$8 sps:$4 sm:$0xff]  }
  0x6f   : > { %3973 = vmatprep.subr.bf16.mxu0 %v5119_v45  ;;  %v5203_v45 = vld [vmem:[%s5856_s29 + $0xa44] ss:$8 sps:$4 sm:$0xff]  }
  0x71   : > { %3463 = vmatpush1.bf16.msra.mxu1 %v5118_v46  ;;  %v5202_v46 = vld [vmem:[%s5856_s29 + $0x240] ss:$8 sps:$4 sm:$0xff]  }
  0x72   : > { %3975 = vmatpush1.bf16.msra.mxu0 %v5121_v47  ;;  %3465 = vmatprep.subr.bf16.mxu1 %v5122_v48  ;;  %v5205_v47 = vld [vmem:[%s5856_s29 + $0xa40] ss:$8 sps:$4 sm:$0xff]   ;;  %v5206_v48 = vld [vmem:[%s5856_s29 + $0x254] ss:$8 sps:$4 sm:$0xff]  }
  0x73   : > { %3977 = vmatprep.subr.bf16.mxu0 %v5125_v49  ;;  %v5209_v49 = vld [vmem:[%s5856_s29 + $0xa54] ss:$8 sps:$4 sm:$0xff]  }
  0x75   : > { %3467 = vmatpush1.bf16.msra.mxu1 %v5124_v51  ;;  %v5208_v51 = vld [vmem:[%s5856_s29 + $0x250] ss:$8 sps:$4 sm:$0xff]  }
  0x76   : > { %3979 = vmatpush1.bf16.msra.mxu0 %v5127_v52  ;;  %3469 = vmatprep.subr.bf16.mxu1 %v5128_v53  ;;  %v5211_v52 = vld [vmem:[%s5856_s29 + $0xa50] ss:$8 sps:$4 sm:$0xff]   ;;  %v5212_v53 = vld [vmem:[%s5856_s29 + $0x264] ss:$8 sps:$4 sm:$0xff]  }
  0x77   : > { %3981 = vmatprep.subr.bf16.mxu0 %v5131_v54  ;;  %v5215_v54 = vld [vmem:[%s5856_s29 + $0xa64] ss:$8 sps:$4 sm:$0xff]  }
  0x79   : > { %3471 = vmatpush1.bf16.msra.mxu1 %v5130_v55  ;;  %v5214_v55 = vld [vmem:[%s5856_s29 + $0x260] ss:$8 sps:$4 sm:$0xff]  }
  0x7a   : > { %3983 = vmatpush1.bf16.msra.mxu0 %v5133_v56  ;;  %3473 = vmatprep.subr.bf16.mxu1 %v5134_v57  ;;  %v5217_v56 = vld [vmem:[%s5856_s29 + $0xa60] ss:$8 sps:$4 sm:$0xff]   ;;  %v5218_v57 = vld [vmem:[%s5856_s29 + $0x274] ss:$8 sps:$4 sm:$0xff]  }
  0x7b   : > { %3985 = vmatprep.subr.bf16.mxu0 %v5137_v58  ;;  %v5221_v58 = vld [vmem:[%s5856_s29 + $0xa74] ss:$8 sps:$4 sm:$0xff]  }
  0x7d   : > { %3475 = vmatpush1.bf16.msra.mxu1 %v5136_v59  ;;  %v5220_v59 = vld [vmem:[%s5856_s29 + $0x270] ss:$8 sps:$4 sm:$0xff]  }
  0x7e   : > { %3987 = vmatpush1.bf16.msra.mxu0 %v5139_v60  ;;  %3477 = vmatprep.subr.bf16.mxu1 %v5140_v61  ;;  %v5223_v60 = vld [vmem:[%s5856_s29 + $0xa70] ss:$8 sps:$4 sm:$0xff]   ;;  %v5224_v61 = vld [vmem:[%s5856_s29 + $0x284] ss:$8 sps:$4 sm:$0xff]  }
  0x7f   : > { %3989 = vmatprep.subr.bf16.mxu0 %v5143_v62  ;;  %v5227_v62 = vld [vmem:[%s5856_s29 + $0xa84] ss:$8 sps:$4 sm:$0xff]  }
  0x81   : > { %3479 = vmatpush1.bf16.msra.mxu1 %v5142_v63  ;;  %v5226_v63 = vld [vmem:[%s5856_s29 + $0x280] ss:$8 sps:$4 sm:$0xff]  }
  0x82   : > { %3991 = vmatpush1.bf16.msra.mxu0 %v5145_v0  ;;  %3481 = vmatprep.subr.bf16.mxu1 %v5146_v1  ;;  %v5229_v0 = vld [vmem:[%s5856_s29 + $0xa80] ss:$8 sps:$4 sm:$0xff]   ;;  %v5230_v1 = vld [vmem:[%s5856_s29 + $0x294] ss:$8 sps:$4 sm:$0xff]  }
  0x83   : > { %3993 = vmatprep.subr.bf16.mxu0 %v5149_v2  ;;  %v5233_v2 = vld [vmem:[%s5856_s29 + $0xa94] ss:$8 sps:$4 sm:$0xff]  }
  0x85   : > { %3483 = vmatpush1.bf16.msra.mxu1 %v5148_v3  ;;  %v5232_v3 = vld [vmem:[%s5856_s29 + $0x290] ss:$8 sps:$4 sm:$0xff]  }
  0x86   : > { %3995 = vmatpush1.bf16.msra.mxu0 %v5151_v4  ;;  %3485 = vmatprep.subr.bf16.mxu1 %v5152_v5  ;;  %v5235_v4 = vld [vmem:[%s5856_s29 + $0xa90] ss:$8 sps:$4 sm:$0xff]   ;;  %v5236_v5 = vld [vmem:[%s5856_s29 + $0x2a4] ss:$8 sps:$4 sm:$0xff]  }
  0x87   : > { %3997 = vmatprep.subr.bf16.mxu0 %v5155_v6  ;;  %v5239_v6 = vld [vmem:[%s5856_s29 + $0xaa4] ss:$8 sps:$4 sm:$0xff]  }
  0x89   : > { %3487 = vmatpush1.bf16.msra.mxu1 %v5154_v7  ;;  %v5238_v7 = vld [vmem:[%s5856_s29 + $0x2a0] ss:$8 sps:$4 sm:$0xff]  }
  0x8a   : > { %3999 = vmatpush1.bf16.msra.mxu0 %v5157_v8  ;;  %3489 = vmatprep.subr.bf16.mxu1 %v5158_v9  ;;  %v5241_v8 = vld [vmem:[%s5856_s29 + $0xaa0] ss:$8 sps:$4 sm:$0xff]   ;;  %v5242_v9 = vld [vmem:[%s5856_s29 + $0x2b4] ss:$8 sps:$4 sm:$0xff]  }
  0x8b   : > { %4001 = vmatprep.subr.bf16.mxu0 %v5161_v10  ;;  %v5245_v10 = vld [vmem:[%s5856_s29 + $0xab4] ss:$8 sps:$4 sm:$0xff]  }
  0x8d   : > { %3491 = vmatpush1.bf16.msra.mxu1 %v5160_v11  ;;  %v5244_v11 = vld [vmem:[%s5856_s29 + $0x2b0] ss:$8 sps:$4 sm:$0xff]  }
  0x8e   : > { %4003 = vmatpush1.bf16.msra.mxu0 %v5163_v12  ;;  %3493 = vmatprep.subr.bf16.mxu1 %v5164_v13  ;;  %v5247_v12 = vld [vmem:[%s5856_s29 + $0xab0] ss:$8 sps:$4 sm:$0xff]   ;;  %v5248_v13 = vld [vmem:[%s5856_s29 + $0x2c4] ss:$8 sps:$4 sm:$0xff]  }
  0x8f   : > { %4005 = vmatprep.subr.bf16.mxu0 %v5167_v14  ;;  %v5251_v14 = vld [vmem:[%s5856_s29 + $0xac4] ss:$8 sps:$4 sm:$0xff]  }
  0x91   : > { %3495 = vmatpush1.bf16.msra.mxu1 %v5166_v15  ;;  %v5250_v15 = vld [vmem:[%s5856_s29 + $0x2c0] ss:$8 sps:$4 sm:$0xff]  }
  0x92   : > { %4007 = vmatpush1.bf16.msra.mxu0 %v5169_v16  ;;  %3497 = vmatprep.subr.bf16.mxu1 %v5170_v19  ;;  %v5253_v16 = vld [vmem:[%s5856_s29 + $0xac0] ss:$8 sps:$4 sm:$0xff]   ;;  %v5254_v19 = vld [vmem:[%s5856_s29 + $0x2d4] ss:$8 sps:$4 sm:$0xff]  }
  0x93   : > { %4009 = vmatprep.subr.bf16.mxu0 %v5173_v20  ;;  %v5257_v20 = vld [vmem:[%s5856_s29 + $0xad4] ss:$8 sps:$4 sm:$0xff]  }
  0x95   : > { %3499 = vmatpush1.bf16.msra.mxu1 %v5172_v21  ;;  %v5256_v21 = vld [vmem:[%s5856_s29 + $0x2d0] ss:$8 sps:$4 sm:$0xff]  }
  0x96   : > { %4011 = vmatpush1.bf16.msra.mxu0 %v5175_v22  ;;  %3501 = vmatprep.subr.bf16.mxu1 %v5176_v23  ;;  %v5259_v22 = vld [vmem:[%s5856_s29 + $0xad0] ss:$8 sps:$4 sm:$0xff]   ;;  %v5260_v23 = vld [vmem:[%s5856_s29 + $0x2e4] ss:$8 sps:$4 sm:$0xff]  }
  0x97   : > { %4013 = vmatprep.subr.bf16.mxu0 %v5179_v24  ;;  %v5263_v24 = vld [vmem:[%s5856_s29 + $0xae4] ss:$8 sps:$4 sm:$0xff]  }
  0x98   : > { %2100 = vmatmul.mubr.f32.vlgmr.msra.gmra.mrb[0].mxu1 %v5935_v17  ;;  %v5191_v17 = vld [vmem:[%s5856_s29 + $0xa24] ss:$8 sps:$4 sm:$0xff]  }
  0x99   : > { %2668 = vmatmul.mubr.f32.vlgmr.msra.gmra.mrb[0].mxu0 %v5938_v18  ;;  %3503 = vmatpush1.bf16.msra.mxu1 %v5178_v25  ;;  %v1896_v18 = vcombine.high %v6030_v35, %v6030_v35  ;;  %v5262_v25 = vld [vmem:[%s5856_s29 + $0x2e0] ss:$8 sps:$4 sm:$0xff]  }
  0x9a   : > { %4015 = vmatpush1.bf16.msra.mxu0 %v5181_v26  ;;  %3505 = vmatprep.subr.bf16.mxu1 %v5182_v27  ;;  %v5265_v26 = vld [vmem:[%s5856_s29 + $0xae0] ss:$8 sps:$4 sm:$0xff]   ;;  %v5266_v27 = vld [vmem:[%s5856_s29 + $0x2f4] ss:$8 sps:$4 sm:$0xff]  }
  0x9b   : > { %4017 = vmatprep.subr.bf16.mxu0 %v5185_v29  ;;  %2170 = vmatprep.mubr.f32.mxu1 %v1828_v34  ;;  %v5269_v29 = vld [vmem:[%s5856_s29 + $0xaf4] ss:$8 sps:$4 sm:$0xff]   ;;  %v5268_v34 = vld [vmem:[%s5856_s29 + $0x2f0] ss:$8 sps:$4 sm:$0xff]  }
  0x9c   : > { %2738 = vmatprep.mubr.f32.mxu0 %v1896_v18  ;;  %v5275_v18 = vld [vmem:[%s5856_s29 + $0xb04] ss:$8 sps:$4 sm:$0xff]  }
  0x9d   : > { %3507 = vmatpush1.bf16.msra.mxu1 %v5184_v32  ;;  %v1813_v32 = vcombine.high %v6012_v28, %v6012_v28 }
  0x9e   : > { %4019 = vmatpush1.bf16.msra.mxu0 %v5187_v33  ;;  %3509 = vmatprep.subr.bf16.mxu1 %v5188_v36  ;;  %v1881_v33 = vcombine.high %v6020_v31, %v6020_v31  ;;  %v5271_v36 = vld [vmem:[%s5856_s29 + $0xaf0] ss:$8 sps:$4 sm:$0xff]   ;;  %v5277_v31 = vld [vmem:[%s5856_s29 + $0xb00] ss:$8 sps:$4 sm:$0xff]  }
  0x9f   : > { %4021 = vmatprep.subr.bf16.mxu0 %v5191_v17  ;;  %v5272_v17 = vld [vmem:[%s5856_s29 + $0x304] ss:$8 sps:$4 sm:$0xff]  }
  0xa0   : > { %v6100_v28 = vrot.slane %v1881_v33, %v5906_v50  ;;  %v5355_v33 = vld [vmem:[%s5856_s29 + $0xbd0] ss:$8 sps:$4 sm:$0xff]  }
  0xa1   : > { %3511 = vmatpush1.bf16.msra.mxu1 %v5190_v37  ;;  %v6097_v37 = vrot.slane %v1813_v32, %v5906_v50  ;;  %v5352_v32 = vld [vmem:[%s5856_s29 + $0x3d0] ss:$8 sps:$4 sm:$0xff]  }
  0xa2   : > { %4023 = vmatpush1.bf16.msra.mxu0 %v5193_v38  ;;  %3513 = vmatprep.subr.bf16.mxu1 %v5194_v39  ;;  %v5274_v38 = vld [vmem:[%s5856_s29 + $0x300] ss:$8 sps:$4 sm:$0xff]   ;;  %v5278_v39 = vld [vmem:[%s5856_s29 + $0x314] ss:$8 sps:$4 sm:$0xff]  }
  0xa3   : > { %4025 = vmatprep.subr.bf16.mxu0 %v5197_v40  ;;  %v5281_v40 = vld [vmem:[%s5856_s29 + $0xb14] ss:$8 sps:$4 sm:$0xff]  }
  0xa5   : > { %3515 = vmatpush1.bf16.msra.mxu1 %v5196_v41  ;;  %v1829_v41 = vcombine.high %v6097_v37, %v6097_v37 }
  0xa6   : > { %4027 = vmatpush1.bf16.msra.mxu0 %v5199_v42  ;;  %3517 = vmatprep.subr.bf16.mxu1 %v5200_v43  ;;  %v1897_v42 = vcombine.high %v6100_v28, %v6100_v28  ;;  %v5280_v43 = vld [vmem:[%s5856_s29 + $0x310] ss:$8 sps:$4 sm:$0xff]  }
  0xa7   : > { %4029 = vmatprep.subr.bf16.mxu0 %v5203_v45  ;;  %v5283_v45 = vld [vmem:[%s5856_s29 + $0xb10] ss:$8 sps:$4 sm:$0xff]  }
  0xa9   : > { %3519 = vmatpush1.bf16.msra.mxu1 %v5202_v46  ;;  %v5284_v46 = vld [vmem:[%s5856_s29 + $0x324] ss:$8 sps:$4 sm:$0xff]  }
  0xaa   : > { %4031 = vmatpush1.bf16.msra.mxu0 %v5205_v47  ;;  %3521 = vmatprep.subr.bf16.mxu1 %v5206_v48  ;;  %v5287_v47 = vld [vmem:[%s5856_s29 + $0xb24] ss:$8 sps:$4 sm:$0xff]   ;;  %v5286_v48 = vld [vmem:[%s5856_s29 + $0x320] ss:$8 sps:$4 sm:$0xff]  }
  0xab   : > { %4033 = vmatprep.subr.bf16.mxu0 %v5209_v49  ;;  %v5293_v49 = vld [vmem:[%s5856_s29 + $0xb34] ss:$8 sps:$4 sm:$0xff]  }
  0xad   : > { %3523 = vmatpush1.bf16.msra.mxu1 %v5208_v51  ;;  %v5292_v51 = vld [vmem:[%s5856_s29 + $0x330] ss:$8 sps:$4 sm:$0xff]  }
  0xae   : > { %4035 = vmatpush1.bf16.msra.mxu0 %v5211_v52  ;;  %3525 = vmatprep.subr.bf16.mxu1 %v5212_v53  ;;  %v5295_v52 = vld [vmem:[%s5856_s29 + $0xb30] ss:$8 sps:$4 sm:$0xff]   ;;  %v5296_v53 = vld [vmem:[%s5856_s29 + $0x344] ss:$8 sps:$4 sm:$0xff]  }
  0xaf   : > { %4037 = vmatprep.subr.bf16.mxu0 %v5215_v54  ;;  %v5299_v54 = vld [vmem:[%s5856_s29 + $0xb44] ss:$8 sps:$4 sm:$0xff]  }
  0xb1   : > { %3527 = vmatpush1.bf16.msra.mxu1 %v5214_v55  ;;  %v5298_v55 = vld [vmem:[%s5856_s29 + $0x340] ss:$8 sps:$4 sm:$0xff]  }
  0xb2   : > { %4039 = vmatpush1.bf16.msra.mxu0 %v5217_v56  ;;  %3529 = vmatprep.subr.bf16.mxu1 %v5218_v57  ;;  %v5301_v56 = vld [vmem:[%s5856_s29 + $0xb40] ss:$8 sps:$4 sm:$0xff]   ;;  %v5302_v57 = vld [vmem:[%s5856_s29 + $0x354] ss:$8 sps:$4 sm:$0xff]  }
  0xb3   : > { %4041 = vmatprep.subr.bf16.mxu0 %v5221_v58  ;;  %v5305_v58 = vld [vmem:[%s5856_s29 + $0xb54] ss:$8 sps:$4 sm:$0xff]  }
  0xb5   : > { %3531 = vmatpush1.bf16.msra.mxu1 %v5220_v59  ;;  %v5304_v59 = vld [vmem:[%s5856_s29 + $0x350] ss:$8 sps:$4 sm:$0xff]  }
  0xb6   : > { %4043 = vmatpush1.bf16.msra.mxu0 %v5223_v60  ;;  %3533 = vmatprep.subr.bf16.mxu1 %v5224_v61  ;;  %v5307_v60 = vld [vmem:[%s5856_s29 + $0xb50] ss:$8 sps:$4 sm:$0xff]   ;;  %v5308_v61 = vld [vmem:[%s5856_s29 + $0x364] ss:$8 sps:$4 sm:$0xff]  }
  0xb7   : > { %4045 = vmatprep.subr.bf16.mxu0 %v5227_v62  ;;  %v5311_v62 = vld [vmem:[%s5856_s29 + $0xb64] ss:$8 sps:$4 sm:$0xff]  }
  0xb9   : > { %3535 = vmatpush1.bf16.msra.mxu1 %v5226_v63  ;;  %v5310_v63 = vld [vmem:[%s5856_s29 + $0x360] ss:$8 sps:$4 sm:$0xff]  }
  0xba   : > { %4047 = vmatpush1.bf16.msra.mxu0 %v5229_v0  ;;  %3537 = vmatprep.subr.bf16.mxu1 %v5230_v1  ;;  %v5313_v0 = vld [vmem:[%s5856_s29 + $0xb60] ss:$8 sps:$4 sm:$0xff]   ;;  %v5314_v1 = vld [vmem:[%s5856_s29 + $0x374] ss:$8 sps:$4 sm:$0xff]  }
  0xbb   : > { %4049 = vmatprep.subr.bf16.mxu0 %v5233_v2  ;;  %v5317_v2 = vld [vmem:[%s5856_s29 + $0xb74] ss:$8 sps:$4 sm:$0xff]  }
  0xbd   : > { %3539 = vmatpush1.bf16.msra.mxu1 %v5232_v3  ;;  %v5316_v3 = vld [vmem:[%s5856_s29 + $0x370] ss:$8 sps:$4 sm:$0xff]  }
  0xbe   : > { %4051 = vmatpush1.bf16.msra.mxu0 %v5235_v4  ;;  %3541 = vmatprep.subr.bf16.mxu1 %v5236_v5  ;;  %v5319_v4 = vld [vmem:[%s5856_s29 + $0xb70] ss:$8 sps:$4 sm:$0xff]   ;;  %v5320_v5 = vld [vmem:[%s5856_s29 + $0x384] ss:$8 sps:$4 sm:$0xff]  }
  0xbf   : > { %4053 = vmatprep.subr.bf16.mxu0 %v5239_v6  ;;  %v5323_v6 = vld [vmem:[%s5856_s29 + $0xb84] ss:$8 sps:$4 sm:$0xff]  }
  0xc1   : > { %3543 = vmatpush1.bf16.msra.mxu1 %v5238_v7  ;;  %v5322_v7 = vld [vmem:[%s5856_s29 + $0x380] ss:$8 sps:$4 sm:$0xff]  }
  0xc2   : > { %4055 = vmatpush1.bf16.msra.mxu0 %v5241_v8  ;;  %3545 = vmatprep.subr.bf16.mxu1 %v5242_v9  ;;  %v5325_v8 = vld [vmem:[%s5856_s29 + $0xb80] ss:$8 sps:$4 sm:$0xff]   ;;  %v5326_v9 = vld [vmem:[%s5856_s29 + $0x394] ss:$8 sps:$4 sm:$0xff]  }
  0xc3   : > { %4057 = vmatprep.subr.bf16.mxu0 %v5245_v10  ;;  %v5329_v10 = vld [vmem:[%s5856_s29 + $0xb94] ss:$8 sps:$4 sm:$0xff]  }
  0xc5   : > { %3547 = vmatpush1.bf16.msra.mxu1 %v5244_v11  ;;  %v5328_v11 = vld [vmem:[%s5856_s29 + $0x390] ss:$8 sps:$4 sm:$0xff]  }
  0xc6   : > { %4059 = vmatpush1.bf16.msra.mxu0 %v5247_v12  ;;  %3549 = vmatprep.subr.bf16.mxu1 %v5248_v13  ;;  %v5331_v12 = vld [vmem:[%s5856_s29 + $0xb90] ss:$8 sps:$4 sm:$0xff]   ;;  %v5332_v13 = vld [vmem:[%s5856_s29 + $0x3a4] ss:$8 sps:$4 sm:$0xff]  }
  0xc7   : > { %4061 = vmatprep.subr.bf16.mxu0 %v5251_v14  ;;  %v5335_v14 = vld [vmem:[%s5856_s29 + $0xba4] ss:$8 sps:$4 sm:$0xff]  }
  0xc9   : > { %3551 = vmatpush1.bf16.msra.mxu1 %v5250_v15  ;;  %v5334_v15 = vld [vmem:[%s5856_s29 + $0x3a0] ss:$8 sps:$4 sm:$0xff]  }
  0xca   : > { %4063 = vmatpush1.bf16.msra.mxu0 %v5253_v16  ;;  %3553 = vmatprep.subr.bf16.mxu1 %v5254_v19  ;;  %v5337_v16 = vld [vmem:[%s5856_s29 + $0xba0] ss:$8 sps:$4 sm:$0xff]   ;;  %v5338_v19 = vld [vmem:[%s5856_s29 + $0x3b4] ss:$8 sps:$4 sm:$0xff]  }
  0xcb   : > { %4065 = vmatprep.subr.bf16.mxu0 %v5257_v20  ;;  %v5341_v20 = vld [vmem:[%s5856_s29 + $0xbb4] ss:$8 sps:$4 sm:$0xff]  }
  0xcd   : > { %3555 = vmatpush1.bf16.msra.mxu1 %v5256_v21  ;;  %v5340_v21 = vld [vmem:[%s5856_s29 + $0x3b0] ss:$8 sps:$4 sm:$0xff]  }
  0xce   : > { %4067 = vmatpush1.bf16.msra.mxu0 %v5259_v22  ;;  %3557 = vmatprep.subr.bf16.mxu1 %v5260_v23  ;;  %v5343_v22 = vld [vmem:[%s5856_s29 + $0xbb0] ss:$8 sps:$4 sm:$0xff]   ;;  %v5344_v23 = vld [vmem:[%s5856_s29 + $0x3c4] ss:$8 sps:$4 sm:$0xff]  }
  0xcf   : > { %4069 = vmatprep.subr.bf16.mxu0 %v5263_v24  ;;  %v5347_v24 = vld [vmem:[%s5856_s29 + $0xbc4] ss:$8 sps:$4 sm:$0xff]  }
  0xd1   : > { %3559 = vmatpush1.bf16.msra.mxu1 %v5262_v25  ;;  %v5346_v25 = vld [vmem:[%s5856_s29 + $0x3c0] ss:$8 sps:$4 sm:$0xff]  }
  0xd2   : > { %4071 = vmatpush1.bf16.msra.mxu0 %v5265_v26  ;;  %3561 = vmatprep.subr.bf16.mxu1 %v5266_v27  ;;  %v5349_v26 = vld [vmem:[%s5856_s29 + $0xbc0] ss:$8 sps:$4 sm:$0xff]   ;;  %v5350_v27 = vld [vmem:[%s5856_s29 + $0x3d4] ss:$8 sps:$4 sm:$0xff]  }
  0xd3   : > { %4073 = vmatprep.subr.bf16.mxu0 %v5269_v29  ;;  %v5353_v29 = vld [vmem:[%s5856_s29 + $0xbd4] ss:$8 sps:$4 sm:$0xff]  }
  0xd5   : > { %3563 = vmatpush1.bf16.msra.mxu1 %v5268_v34  ;;  %v5356_v34 = vld [vmem:[%s5856_s29 + $0x3e4] ss:$8 sps:$4 sm:$0xff]  }
  0xd6   : > { %4075 = vmatpush1.bf16.msra.mxu0 %v5271_v36  ;;  %3565 = vmatprep.subr.bf16.mxu1 %v5272_v17  ;;  %v5359_v36 = vld [vmem:[%s5856_s29 + $0xbe4] ss:$8 sps:$4 sm:$0xff]   ;;  %v5358_v17 = vld [vmem:[%s5856_s29 + $0x3e0] ss:$8 sps:$4 sm:$0xff]  }
  0xd7   : > { %4077 = vmatprep.subr.bf16.mxu0 %v5275_v18  ;;  %v5361_v18 = vld [vmem:[%s5856_s29 + $0xbe0] ss:$8 sps:$4 sm:$0xff]  }
  0xd8   : > { %2171 = vmatmul.mubr.f32.vlgmr.msra.gmra.mrb[0].mxu1 %v6017_v30  ;;  %v5289_v30 = vld [vmem:[%s5856_s29 + $0xb20] ss:$8 sps:$4 sm:$0xff]  }
  0xd9   : > { %2739 = vmatmul.mubr.f32.vlgmr.msra.gmra.mrb[0].mxu0 %v6030_v35  ;;  %3567 = vmatpush1.bf16.msra.mxu1 %v5274_v38  ;;  %v5290_v35 = vld [vmem:[%s5856_s29 + $0x334] ss:$8 sps:$4 sm:$0xff]  }
  0xda   : > { %4079 = vmatpush1.bf16.msra.mxu0 %v5277_v31  ;;  %3569 = vmatprep.subr.bf16.mxu1 %v5278_v39  ;;  %v5362_v38 = vld [vmem:[%s5856_s29 + $0x3f4] ss:$8 sps:$4 sm:$0xff]  }
  0xdb   : > { %4081 = vmatprep.subr.bf16.mxu0 %v5281_v40  ;;  %2241 = vmatprep.mubr.f32.mxu1 %v1829_v41  ;;  %v5365_v31 = vld [vmem:[%s5856_s29 + $0xbf4] ss:$8 sps:$4 sm:$0xff]   ;;  %v5364_v41 = vld [vmem:[%s5856_s29 + $0x3f0] ss:$8 sps:$4 sm:$0xff]  }
  0xdc   : > { %2809 = vmatprep.mubr.f32.mxu0 %v1897_v42  ;;  %v6169_v39 = vld [vmem:[%s5851_s25 + $0x10] sm:$0xff] }
  0xdd   : > { %3571 = vmatpush1.bf16.msra.mxu1 %v5280_v43  ;;  %v6172_v40 = vld [vmem:[%s5851_s25 + $0x30] sm:$0xff]  ;;  %v5369_v43 = vld [vmem:[%s5856_s29 + $0x404] ss:$8 sps:$4 sm:$0xff]  }
  0xde   : > { %4083 = vmatpush1.bf16.msra.mxu0 %v5283_v45  ;;  %3573 = vmatprep.subr.bf16.mxu1 %v5284_v46  ;;  %v5367_v42 = vld [vmem:[%s5856_s29 + $0xbf0] ss:$8 sps:$4 sm:$0xff]   ;;  %v5373_v45 = vld [vmem:[%s5856_s29 + $0xc04] ss:$8 sps:$4 sm:$0xff]   ;;  %v6180_v46 = vrot.slane %v6169_v39, %v5906_v50 }
  0xdf   : > { %4085 = vmatprep.subr.bf16.mxu0 %v5287_v47  ;;  %v6184_v47 = vrot.slane %v6172_v40, %v5906_v50 }
  0xe1   : > { %3575 = vmatpush1.bf16.msra.mxu1 %v5286_v48  ;;  %v5371_v48 = vld [vmem:[%s5856_s29 + $0x400] ss:$8 sps:$4 sm:$0xff]  }
  0xe2   : > { %4087 = vmatpush1.bf16.msra.mxu0 %v5289_v30  ;;  %3577 = vmatprep.subr.bf16.mxu1 %v5290_v35  ;;  %v5375_v30 = vld [vmem:[%s5856_s29 + $0xc00] ss:$8 sps:$4 sm:$0xff]   ;;  %v5376_v35 = vld [vmem:[%s5856_s29 + $0x414] ss:$8 sps:$4 sm:$0xff]  }
  0xe3   : > { %4089 = vmatprep.subr.bf16.mxu0 %v5293_v49  ;;  %v5379_v49 = vld [vmem:[%s5856_s29 + $0xc14] ss:$8 sps:$4 sm:$0xff]  }
  0xe5   : > { %3579 = vmatpush1.bf16.msra.mxu1 %v5292_v51  ;;  %v1845_v51 = vcombine.high %v6180_v46, %v6180_v46 }
  0xe6   : > { %4091 = vmatpush1.bf16.msra.mxu0 %v5295_v52  ;;  %3581 = vmatprep.subr.bf16.mxu1 %v5296_v53  ;;  %v1913_v52 = vcombine.high %v6184_v47, %v6184_v47  ;;  %v5378_v53 = vld [vmem:[%s5856_s29 + $0x410] ss:$8 sps:$4 sm:$0xff]  }
  0xe7   : > { %4093 = vmatprep.subr.bf16.mxu0 %v5299_v54  ;;  %v5381_v54 = vld [vmem:[%s5856_s29 + $0xc10] ss:$8 sps:$4 sm:$0xff]  }
  0xe9   : > { %3583 = vmatpush1.bf16.msra.mxu1 %v5298_v55  ;;  %v5382_v55 = vld [vmem:[%s5856_s29 + $0x424] ss:$8 sps:$4 sm:$0xff]  }
  0xea   : > { %4095 = vmatpush1.bf16.msra.mxu0 %v5301_v56  ;;  %3585 = vmatprep.subr.bf16.mxu1 %v5302_v57  ;;  %v5385_v56 = vld [vmem:[%s5856_s29 + $0xc24] ss:$8 sps:$4 sm:$0xff]   ;;  %v5384_v57 = vld [vmem:[%s5856_s29 + $0x420] ss:$8 sps:$4 sm:$0xff]  }
  0xeb   : > { %4097 = vmatprep.subr.bf16.mxu0 %v5305_v58  ;;  %v5391_v58 = vld [vmem:[%s5856_s29 + $0xc34] ss:$8 sps:$4 sm:$0xff]  }
  0xed   : > { %3587 = vmatpush1.bf16.msra.mxu1 %v5304_v59  ;;  %v5390_v59 = vld [vmem:[%s5856_s29 + $0x430] ss:$8 sps:$4 sm:$0xff]  }
  0xee   : > { %4099 = vmatpush1.bf16.msra.mxu0 %v5307_v60  ;;  %3589 = vmatprep.subr.bf16.mxu1 %v5308_v61  ;;  %v5393_v60 = vld [vmem:[%s5856_s29 + $0xc30] ss:$8 sps:$4 sm:$0xff]   ;;  %v5394_v61 = vld [vmem:[%s5856_s29 + $0x444] ss:$8 sps:$4 sm:$0xff]  }
  0xef   : > { %4101 = vmatprep.subr.bf16.mxu0 %v5311_v62  ;;  %v5397_v62 = vld [vmem:[%s5856_s29 + $0xc44] ss:$8 sps:$4 sm:$0xff]  }
  0xf1   : > { %3591 = vmatpush1.bf16.msra.mxu1 %v5310_v63  ;;  %v5396_v63 = vld [vmem:[%s5856_s29 + $0x440] ss:$8 sps:$4 sm:$0xff]  }
  0xf2   : > { %4103 = vmatpush1.bf16.msra.mxu0 %v5313_v0  ;;  %3593 = vmatprep.subr.bf16.mxu1 %v5314_v1  ;;  %v5399_v0 = vld [vmem:[%s5856_s29 + $0xc40] ss:$8 sps:$4 sm:$0xff]   ;;  %v5400_v1 = vld [vmem:[%s5856_s29 + $0x454] ss:$8 sps:$4 sm:$0xff]  }
  0xf3   : > { %4105 = vmatprep.subr.bf16.mxu0 %v5317_v2  ;;  %v5403_v2 = vld [vmem:[%s5856_s29 + $0xc54] ss:$8 sps:$4 sm:$0xff]  }
  0xf5   : > { %3595 = vmatpush1.bf16.msra.mxu1 %v5316_v3  ;;  %v5402_v3 = vld [vmem:[%s5856_s29 + $0x450] ss:$8 sps:$4 sm:$0xff]  }
  0xf6   : > { %4107 = vmatpush1.bf16.msra.mxu0 %v5319_v4  ;;  %3597 = vmatprep.subr.bf16.mxu1 %v5320_v5  ;;  %v5405_v4 = vld [vmem:[%s5856_s29 + $0xc50] ss:$8 sps:$4 sm:$0xff]   ;;  %v5406_v5 = vld [vmem:[%s5856_s29 + $0x464] ss:$8 sps:$4 sm:$0xff]  }
  0xf7   : > { %4109 = vmatprep.subr.bf16.mxu0 %v5323_v6  ;;  %v5409_v6 = vld [vmem:[%s5856_s29 + $0xc64] ss:$8 sps:$4 sm:$0xff]  }
  0xf9   : > { %3599 = vmatpush1.bf16.msra.mxu1 %v5322_v7  ;;  %v5408_v7 = vld [vmem:[%s5856_s29 + $0x460] ss:$8 sps:$4 sm:$0xff]  }
  0xfa   : > { %4111 = vmatpush1.bf16.msra.mxu0 %v5325_v8  ;;  %3601 = vmatprep.subr.bf16.mxu1 %v5326_v9  ;;  %v5411_v8 = vld [vmem:[%s5856_s29 + $0xc60] ss:$8 sps:$4 sm:$0xff]   ;;  %v5412_v9 = vld [vmem:[%s5856_s29 + $0x474] ss:$8 sps:$4 sm:$0xff]  }
  0xfb   : > { %4113 = vmatprep.subr.bf16.mxu0 %v5329_v10  ;;  %v5415_v10 = vld [vmem:[%s5856_s29 + $0xc74] ss:$8 sps:$4 sm:$0xff]  }
  0xfd   : > { %3603 = vmatpush1.bf16.msra.mxu1 %v5328_v11  ;;  %v5414_v11 = vld [vmem:[%s5856_s29 + $0x470] ss:$8 sps:$4 sm:$0xff]  }
  0xfe   : > { %4115 = vmatpush1.bf16.msra.mxu0 %v5331_v12  ;;  %3605 = vmatprep.subr.bf16.mxu1 %v5332_v13  ;;  %v5417_v12 = vld [vmem:[%s5856_s29 + $0xc70] ss:$8 sps:$4 sm:$0xff]   ;;  %v5418_v13 = vld [vmem:[%s5856_s29 + $0x484] ss:$8 sps:$4 sm:$0xff]  }
  0xff   : > { %4117 = vmatprep.subr.bf16.mxu0 %v5335_v14  ;;  %v5421_v14 = vld [vmem:[%s5856_s29 + $0xc84] ss:$8 sps:$4 sm:$0xff]  }
 0x101   : > { %3607 = vmatpush1.bf16.msra.mxu1 %v5334_v15  ;;  %v5420_v15 = vld [vmem:[%s5856_s29 + $0x480] ss:$8 sps:$4 sm:$0xff]  }
 0x102   : > { %4119 = vmatpush1.bf16.msra.mxu0 %v5337_v16  ;;  %3609 = vmatprep.subr.bf16.mxu1 %v5338_v19  ;;  %v5423_v16 = vld [vmem:[%s5856_s29 + $0xc80] ss:$8 sps:$4 sm:$0xff]   ;;  %v5424_v19 = vld [vmem:[%s5856_s29 + $0x494] ss:$8 sps:$4 sm:$0xff]  }
 0x103   : > { %4121 = vmatprep.subr.bf16.mxu0 %v5341_v20  ;;  %v5427_v20 = vld [vmem:[%s5856_s29 + $0xc94] ss:$8 sps:$4 sm:$0xff]  }
 0x105   : > { %3611 = vmatpush1.bf16.msra.mxu1 %v5340_v21  ;;  %v5426_v21 = vld [vmem:[%s5856_s29 + $0x490] ss:$8 sps:$4 sm:$0xff]  }
 0x106   : > { %4123 = vmatpush1.bf16.msra.mxu0 %v5343_v22  ;;  %3613 = vmatprep.subr.bf16.mxu1 %v5344_v23  ;;  %v5429_v22 = vld [vmem:[%s5856_s29 + $0xc90] ss:$8 sps:$4 sm:$0xff]   ;;  %v5430_v23 = vld [vmem:[%s5856_s29 + $0x4a4] ss:$8 sps:$4 sm:$0xff]  }
 0x107   : > { %4125 = vmatprep.subr.bf16.mxu0 %v5347_v24  ;;  %v5433_v24 = vld [vmem:[%s5856_s29 + $0xca4] ss:$8 sps:$4 sm:$0xff]  }
 0x109   : > { %3615 = vmatpush1.bf16.msra.mxu1 %v5346_v25  ;;  %v5432_v25 = vld [vmem:[%s5856_s29 + $0x4a0] ss:$8 sps:$4 sm:$0xff]  }
 0x10a   : > { %4127 = vmatpush1.bf16.msra.mxu0 %v5349_v26  ;;  %3617 = vmatprep.subr.bf16.mxu1 %v5350_v27  ;;  %v5435_v26 = vld [vmem:[%s5856_s29 + $0xca0] ss:$8 sps:$4 sm:$0xff]   ;;  %v5436_v27 = vld [vmem:[%s5856_s29 + $0x4b4] ss:$8 sps:$4 sm:$0xff]  }
 0x10b   : > { %4129 = vmatprep.subr.bf16.mxu0 %v5353_v29  ;;  %v5439_v29 = vld [vmem:[%s5856_s29 + $0xcb4] ss:$8 sps:$4 sm:$0xff]  }
 0x10d   : > { %3619 = vmatpush1.bf16.msra.mxu1 %v5352_v32  ;;  %v5438_v32 = vld [vmem:[%s5856_s29 + $0x4b0] ss:$8 sps:$4 sm:$0xff]  }
 0x10e   : > { %4131 = vmatpush1.bf16.msra.mxu0 %v5355_v33  ;;  %3621 = vmatprep.subr.bf16.mxu1 %v5356_v34  ;;  %v5441_v33 = vld [vmem:[%s5856_s29 + $0xcb0] ss:$8 sps:$4 sm:$0xff]   ;;  %v5442_v34 = vld [vmem:[%s5856_s29 + $0x4c4] ss:$8 sps:$4 sm:$0xff]  }
 0x10f   : > { %4133 = vmatprep.subr.bf16.mxu0 %v5359_v36  ;;  %v5445_v36 = vld [vmem:[%s5856_s29 + $0xcc4] ss:$8 sps:$4 sm:$0xff]  }
 0x111   : > { %3623 = vmatpush1.bf16.msra.mxu1 %v5358_v17  ;;  %v5444_v17 = vld [vmem:[%s5856_s29 + $0x4c0] ss:$8 sps:$4 sm:$0xff]  }
 0x112   : > { %4135 = vmatpush1.bf16.msra.mxu0 %v5361_v18  ;;  %3625 = vmatprep.subr.bf16.mxu1 %v5362_v38  ;;  %v5447_v18 = vld [vmem:[%s5856_s29 + $0xcc0] ss:$8 sps:$4 sm:$0xff]   ;;  %v5448_v38 = vld [vmem:[%s5856_s29 + $0x4d4] ss:$8 sps:$4 sm:$0xff]  }
 0x113   : > { %4137 = vmatprep.subr.bf16.mxu0 %v5365_v31  ;;  %v5451_v31 = vld [vmem:[%s5856_s29 + $0xcd4] ss:$8 sps:$4 sm:$0xff]  }
 0x115   : > { %3627 = vmatpush1.bf16.msra.mxu1 %v5364_v41  ;;  %v5450_v41 = vld [vmem:[%s5856_s29 + $0x4d0] ss:$8 sps:$4 sm:$0xff]  }
 0x116   : > { %4139 = vmatpush1.bf16.msra.mxu0 %v5367_v42  ;;  %3629 = vmatprep.subr.bf16.mxu1 %v5369_v43  ;;  %v5453_v42 = vld [vmem:[%s5856_s29 + $0xcd0] ss:$8 sps:$4 sm:$0xff]   ;;  %v5454_v43 = vld [vmem:[%s5856_s29 + $0x4e4] ss:$8 sps:$4 sm:$0xff]  }
 0x117   : > { %4141 = vmatprep.subr.bf16.mxu0 %v5373_v45  ;;  %v5457_v45 = vld [vmem:[%s5856_s29 + $0xce4] ss:$8 sps:$4 sm:$0xff]  }
 0x118   : > { %2242 = vmatmul.mubr.f32.vlgmr.msra.gmra.mrb[0].mxu1 %v6097_v37  ;;  %v5387_v37 = vld [vmem:[%s5856_s29 + $0xc20] ss:$8 sps:$4 sm:$0xff]  }
 0x119   : > { %2810 = vmatmul.mubr.f32.vlgmr.msra.gmra.mrb[0].mxu0 %v6100_v28  ;;  %3631 = vmatpush1.bf16.msra.mxu1 %v5371_v48  ;;  %v5388_v28 = vld [vmem:[%s5856_s29 + $0x434] ss:$8 sps:$4 sm:$0xff]   ;;  %v5456_v48 = vld [vmem:[%s5856_s29 + $0x4e0] ss:$8 sps:$4 sm:$0xff]  }
 0x11a   : > { %4143 = vmatpush1.bf16.msra.mxu0 %v5375_v30  ;;  %3633 = vmatprep.subr.bf16.mxu1 %v5376_v35  ;;  %v5459_v30 = vld [vmem:[%s5856_s29 + $0xce0] ss:$8 sps:$4 sm:$0xff]   ;;  %v5460_v35 = vld [vmem:[%s5856_s29 + $0x4f4] ss:$8 sps:$4 sm:$0xff]  }
 0x11b   : > { %4145 = vmatprep.subr.bf16.mxu0 %v5379_v49  ;;  %2312 = vmatprep.mubr.f32.mxu1 %v1845_v51  ;;  %v5463_v49 = vld [vmem:[%s5856_s29 + $0xcf4] ss:$8 sps:$4 sm:$0xff]   ;;  %v5462_v51 = vld [vmem:[%s5856_s29 + $0x4f0] ss:$8 sps:$4 sm:$0xff]  }
 0x11c   : > { %2880 = vmatprep.mubr.f32.mxu0 %v1913_v52  ;;  %v1830_v52 = vcombine.high %v6169_v39, %v6169_v39 }
 0x11d   : > { %3635 = vmatpush1.bf16.msra.mxu1 %v5378_v53  ;;  %v1898_v53 = vcombine.high %v6172_v40, %v6172_v40  ;;  %v5471_v40 = vld [vmem:[%s5856_s29 + $0xd00] ss:$8 sps:$4 sm:$0xff]  }
 0x11e   : > { %4147 = vmatpush1.bf16.msra.mxu0 %v5381_v54  ;;  %3637 = vmatprep.subr.bf16.mxu1 %v5382_v55  ;;  %v5465_v54 = vld [vmem:[%s5856_s29 + $0xcf0] ss:$8 sps:$4 sm:$0xff]   ;;  %v5466_v55 = vld [vmem:[%s5856_s29 + $0x504] ss:$8 sps:$4 sm:$0xff]  }
 0x11f   : > { %4149 = vmatprep.subr.bf16.mxu0 %v5385_v56  ;;  %v5469_v56 = vld [vmem:[%s5856_s29 + $0xd04] ss:$8 sps:$4 sm:$0xff]   ;;  %v6265_v39 = vrot.slane %v1898_v53, %v5906_v50 }
 0x120   : > { %v5550_v53 = vld [vmem:[%s5856_s29 + $0x5e4] ss:$8 sps:$4 sm:$0xff]  }
 0x121   : > { %3639 = vmatpush1.bf16.msra.mxu1 %v5384_v57  ;;  %v5468_v57 = vld [vmem:[%s5856_s29 + $0x500] ss:$8 sps:$4 sm:$0xff]  }
 0x122   : > { %4151 = vmatpush1.bf16.msra.mxu0 %v5387_v37  ;;  %3641 = vmatprep.subr.bf16.mxu1 %v5388_v28  ;;  %v6262_v37 = vrot.slane %v1830_v52, %v5906_v50  ;;  %v5472_v28 = vld [vmem:[%s5856_s29 + $0x514] ss:$8 sps:$4 sm:$0xff]   ;;  %v5549_v52 = vld [vmem:[%s5856_s29 + $0xdd0] ss:$8 sps:$4 sm:$0xff]  }
 0x123   : > { %4153 = vmatprep.subr.bf16.mxu0 %v5391_v58  ;;  %v5475_v58 = vld [vmem:[%s5856_s29 + $0xd14] ss:$8 sps:$4 sm:$0xff]  }
 0x125   : > { %3643 = vmatpush1.bf16.msra.mxu1 %v5390_v59  ;;  %v1846_v59 = vcombine.high %v6262_v37, %v6262_v37 }
 0x126   : > { %4155 = vmatpush1.bf16.msra.mxu0 %v5393_v60  ;;  %3645 = vmatprep.subr.bf16.mxu1 %v5394_v61  ;;  %v1914_v60 = vcombine.high %v6265_v39, %v6265_v39  ;;  %v5474_v61 = vld [vmem:[%s5856_s29 + $0x510] ss:$8 sps:$4 sm:$0xff]  }
 0x127   : > { %4157 = vmatprep.subr.bf16.mxu0 %v5397_v62  ;;  %v5477_v62 = vld [vmem:[%s5856_s29 + $0xd10] ss:$8 sps:$4 sm:$0xff]  }
 0x129   : > { %3647 = vmatpush1.bf16.msra.mxu1 %v5396_v63  ;;  %v5478_v63 = vld [vmem:[%s5856_s29 + $0x524] ss:$8 sps:$4 sm:$0xff]  }
 0x12a   : > { %4159 = vmatpush1.bf16.msra.mxu0 %v5399_v0  ;;  %3649 = vmatprep.subr.bf16.mxu1 %v5400_v1  ;;  %v5481_v0 = vld [vmem:[%s5856_s29 + $0xd24] ss:$8 sps:$4 sm:$0xff]   ;;  %v5484_v1 = vld [vmem:[%s5856_s29 + $0x534] ss:$8 sps:$4 sm:$0xff]  }
 0x12b   : > { %4161 = vmatprep.subr.bf16.mxu0 %v5403_v2  ;;  %v5487_v2 = vld [vmem:[%s5856_s29 + $0xd34] ss:$8 sps:$4 sm:$0xff]  }
 0x12d   : > { %3651 = vmatpush1.bf16.msra.mxu1 %v5402_v3  ;;  %v5486_v3 = vld [vmem:[%s5856_s29 + $0x530] ss:$8 sps:$4 sm:$0xff]  }
 0x12e   : > { %4163 = vmatpush1.bf16.msra.mxu0 %v5405_v4  ;;  %3653 = vmatprep.subr.bf16.mxu1 %v5406_v5  ;;  %v5489_v4 = vld [vmem:[%s5856_s29 + $0xd30] ss:$8 sps:$4 sm:$0xff]   ;;  %v5490_v5 = vld [vmem:[%s5856_s29 + $0x544] ss:$8 sps:$4 sm:$0xff]  }
 0x12f   : > { %4165 = vmatprep.subr.bf16.mxu0 %v5409_v6  ;;  %v5493_v6 = vld [vmem:[%s5856_s29 + $0xd44] ss:$8 sps:$4 sm:$0xff]  }
 0x131   : > { %3655 = vmatpush1.bf16.msra.mxu1 %v5408_v7  ;;  %v5492_v7 = vld [vmem:[%s5856_s29 + $0x540] ss:$8 sps:$4 sm:$0xff]  }
 0x132   : > { %4167 = vmatpush1.bf16.msra.mxu0 %v5411_v8  ;;  %3657 = vmatprep.subr.bf16.mxu1 %v5412_v9  ;;  %v5495_v8 = vld [vmem:[%s5856_s29 + $0xd40] ss:$8 sps:$4 sm:$0xff]   ;;  %v5496_v9 = vld [vmem:[%s5856_s29 + $0x554] ss:$8 sps:$4 sm:$0xff]  }
 0x133   : > { %4169 = vmatprep.subr.bf16.mxu0 %v5415_v10  ;;  %v5499_v10 = vld [vmem:[%s5856_s29 + $0xd54] ss:$8 sps:$4 sm:$0xff]  }
 0x135   : > { %3659 = vmatpush1.bf16.msra.mxu1 %v5414_v11  ;;  %v5498_v11 = vld [vmem:[%s5856_s29 + $0x550] ss:$8 sps:$4 sm:$0xff]  }
 0x136   : > { %4171 = vmatpush1.bf16.msra.mxu0 %v5417_v12  ;;  %3661 = vmatprep.subr.bf16.mxu1 %v5418_v13  ;;  %v5501_v12 = vld [vmem:[%s5856_s29 + $0xd50] ss:$8 sps:$4 sm:$0xff]   ;;  %v5502_v13 = vld [vmem:[%s5856_s29 + $0x564] ss:$8 sps:$4 sm:$0xff]  }
 0x137   : > { %4173 = vmatprep.subr.bf16.mxu0 %v5421_v14  ;;  %v5505_v14 = vld [vmem:[%s5856_s29 + $0xd64] ss:$8 sps:$4 sm:$0xff]  }
 0x139   : > { %3663 = vmatpush1.bf16.msra.mxu1 %v5420_v15  ;;  %v5504_v15 = vld [vmem:[%s5856_s29 + $0x560] ss:$8 sps:$4 sm:$0xff]  }
 0x13a   : > { %4175 = vmatpush1.bf16.msra.mxu0 %v5423_v16  ;;  %3665 = vmatprep.subr.bf16.mxu1 %v5424_v19  ;;  %v5507_v16 = vld [vmem:[%s5856_s29 + $0xd60] ss:$8 sps:$4 sm:$0xff]   ;;  %v5508_v19 = vld [vmem:[%s5856_s29 + $0x574] ss:$8 sps:$4 sm:$0xff]  }
 0x13b   : > { %4177 = vmatprep.subr.bf16.mxu0 %v5427_v20  ;;  %v5511_v20 = vld [vmem:[%s5856_s29 + $0xd74] ss:$8 sps:$4 sm:$0xff]  }
 0x13d   : > { %3667 = vmatpush1.bf16.msra.mxu1 %v5426_v21  ;;  %v5510_v21 = vld [vmem:[%s5856_s29 + $0x570] ss:$8 sps:$4 sm:$0xff]  }
 0x13e   : > { %4179 = vmatpush1.bf16.msra.mxu0 %v5429_v22  ;;  %3669 = vmatprep.subr.bf16.mxu1 %v5430_v23  ;;  %v5513_v22 = vld [vmem:[%s5856_s29 + $0xd70] ss:$8 sps:$4 sm:$0xff]   ;;  %v5514_v23 = vld [vmem:[%s5856_s29 + $0x584] ss:$8 sps:$4 sm:$0xff]  }
 0x13f   : > { %4181 = vmatprep.subr.bf16.mxu0 %v5433_v24  ;;  %v5517_v24 = vld [vmem:[%s5856_s29 + $0xd84] ss:$8 sps:$4 sm:$0xff]  }
 0x141   : > { %3671 = vmatpush1.bf16.msra.mxu1 %v5432_v25  ;;  %v5516_v25 = vld [vmem:[%s5856_s29 + $0x580] ss:$8 sps:$4 sm:$0xff]  }
 0x142   : > { %4183 = vmatpush1.bf16.msra.mxu0 %v5435_v26  ;;  %3673 = vmatprep.subr.bf16.mxu1 %v5436_v27  ;;  %v5519_v26 = vld [vmem:[%s5856_s29 + $0xd80] ss:$8 sps:$4 sm:$0xff]   ;;  %v5520_v27 = vld [vmem:[%s5856_s29 + $0x594] ss:$8 sps:$4 sm:$0xff]  }
 0x143   : > { %4185 = vmatprep.subr.bf16.mxu0 %v5439_v29  ;;  %v5523_v29 = vld [vmem:[%s5856_s29 + $0xd94] ss:$8 sps:$4 sm:$0xff]  }
 0x145   : > { %3675 = vmatpush1.bf16.msra.mxu1 %v5438_v32  ;;  %v5522_v32 = vld [vmem:[%s5856_s29 + $0x590] ss:$8 sps:$4 sm:$0xff]  }
 0x146   : > { %4187 = vmatpush1.bf16.msra.mxu0 %v5441_v33  ;;  %3677 = vmatprep.subr.bf16.mxu1 %v5442_v34  ;;  %v5525_v33 = vld [vmem:[%s5856_s29 + $0xd90] ss:$8 sps:$4 sm:$0xff]   ;;  %v5526_v34 = vld [vmem:[%s5856_s29 + $0x5a4] ss:$8 sps:$4 sm:$0xff]  }
 0x147   : > { %4189 = vmatprep.subr.bf16.mxu0 %v5445_v36  ;;  %v5529_v36 = vld [vmem:[%s5856_s29 + $0xda4] ss:$8 sps:$4 sm:$0xff]  }
 0x149   : > { %3679 = vmatpush1.bf16.msra.mxu1 %v5444_v17  ;;  %v5528_v17 = vld [vmem:[%s5856_s29 + $0x5a0] ss:$8 sps:$4 sm:$0xff]  }
 0x14a   : > { %4191 = vmatpush1.bf16.msra.mxu0 %v5447_v18  ;;  %3681 = vmatprep.subr.bf16.mxu1 %v5448_v38  ;;  %v5531_v18 = vld [vmem:[%s5856_s29 + $0xda0] ss:$8 sps:$4 sm:$0xff]   ;;  %v5532_v38 = vld [vmem:[%s5856_s29 + $0x5b4] ss:$8 sps:$4 sm:$0xff]  }
 0x14b   : > { %4193 = vmatprep.subr.bf16.mxu0 %v5451_v31  ;;  %v5535_v31 = vld [vmem:[%s5856_s29 + $0xdb4] ss:$8 sps:$4 sm:$0xff]  }
 0x14d   : > { %3683 = vmatpush1.bf16.msra.mxu1 %v5450_v41  ;;  %v5534_v41 = vld [vmem:[%s5856_s29 + $0x5b0] ss:$8 sps:$4 sm:$0xff]  }
 0x14e   : > { %4195 = vmatpush1.bf16.msra.mxu0 %v5453_v42  ;;  %3685 = vmatprep.subr.bf16.mxu1 %v5454_v43  ;;  %v5537_v42 = vld [vmem:[%s5856_s29 + $0xdb0] ss:$8 sps:$4 sm:$0xff]   ;;  %v5538_v43 = vld [vmem:[%s5856_s29 + $0x5c4] ss:$8 sps:$4 sm:$0xff]  }
 0x14f   : > { %4197 = vmatprep.subr.bf16.mxu0 %v5457_v45  ;;  %v5541_v45 = vld [vmem:[%s5856_s29 + $0xdc4] ss:$8 sps:$4 sm:$0xff]  }
 0x151   : > { %3687 = vmatpush1.bf16.msra.mxu1 %v5456_v48  ;;  %v5540_v48 = vld [vmem:[%s5856_s29 + $0x5c0] ss:$8 sps:$4 sm:$0xff]  }
 0x152   : > { %4199 = vmatpush1.bf16.msra.mxu0 %v5459_v30  ;;  %3689 = vmatprep.subr.bf16.mxu1 %v5460_v35  ;;  %v5543_v30 = vld [vmem:[%s5856_s29 + $0xdc0] ss:$8 sps:$4 sm:$0xff]   ;;  %v5544_v35 = vld [vmem:[%s5856_s29 + $0x5d4] ss:$8 sps:$4 sm:$0xff]  }
 0x153   : > { %4201 = vmatprep.subr.bf16.mxu0 %v5463_v49  ;;  %v5547_v49 = vld [vmem:[%s5856_s29 + $0xdd4] ss:$8 sps:$4 sm:$0xff]  }
 0x155   : > { %3691 = vmatpush1.bf16.msra.mxu1 %v5462_v51  ;;  %v5546_v51 = vld [vmem:[%s5856_s29 + $0x5d0] ss:$8 sps:$4 sm:$0xff]  }
 0x156   : > { %4203 = vmatpush1.bf16.msra.mxu0 %v5465_v54  ;;  %3693 = vmatprep.subr.bf16.mxu1 %v5466_v55  ;;  %v5553_v54 = vld [vmem:[%s5856_s29 + $0xde4] ss:$8 sps:$4 sm:$0xff]   ;;  %v5552_v55 = vld [vmem:[%s5856_s29 + $0x5e0] ss:$8 sps:$4 sm:$0xff]  }
 0x157   : > { %4205 = vmatprep.subr.bf16.mxu0 %v5469_v56  ;;  %v5555_v56 = vld [vmem:[%s5856_s29 + $0xde0] ss:$8 sps:$4 sm:$0xff]  }
 0x158   : > { %2313 = vmatmul.mubr.f32.vlgmr.msra.gmra.mrb[0].mxu1 %v6180_v46  ;;  %v5480_v46 = vld [vmem:[%s5856_s29 + $0x520] ss:$8 sps:$4 sm:$0xff]  }
 0x159   : > { %2881 = vmatmul.mubr.f32.vlgmr.msra.gmra.mrb[0].mxu0 %v6184_v47  ;;  %3695 = vmatpush1.bf16.msra.mxu1 %v5468_v57  ;;  %v5483_v47 = vld [vmem:[%s5856_s29 + $0xd20] ss:$8 sps:$4 sm:$0xff]   ;;  %v5556_v57 = vld [vmem:[%s5856_s29 + $0x5f4] ss:$8 sps:$4 sm:$0xff]  }
 0x15a   : > { %4207 = vmatpush1.bf16.msra.mxu0 %v5471_v40  ;;  %3697 = vmatprep.subr.bf16.mxu1 %v5472_v28  ;;  %v5559_v40 = vld [vmem:[%s5856_s29 + $0xdf4] ss:$8 sps:$4 sm:$0xff]  }
 0x15b   : > { %4209 = vmatprep.subr.bf16.mxu0 %v5475_v58  ;;  %2383 = vmatprep.mubr.f32.mxu1 %v1846_v59  ;;  %v6333_v28 = vld [vmem:[%s5851_s25 + $0x18] sm:$0xff] }
 0x15c   : > { %2951 = vmatprep.mubr.f32.mxu0 %v1914_v60  ;;  %v6336_v58 = vld [vmem:[%s5851_s25 + $0x38] sm:$0xff] }
 0x15d   : > { %3699 = vmatpush1.bf16.msra.mxu1 %v5474_v61  ;;  %v5558_v59 = vld [vmem:[%s5856_s29 + $0x5f0] ss:$8 sps:$4 sm:$0xff]   ;;  %v5563_v61 = vld [vmem:[%s5856_s29 + $0x604] ss:$8 sps:$4 sm:$0xff]  }
 0x15e   : > { %4211 = vmatpush1.bf16.msra.mxu0 %v5477_v62  ;;  %3701 = vmatprep.subr.bf16.mxu1 %v5478_v63  ;;  %v5561_v60 = vld [vmem:[%s5856_s29 + $0xdf0] ss:$8 sps:$4 sm:$0xff]   ;;  %v5567_v62 = vld [vmem:[%s5856_s29 + $0xe04] ss:$8 sps:$4 sm:$0xff]   ;;  %v6344_v63 = vrot.slane %v6333_v28, %v5906_v50 }
 0x15f   : > { %4213 = vmatprep.subr.bf16.mxu0 %v5481_v0  ;;  %v6348_v0 = vrot.slane %v6336_v58, %v5906_v50 }
 0x161   : > { %3703 = vmatpush1.bf16.msra.mxu1 %v5480_v46  ;;  %v5565_v46 = vld [vmem:[%s5856_s29 + $0x600] ss:$8 sps:$4 sm:$0xff]  }
 0x162   : > { %4215 = vmatpush1.bf16.msra.mxu0 %v5483_v47  ;;  %3705 = vmatprep.subr.bf16.mxu1 %v5484_v1  ;;  %v5569_v47 = vld [vmem:[%s5856_s29 + $0xe00] ss:$8 sps:$4 sm:$0xff]   ;;  %v5570_v1 = vld [vmem:[%s5856_s29 + $0x614] ss:$8 sps:$4 sm:$0xff]  }
 0x163   : > { %4217 = vmatprep.subr.bf16.mxu0 %v5487_v2  ;;  %v5573_v2 = vld [vmem:[%s5856_s29 + $0xe14] ss:$8 sps:$4 sm:$0xff]  }
 0x165   : > { %3707 = vmatpush1.bf16.msra.mxu1 %v5486_v3  ;;  %v1862_v3 = vcombine.high %v6344_v63, %v6344_v63 }
 0x166   : > { %4219 = vmatpush1.bf16.msra.mxu0 %v5489_v4  ;;  %3709 = vmatprep.subr.bf16.mxu1 %v5490_v5  ;;  %v1930_v4 = vcombine.high %v6348_v0, %v6348_v0  ;;  %v5572_v5 = vld [vmem:[%s5856_s29 + $0x610] ss:$8 sps:$4 sm:$0xff]  }
 0x167   : > { %4221 = vmatprep.subr.bf16.mxu0 %v5493_v6  ;;  %v5575_v6 = vld [vmem:[%s5856_s29 + $0xe10] ss:$8 sps:$4 sm:$0xff]  }
 0x169   : > { %3711 = vmatpush1.bf16.msra.mxu1 %v5492_v7  ;;  %v5576_v7 = vld [vmem:[%s5856_s29 + $0x624] ss:$8 sps:$4 sm:$0xff]  }
 0x16a   : > { %4223 = vmatpush1.bf16.msra.mxu0 %v5495_v8  ;;  %3713 = vmatprep.subr.bf16.mxu1 %v5496_v9  ;;  %v5579_v8 = vld [vmem:[%s5856_s29 + $0xe24] ss:$8 sps:$4 sm:$0xff]   ;;  %v5582_v9 = vld [vmem:[%s5856_s29 + $0x634] ss:$8 sps:$4 sm:$0xff]  }
 0x16b   : > { %4225 = vmatprep.subr.bf16.mxu0 %v5499_v10  ;;  %v5585_v10 = vld [vmem:[%s5856_s29 + $0xe34] ss:$8 sps:$4 sm:$0xff]  }
 0x16d   : > { %3715 = vmatpush1.bf16.msra.mxu1 %v5498_v11  ;;  %v5584_v11 = vld [vmem:[%s5856_s29 + $0x630] ss:$8 sps:$4 sm:$0xff]  }
 0x16e   : > { %4227 = vmatpush1.bf16.msra.mxu0 %v5501_v12  ;;  %3717 = vmatprep.subr.bf16.mxu1 %v5502_v13  ;;  %v5587_v12 = vld [vmem:[%s5856_s29 + $0xe30] ss:$8 sps:$4 sm:$0xff]   ;;  %v5588_v13 = vld [vmem:[%s5856_s29 + $0x644] ss:$8 sps:$4 sm:$0xff]  }
 0x16f   : > { %4229 = vmatprep.subr.bf16.mxu0 %v5505_v14  ;;  %v5591_v14 = vld [vmem:[%s5856_s29 + $0xe44] ss:$8 sps:$4 sm:$0xff]  }
 0x171   : > { %3719 = vmatpush1.bf16.msra.mxu1 %v5504_v15  ;;  %v5590_v15 = vld [vmem:[%s5856_s29 + $0x640] ss:$8 sps:$4 sm:$0xff]  }
 0x172   : > { %4231 = vmatpush1.bf16.msra.mxu0 %v5507_v16  ;;  %3721 = vmatprep.subr.bf16.mxu1 %v5508_v19  ;;  %v5593_v16 = vld [vmem:[%s5856_s29 + $0xe40] ss:$8 sps:$4 sm:$0xff]   ;;  %v5594_v19 = vld [vmem:[%s5856_s29 + $0x654] ss:$8 sps:$4 sm:$0xff]  }
 0x173   : > { %4233 = vmatprep.subr.bf16.mxu0 %v5511_v20  ;;  %v5597_v20 = vld [vmem:[%s5856_s29 + $0xe54] ss:$8 sps:$4 sm:$0xff]  }
 0x175   : > { %3723 = vmatpush1.bf16.msra.mxu1 %v5510_v21  ;;  %v5596_v21 = vld [vmem:[%s5856_s29 + $0x650] ss:$8 sps:$4 sm:$0xff]  }
 0x176   : > { %4235 = vmatpush1.bf16.msra.mxu0 %v5513_v22  ;;  %3725 = vmatprep.subr.bf16.mxu1 %v5514_v23  ;;  %v5599_v22 = vld [vmem:[%s5856_s29 + $0xe50] ss:$8 sps:$4 sm:$0xff]   ;;  %v5600_v23 = vld [vmem:[%s5856_s29 + $0x664] ss:$8 sps:$4 sm:$0xff]  }
 0x177   : > { %4237 = vmatprep.subr.bf16.mxu0 %v5517_v24  ;;  %v5603_v24 = vld [vmem:[%s5856_s29 + $0xe64] ss:$8 sps:$4 sm:$0xff]  }
 0x179   : > { %3727 = vmatpush1.bf16.msra.mxu1 %v5516_v25  ;;  %v5602_v25 = vld [vmem:[%s5856_s29 + $0x660] ss:$8 sps:$4 sm:$0xff]  }
 0x17a   : > { %4239 = vmatpush1.bf16.msra.mxu0 %v5519_v26  ;;  %3729 = vmatprep.subr.bf16.mxu1 %v5520_v27  ;;  %v5605_v26 = vld [vmem:[%s5856_s29 + $0xe60] ss:$8 sps:$4 sm:$0xff]   ;;  %v5606_v27 = vld [vmem:[%s5856_s29 + $0x674] ss:$8 sps:$4 sm:$0xff]  }
 0x17b   : > { %4241 = vmatprep.subr.bf16.mxu0 %v5523_v29  ;;  %v5609_v29 = vld [vmem:[%s5856_s29 + $0xe74] ss:$8 sps:$4 sm:$0xff]  }
 0x17d   : > { %3731 = vmatpush1.bf16.msra.mxu1 %v5522_v32  ;;  %v5608_v32 = vld [vmem:[%s5856_s29 + $0x670] ss:$8 sps:$4 sm:$0xff]  }
 0x17e   : > { %4243 = vmatpush1.bf16.msra.mxu0 %v5525_v33  ;;  %3733 = vmatprep.subr.bf16.mxu1 %v5526_v34  ;;  %v5611_v33 = vld [vmem:[%s5856_s29 + $0xe70] ss:$8 sps:$4 sm:$0xff]   ;;  %v5612_v34 = vld [vmem:[%s5856_s29 + $0x684] ss:$8 sps:$4 sm:$0xff]  }
 0x17f   : > { %4245 = vmatprep.subr.bf16.mxu0 %v5529_v36  ;;  %v5615_v36 = vld [vmem:[%s5856_s29 + $0xe84] ss:$8 sps:$4 sm:$0xff]  }
 0x181   : > { %3735 = vmatpush1.bf16.msra.mxu1 %v5528_v17  ;;  %v5614_v17 = vld [vmem:[%s5856_s29 + $0x680] ss:$8 sps:$4 sm:$0xff]  }
 0x182   : > { %4247 = vmatpush1.bf16.msra.mxu0 %v5531_v18  ;;  %3737 = vmatprep.subr.bf16.mxu1 %v5532_v38  ;;  %v5617_v18 = vld [vmem:[%s5856_s29 + $0xe80] ss:$8 sps:$4 sm:$0xff]   ;;  %v5618_v38 = vld [vmem:[%s5856_s29 + $0x694] ss:$8 sps:$4 sm:$0xff]  }
 0x183   : > { %4249 = vmatprep.subr.bf16.mxu0 %v5535_v31  ;;  %v5621_v31 = vld [vmem:[%s5856_s29 + $0xe94] ss:$8 sps:$4 sm:$0xff]  }
 0x185   : > { %3739 = vmatpush1.bf16.msra.mxu1 %v5534_v41  ;;  %v5620_v41 = vld [vmem:[%s5856_s29 + $0x690] ss:$8 sps:$4 sm:$0xff]  }
 0x186   : > { %4251 = vmatpush1.bf16.msra.mxu0 %v5537_v42  ;;  %3741 = vmatprep.subr.bf16.mxu1 %v5538_v43  ;;  %v5623_v42 = vld [vmem:[%s5856_s29 + $0xe90] ss:$8 sps:$4 sm:$0xff]   ;;  %v5624_v43 = vld [vmem:[%s5856_s29 + $0x6a4] ss:$8 sps:$4 sm:$0xff]  }
 0x187   : > { %4253 = vmatprep.subr.bf16.mxu0 %v5541_v45  ;;  %v5627_v45 = vld [vmem:[%s5856_s29 + $0xea4] ss:$8 sps:$4 sm:$0xff]  }
 0x189   : > { %3743 = vmatpush1.bf16.msra.mxu1 %v5540_v48  ;;  %v5626_v48 = vld [vmem:[%s5856_s29 + $0x6a0] ss:$8 sps:$4 sm:$0xff]  }
 0x18a   : > { %4255 = vmatpush1.bf16.msra.mxu0 %v5543_v30  ;;  %3745 = vmatprep.subr.bf16.mxu1 %v5544_v35  ;;  %v5629_v30 = vld [vmem:[%s5856_s29 + $0xea0] ss:$8 sps:$4 sm:$0xff]   ;;  %v5630_v35 = vld [vmem:[%s5856_s29 + $0x6b4] ss:$8 sps:$4 sm:$0xff]  }
 0x18b   : > { %4257 = vmatprep.subr.bf16.mxu0 %v5547_v49  ;;  %v5633_v49 = vld [vmem:[%s5856_s29 + $0xeb4] ss:$8 sps:$4 sm:$0xff]  }
 0x18d   : > { %3747 = vmatpush1.bf16.msra.mxu1 %v5546_v51  ;;  %v5632_v51 = vld [vmem:[%s5856_s29 + $0x6b0] ss:$8 sps:$4 sm:$0xff]  }
 0x18e   : > { %4259 = vmatpush1.bf16.msra.mxu0 %v5549_v52  ;;  %3749 = vmatprep.subr.bf16.mxu1 %v5550_v53  ;;  %v5635_v52 = vld [vmem:[%s5856_s29 + $0xeb0] ss:$8 sps:$4 sm:$0xff]   ;;  %v5636_v53 = vld [vmem:[%s5856_s29 + $0x6c4] ss:$8 sps:$4 sm:$0xff]  }
 0x18f   : > { %4261 = vmatprep.subr.bf16.mxu0 %v5553_v54  ;;  %v5639_v54 = vld [vmem:[%s5856_s29 + $0xec4] ss:$8 sps:$4 sm:$0xff]  }
 0x191   : > { %3751 = vmatpush1.bf16.msra.mxu1 %v5552_v55  ;;  %v5638_v55 = vld [vmem:[%s5856_s29 + $0x6c0] ss:$8 sps:$4 sm:$0xff]  }
 0x192   : > { %4263 = vmatpush1.bf16.msra.mxu0 %v5555_v56  ;;  %3753 = vmatprep.subr.bf16.mxu1 %v5556_v57  ;;  %v5641_v56 = vld [vmem:[%s5856_s29 + $0xec0] ss:$8 sps:$4 sm:$0xff]   ;;  %v5642_v57 = vld [vmem:[%s5856_s29 + $0x6d4] ss:$8 sps:$4 sm:$0xff]  }
 0x193   : > { %4265 = vmatprep.subr.bf16.mxu0 %v5559_v40  ;;  %v5645_v40 = vld [vmem:[%s5856_s29 + $0xed4] ss:$8 sps:$4 sm:$0xff]  }
 0x195   : > { %3755 = vmatpush1.bf16.msra.mxu1 %v5558_v59  ;;  %v5644_v59 = vld [vmem:[%s5856_s29 + $0x6d0] ss:$8 sps:$4 sm:$0xff]  }
 0x196   : > { %4267 = vmatpush1.bf16.msra.mxu0 %v5561_v60  ;;  %3757 = vmatprep.subr.bf16.mxu1 %v5563_v61  ;;  %v5647_v60 = vld [vmem:[%s5856_s29 + $0xed0] ss:$8 sps:$4 sm:$0xff]   ;;  %v5648_v61 = vld [vmem:[%s5856_s29 + $0x6e4] ss:$8 sps:$4 sm:$0xff]  }
 0x197   : > { %4269 = vmatprep.subr.bf16.mxu0 %v5567_v62  ;;  %v5651_v62 = vld [vmem:[%s5856_s29 + $0xee4] ss:$8 sps:$4 sm:$0xff]  }
 0x198   : > { %2384 = vmatmul.mubr.f32.vlgmr.msra.gmra.mrb[0].mxu1 %v6262_v37  ;;  %v5578_v37 = vld [vmem:[%s5856_s29 + $0x620] ss:$8 sps:$4 sm:$0xff]  }
 0x199   : > { %2952 = vmatmul.mubr.f32.vlgmr.msra.gmra.mrb[0].mxu0 %v6265_v39  ;;  %3759 = vmatpush1.bf16.msra.mxu1 %v5565_v46  ;;  %v5581_v39 = vld [vmem:[%s5856_s29 + $0xe20] ss:$8 sps:$4 sm:$0xff]  }
 0x19a   : > { %4271 = vmatpush1.bf16.msra.mxu0 %v5569_v47  ;;  %3761 = vmatprep.subr.bf16.mxu1 %v5570_v1  ;;  %v5650_v46 = vld [vmem:[%s5856_s29 + $0x6e0] ss:$8 sps:$4 sm:$0xff]   ;;  %v5654_v1 = vld [vmem:[%s5856_s29 + $0x6f4] ss:$8 sps:$4 sm:$0xff]  }
 0x19b   : > { %4273 = vmatprep.subr.bf16.mxu0 %v5573_v2  ;;  %2454 = vmatprep.mubr.f32.mxu1 %v1862_v3  ;;  %v5653_v47 = vld [vmem:[%s5856_s29 + $0xee0] ss:$8 sps:$4 sm:$0xff]   ;;  %v5657_v2 = vld [vmem:[%s5856_s29 + $0xef4] ss:$8 sps:$4 sm:$0xff]   ;;  %v1847_v3 = vcombine.high %v6333_v28, %v6333_v28 }
 0x19c   : > { %3022 = vmatprep.mubr.f32.mxu0 %v1930_v4  ;;  %v1915_v4 = vcombine.high %v6336_v58, %v6336_v58  ;;  %v5662_v28 = vld [vmem:[%s5856_s29 + $0x700] ss:$8 sps:$4 sm:$0xff]  }
 0x19d   : > { %3763 = vmatpush1.bf16.msra.mxu1 %v5572_v5  ;;  %v5656_v5 = vld [vmem:[%s5856_s29 + $0x6f0] ss:$8 sps:$4 sm:$0xff]   ;;  %v5665_v58 = vld [vmem:[%s5856_s29 + $0xf00] ss:$8 sps:$4 sm:$0xff]  }
 0x19e   : > { %4275 = vmatpush1.bf16.msra.mxu0 %v5575_v6  ;;  %3765 = vmatprep.subr.bf16.mxu1 %v5576_v7  ;;  %v5659_v6 = vld [vmem:[%s5856_s29 + $0xef0] ss:$8 sps:$4 sm:$0xff]   ;;  %v5660_v7 = vld [vmem:[%s5856_s29 + $0x704] ss:$8 sps:$4 sm:$0xff]  }
 0x19f   : > { %4277 = vmatprep.subr.bf16.mxu0 %v5579_v8  ;;  %v5663_v8 = vld [vmem:[%s5856_s29 + $0xf04] ss:$8 sps:$4 sm:$0xff]  }
 0x1a1   : > { %3767 = vmatpush1.bf16.msra.mxu1 %v5578_v37  ;;  %v6425_v37 = vrot.slane %v1847_v3, %v5906_v50  ;;  %v5740_v3 = vld [vmem:[%s5856_s29 + $0x7d0] ss:$8 sps:$4 sm:$0xff]  }
 0x1a2   : > { %4279 = vmatpush1.bf16.msra.mxu0 %v5581_v39  ;;  %3769 = vmatprep.subr.bf16.mxu1 %v5582_v9  ;;  %v6428_v39 = vrot.slane %v1915_v4, %v5906_v50  ;;  %v5666_v9 = vld [vmem:[%s5856_s29 + $0x714] ss:$8 sps:$4 sm:$0xff]   ;;  %v5743_v4 = vld [vmem:[%s5856_s29 + $0xfd0] ss:$8 sps:$4 sm:$0xff]  }
 0x1a3   : > { %4281 = vmatprep.subr.bf16.mxu0 %v5585_v10  ;;  %v5669_v10 = vld [vmem:[%s5856_s29 + $0xf14] ss:$8 sps:$4 sm:$0xff]  }
 0x1a5   : > { %3771 = vmatpush1.bf16.msra.mxu1 %v5584_v11  ;;  %v1863_v11 = vcombine.high %v6425_v37, %v6425_v37 }
 0x1a6   : > { %4283 = vmatpush1.bf16.msra.mxu0 %v5587_v12  ;;  %3773 = vmatprep.subr.bf16.mxu1 %v5588_v13  ;;  %v1931_v12 = vcombine.high %v6428_v39, %v6428_v39  ;;  %v5668_v13 = vld [vmem:[%s5856_s29 + $0x710] ss:$8 sps:$4 sm:$0xff]  }
 0x1a7   : > { %4285 = vmatprep.subr.bf16.mxu0 %v5591_v14  ;;  %v5671_v14 = vld [vmem:[%s5856_s29 + $0xf10] ss:$8 sps:$4 sm:$0xff]  }
 0x1a9   : > { %3775 = vmatpush1.bf16.msra.mxu1 %v5590_v15  ;;  %v5672_v15 = vld [vmem:[%s5856_s29 + $0x724] ss:$8 sps:$4 sm:$0xff]  }
 0x1aa   : > { %4287 = vmatpush1.bf16.msra.mxu0 %v5593_v16  ;;  %3777 = vmatprep.subr.bf16.mxu1 %v5594_v19  ;;  %v5675_v16 = vld [vmem:[%s5856_s29 + $0xf24] ss:$8 sps:$4 sm:$0xff]   ;;  %v5678_v19 = vld [vmem:[%s5856_s29 + $0x734] ss:$8 sps:$4 sm:$0xff]  }
 0x1ab   : > { %4289 = vmatprep.subr.bf16.mxu0 %v5597_v20  ;;  %v5681_v20 = vld [vmem:[%s5856_s29 + $0xf34] ss:$8 sps:$4 sm:$0xff]  }
 0x1ad   : > { %3779 = vmatpush1.bf16.msra.mxu1 %v5596_v21  ;;  %v5680_v21 = vld [vmem:[%s5856_s29 + $0x730] ss:$8 sps:$4 sm:$0xff]  }
 0x1ae   : > { %4291 = vmatpush1.bf16.msra.mxu0 %v5599_v22  ;;  %3781 = vmatprep.subr.bf16.mxu1 %v5600_v23  ;;  %v5683_v22 = vld [vmem:[%s5856_s29 + $0xf30] ss:$8 sps:$4 sm:$0xff]   ;;  %v5684_v23 = vld [vmem:[%s5856_s29 + $0x744] ss:$8 sps:$4 sm:$0xff]  }
 0x1af   : > { %4293 = vmatprep.subr.bf16.mxu0 %v5603_v24  ;;  %v5687_v24 = vld [vmem:[%s5856_s29 + $0xf44] ss:$8 sps:$4 sm:$0xff]  }
 0x1b1   : > { %3783 = vmatpush1.bf16.msra.mxu1 %v5602_v25  ;;  %v5686_v25 = vld [vmem:[%s5856_s29 + $0x740] ss:$8 sps:$4 sm:$0xff]  }
 0x1b2   : > { %4295 = vmatpush1.bf16.msra.mxu0 %v5605_v26  ;;  %3785 = vmatprep.subr.bf16.mxu1 %v5606_v27  ;;  %v5689_v26 = vld [vmem:[%s5856_s29 + $0xf40] ss:$8 sps:$4 sm:$0xff]   ;;  %v5690_v27 = vld [vmem:[%s5856_s29 + $0x754] ss:$8 sps:$4 sm:$0xff]  }
 0x1b3   : > { %4297 = vmatprep.subr.bf16.mxu0 %v5609_v29  ;;  %v5693_v29 = vld [vmem:[%s5856_s29 + $0xf54] ss:$8 sps:$4 sm:$0xff]  }
 0x1b5   : > { %3787 = vmatpush1.bf16.msra.mxu1 %v5608_v32  ;;  %v5692_v32 = vld [vmem:[%s5856_s29 + $0x750] ss:$8 sps:$4 sm:$0xff]  }
 0x1b6   : > { %4299 = vmatpush1.bf16.msra.mxu0 %v5611_v33  ;;  %3789 = vmatprep.subr.bf16.mxu1 %v5612_v34  ;;  %v5695_v33 = vld [vmem:[%s5856_s29 + $0xf50] ss:$8 sps:$4 sm:$0xff]   ;;  %v5696_v34 = vld [vmem:[%s5856_s29 + $0x764] ss:$8 sps:$4 sm:$0xff]  }
 0x1b7   : > { %4301 = vmatprep.subr.bf16.mxu0 %v5615_v36  ;;  %v5699_v36 = vld [vmem:[%s5856_s29 + $0xf64] ss:$8 sps:$4 sm:$0xff]  }
 0x1b9   : > { %3791 = vmatpush1.bf16.msra.mxu1 %v5614_v17  ;;  %v5698_v17 = vld [vmem:[%s5856_s29 + $0x760] ss:$8 sps:$4 sm:$0xff]  }
 0x1ba   : > { %4303 = vmatpush1.bf16.msra.mxu0 %v5617_v18  ;;  %3793 = vmatprep.subr.bf16.mxu1 %v5618_v38  ;;  %v5701_v18 = vld [vmem:[%s5856_s29 + $0xf60] ss:$8 sps:$4 sm:$0xff]   ;;  %v5702_v38 = vld [vmem:[%s5856_s29 + $0x774] ss:$8 sps:$4 sm:$0xff]  }
 0x1bb   : > { %4305 = vmatprep.subr.bf16.mxu0 %v5621_v31  ;;  %v5705_v31 = vld [vmem:[%s5856_s29 + $0xf74] ss:$8 sps:$4 sm:$0xff]  }
 0x1bd   : > { %3795 = vmatpush1.bf16.msra.mxu1 %v5620_v41  ;;  %v5704_v41 = vld [vmem:[%s5856_s29 + $0x770] ss:$8 sps:$4 sm:$0xff]  }
 0x1be   : > { %4307 = vmatpush1.bf16.msra.mxu0 %v5623_v42  ;;  %3797 = vmatprep.subr.bf16.mxu1 %v5624_v43  ;;  %v5707_v42 = vld [vmem:[%s5856_s29 + $0xf70] ss:$8 sps:$4 sm:$0xff]   ;;  %v5708_v43 = vld [vmem:[%s5856_s29 + $0x784] ss:$8 sps:$4 sm:$0xff]  }
 0x1bf   : > { %4309 = vmatprep.subr.bf16.mxu0 %v5627_v45  ;;  %v5711_v45 = vld [vmem:[%s5856_s29 + $0xf84] ss:$8 sps:$4 sm:$0xff]  }
 0x1c1   : > { %3799 = vmatpush1.bf16.msra.mxu1 %v5626_v48  ;;  %v5710_v48 = vld [vmem:[%s5856_s29 + $0x780] ss:$8 sps:$4 sm:$0xff]  }
 0x1c2   : > { %4311 = vmatpush1.bf16.msra.mxu0 %v5629_v30  ;;  %3801 = vmatprep.subr.bf16.mxu1 %v5630_v35  ;;  %v5713_v30 = vld [vmem:[%s5856_s29 + $0xf80] ss:$8 sps:$4 sm:$0xff]   ;;  %v5714_v35 = vld [vmem:[%s5856_s29 + $0x794] ss:$8 sps:$4 sm:$0xff]  }
 0x1c3   : > { %4313 = vmatprep.subr.bf16.mxu0 %v5633_v49  ;;  %v5717_v49 = vld [vmem:[%s5856_s29 + $0xf94] ss:$8 sps:$4 sm:$0xff]  }
 0x1c5   : > { %3803 = vmatpush1.bf16.msra.mxu1 %v5632_v51  ;;  %v5716_v51 = vld [vmem:[%s5856_s29 + $0x790] ss:$8 sps:$4 sm:$0xff]  }
 0x1c6   : > { %4315 = vmatpush1.bf16.msra.mxu0 %v5635_v52  ;;  %3805 = vmatprep.subr.bf16.mxu1 %v5636_v53  ;;  %v5719_v52 = vld [vmem:[%s5856_s29 + $0xf90] ss:$8 sps:$4 sm:$0xff]   ;;  %v5720_v53 = vld [vmem:[%s5856_s29 + $0x7a4] ss:$8 sps:$4 sm:$0xff]  }
 0x1c7   : > { %4317 = vmatprep.subr.bf16.mxu0 %v5639_v54  ;;  %v5723_v54 = vld [vmem:[%s5856_s29 + $0xfa4] ss:$8 sps:$4 sm:$0xff]  }
 0x1c9   : > { %3807 = vmatpush1.bf16.msra.mxu1 %v5638_v55  ;;  %v5722_v55 = vld [vmem:[%s5856_s29 + $0x7a0] ss:$8 sps:$4 sm:$0xff]  }
 0x1ca   : > { %4319 = vmatpush1.bf16.msra.mxu0 %v5641_v56  ;;  %3809 = vmatprep.subr.bf16.mxu1 %v5642_v57  ;;  %v5725_v56 = vld [vmem:[%s5856_s29 + $0xfa0] ss:$8 sps:$4 sm:$0xff]   ;;  %v5726_v57 = vld [vmem:[%s5856_s29 + $0x7b4] ss:$8 sps:$4 sm:$0xff]  }
 0x1cb   : > { %4321 = vmatprep.subr.bf16.mxu0 %v5645_v40  ;;  %v5729_v40 = vld [vmem:[%s5856_s29 + $0xfb4] ss:$8 sps:$4 sm:$0xff]  }
 0x1cd   : > { %3811 = vmatpush1.bf16.msra.mxu1 %v5644_v59  ;;  %v5728_v59 = vld [vmem:[%s5856_s29 + $0x7b0] ss:$8 sps:$4 sm:$0xff]  }
 0x1ce   : > { %4323 = vmatpush1.bf16.msra.mxu0 %v5647_v60  ;;  %3813 = vmatprep.subr.bf16.mxu1 %v5648_v61  ;;  %v5731_v60 = vld [vmem:[%s5856_s29 + $0xfb0] ss:$8 sps:$4 sm:$0xff]   ;;  %v5732_v61 = vld [vmem:[%s5856_s29 + $0x7c4] ss:$8 sps:$4 sm:$0xff]  }
 0x1cf   : > { %4325 = vmatprep.subr.bf16.mxu0 %v5651_v62  ;;  %v5735_v62 = vld [vmem:[%s5856_s29 + $0xfc4] ss:$8 sps:$4 sm:$0xff]  }
 0x1d1   : > { %3815 = vmatpush1.bf16.msra.mxu1 %v5650_v46  ;;  %v5734_v46 = vld [vmem:[%s5856_s29 + $0x7c0] ss:$8 sps:$4 sm:$0xff]  }
 0x1d2   : > { %4327 = vmatpush1.bf16.msra.mxu0 %v5653_v47  ;;  %3817 = vmatprep.subr.bf16.mxu1 %v5654_v1  ;;  %v5737_v47 = vld [vmem:[%s5856_s29 + $0xfc0] ss:$8 sps:$4 sm:$0xff]   ;;  %v5738_v1 = vld [vmem:[%s5856_s29 + $0x7d4] ss:$8 sps:$4 sm:$0xff]  }
 0x1d3   : > { %4329 = vmatprep.subr.bf16.mxu0 %v5657_v2  ;;  %v5741_v2 = vld [vmem:[%s5856_s29 + $0xfd4] ss:$8 sps:$4 sm:$0xff]  }
 0x1d5   : > { %3819 = vmatpush1.bf16.msra.mxu1 %v5656_v5  ;;  %v5744_v5 = vld [vmem:[%s5856_s29 + $0x7e4] ss:$8 sps:$4 sm:$0xff]  }
 0x1d6   : > { %4331 = vmatpush1.bf16.msra.mxu0 %v5659_v6  ;;  %3821 = vmatprep.subr.bf16.mxu1 %v5660_v7  ;;  %v5747_v6 = vld [vmem:[%s5856_s29 + $0xfe4] ss:$8 sps:$4 sm:$0xff]   ;;  %v5746_v7 = vld [vmem:[%s5856_s29 + $0x7e0] ss:$8 sps:$4 sm:$0xff]  }
 0x1d7   : > { %4333 = vmatprep.subr.bf16.mxu0 %v5663_v8  ;;  %v5749_v8 = vld [vmem:[%s5856_s29 + $0xfe0] ss:$8 sps:$4 sm:$0xff]  }
 0x1d8   : > { %2455 = vmatmul.mubr.f32.vlgmr.msra.gmra.mrb[0].mxu1 %v6344_v63  ;;  %v5674_v63 = vld [vmem:[%s5856_s29 + $0x720] ss:$8 sps:$4 sm:$0xff]  }
 0x1d9   : > { %3023 = vmatmul.mubr.f32.vlgmr.msra.gmra.mrb[0].mxu0 %v6348_v0  ;;  %3823 = vmatpush1.bf16.msra.mxu1 %v5662_v28  ;;  %v5677_v0 = vld [vmem:[%s5856_s29 + $0xf20] ss:$8 sps:$4 sm:$0xff]   ;;  %v5750_v28 = vld [vmem:[%s5856_s29 + $0x7f4] ss:$8 sps:$4 sm:$0xff]  }
 0x1da   : > { %4335 = vmatpush1.bf16.msra.mxu0 %v5665_v58  ;;  %3825 = vmatprep.subr.bf16.mxu1 %v5666_v9  ;;  %v5753_v58 = vld [vmem:[%s5856_s29 + $0xff4] ss:$8 sps:$4 sm:$0xff]   ;;  %v5752_v9 = vld [vmem:[%s5856_s29 + $0x7f0] ss:$8 sps:$4 sm:$0xff]  }
 0x1db   : > { %4337 = vmatprep.subr.bf16.mxu0 %v5669_v10  ;;  %2525 = vmatprep.mubr.f32.mxu1 %v1863_v11  ;;  %v5755_v10 = vld [vmem:[%s5856_s29 + $0xff0] ss:$8 sps:$4 sm:$0xff]  }
 0x1dc   : > { %3093 = vmatprep.mubr.f32.mxu0 %v1931_v12 }
 0x1dd   : > { %3827 = vmatpush1.bf16.msra.mxu1 %v5668_v13 }
 0x1de   : > { %4339 = vmatpush1.bf16.msra.mxu0 %v5671_v14  ;;  %3829 = vmatprep.subr.bf16.mxu1 %v5672_v15 }
 0x1df   : > { %4341 = vmatprep.subr.bf16.mxu0 %v5675_v16 }
 0x1e1   : > { %3831 = vmatpush1.bf16.msra.mxu1 %v5674_v63 }
 0x1e2   : > { %4343 = vmatpush1.bf16.msra.mxu0 %v5677_v0  ;;  %3833 = vmatprep.subr.bf16.mxu1 %v5678_v19  ;;  %v243_v0 = vld [vmem:[#allocation2] sm:$0xf] }
 0x1e3   : > { %4345 = vmatprep.subr.bf16.mxu0 %v5681_v20 }
 0x1e5   : > { %3835 = vmatpush1.bf16.msra.mxu1 %v5680_v21  ;;  %v3151_v21 = vld [vmem:[%s6588_s3 + $0x10] sm:$0xff] (!%p3312_p6) }
 0x1e6   : > { %4347 = vmatpush1.bf16.msra.mxu0 %v5683_v22  ;;  %3837 = vmatprep.subr.bf16.mxu1 %v5684_v23  ;;  %v5802_v22 = vmov (!%p3312_p6), 0.0|0.0  }
 0x1e7   : > { %4349 = vmatprep.subr.bf16.mxu0 %v5687_v24  ;;  %v3152_v24 = vld [vmem:[%s6588_s3 + $0x18] sm:$0xff] (!%p3312_p6) }
 0x1e9   : > { %3839 = vmatpush1.bf16.msra.mxu1 %v5686_v25  ;;  %v5804_v25 = vmov (!%p3312_p6), 0.0  }
 0x1ea   : > { %4351 = vmatpush1.bf16.msra.mxu0 %v5689_v26  ;;  %3841 = vmatprep.subr.bf16.mxu1 %v5690_v27  ;;  %v3122_v26 = vsub.s32 (!%p3312_p6), 0, %v5898_v44  ;;  %v3126_v27 = vsub.s32 (!%p3312_p6), 1, %v5898_v44  ;;  %v3155_v44 = vld [vmem:[%s6588_s3 + $0x30] sm:$0xff] (!%p3312_p6) }
 0x1eb   : > { %4353 = vmatprep.subr.bf16.mxu0 %v5693_v29  ;;  %v4400_v29 = vpack.c.bf16 (!%p3312_p6), %v3152_v24, %v3151_v21 }
 0x1ed   : > { %3843 = vmatpush1.bf16.msra.mxu1 %v5692_v32  ;;  %v3153_v32 = vld [vmem:[%s6588_s3 + $0x20] sm:$0xff] (!%p3312_p6) }
 0x1ee   : > { %4355 = vmatpush1.bf16.msra.mxu0 %v5695_v33  ;;  %3845 = vmatprep.subr.bf16.mxu1 %v5696_v34  ;;  %v3154_v33 = vld [vmem:[%s6588_s3 + $0x28] sm:$0xff] (!%p3312_p6)  ;;  %v3118_v34 = vld [vmem:[%s6587_s2] sm:$0x3] (!%p3312_p6) }
 0x1ef   : > { %4357 = vmatprep.subr.bf16.mxu0 %v5699_v36  ;;  %v3123_v36 = vrot.slane (!%p3312_p6), %v3118_v34, %v3122_v26 }
 0x1f1   : > { %3847 = vmatpush1.bf16.msra.mxu1 %v5698_v17  ;;  %v3127_v17 = vrot.slane (!%p3312_p6), %v3118_v34, %v3126_v27 }
 0x1f2   : > { %4359 = vmatpush1.bf16.msra.mxu0 %v5701_v18  ;;  %3849 = vmatprep.subr.bf16.mxu1 %v5702_v38  ;;  %v4403_v18 = vpack.c.bf16 (!%p3312_p6), %v3154_v33, %v3153_v32  ;;  %v3156_v38 = vld [vmem:[%s6588_s3 + $0x38] sm:$0xff] (!%p3312_p6) }
 0x1f3   : > { %4361 = vmatprep.subr.bf16.mxu0 %v5705_v31  ;;  %v3128_v31 = vcombine.low (!%p3312_p6), %v3123_v36, %v3127_v17 }
 0x1f5   : > { %3851 = vmatpush1.bf16.msra.mxu1 %v5704_v41 }
 0x1f6   : > { %4363 = vmatpush1.bf16.msra.mxu0 %v5707_v42  ;;  %3853 = vmatprep.subr.bf16.mxu1 %v5708_v43  ;;  %v3135_v42 = vrot.slane (!%p3312_p6), %v3128_v31, %v5906_v50  ;;  %v4406_v43 = vpack.c.bf16 (!%p3312_p6), %v3156_v38, %v3155_v44 }
 0x1f7   : > { %4365 = vmatprep.subr.bf16.mxu0 %v5711_v45  ;;  %v3157_v45 = vld [vmem:[%s6588_s3 + $0x40] sm:$0xff] (!%p3312_p6) }
 0x1f9   : > { %3855 = vmatpush1.bf16.msra.mxu1 %v5710_v48  ;;  %v3158_v48 = vld [vmem:[%s6588_s3 + $0x48] sm:$0xff] (!%p3312_p6) }
 0x1fa   : > { %4367 = vmatpush1.bf16.msra.mxu0 %v5713_v30  ;;  %3857 = vmatprep.subr.bf16.mxu1 %v5714_v35 }
 0x1fb   : > { %4369 = vmatprep.subr.bf16.mxu0 %v5717_v49  ;;  %v4409_v49 = vpack.c.bf16 (!%p3312_p6), %v3158_v48, %v3157_v45 }
 0x1fd   : > { %3859 = vmatpush1.bf16.msra.mxu1 %v5716_v51  ;;  %v3160_v51 = vld [vmem:[%s6588_s3 + $0x58] sm:$0xff] (!%p3312_p6) }
 0x1fe   : > { %4371 = vmatpush1.bf16.msra.mxu0 %v5719_v52  ;;  %3861 = vmatprep.subr.bf16.mxu1 %v5720_v53 }
 0x1ff   : > { %4373 = vmatprep.subr.bf16.mxu0 %v5723_v54  ;;  %v3161_v54 = vld [vmem:[%s6588_s3 + $0x60] sm:$0xff] (!%p3312_p6) }
 0x201   : > { %3863 = vmatpush1.bf16.msra.mxu1 %v5722_v55  ;;  %v3162_v55 = vld [vmem:[%s6588_s3 + $0x68] sm:$0xff] (!%p3312_p6) }
 0x202   : > { %4375 = vmatpush1.bf16.msra.mxu0 %v5725_v56  ;;  %3865 = vmatprep.subr.bf16.mxu1 %v5726_v57  ;;  %v4415_v56 = vpack.c.bf16 (!%p3312_p6), %v3162_v55, %v3161_v54  ;;  %v3163_v57 = vld [vmem:[%s6588_s3 + $0x70] sm:$0xff] (!%p3312_p6) }
 0x203   : > { %4377 = vmatprep.subr.bf16.mxu0 %v5729_v40  ;;  %v3164_v40 = vld [vmem:[%s6588_s3 + $0x78] sm:$0xff] (!%p3312_p6) }
 0x205   : > { %3867 = vmatpush1.bf16.msra.mxu1 %v5728_v59  ;;  %v4418_v59 = vpack.c.bf16 (!%p3312_p6), %v3164_v40, %v3163_v57 }
 0x206   : > { %4379 = vmatpush1.bf16.msra.mxu0 %v5731_v60  ;;  %3869 = vmatprep.subr.bf16.mxu1 %v5732_v61 }
 0x207   : > { %4381 = vmatprep.subr.bf16.mxu0 %v5735_v62 }
 0x209   : > { %3871 = vmatpush1.bf16.msra.mxu1 %v5734_v46 }
 0x20a   : > { %4383 = vmatpush1.bf16.msra.mxu0 %v5737_v47  ;;  %3873 = vmatprep.subr.bf16.mxu1 %v5738_v1  ;;  %v3314_v1 = vld [vmem:[%s6589_s4] ss:$0 sm:$0xff] (!%p3312_p6) }
 0x20b   : > { %4385 = vmatprep.subr.bf16.mxu0 %v5741_v2 }
 0x20d   : > { %3875 = vmatpush1.bf16.msra.mxu1 %v5740_v3 }
 0x20e   : > { %4387 = vmatpush1.bf16.msra.mxu0 %v5743_v4  ;;  %3877 = vmatprep.subr.bf16.mxu1 %v5744_v5 }
 0x20f   : > { %4389 = vmatprep.subr.bf16.mxu0 %v5747_v6 }
 0x211   : > { %3879 = vmatpush1.bf16.msra.mxu1 %v5746_v7 }
 0x212   : > { %4391 = vmatpush1.bf16.msra.mxu0 %v5749_v8  ;;  %3881 = vmatprep.subr.bf16.mxu1 %v5750_v28 }
 0x213   : > { %4393 = vmatprep.subr.bf16.mxu0 %v5753_v58 }
 0x215   : > { %3883 = vmatpush1.bf16.msra.mxu1 %v5752_v9 }
 0x216   : > { %4395 = vmatpush1.bf16.msra.mxu0 %v5755_v10 }
 0x217   : > { %4396 = vmatprep.subr.bf16.mxu0 (!%p3312_p6), %v5802_v22 }
 0x218   : > { %2526 = vmatmul.mubr.f32.vlgmr.msra.gmra.mrb[0].mxu1 %v6425_v37  ;;  %v3149_v37 = vld [vmem:[%s6588_s3] sm:$0xff] (!%p3312_p6) }
 0x219   : > { %3094 = vmatmul.mubr.f32.vlgmr.msra.gmra.mrb[0].mxu0 %v6428_v39  ;;  %v3150_v39 = vld [vmem:[%s6588_s3 + $0x8] sm:$0xff] (!%p3312_p6) }
 0x21a   : > { %v4397_v23 = vpack.c.bf16 (!%p3312_p6), %v3150_v39, %v3149_v37  ;;  %3369 = vmatprep.mubr.msk.f32.mxu0 (!%p3312_p6), %vm5803_vm0, %v5804_v25 }
 0x21c   : > { %4398 = vmatpush3.bf16.msra.mxu0 (!%p3312_p6), %v4397_v23 }
 0x21d   : > { %4399 = vmatprep.subr.bf16.mxu0 (!%p3312_p6), %v5802_v22 }
 0x220   : > { %4401 = vmatpush3.bf16.msra.mxu0 (!%p3312_p6), %v4400_v29 }
 0x221   : > { %4402 = vmatprep.subr.bf16.mxu0 (!%p3312_p6), %v5802_v22 }
 0x224   : > { %4404 = vmatpush3.bf16.msra.mxu0 (!%p3312_p6), %v4403_v18 }
 0x225   : > { %4405 = vmatprep.subr.bf16.mxu0 (!%p3312_p6), %v5802_v22 }
 0x228   : > { %4407 = vmatpush3.bf16.msra.mxu0 (!%p3312_p6), %v4406_v43 }
 0x229   : > { %4408 = vmatprep.subr.bf16.mxu0 (!%p3312_p6), %v5802_v22 }
 0x22c   : > { %4410 = vmatpush3.bf16.msra.mxu0 (!%p3312_p6), %v4409_v49 }
 0x22d   : > { %4411 = vmatprep.subr.bf16.mxu0 (!%p3312_p6), %v5802_v22 }
 0x2eb   : > { %v2527_v11 = vpop.f32.mrb[0].mxu1 }
 0x2ec   : > { %v3095_v12 = vpop.f32.mrb[0].mxu0  ;;  %v2529_v14 = vpop.f32.mrb[1].mxu1 }
 0x2ed   : > { %v4420_v13 = vadd.f32 %v3095_v12, %v2527_v11  ;;  %v3097_v15 = vpop.f32.mrb[1].mxu0 }
 0x2ee   : > { %v4421_v16 = vadd.f32 %v3097_v15, %v2529_v14 }
 0x2f0   : > { %v3102_v63 = vcombine.low %v4420_v13, %v4421_v16  ;;  %3116 = sbr.rel (%p3312_p6) target bundleno = 1013 (0x3f5), region = 48 }
 0x2f2   : > { %v3109_v19 = vrot.slane %v3102_v63, %v5906_v50  ;;  %v3159_v50 = vld [vmem:[%s6588_s3 + $0x50] sm:$0xff] (!%p3312_p6) }
 0x2f3   : > { %v4412_v53 = vpack.c.bf16 (!%p3312_p6), %v3160_v51, %v3159_v50 }
 0x2f4   : > { %v3111_v20 = vadd.f32 %v3109_v19, %v243_v0 }
 0x2f5   : > { %4413 = vmatpush3.bf16.msra.mxu0 (!%p3312_p6), %v4412_v53 }
 0x2f6   : > { %3112 = vst [vmem:[#allocation2] sm:$0xf] %v3111_v20  ;;  %4414 = vmatprep.subr.bf16.mxu0 (!%p3312_p6), %v5802_v22 }
 0x2f9   : > { %4416 = vmatpush3.bf16.msra.mxu0 %v4415_v56 }
 0x2fa   : > { %4417 = vmatprep.subr.bf16.mxu0 %v5802_v22 }
 0x2fd   : > { %v3117_v41 = vld [vmem:[#allocation2] sm:$0xf]  ;;  %4419 = vmatpush3.bf16.msra.mxu0 %v4418_v59 }
 0x2fe   : > { %v3137_v30 = vadd.f32 %v3135_v42, %v3117_v41 }
 0x300   : > { %v3140_v35 = vrot.slane %v3137_v30, 2  ;;  %v3138_v62 = vmax.f32 %v3137_v30, 0.0 }
 0x302   : > { %v3313_v52 = vmul.f32 -1.442695, %v3140_v35 }
 0x304   : > { %5758 = vpow2.f32 %v3313_v52 }
 0x30e   : > { %v5759_v60 = vpop.eup %5758 }
 0x30f   : > { %v3145_v61 = vadd.f32 1.0, %v5759_v60 }
 0x311   : > { %5760 = vrcp.f32 %v3145_v61 }
 0x31b   : > { %v5761_v46 = vpop.eup %5760 }
 0x31c   : > { %v3148_v47 = vmul.f32 %v5761_v46, %v3138_v62 }
 0x31e   : > { %3370 = vmatmul.mubr.f32.vlgmr.msra.gmra.mrb[0].mxu0 %v3148_v47 }
 0x3f1   : > { %v3238_v2 = vpop.f32.mrb[0].mxu0 }
 0x3f2   : > { %v3239_v3 = vadd.f32 %v3314_v1, %v3238_v2  ;;  %v3371_v4 = vpop.f32.mrb[1].mxu0 }
 0x3f4   : > { %3243 = vst.msk [vmem:[#allocation3] sm:$0x3] %vm3242_vm1, %v3239_v3 }
 0x3f5 PF: > { %p4966_p7 = scmp.eq.s32.totalorder %s5842_s19, 3  ;;  %s5805_s20 = smov [#allocation3]  }
 0x3f6   : > { %s3251_s21 = sshll.u32 %s5805_s20, 4  ;;  %s3252_s21 = int_to_ptr.vmem [resolvable:$true] %s3251_s21 }
 0x3f7   : > { %s5762_s22 = scalar_lea.vmem %s3252_s21, 32  ;;  %p5769_p11 = scmp.lt.s32.totalorder %s3252_s21, %s3252_s21 }
 0x3f8   : > { %p5763_p8 = scmp.ne.s32.totalorder %s3252_s21, %s5762_s22  ;;  %p5770_p12 = scmp.lt.s32.totalorder %s5762_s22, %s5762_s22 }
 0x3fa   : > { %p5764_p9 = pnand %p5763_p8, %p4966_p7  ;;  %p5771_p13 = por %p5770_p12, %p5769_p11 }
 0x3fc   : > { %p5765_p10 = pneg %p5764_p9 }
 0x3fe   : > { %p5772_p0 = pnand %p5771_p13, %p5765_p10 }
 0x400   : > { %5775 = shalt.err (!%p5772_p0)
}
 0x401   : > { %s5776_s25 = scalar_lea.hbm %s6590_s5, 32 }
 0x402   : > { %p5777_p1 = scmp.ne.s32.totalorder %s6590_s5, %s5776_s25  ;;  %p5782_p4 = scmp.lt.u32.totalorder %s5776_s25, %s6590_s5 }
 0x404   : > { %p5778_p2 = pnand %p5777_p1, %p4966_p7 }
 0x406   : > { %p5779_p3 = pneg %p5778_p2 }
 0x408   : > { %p5784_p5 = pnand %p5782_p4, %p5779_p3 }
 0x40a   : > { %5787 = shalt.err (!%p5784_p5)
}
 0x40b   : > { %4963 = dma.vmem_to_hbm [thread:$0]  (%p4966_p7), %s3252_s21, 32, %s6590_s5, [#allocation4]  }
 0x40c   : > { %5793 = dma.done.wait (%p4966_p7), [#allocation4], 32  }
 0x40d   : > { %5795 = vsyncadd (%p4966_p7), [#allocation4], 4294967264 }
 0x40e PF: > { %s16_s18 = sadd.s32 1, %s5798_s18  }
 0x40f   : > { %p13_p6 = scmp.ge.s32.totalorder %s16_s18, 6  }
 0x411   :  { %15 = sbr.rel (!%p13_p6) target bundleno = 1 (0x1), region = 78 }
 0x418   :  { %3264 = vsyncpa [#allocation4], 1 }
 0x419   :  { %3266 = vsyncpa [#allocation4 + $0x1], 1 }

// kernel: _lambda_.4
= control target key start
LH: loop header
LB: loop body
LE: loop exit
PB: predicated region body
PF: predicated region fallthrough
CT: control target
= control target key end

     0   :  { %8 = vsyncpa [#allocation4], 0  ;;  %s7936_s0 = inlined_call_operand.vmem [shape: f32[2,10,10,128], index: 0, kind: input, shape index: {}]   ;;  %s7937_s1 = inlined_call_operand.hbm [shape: f32[1152,768], index: 1, kind: input, shape index: {}]   ;;  %s7938_s2 = inlined_call_operand.hbm [shape: f32[1,768], index: 2, kind: input, shape index: {}]   ;;  %s7939_s3 = inlined_call_operand.vmem [shape: f32[2,8,8,256], index: 3, kind: output, shape index: {}]  }
   0x1   :  { %9 = vsyncpa [#allocation6], 0  ;;  %s5941_s12 = smov [#allocation3]   ;;  %s5893_s16 = scalar_lea.hbm %s7937_s1, 110592 }
   0x2   :  { %s17_s13 = sshll.u32 %s5941_s12, 4  ;;  %p5894_p0 = scmp.ne.s32.totalorder %s7937_s1, %s5893_s16  ;;  %s18_s13 = int_to_ptr.vmem [resolvable:$true] %s17_s13 }
   0x3   :  { %p5897_p1 = scmp.lt.u32.totalorder %s5893_s16, %s7937_s1 }
   0x5   :  { %p5899_p2 = pnand %p5897_p1, %p5894_p0 }
   0x7   :  { %5902 = shalt.err (!%p5899_p2)
}
   0x8   :  { %s5903_s21 = scalar_lea.vmem %s18_s13, 110592  ;;  %p5908_p4 = scmp.lt.s32.totalorder %s18_s13, %s18_s13 }
   0x9   :  { %p5904_p3 = scmp.ne.s32.totalorder %s18_s13, %s5903_s21  ;;  %p5909_p5 = scmp.lt.s32.totalorder %s5903_s21, %s5903_s21 }
   0xb   :  { %p5910_p6 = por %p5909_p5, %p5908_p4 }
   0xd   :  { %p5911_p7 = pnand %p5910_p6, %p5904_p3 }
   0xf   :  { %5914 = shalt.err (!%p5911_p7)
}
  0x10   :  { %s5942_s22 = smov 768   ;;  %s5943_s23 = smov 48  }
  0x11   :  { %23 = dma.hbm_to_vmem [thread:$0]  %s7937_s1, 110592, %s18_s13, [#allocation4], %s5942_s22, %s5942_s22, %s5943_s23  }
  0x12   :  { %s5944_s26 = smov [#allocation5]   ;;  %s5915_s30 = scalar_lea.hbm %s7938_s2, 96 }
  0x13   :  { %s30_s27 = sshll.u32 %s5944_s26, 4  ;;  %p5916_p8 = scmp.ne.s32.totalorder %s7938_s2, %s5915_s30  ;;  %s31_s27 = int_to_ptr.vmem [resolvable:$true] %s30_s27 }
  0x14   :  { %p5919_p9 = scmp.lt.u32.totalorder %s5915_s30, %s7938_s2 }
  0x16   :  { %p5921_p10 = pnand %p5919_p9, %p5916_p8 }
  0x18   :  { %5924 = shalt.err (!%p5921_p10)
}
  0x19   :  { %s5925_s8 = scalar_lea.vmem %s31_s27, 96  ;;  %p5930_p12 = scmp.lt.s32.totalorder %s31_s27, %s31_s27 }
  0x1a   :  { %p5926_p11 = scmp.ne.s32.totalorder %s31_s27, %s5925_s8  ;;  %p5931_p13 = scmp.lt.s32.totalorder %s5925_s8, %s5925_s8 }
  0x1c   :  { %p5932_p0 = por %p5931_p13, %p5930_p12 }
  0x1e   :  { %p5933_p1 = pnand %p5932_p0, %p5926_p11 }
  0x20   :  { %5936 = shalt.err (!%p5933_p1)
}
  0x21   :  { %33 = dma.hbm_to_vmem [thread:$0]  %s7938_s2, 96, %s31_s27, [#allocation6]  }
  0x22   :  { %5937 = dma.done.wait [#allocation4], 110592  }
  0x23   :  { %5938 = vsyncadd [#allocation4], 4294856704 }
  0x24   :  { %5939 = dma.done.wait [#allocation6], 96  }
  0x25   :  { %5940 = vsyncadd [#allocation6], 4294967200  ;;  %v475_v0 = vld [vmem:[#allocation3 + $0x8] sm:$0xff]  ;;  %v481_v1 = vld [vmem:[#allocation3 + $0x38] sm:$0xff] }
  0x26   :  { %v859_v2 = vld [vmem:[#allocation3 + $0xc08] sm:$0xff]  ;;  %v4239_v3 = vpack.c.bf16 %v481_v1, %v475_v0  ;;  %v865_v4 = vld [vmem:[#allocation3 + $0xc38] sm:$0xff]  ;;  %v474_v5 = vld [vmem:[#allocation3] sm:$0xff] }
  0x27   :  { %v480_v6 = vld [vmem:[#allocation3 + $0x30] sm:$0xff]  ;;  %v4367_v7 = vpack.c.bf16 %v865_v4, %v859_v2  ;;  %v858_v9 = vld [vmem:[#allocation3 + $0xc00] sm:$0xff]  ;;  %v487_v11 = vld [vmem:[#allocation3 + $0x68] sm:$0xff] }
  0x28   :  { %v4241_v8 = vpack.c.bf16 %v480_v6, %v474_v5  ;;  %v864_v10 = vld [vmem:[#allocation3 + $0xc30] sm:$0xff]  ;;  %4240 = vmatprep.subr.bf16.mxu1 %v4239_v3  ;;  %v493_v13 = vld [vmem:[#allocation3 + $0x98] sm:$0xff]  ;;  %v871_v14 = vld [vmem:[#allocation3 + $0xc68] sm:$0xff] }
  0x29   :  { %v4369_v12 = vpack.c.bf16 %v864_v10, %v858_v9  ;;  %v877_v15 = vld [vmem:[#allocation3 + $0xc98] sm:$0xff]  ;;  %4368 = vmatprep.subr.bf16.mxu0 %v4367_v7  ;;  %v4243_v16 = vpack.c.bf16 %v493_v13, %v487_v11  ;;  %v486_v18 = vld [vmem:[#allocation3 + $0x60] sm:$0xff]  ;;  %v492_v19 = vld [vmem:[#allocation3 + $0x90] sm:$0xff] }
  0x2a   :  { %4242 = vmatpush1.bf16.msra.mxu1 %v4241_v8  ;;  %v4371_v17 = vpack.c.bf16 %v877_v15, %v871_v14  ;;  %v870_v20 = vld [vmem:[#allocation3 + $0xc60] sm:$0xff]  ;;  %v4245_v21 = vpack.c.bf16 %v492_v19, %v486_v18  ;;  %v876_v22 = vld [vmem:[#allocation3 + $0xc90] sm:$0xff]  ;;  %v499_v23 = vld [vmem:[#allocation3 + $0xc8] sm:$0xff] }
  0x2b   :  { %4370 = vmatpush1.bf16.msra.mxu0 %v4369_v12  ;;  %v505_v24 = vld [vmem:[#allocation3 + $0xf8] sm:$0xff]  ;;  %4244 = vmatprep.subr.bf16.mxu1 %v4243_v16  ;;  %v4373_v25 = vpack.c.bf16 %v876_v22, %v870_v20  ;;  %v883_v27 = vld [vmem:[#allocation3 + $0xcc8] sm:$0xff]  ;;  %v498_v29 = vld [vmem:[#allocation3 + $0xc0] sm:$0xff] }
  0x2c   :  { %4372 = vmatprep.subr.bf16.mxu0 %v4371_v17  ;;  %v4247_v26 = vpack.c.bf16 %v505_v24, %v499_v23  ;;  %v889_v28 = vld [vmem:[#allocation3 + $0xcf8] sm:$0xff]  ;;  %v504_v31 = vld [vmem:[#allocation3 + $0xf0] sm:$0xff]  ;;  %v882_v32 = vld [vmem:[#allocation3 + $0xcc0] sm:$0xff] }
  0x2d   :  { %v4375_v30 = vpack.c.bf16 %v889_v28, %v883_v27  ;;  %v888_v33 = vld [vmem:[#allocation3 + $0xcf0] sm:$0xff]  ;;  %v4249_v34 = vpack.c.bf16 %v504_v31, %v498_v29  ;;  %v511_v35 = vld [vmem:[#allocation3 + $0x128] sm:$0xff]  ;;  %v517_v36 = vld [vmem:[#allocation3 + $0x158] sm:$0xff] }
  0x2e   :  { %4246 = vmatpush1.bf16.msra.mxu1 %v4245_v21  ;;  %v895_v37 = vld [vmem:[#allocation3 + $0xd28] sm:$0xff]  ;;  %v4377_v38 = vpack.c.bf16 %v888_v33, %v882_v32  ;;  %v4251_v39 = vpack.c.bf16 %v517_v36, %v511_v35  ;;  %v901_v40 = vld [vmem:[#allocation3 + $0xd58] sm:$0xff]  ;;  %v510_v41 = vld [vmem:[#allocation3 + $0x120] sm:$0xff] }
  0x2f   :  { %4374 = vmatpush1.bf16.msra.mxu0 %v4373_v25  ;;  %4248 = vmatprep.subr.bf16.mxu1 %v4247_v26  ;;  %v516_v42 = vld [vmem:[#allocation3 + $0x150] sm:$0xff]  ;;  %v4379_v43 = vpack.c.bf16 %v901_v40, %v895_v37  ;;  %v894_v44 = vld [vmem:[#allocation3 + $0xd20] sm:$0xff]  ;;  %v523_v46 = vld [vmem:[#allocation3 + $0x188] sm:$0xff] }
  0x30   :  { %4376 = vmatprep.subr.bf16.mxu0 %v4375_v30  ;;  %v900_v45 = vld [vmem:[#allocation3 + $0xd50] sm:$0xff]  ;;  %v529_v47 = vld [vmem:[#allocation3 + $0x1b8] sm:$0xff]  ;;  %v907_v48 = vld [vmem:[#allocation3 + $0xd88] sm:$0xff]  ;;  %v4253_v50 = vpack.c.bf16 %v516_v42, %v510_v41 }
  0x31   :  { %v913_v49 = vld [vmem:[#allocation3 + $0xdb8] sm:$0xff]  ;;  %v4381_v51 = vpack.c.bf16 %v900_v45, %v894_v44  ;;  %v4255_v52 = vpack.c.bf16 %v529_v47, %v523_v46  ;;  %v522_v53 = vld [vmem:[#allocation3 + $0x180] sm:$0xff]  ;;  %v528_v54 = vld [vmem:[#allocation3 + $0x1b0] sm:$0xff] }
  0x32   :  { %4250 = vmatpush1.bf16.msra.mxu1 %v4249_v34  ;;  %v906_v55 = vld [vmem:[#allocation3 + $0xd80] sm:$0xff]  ;;  %v4383_v56 = vpack.c.bf16 %v913_v49, %v907_v48  ;;  %v912_v57 = vld [vmem:[#allocation3 + $0xdb0] sm:$0xff]  ;;  %v535_v58 = vld [vmem:[#allocation3 + $0x1e8] sm:$0xff]  ;;  %v4257_v62 = vpack.c.bf16 %v528_v54, %v522_v53 }
  0x33   :  { %4378 = vmatpush1.bf16.msra.mxu0 %v4377_v38  ;;  %4252 = vmatprep.subr.bf16.mxu1 %v4251_v39  ;;  %v541_v59 = vld [vmem:[#allocation3 + $0x218] sm:$0xff]  ;;  %v919_v60 = vld [vmem:[#allocation3 + $0xde8] sm:$0xff]  ;;  %v4385_v63 = vpack.c.bf16 %v912_v57, %v906_v55  ;;  %v534_v1 = vld [vmem:[#allocation3 + $0x1e0] sm:$0xff] }
  0x34   :  { %4380 = vmatprep.subr.bf16.mxu0 %v4379_v43  ;;  %v925_v61 = vld [vmem:[#allocation3 + $0xe18] sm:$0xff]  ;;  %v4259_v0 = vpack.c.bf16 %v541_v59, %v535_v58  ;;  %v540_v2 = vld [vmem:[#allocation3 + $0x210] sm:$0xff]  ;;  %v918_v3 = vld [vmem:[#allocation3 + $0xde0] sm:$0xff] }
  0x35   :  { %v4387_v4 = vpack.c.bf16 %v925_v61, %v919_v60  ;;  %v924_v5 = vld [vmem:[#allocation3 + $0xe10] sm:$0xff]  ;;  %v547_v6 = vld [vmem:[#allocation3 + $0x248] sm:$0xff]  ;;  %v553_v7 = vld [vmem:[#allocation3 + $0x278] sm:$0xff]  ;;  %v4261_v10 = vpack.c.bf16 %v540_v2, %v534_v1 }
  0x36   :  { %4254 = vmatpush1.bf16.msra.mxu1 %v4253_v50  ;;  %v931_v8 = vld [vmem:[#allocation3 + $0xe48] sm:$0xff]  ;;  %v937_v9 = vld [vmem:[#allocation3 + $0xe78] sm:$0xff]  ;;  %v4389_v11 = vpack.c.bf16 %v924_v5, %v918_v3  ;;  %v4263_v12 = vpack.c.bf16 %v553_v7, %v547_v6  ;;  %v546_v13 = vld [vmem:[#allocation3 + $0x240] sm:$0xff] }
  0x37   :  { %4382 = vmatpush1.bf16.msra.mxu0 %v4381_v51  ;;  %4256 = vmatprep.subr.bf16.mxu1 %v4255_v52  ;;  %v552_v14 = vld [vmem:[#allocation3 + $0x270] sm:$0xff]  ;;  %v930_v15 = vld [vmem:[#allocation3 + $0xe40] sm:$0xff]  ;;  %v4391_v16 = vpack.c.bf16 %v937_v9, %v931_v8  ;;  %v559_v18 = vld [vmem:[#allocation3 + $0x2a8] sm:$0xff] }
  0x38   :  { %4384 = vmatprep.subr.bf16.mxu0 %v4383_v56  ;;  %v936_v17 = vld [vmem:[#allocation3 + $0xe70] sm:$0xff]  ;;  %v565_v19 = vld [vmem:[#allocation3 + $0x2d8] sm:$0xff]  ;;  %v943_v20 = vld [vmem:[#allocation3 + $0xea8] sm:$0xff]  ;;  %v4265_v22 = vpack.c.bf16 %v552_v14, %v546_v13 }
  0x39   :  { %v949_v21 = vld [vmem:[#allocation3 + $0xed8] sm:$0xff]  ;;  %v4393_v23 = vpack.c.bf16 %v936_v17, %v930_v15  ;;  %v4267_v24 = vpack.c.bf16 %v565_v19, %v559_v18  ;;  %v558_v25 = vld [vmem:[#allocation3 + $0x2a0] sm:$0xff]  ;;  %v564_v26 = vld [vmem:[#allocation3 + $0x2d0] sm:$0xff] }
  0x3a   :  { %4258 = vmatpush1.bf16.msra.mxu1 %v4257_v62  ;;  %v942_v27 = vld [vmem:[#allocation3 + $0xea0] sm:$0xff]  ;;  %v4395_v28 = vpack.c.bf16 %v949_v21, %v943_v20  ;;  %v948_v29 = vld [vmem:[#allocation3 + $0xed0] sm:$0xff]  ;;  %v571_v30 = vld [vmem:[#allocation3 + $0x308] sm:$0xff]  ;;  %v4269_v34 = vpack.c.bf16 %v564_v26, %v558_v25 }
  0x3b   :  { %4386 = vmatpush1.bf16.msra.mxu0 %v4385_v63  ;;  %4260 = vmatprep.subr.bf16.mxu1 %v4259_v0  ;;  %v577_v31 = vld [vmem:[#allocation3 + $0x338] sm:$0xff]  ;;  %v955_v32 = vld [vmem:[#allocation3 + $0xf08] sm:$0xff]  ;;  %v4397_v35 = vpack.c.bf16 %v948_v29, %v942_v27  ;;  %v570_v37 = vld [vmem:[#allocation3 + $0x300] sm:$0xff] }
  0x3c   :  { %4388 = vmatprep.subr.bf16.mxu0 %v4387_v4  ;;  %v961_v33 = vld [vmem:[#allocation3 + $0xf38] sm:$0xff]  ;;  %v4271_v36 = vpack.c.bf16 %v577_v31, %v571_v30  ;;  %v576_v38 = vld [vmem:[#allocation3 + $0x330] sm:$0xff]  ;;  %v954_v39 = vld [vmem:[#allocation3 + $0xf00] sm:$0xff] }
  0x3d   :  { %v4399_v40 = vpack.c.bf16 %v961_v33, %v955_v32  ;;  %v960_v41 = vld [vmem:[#allocation3 + $0xf30] sm:$0xff]  ;;  %v583_v42 = vld [vmem:[#allocation3 + $0x368] sm:$0xff]  ;;  %v589_v43 = vld [vmem:[#allocation3 + $0x398] sm:$0xff]  ;;  %v4273_v46 = vpack.c.bf16 %v576_v38, %v570_v37 }
  0x3e   :  { %4262 = vmatpush1.bf16.msra.mxu1 %v4261_v10  ;;  %v967_v44 = vld [vmem:[#allocation3 + $0xf68] sm:$0xff]  ;;  %v973_v45 = vld [vmem:[#allocation3 + $0xf98] sm:$0xff]  ;;  %v4401_v47 = vpack.c.bf16 %v960_v41, %v954_v39  ;;  %v4275_v48 = vpack.c.bf16 %v589_v43, %v583_v42  ;;  %v582_v49 = vld [vmem:[#allocation3 + $0x360] sm:$0xff] }
  0x3f   :  { %4390 = vmatpush1.bf16.msra.mxu0 %v4389_v11  ;;  %4264 = vmatprep.subr.bf16.mxu1 %v4263_v12  ;;  %v588_v50 = vld [vmem:[#allocation3 + $0x390] sm:$0xff]  ;;  %v966_v51 = vld [vmem:[#allocation3 + $0xf60] sm:$0xff]  ;;  %v4403_v52 = vpack.c.bf16 %v973_v45, %v967_v44  ;;  %v595_v54 = vld [vmem:[#allocation3 + $0x3c8] sm:$0xff] }
  0x40   :  { %4392 = vmatprep.subr.bf16.mxu0 %v4391_v16  ;;  %v972_v53 = vld [vmem:[#allocation3 + $0xf90] sm:$0xff]  ;;  %v601_v55 = vld [vmem:[#allocation3 + $0x3f8] sm:$0xff]  ;;  %v979_v56 = vld [vmem:[#allocation3 + $0xfc8] sm:$0xff]  ;;  %v4277_v58 = vpack.c.bf16 %v588_v50, %v582_v49 }
  0x41   :  { %v985_v57 = vld [vmem:[#allocation3 + $0xff8] sm:$0xff]  ;;  %v4405_v59 = vpack.c.bf16 %v972_v53, %v966_v51  ;;  %v4279_v60 = vpack.c.bf16 %v601_v55, %v595_v54  ;;  %v594_v61 = vld [vmem:[#allocation3 + $0x3c0] sm:$0xff]  ;;  %v600_v62 = vld [vmem:[#allocation3 + $0x3f0] sm:$0xff] }
  0x42   :  { %4266 = vmatpush1.bf16.msra.mxu1 %v4265_v22  ;;  %v978_v63 = vld [vmem:[#allocation3 + $0xfc0] sm:$0xff]  ;;  %v4407_v0 = vpack.c.bf16 %v985_v57, %v979_v56  ;;  %v984_v1 = vld [vmem:[#allocation3 + $0xff0] sm:$0xff]  ;;  %v607_v2 = vld [vmem:[#allocation3 + $0x428] sm:$0xff]  ;;  %v4281_v6 = vpack.c.bf16 %v600_v62, %v594_v61 }
  0x43   :  { %4394 = vmatpush1.bf16.msra.mxu0 %v4393_v23  ;;  %4268 = vmatprep.subr.bf16.mxu1 %v4267_v24  ;;  %v613_v3 = vld [vmem:[#allocation3 + $0x458] sm:$0xff]  ;;  %v991_v4 = vld [vmem:[#allocation3 + $0x1028] sm:$0xff]  ;;  %v606_v7 = vld [vmem:[#allocation3 + $0x420] sm:$0xff]  ;;  %v4409_v8 = vpack.c.bf16 %v984_v1, %v978_v63 }
  0x44   :  { %4396 = vmatprep.subr.bf16.mxu0 %v4395_v28  ;;  %v997_v5 = vld [vmem:[#allocation3 + $0x1058] sm:$0xff]  ;;  %v4283_v9 = vpack.c.bf16 %v613_v3, %v607_v2  ;;  %v612_v10 = vld [vmem:[#allocation3 + $0x450] sm:$0xff]  ;;  %v990_v11 = vld [vmem:[#allocation3 + $0x1020] sm:$0xff] }
  0x45   :  { %v996_v12 = vld [vmem:[#allocation3 + $0x1050] sm:$0xff]  ;;  %v4411_v13 = vpack.c.bf16 %v997_v5, %v991_v4  ;;  %v619_v14 = vld [vmem:[#allocation3 + $0x488] sm:$0xff]  ;;  %v625_v15 = vld [vmem:[#allocation3 + $0x4b8] sm:$0xff]  ;;  %v4285_v20 = vpack.c.bf16 %v612_v10, %v606_v7 }
  0x46   :  { %4270 = vmatpush1.bf16.msra.mxu1 %v4269_v34  ;;  %v72_v16 = vld [vmem:[%s7936_s0 + $0x1] sm:$0xff]  ;;  %v1009_v18 = vld [vmem:[#allocation3 + $0x10b8] sm:$0xff]  ;;  %v4413_v21 = vpack.c.bf16 %v996_v12, %v990_v11  ;;  %v4287_v22 = vpack.c.bf16 %v625_v15, %v619_v14  ;;  %v624_v24 = vld [vmem:[#allocation3 + $0x4b0] sm:$0xff] }
  0x47   :  { %4398 = vmatpush1.bf16.msra.mxu0 %v4397_v35  ;;  %4272 = vmatprep.subr.bf16.mxu1 %v4271_v36  ;;  %v1003_v17 = vld [vmem:[#allocation3 + $0x1088] sm:$0xff]  ;;  %v5996_v19 = vld [vmem:[%s7936_s0 + $0x12] sm:$0xff]  ;;  %v618_v23 = vld [vmem:[#allocation3 + $0x480] sm:$0xff] }
  0x48   :  { %4400 = vmatprep.subr.bf16.mxu0 %v4399_v40  ;;  %1434 = vmatprep.mubr.f32.mxu1 %v72_v16  ;;  %v1002_v25 = vld [vmem:[#allocation3 + $0x1080] sm:$0xff]  ;;  %v4415_v26 = vpack.c.bf16 %v1009_v18, %v1003_v17  ;;  %v1008_v27 = vld [vmem:[#allocation3 + $0x10b0] sm:$0xff]  ;;  %v631_v28 = vld [vmem:[#allocation3 + $0x4e8] sm:$0xff]  ;;  %v4289_v32 = vpack.c.bf16 %v624_v24, %v618_v23 }
  0x49   :  { %1756 = vmatprep.mubr.f32.mxu0 %v5996_v19  ;;  %v637_v29 = vld [vmem:[#allocation3 + $0x518] sm:$0xff]  ;;  %v1015_v30 = vld [vmem:[#allocation3 + $0x10e8] sm:$0xff]  ;;  %v4417_v33 = vpack.c.bf16 %v1008_v27, %v1002_v25  ;;  %v630_v35 = vld [vmem:[#allocation3 + $0x4e0] sm:$0xff] }
  0x4a   :  { %4274 = vmatpush1.bf16.msra.mxu1 %v4273_v46  ;;  %v1021_v31 = vld [vmem:[#allocation3 + $0x1118] sm:$0xff]  ;;  %v4291_v34 = vpack.c.bf16 %v637_v29, %v631_v28  ;;  %v636_v36 = vld [vmem:[#allocation3 + $0x510] sm:$0xff]  ;;  %v1014_v37 = vld [vmem:[#allocation3 + $0x10e0] sm:$0xff] }
  0x4b   :  { %4402 = vmatpush1.bf16.msra.mxu0 %v4401_v47  ;;  %4276 = vmatprep.subr.bf16.mxu1 %v4275_v48  ;;  %v4419_v38 = vpack.c.bf16 %v1021_v31, %v1015_v30  ;;  %v1020_v39 = vld [vmem:[#allocation3 + $0x1110] sm:$0xff]  ;;  %v643_v40 = vld [vmem:[#allocation3 + $0x548] sm:$0xff]  ;;  %v649_v41 = vld [vmem:[#allocation3 + $0x578] sm:$0xff]  ;;  %v4293_v44 = vpack.c.bf16 %v636_v36, %v630_v35 }
  0x4c   :  { %4404 = vmatprep.subr.bf16.mxu0 %v4403_v52  ;;  %v1027_v42 = vld [vmem:[#allocation3 + $0x1148] sm:$0xff]  ;;  %v1033_v43 = vld [vmem:[#allocation3 + $0x1178] sm:$0xff]  ;;  %v4421_v45 = vpack.c.bf16 %v1020_v39, %v1014_v37  ;;  %v4295_v46 = vpack.c.bf16 %v649_v41, %v643_v40  ;;  %v642_v47 = vld [vmem:[#allocation3 + $0x540] sm:$0xff] }
  0x4d   :  { %v648_v48 = vld [vmem:[#allocation3 + $0x570] sm:$0xff]  ;;  %v1026_v49 = vld [vmem:[#allocation3 + $0x1140] sm:$0xff]  ;;  %v4423_v50 = vpack.c.bf16 %v1033_v43, %v1027_v42  ;;  %v655_v52 = vld [vmem:[#allocation3 + $0x5a8] sm:$0xff] }
  0x4e   :  { %4278 = vmatpush1.bf16.msra.mxu1 %v4277_v58  ;;  %v1032_v51 = vld [vmem:[#allocation3 + $0x1170] sm:$0xff]  ;;  %v661_v53 = vld [vmem:[#allocation3 + $0x5d8] sm:$0xff]  ;;  %v1039_v54 = vld [vmem:[#allocation3 + $0x11a8] sm:$0xff]  ;;  %v4297_v56 = vpack.c.bf16 %v648_v48, %v642_v47 }
  0x4f   :  { %4406 = vmatpush1.bf16.msra.mxu0 %v4405_v59  ;;  %4280 = vmatprep.subr.bf16.mxu1 %v4279_v60  ;;  %v1045_v55 = vld [vmem:[#allocation3 + $0x11d8] sm:$0xff]  ;;  %v4425_v57 = vpack.c.bf16 %v1032_v51, %v1026_v49  ;;  %v4299_v58 = vpack.c.bf16 %v661_v53, %v655_v52  ;;  %v654_v59 = vld [vmem:[#allocation3 + $0x5a0] sm:$0xff]  ;;  %v660_v60 = vld [vmem:[#allocation3 + $0x5d0] sm:$0xff] }
  0x50   :  { %4408 = vmatprep.subr.bf16.mxu0 %v4407_v0  ;;  %v1038_v61 = vld [vmem:[#allocation3 + $0x11a0] sm:$0xff]  ;;  %v4427_v62 = vpack.c.bf16 %v1045_v55, %v1039_v54  ;;  %v1044_v63 = vld [vmem:[#allocation3 + $0x11d0] sm:$0xff]  ;;  %v667_v0 = vld [vmem:[#allocation3 + $0x608] sm:$0xff]  ;;  %v4301_v4 = vpack.c.bf16 %v660_v60, %v654_v59 }
  0x51   :  { %v673_v1 = vld [vmem:[#allocation3 + $0x638] sm:$0xff]  ;;  %v1051_v2 = vld [vmem:[#allocation3 + $0x1208] sm:$0xff]  ;;  %v4429_v5 = vpack.c.bf16 %v1044_v63, %v1038_v61  ;;  %v666_v7 = vld [vmem:[#allocation3 + $0x600] sm:$0xff] }
  0x52   :  { %4282 = vmatpush1.bf16.msra.mxu1 %v4281_v6  ;;  %v1057_v3 = vld [vmem:[#allocation3 + $0x1238] sm:$0xff]  ;;  %v4303_v6 = vpack.c.bf16 %v673_v1, %v667_v0  ;;  %v1050_v10 = vld [vmem:[#allocation3 + $0x1200] sm:$0xff]  ;;  %v1056_v11 = vld [vmem:[#allocation3 + $0x1230] sm:$0xff] }
  0x53   :  { %4410 = vmatpush1.bf16.msra.mxu0 %v4409_v8  ;;  %4284 = vmatprep.subr.bf16.mxu1 %v4283_v9  ;;  %v672_v8 = vld [vmem:[#allocation3 + $0x630] sm:$0xff]  ;;  %v4431_v9 = vpack.c.bf16 %v1057_v3, %v1051_v2  ;;  %v679_v12 = vld [vmem:[#allocation3 + $0x668] sm:$0xff]  ;;  %v40_v14 = vld [vmem:[%s7936_s0] sm:$0xff] }
  0x54   :  { %4412 = vmatprep.subr.bf16.mxu0 %v4411_v13  ;;  %v685_v13 = vld [vmem:[#allocation3 + $0x698] sm:$0xff]  ;;  %v4305_v15 = vpack.c.bf16 %v672_v8, %v666_v7  ;;  %v1063_v16 = vld [vmem:[#allocation3 + $0x1268] sm:$0xff]  ;;  %v1062_v24 = vld [vmem:[#allocation3 + $0x1260] sm:$0xff] }
  0x55   :  { %v1069_v17 = vld [vmem:[#allocation3 + $0x1298] sm:$0xff]  ;;  %v4307_v23 = vpack.c.bf16 %v685_v13, %v679_v12  ;;  %v1068_v25 = vld [vmem:[#allocation3 + $0x1290] sm:$0xff]  ;;  %v691_v28 = vld [vmem:[#allocation3 + $0x6c8] sm:$0xff] }
  0x56   :  { %4286 = vmatpush1.bf16.msra.mxu1 %v4285_v20  ;;  %v4127_v18 = vld [vmem:[%s7936_s0 + $0x11] sm:$0xff]  ;;  %v4433_v20 = vpack.c.bf16 %v1056_v11, %v1050_v10  ;;  %v4435_v27 = vpack.c.bf16 %v1069_v17, %v1063_v16  ;;  %v4437_v35 = vpack.c.bf16 %v1068_v25, %v1062_v24  ;;  %v690_v36 = vld [vmem:[#allocation3 + $0x6c0] sm:$0xff]  ;;  %v703_v43 = vld [vmem:[#allocation3 + $0x728] sm:$0xff] }
  0x57   :  { %4414 = vmatpush1.bf16.msra.mxu0 %v4413_v21  ;;  %4288 = vmatprep.subr.bf16.mxu1 %v4287_v22  ;;  %v678_v21 = vld [vmem:[#allocation3 + $0x660] sm:$0xff]  ;;  %v684_v22 = vld [vmem:[#allocation3 + $0x690] sm:$0xff]  ;;  %v697_v29 = vld [vmem:[#allocation3 + $0x6f8] sm:$0xff] }
  0x58   :  { %4416 = vmatprep.subr.bf16.mxu0 %v4415_v26  ;;  %v6008_v26 = vld [vmem:[%s7936_s0 + $0x22] sm:$0xff]  ;;  %v6013_v30 = vld [vmem:[%s7936_s0 + $0x10] sm:$0xff]  ;;  %v4309_v31 = vpack.c.bf16 %v684_v22, %v678_v21  ;;  %v1093_v48 = vld [vmem:[#allocation3 + $0x1358] sm:$0xff] }
  0x59   :  { %v696_v37 = vld [vmem:[#allocation3 + $0x6f0] sm:$0xff]  ;;  %v1074_v39 = vld [vmem:[#allocation3 + $0x12c0] sm:$0xff]  ;;  %v1087_v47 = vld [vmem:[#allocation3 + $0x1328] sm:$0xff] }
  0x5a   :  { %4290 = vmatpush1.bf16.msra.mxu1 %v4289_v32  ;;  %v1075_v32 = vld [vmem:[#allocation3 + $0x12c8] sm:$0xff]  ;;  %v1080_v40 = vld [vmem:[#allocation3 + $0x12f0] sm:$0xff]  ;;  %v702_v51 = vld [vmem:[#allocation3 + $0x720] sm:$0xff] }
  0x5b   :  { %4418 = vmatpush1.bf16.msra.mxu0 %v4417_v33  ;;  %4292 = vmatprep.subr.bf16.mxu1 %v4291_v34  ;;  %v1081_v33 = vld [vmem:[#allocation3 + $0x12f8] sm:$0xff]  ;;  %v6018_v34 = vld [vmem:[%s7936_s0 + $0x21] sm:$0xff]  ;;  %v708_v52 = vld [vmem:[#allocation3 + $0x750] sm:$0xff] }
  0x5c   :  { %4420 = vmatprep.subr.bf16.mxu0 %v4419_v38  ;;  %v4311_v38 = vpack.c.bf16 %v697_v29, %v691_v28  ;;  %v6025_v41 = vld [vmem:[%s7936_s0 + $0x32] sm:$0xff]  ;;  %v4439_v42 = vpack.c.bf16 %v1081_v33, %v1075_v32  ;;  %v1086_v54 = vld [vmem:[#allocation3 + $0x1320] sm:$0xff]  ;;  %v4317_v61 = vpack.c.bf16 %v708_v52, %v702_v51  ;;  %v1111_v13 = vld [vmem:[#allocation3 + $0x13e8] sm:$0xff] }
  0x5d   :  { %v6037_v49 = vld [vmem:[%s7936_s0 + $0x31] sm:$0xff]  ;;  %v6056_v0 = vld [vmem:[%s7936_s0 + $0x41] sm:$0xff] }
  0x5e   :  { %4294 = vmatpush1.bf16.msra.mxu1 %v4293_v44  ;;  %v709_v44 = vld [vmem:[#allocation3 + $0x758] sm:$0xff]  ;;  %v1092_v55 = vld [vmem:[#allocation3 + $0x1350] sm:$0xff]  ;;  %v714_v2 = vld [vmem:[#allocation3 + $0x780] sm:$0xff] }
  0x5f   :  { %4422 = vmatpush1.bf16.msra.mxu0 %v4421_v45  ;;  %4296 = vmatprep.subr.bf16.mxu1 %v4295_v46  ;;  %v6031_v45 = vld [vmem:[%s7936_s0 + $0x20] sm:$0xff]  ;;  %v4313_v46 = vpack.c.bf16 %v696_v37, %v690_v36  ;;  %v4315_v53 = vpack.c.bf16 %v709_v44, %v703_v43  ;;  %v721_v59 = vld [vmem:[#allocation3 + $0x7b8] sm:$0xff]  ;;  %v6050_v60 = vld [vmem:[%s7936_s0 + $0x30] sm:$0xff]  ;;  %v4445_v1 = vpack.c.bf16 %v1092_v55, %v1086_v54 }
  0x60   :  { %4424 = vmatprep.subr.bf16.mxu0 %v4423_v50  ;;  %v4441_v50 = vpack.c.bf16 %v1080_v40, %v1074_v39  ;;  %v1105_v63 = vld [vmem:[#allocation3 + $0x13b8] sm:$0xff]  ;;  %v720_v3 = vld [vmem:[#allocation3 + $0x7b0] sm:$0xff]  ;;  %v6069_v11 = vld [vmem:[%s7936_s0 + $0x40] sm:$0xff] }
  0x61   :  { %v6063_v7 = vld [vmem:[%s7936_s0 + $0x52] sm:$0xff]  ;;  %v4321_v12 = vpack.c.bf16 %v720_v3, %v714_v2  ;;  %v726_v17 = vld [vmem:[#allocation3 + $0x7e0] sm:$0xff]  ;;  %v739_v25 = vld [vmem:[#allocation3 + $0x848] sm:$0xff] }
  0x62   :  { %4298 = vmatpush1.bf16.msra.mxu1 %v4297_v56  ;;  %v6044_v56 = vld [vmem:[%s7936_s0 + $0x42] sm:$0xff]  ;;  %v733_v10 = vld [vmem:[#allocation3 + $0x818] sm:$0xff]  ;;  %v1116_v22 = vld [vmem:[#allocation3 + $0x1410] sm:$0xff] }
  0x63   :  { %4426 = vmatpush1.bf16.msra.mxu0 %v4425_v57  ;;  %4300 = vmatprep.subr.bf16.mxu1 %v4299_v58  ;;  %v4443_v57 = vpack.c.bf16 %v1093_v48, %v1087_v47  ;;  %v715_v58 = vld [vmem:[#allocation3 + $0x788] sm:$0xff]  ;;  %v1110_v21 = vld [vmem:[#allocation3 + $0x13e0] sm:$0xff]  ;;  %v6088_v28 = vld [vmem:[%s7936_s0 + $0x50] sm:$0xff] }
  0x64   :  { %4428 = vmatprep.subr.bf16.mxu0 %v4427_v62  ;;  %v1099_v62 = vld [vmem:[#allocation3 + $0x1388] sm:$0xff]  ;;  %v1129_v32 = vld [vmem:[#allocation3 + $0x1478] sm:$0xff]  ;;  %v738_v36 = vld [vmem:[#allocation3 + $0x840] sm:$0xff] }
  0x65   :  { %v4447_v8 = vpack.c.bf16 %v1105_v63, %v1099_v62  ;;  %v6094_v33 = vld [vmem:[%s7936_s0 + $0x61] sm:$0xff]  ;;  %v744_v37 = vld [vmem:[#allocation3 + $0x870] sm:$0xff]  ;;  %v1141_v51 = vld [vmem:[#allocation3 + $0x14d8] sm:$0xff] }
  0x66   :  { %4302 = vmatpush1.bf16.msra.mxu1 %v4301_v4  ;;  %v4319_v4 = vpack.c.bf16 %v721_v59, %v715_v58  ;;  %v1122_v39 = vld [vmem:[#allocation3 + $0x1440] sm:$0xff]  ;;  %v1128_v40 = vld [vmem:[#allocation3 + $0x1470] sm:$0xff]  ;;  %v751_v44 = vld [vmem:[#allocation3 + $0x8a8] sm:$0xff]  ;;  %v4329_v48 = vpack.c.bf16 %v744_v37, %v738_v36 }
  0x67   :  { %4430 = vmatpush1.bf16.msra.mxu0 %v4429_v5  ;;  %4304 = vmatprep.subr.bf16.mxu1 %v4303_v6  ;;  %v1098_v5 = vld [vmem:[#allocation3 + $0x1380] sm:$0xff]  ;;  %v1104_v6 = vld [vmem:[#allocation3 + $0x13b0] sm:$0xff]  ;;  %v763_v63 = vld [vmem:[#allocation3 + $0x908] sm:$0xff] }
  0x68   :  { %4432 = vmatprep.subr.bf16.mxu0 %v4431_v9  ;;  %v727_v9 = vld [vmem:[#allocation3 + $0x7e8] sm:$0xff]  ;;  %v4449_v16 = vpack.c.bf16 %v1104_v6, %v1098_v5  ;;  %v6107_v47 = vld [vmem:[%s7936_s0 + $0x60] sm:$0xff]  ;;  %v6113_v52 = vld [vmem:[%s7936_s0 + $0x71] sm:$0xff] }
  0x69   :  { %1435 = vmatmul.mubr.f32.vlgmr.msra.gmra.mrb[0].mxu1 %v40_v14  ;;  %v1117_v14 = vld [vmem:[#allocation3 + $0x1418] sm:$0xff]  ;;  %v750_v54 = vld [vmem:[#allocation3 + $0x8a0] sm:$0xff]  ;;  %v756_v55 = vld [vmem:[#allocation3 + $0x8d0] sm:$0xff] }
  0x6a   :  { %1757 = vmatmul.mubr.f32.vlgmr.msra.gmra.mrb[0].mxu0 %v4127_v18  ;;  %4306 = vmatpush1.bf16.msra.mxu1 %v4305_v15  ;;  %v6075_v15 = vld [vmem:[%s7936_s0 + $0x51] sm:$0xff]  ;;  %v4451_v24 = vpack.c.bf16 %v1117_v14, %v1111_v13  ;;  %v1134_v58 = vld [vmem:[#allocation3 + $0x14a0] sm:$0xff]  ;;  %v4333_v3 = vpack.c.bf16 %v756_v55, %v750_v54 }
  0x6b   :  { %4434 = vmatpush1.bf16.msra.mxu0 %v4433_v20  ;;  %1440 = vmatprep.mubr.f32.mxu1 %v4127_v18  ;;  %v732_v18 = vld [vmem:[#allocation3 + $0x810] sm:$0xff]  ;;  %v4323_v20 = vpack.c.bf16 %v733_v10, %v727_v9  ;;  %v1153_v5 = vld [vmem:[#allocation3 + $0x1538] sm:$0xff]  ;;  %v6130_v6 = vld [vmem:[%s7936_s0 + $0x81] sm:$0xff] }
  0x6c   :  { %1762 = vmatprep.mubr.f32.mxu0 %v6008_v26  ;;  %4308 = vmatprep.subr.bf16.mxu1 %v4307_v23  ;;  %v6082_v23 = vld [vmem:[%s7936_s0 + $0x62] sm:$0xff]  ;;  %v4325_v29 = vpack.c.bf16 %v732_v18, %v726_v17  ;;  %v1140_v59 = vld [vmem:[#allocation3 + $0x14d0] sm:$0xff] }
  0x6d   :  { %1441 = vmatmul.mubr.f32.gmra.mrb[2].mxu1 %v6013_v30  ;;  %4436 = vmatprep.subr.bf16.mxu0 %v4435_v27  ;;  %v745_v27 = vld [vmem:[#allocation3 + $0x878] sm:$0xff]  ;;  %v6124_v2 = vld [vmem:[%s7936_s0 + $0x70] sm:$0xff]  ;;  %v762_v9 = vld [vmem:[#allocation3 + $0x900] sm:$0xff] }
  0x6e   :  { %1763 = vmatmul.mubr.f32.gmra.mrb[2].mxu0 %v6018_v34  ;;  %4310 = vmatpush1.bf16.msra.mxu1 %v4309_v31  ;;  %v1123_v31 = vld [vmem:[#allocation3 + $0x1448] sm:$0xff]  ;;  %v768_v10 = vld [vmem:[#allocation3 + $0x930] sm:$0xff]  ;;  %v1146_v14 = vld [vmem:[#allocation3 + $0x1500] sm:$0xff] }
  0x6f   :  { %4438 = vmatpush1.bf16.msra.mxu0 %v4437_v35  ;;  %1446 = vmatprep.mubr.f32.mxu1 %v6018_v34  ;;  %v4453_v35 = vpack.c.bf16 %v1116_v22, %v1110_v21  ;;  %v4455_v43 = vpack.c.bf16 %v1129_v32, %v1123_v31  ;;  %v6139_v17 = vld [vmem:[%s7936_s0 + $0xb2] sm:$0xff]  ;;  %v48_v22 = vld [vmem:[%s7936_s0 + $0xa0] sm:$0xff] }
  0x70   :  { %1768 = vmatprep.mubr.f32.mxu0 %v6025_v41  ;;  %4312 = vmatprep.subr.bf16.mxu1 %v4311_v38  ;;  %v4327_v38 = vpack.c.bf16 %v745_v27, %v739_v25  ;;  %v781_v21 = vld [vmem:[#allocation3 + $0x998] sm:$0xff]  ;;  %v1159_v25 = vld [vmem:[#allocation3 + $0x1568] sm:$0xff]  ;;  %v774_v32 = vld [vmem:[#allocation3 + $0x960] sm:$0xff] }
  0x71   :  { %1447 = vmatmul.mubr.f32.gmra.mrb[4].mxu1 %v6031_v45  ;;  %4440 = vmatprep.subr.bf16.mxu0 %v4439_v42  ;;  %v6101_v42 = vld [vmem:[%s7936_s0 + $0x72] sm:$0xff]  ;;  %v1158_v37 = vld [vmem:[#allocation3 + $0x1560] sm:$0xff] }
  0x72   :  { %1769 = vmatmul.mubr.f32.gmra.mrb[4].mxu0 %v6037_v49  ;;  %4314 = vmatpush1.bf16.msra.mxu1 %v4313_v46  ;;  %v757_v46 = vld [vmem:[#allocation3 + $0x8d8] sm:$0xff]  ;;  %v786_v55 = vld [vmem:[#allocation3 + $0x9c0] sm:$0xff] }
  0x73   :  { %4442 = vmatpush1.bf16.msra.mxu0 %v4441_v50  ;;  %1452 = vmatprep.mubr.f32.mxu1 %v6037_v49  ;;  %v1135_v50 = vld [vmem:[#allocation3 + $0x14a8] sm:$0xff]  ;;  %v1165_v27 = vld [vmem:[#allocation3 + $0x1598] sm:$0xff] }
  0x74   :  { %1774 = vmatprep.mubr.f32.mxu0 %v6044_v56  ;;  %4316 = vmatprep.subr.bf16.mxu1 %v4315_v53  ;;  %v4457_v53 = vpack.c.bf16 %v1128_v40, %v1122_v39  ;;  %v4459_v62 = vpack.c.bf16 %v1141_v51, %v1135_v50  ;;  %v6152_v39 = vld [vmem:[%s7936_s0 + $0xc2] sm:$0xff]  ;;  %v4467_v40 = vpack.c.bf16 %v1165_v27, %v1159_v25  ;;  %v1177_v51 = vld [vmem:[#allocation3 + $0x15f8] sm:$0xff]  ;;  %v6194_v27 = vld [vmem:[%s7936_s0 + $0xd0] sm:$0xff] }
  0x75   :  { %1453 = vmatmul.mubr.f32.gmra.mrb[6].mxu1 %v6050_v60  ;;  %4444 = vmatprep.subr.bf16.mxu0 %v4443_v57  ;;  %v4331_v57 = vpack.c.bf16 %v757_v46, %v751_v44  ;;  %v793_v44 = vld [vmem:[#allocation3 + $0x9f8] sm:$0xff]  ;;  %v6157_v46 = vld [vmem:[%s7936_s0 + $0xb0] sm:$0xff]  ;;  %v1171_v50 = vld [vmem:[#allocation3 + $0x15c8] sm:$0xff] }
  0x76   :  { %1775 = vmatmul.mubr.f32.gmra.mrb[6].mxu0 %v6056_v0  ;;  %4318 = vmatpush1.bf16.msra.mxu1 %v4317_v61  ;;  %v4150_v61 = vld [vmem:[%s7936_s0 + $0x82] sm:$0xff]  ;;  %v817_v25 = vld [vmem:[#allocation3 + $0xab8] sm:$0xff] }
  0x77   :  { %4446 = vmatpush1.bf16.msra.mxu0 %v4445_v1  ;;  %1458 = vmatprep.mubr.f32.mxu1 %v6056_v0  ;;  %v769_v1 = vld [vmem:[#allocation3 + $0x938] sm:$0xff] }
  0x78   :  { %1780 = vmatprep.mubr.f32.mxu0 %v6063_v7  ;;  %4320 = vmatprep.subr.bf16.mxu1 %v4319_v4  ;;  %v1147_v4 = vld [vmem:[#allocation3 + $0x1508] sm:$0xff]  ;;  %v4335_v13 = vpack.c.bf16 %v769_v1, %v763_v63  ;;  %v4471_v63 = vpack.c.bf16 %v1177_v51, %v1171_v50 }
  0x79   :  { %1459 = vmatmul.mubr.f32.gmra.mrb[8].mxu1 %v6069_v11  ;;  %4448 = vmatprep.subr.bf16.mxu0 %v4447_v8  ;;  %v4461_v8 = vpack.c.bf16 %v1140_v59, %v1134_v58  ;;  %v4463_v18 = vpack.c.bf16 %v1153_v5, %v1147_v4  ;;  %v1170_v59 = vld [vmem:[#allocation3 + $0x15c0] sm:$0xff]  ;;  %v799_v1 = vld [vmem:[#allocation3 + $0xa28] sm:$0xff] }
  0x7a   :  { %1781 = vmatmul.mubr.f32.gmra.mrb[8].mxu0 %v6075_v15  ;;  %4322 = vmatpush1.bf16.msra.mxu1 %v4321_v12  ;;  %v80_v12 = vld [vmem:[%s7936_s0 + $0xa1] sm:$0xff] }
  0x7b   :  { %4450 = vmatpush1.bf16.msra.mxu0 %v4449_v16  ;;  %1464 = vmatprep.mubr.f32.mxu1 %v6075_v15  ;;  %v1152_v16 = vld [vmem:[#allocation3 + $0x1530] sm:$0xff]  ;;  %v6175_v4 = vld [vmem:[%s7936_s0 + $0xc0] sm:$0xff]  ;;  %v823_v51 = vld [vmem:[#allocation3 + $0xae8] sm:$0xff] }
  0x7c   :  { %1786 = vmatprep.mubr.f32.mxu0 %v6082_v23  ;;  %4324 = vmatprep.subr.bf16.mxu1 %v4323_v20  ;;  %v775_v20 = vld [vmem:[#allocation3 + $0x968] sm:$0xff]  ;;  %v4465_v31 = vpack.c.bf16 %v1152_v16, %v1146_v14  ;;  %v804_v14 = vld [vmem:[#allocation3 + $0xa50] sm:$0xff] }
  0x7d   :  { %1465 = vmatmul.mubr.f32.gmra.mrb[10].mxu1 %v6088_v28  ;;  %4452 = vmatprep.subr.bf16.mxu0 %v4451_v24  ;;  %v4337_v24 = vpack.c.bf16 %v768_v10, %v762_v9  ;;  %v4339_v36 = vpack.c.bf16 %v781_v21, %v775_v20  ;;  %v1189_v9 = vld [vmem:[#allocation3 + $0x1658] sm:$0xff]  ;;  %v1188_v20 = vld [vmem:[#allocation3 + $0x1650] sm:$0xff]  ;;  %v6188_v21 = vld [vmem:[%s7936_s0 + $0xe2] sm:$0xff] }
  0x7e   :  { %1787 = vmatmul.mubr.f32.gmra.mrb[10].mxu0 %v6094_v33  ;;  %4326 = vmatpush1.bf16.msra.mxu1 %v4325_v29  ;;  %v4135_v29 = vld [vmem:[%s7936_s0 + $0xb1] sm:$0xff] }
  0x7f   :  { %4454 = vmatpush1.bf16.msra.mxu0 %v4453_v35  ;;  %1470 = vmatprep.mubr.f32.mxu1 %v6094_v33  ;;  %v780_v35 = vld [vmem:[#allocation3 + $0x990] sm:$0xff] }
  0x80   :  { %1792 = vmatprep.mubr.f32.mxu0 %v6101_v42  ;;  %4328 = vmatprep.subr.bf16.mxu1 %v4327_v38  ;;  %v1164_v38 = vld [vmem:[#allocation3 + $0x1590] sm:$0xff] }
  0x81   :  { %1471 = vmatmul.mubr.f32.gmra.mrb[12].mxu1 %v6107_v47  ;;  %4456 = vmatprep.subr.bf16.mxu0 %v4455_v43  ;;  %v787_v43 = vld [vmem:[#allocation3 + $0x9c8] sm:$0xff]  ;;  %v4469_v54 = vpack.c.bf16 %v1164_v38, %v1158_v37  ;;  %v6181_v10 = vld [vmem:[%s7936_s0 + $0xd1] sm:$0xff]  ;;  %v810_v37 = vld [vmem:[#allocation3 + $0xa80] sm:$0xff] }
  0x82   :  { %1793 = vmatmul.mubr.f32.gmra.mrb[12].mxu0 %v6113_v52  ;;  %4330 = vmatpush1.bf16.msra.mxu1 %v4329_v48  ;;  %v4341_v48 = vpack.c.bf16 %v780_v35, %v774_v32  ;;  %v4343_v58 = vpack.c.bf16 %v793_v44, %v787_v43  ;;  %v1201_v32 = vld [vmem:[#allocation3 + $0x16b8] sm:$0xff]  ;;  %v6200_v35 = vld [vmem:[%s7936_s0 + $0xe1] sm:$0xff]  ;;  %v816_v38 = vld [vmem:[#allocation3 + $0xab0] sm:$0xff] }
  0x83   :  { %4458 = vmatpush1.bf16.msra.mxu0 %v4457_v53  ;;  %1476 = vmatprep.mubr.f32.mxu1 %v6113_v52  ;;  %v6162_v53 = vld [vmem:[%s7936_s0 + $0xc1] sm:$0xff]  ;;  %v1200_v44 = vld [vmem:[#allocation3 + $0x16b0] sm:$0xff] }
  0x84   :  { %1798 = vmatprep.mubr.f32.mxu0 %v4150_v61  ;;  %4332 = vmatprep.subr.bf16.mxu1 %v4331_v57  ;;  %v792_v57 = vld [vmem:[#allocation3 + $0x9f0] sm:$0xff]  ;;  %v1194_v43 = vld [vmem:[#allocation3 + $0x1680] sm:$0xff] }
  0x85   :  { %1477 = vmatmul.mubr.f32.gmra.mrb[14].mxu1 %v6124_v2  ;;  %4460 = vmatprep.subr.bf16.mxu0 %v4459_v62  ;;  %v1176_v61 = vld [vmem:[#allocation3 + $0x15f0] sm:$0xff]  ;;  %v4345_v5 = vpack.c.bf16 %v792_v57, %v786_v55  ;;  %v6213_v55 = vld [vmem:[%s7936_s0 + $0xe0] sm:$0xff]  ;;  %v4353_v57 = vpack.c.bf16 %v816_v38, %v810_v37 }
  0x86   :  { %1799 = vmatmul.mubr.f32.gmra.mrb[14].mxu0 %v6130_v6  ;;  %4334 = vmatpush1.bf16.msra.mxu1 %v4333_v3  ;;  %v6169_v62 = vld [vmem:[%s7936_s0 + $0xd2] sm:$0xff]  ;;  %v1218_v37 = vld [vmem:[#allocation3 + $0x1740] sm:$0xff] }
  0x87   :  { %4462 = vmatpush1.bf16.msra.mxu0 %v4461_v8  ;;  %1482 = vmatprep.mubr.f32.mxu1 %v80_v12  ;;  %v805_v3 = vld [vmem:[#allocation3 + $0xa58] sm:$0xff]  ;;  %v1183_v8 = vld [vmem:[#allocation3 + $0x1628] sm:$0xff]  ;;  %v4473_v12 = vpack.c.bf16 %v1176_v61, %v1170_v59  ;;  %v1224_v38 = vld [vmem:[#allocation3 + $0x1770] sm:$0xff] }
  0x88   :  { %1804 = vmatprep.mubr.f32.mxu0 %v6139_v17  ;;  %4336 = vmatprep.subr.bf16.mxu1 %v4335_v13  ;;  %v798_v13 = vld [vmem:[#allocation3 + $0xa20] sm:$0xff]  ;;  %v4347_v16 = vpack.c.bf16 %v805_v3, %v799_v1  ;;  %v1213_v59 = vld [vmem:[#allocation3 + $0x1718] sm:$0xff]  ;;  %v828_v3 = vld [vmem:[#allocation3 + $0xb10] sm:$0xff] }
  0x89   :  { %1483 = vmatmul.mubr.f32.gmra.mrb[16].mxu1 %v48_v22  ;;  %4464 = vmatprep.subr.bf16.mxu0 %v4463_v18  ;;  %v1182_v18 = vld [vmem:[#allocation3 + $0x1620] sm:$0xff]  ;;  %v4475_v22 = vpack.c.bf16 %v1189_v9, %v1183_v8  ;;  %v6219_v61 = vld [vmem:[%s7936_s0 + $0xf1] sm:$0xff] }
  0x8a   :  { %1805 = vmatmul.mubr.f32.gmra.mrb[16].mxu0 %v4135_v29  ;;  %4338 = vmatpush1.bf16.msra.mxu1 %v4337_v24  ;;  %v811_v24 = vld [vmem:[#allocation3 + $0xa88] sm:$0xff]  ;;  %v822_v1 = vld [vmem:[#allocation3 + $0xae0] sm:$0xff]  ;;  %v1212_v9 = vld [vmem:[#allocation3 + $0x1710] sm:$0xff] }
  0x8b   :  { %4466 = vmatpush1.bf16.msra.mxu0 %v4465_v31  ;;  %1488 = vmatprep.mubr.f32.mxu1 %v4135_v29  ;;  %v4349_v29 = vpack.c.bf16 %v804_v14, %v798_v13  ;;  %v1195_v31 = vld [vmem:[#allocation3 + $0x1688] sm:$0xff]  ;;  %v1206_v8 = vld [vmem:[#allocation3 + $0x16e0] sm:$0xff] }
  0x8c   :  { %1810 = vmatprep.mubr.f32.mxu0 %v6152_v39  ;;  %4340 = vmatprep.subr.bf16.mxu1 %v4339_v36  ;;  %v4477_v36 = vpack.c.bf16 %v1188_v20, %v1182_v18  ;;  %v4479_v50 = vpack.c.bf16 %v1201_v32, %v1195_v31  ;;  %v835_v14 = vld [vmem:[#allocation3 + $0xb48] sm:$0xff]  ;;  %v6232_v18 = vld [vmem:[%s7936_s0 + $0xf0] sm:$0xff]  ;;  %v4357_v20 = vpack.c.bf16 %v828_v3, %v822_v1  ;;  %v834_v31 = vld [vmem:[#allocation3 + $0xb40] sm:$0xff] }
  0x8d   :  { %1489 = vmatmul.mubr.f32.gmra.mrb[18].mxu1 %v6157_v46  ;;  %4468 = vmatprep.subr.bf16.mxu0 %v4467_v40  ;;  %v4351_v40 = vpack.c.bf16 %v817_v25, %v811_v24  ;;  %v1225_v24 = vld [vmem:[#allocation3 + $0x1778] sm:$0xff]  ;;  %v6238_v25 = vld [vmem:[%s7936_s0 + $0x101] sm:$0xff]  ;;  %v840_v32 = vld [vmem:[#allocation3 + $0xb70] sm:$0xff] }
  0x8e   :  { %1811 = vmatmul.mubr.f32.gmra.mrb[18].mxu0 %v6162_v53  ;;  %4342 = vmatpush1.bf16.msra.mxu1 %v4341_v48  ;;  %v6207_v48 = vld [vmem:[%s7936_s0 + $0xf2] sm:$0xff]  ;;  %v846_v1 = vld [vmem:[#allocation3 + $0xba0] sm:$0xff] }
  0x8f   :  { %4470 = vmatpush1.bf16.msra.mxu0 %v4469_v54  ;;  %1494 = vmatprep.mubr.f32.mxu1 %v6162_v53  ;;  %v829_v54 = vld [vmem:[#allocation3 + $0xb18] sm:$0xff]  ;;  %v852_v3 = vld [vmem:[#allocation3 + $0xbd0] sm:$0xff] }
  0x90   :  { %1816 = vmatprep.mubr.f32.mxu0 %v6169_v62  ;;  %4344 = vmatprep.subr.bf16.mxu1 %v4343_v58  ;;  %v1207_v58 = vld [vmem:[#allocation3 + $0x16e8] sm:$0xff] }
  0x91   :  { %1495 = vmatmul.mubr.f32.gmra.mrb[20].mxu1 %v6175_v4  ;;  %4472 = vmatprep.subr.bf16.mxu0 %v4471_v63  ;;  %v4481_v63 = vpack.c.bf16 %v1200_v44, %v1194_v43  ;;  %v4483_v13 = vpack.c.bf16 %v1213_v59, %v1207_v58  ;;  %v847_v44 = vld [vmem:[#allocation3 + $0xba8] sm:$0xff]  ;;  %v1237_v58 = vld [vmem:[#allocation3 + $0x17d8] sm:$0xff] }
  0x92   :  { %1817 = vmatmul.mubr.f32.gmra.mrb[20].mxu0 %v6181_v10  ;;  %4346 = vmatpush1.bf16.msra.mxu1 %v4345_v5  ;;  %v4355_v5 = vpack.c.bf16 %v829_v54, %v823_v51  ;;  %v6251_v51 = vld [vmem:[%s7936_s0 + $0x100] sm:$0xff]  ;;  %v4361_v54 = vpack.c.bf16 %v840_v32, %v834_v31  ;;  %v6257_v59 = vld [vmem:[%s7936_s0 + $0x111] sm:$0xff] }
  0x93   :  { %4474 = vmatpush1.bf16.msra.mxu0 %v4473_v12  ;;  %1500 = vmatprep.mubr.f32.mxu1 %v6181_v10  ;;  %v6226_v12 = vld [vmem:[%s7936_s0 + $0x102] sm:$0xff]  ;;  %v1249_v31 = vld [vmem:[#allocation3 + $0x1838] sm:$0xff] }
  0x94   :  { %1822 = vmatprep.mubr.f32.mxu0 %v6188_v21  ;;  %4348 = vmatprep.subr.bf16.mxu1 %v4347_v16  ;;  %v841_v16 = vld [vmem:[#allocation3 + $0xb78] sm:$0xff]  ;;  %v6274_v32 = vld [vmem:[%s7936_s0 + $0x121] sm:$0xff] }
  0x95   :  { %1501 = vmatmul.mubr.f32.gmra.mrb[22].mxu1 %v6194_v27  ;;  %4476 = vmatprep.subr.bf16.mxu0 %v4475_v22  ;;  %v1219_v22 = vld [vmem:[#allocation3 + $0x1748] sm:$0xff] }
  0x96   :  { %1823 = vmatmul.mubr.f32.gmra.mrb[22].mxu0 %v6200_v35  ;;  %4350 = vmatpush1.bf16.msra.mxu1 %v4349_v29  ;;  %v4485_v29 = vpack.c.bf16 %v1212_v9, %v1206_v8  ;;  %v4487_v43 = vpack.c.bf16 %v1225_v24, %v1219_v22  ;;  %v1230_v8 = vld [vmem:[#allocation3 + $0x17a0] sm:$0xff]  ;;  %v1236_v9 = vld [vmem:[#allocation3 + $0x17d0] sm:$0xff]  ;;  %v4365_v24 = vpack.c.bf16 %v852_v3, %v846_v1  ;;  %v1255_v3 = vld [vmem:[#allocation3 + $0x1868] sm:$0xff] }
  0x97   :  { %4478 = vmatpush1.bf16.msra.mxu0 %v4477_v36  ;;  %1506 = vmatprep.mubr.f32.mxu1 %v6200_v35  ;;  %v4359_v36 = vpack.c.bf16 %v841_v16, %v835_v14  ;;  %v477_v16 = vld [vmem:[#allocation3 + $0x18] sm:$0xff]  ;;  %v6268_v22 = vld [vmem:[%s7936_s0 + $0x110] sm:$0xff] }
  0x98   :  { %1828 = vmatprep.mubr.f32.mxu0 %v6207_v48  ;;  %4352 = vmatprep.subr.bf16.mxu1 %v4351_v40  ;;  %v6245_v40 = vld [vmem:[%s7936_s0 + $0x112] sm:$0xff] }
  0x99   :  { %1507 = vmatmul.mubr.f32.gmra.mrb[24].mxu1 %v6213_v55  ;;  %4480 = vmatprep.subr.bf16.mxu0 %v4479_v50  ;;  %v853_v50 = vld [vmem:[#allocation3 + $0xbd8] sm:$0xff] }
  0x9a   :  { %1829 = vmatmul.mubr.f32.gmra.mrb[24].mxu0 %v6219_v61  ;;  %4354 = vmatpush1.bf16.msra.mxu1 %v4353_v57  ;;  %v1231_v57 = vld [vmem:[#allocation3 + $0x17a8] sm:$0xff] }
  0x9b   :  { %4482 = vmatpush1.bf16.msra.mxu0 %v4481_v63  ;;  %1512 = vmatprep.mubr.f32.mxu1 %v6219_v61  ;;  %v4489_v63 = vpack.c.bf16 %v1224_v38, %v1218_v37  ;;  %v4491_v14 = vpack.c.bf16 %v1237_v58, %v1231_v57  ;;  %v476_v37 = vld [vmem:[#allocation3 + $0x10] sm:$0xff]  ;;  %v482_v38 = vld [vmem:[#allocation3 + $0x40] sm:$0xff]  ;;  %v489_v57 = vld [vmem:[#allocation3 + $0x78] sm:$0xff] }
  0x9c   :  { %1834 = vmatprep.mubr.f32.mxu0 %v6226_v12  ;;  %4356 = vmatprep.subr.bf16.mxu1 %v4355_v5  ;;  %v4363_v5 = vpack.c.bf16 %v853_v50, %v847_v44  ;;  %v1242_v44 = vld [vmem:[#allocation3 + $0x1800] sm:$0xff]  ;;  %v495_v58 = vld [vmem:[#allocation3 + $0xa8] sm:$0xff]  ;;  %v4529_v1 = vpack.c.bf16 %v482_v38, %v476_v37 }
  0x9d   :  { %1513 = vmatmul.mubr.f32.gmra.mrb[26].mxu1 %v6232_v18  ;;  %4484 = vmatprep.subr.bf16.mxu0 %v4483_v13  ;;  %v4158_v13 = vld [vmem:[%s7936_s0 + $0x122] sm:$0xff] }
  0x9e   :  { %1835 = vmatmul.mubr.f32.gmra.mrb[26].mxu0 %v6238_v25  ;;  %4358 = vmatpush1.bf16.msra.mxu1 %v4357_v20  ;;  %v483_v20 = vld [vmem:[#allocation3 + $0x48] sm:$0xff]  ;;  %v506_v38 = vld [vmem:[#allocation3 + $0x100] sm:$0xff] }
  0x9f   :  { %4486 = vmatpush1.bf16.msra.mxu0 %v4485_v29  ;;  %1518 = vmatprep.mubr.f32.mxu1 %v6238_v25  ;;  %v1243_v29 = vld [vmem:[#allocation3 + $0x1808] sm:$0xff] }
  0xa0   :  { %1840 = vmatprep.mubr.f32.mxu0 %v6245_v40  ;;  %4360 = vmatprep.subr.bf16.mxu1 %v4359_v36  ;;  %v4493_v36 = vpack.c.bf16 %v1236_v9, %v1230_v8  ;;  %v4495_v50 = vpack.c.bf16 %v1249_v31, %v1243_v29  ;;  %v1261_v8 = vld [vmem:[#allocation3 + $0x1898] sm:$0xff]  ;;  %v494_v9 = vld [vmem:[#allocation3 + $0xa0] sm:$0xff]  ;;  %v1260_v31 = vld [vmem:[#allocation3 + $0x1890] sm:$0xff] }
  0xa1   :  { %1519 = vmatmul.mubr.f32.gmra.mrb[28].mxu1 %v6251_v51  ;;  %4488 = vmatprep.subr.bf16.mxu0 %v4487_v43  ;;  %v4527_v43 = vpack.c.bf16 %v483_v20, %v477_v16  ;;  %v501_v16 = vld [vmem:[#allocation3 + $0xd8] sm:$0xff]  ;;  %v507_v20 = vld [vmem:[#allocation3 + $0x108] sm:$0xff]  ;;  %v1254_v29 = vld [vmem:[#allocation3 + $0x1860] sm:$0xff] }
  0xa2   :  { %1841 = vmatmul.mubr.f32.gmra.mrb[28].mxu0 %v6257_v59  ;;  %4362 = vmatpush1.bf16.msra.mxu1 %v4361_v54  ;;  %v1248_v54 = vld [vmem:[#allocation3 + $0x1830] sm:$0xff]  ;;  %v1267_v37 = vld [vmem:[#allocation3 + $0x18c8] sm:$0xff] }
  0xa3   :  { %4490 = vmatpush1.bf16.msra.mxu0 %v4489_v63  ;;  %1524 = vmatprep.mubr.f32.mxu1 %v6257_v59  ;;  %v104_v63 = vld [vmem:[%s7936_s0 + $0x2] sm:$0xff] }
  0xa4   :  { %1846 = vmatprep.mubr.f32.mxu0 %v4158_v13  ;;  %4364 = vmatprep.subr.bf16.mxu1 %v4363_v5  ;;  %v488_v5 = vld [vmem:[#allocation3 + $0x70] sm:$0xff]  ;;  %v4497_v13 = vpack.c.bf16 %v1248_v54, %v1242_v44  ;;  %v4501_v44 = vpack.c.bf16 %v1260_v31, %v1254_v29  ;;  %v519_v54 = vld [vmem:[#allocation3 + $0x168] sm:$0xff]  ;;  %v530_v31 = vld [vmem:[#allocation3 + $0x1c0] sm:$0xff] }
  0xa5   :  { %1525 = vmatmul.mubr.f32.gmra.mrb[30].mxu1 %v6268_v22  ;;  %4492 = vmatprep.subr.bf16.mxu0 %v4491_v14  ;;  %v4531_v14 = vpack.c.bf16 %v495_v58, %v489_v57  ;;  %v1266_v58 = vld [vmem:[#allocation3 + $0x18c0] sm:$0xff]  ;;  %v524_v29 = vld [vmem:[#allocation3 + $0x190] sm:$0xff] }
  0xa6   :  { %1847 = vmatmul.mubr.f32.gmra.mrb[30].mxu0 %v6274_v32  ;;  %4366 = vmatpush1.bf16.msra.mxu1 %v4365_v24  ;;  %v4499_v24 = vpack.c.bf16 %v1261_v8, %v1255_v3  ;;  %v512_v3 = vld [vmem:[#allocation3 + $0x130] sm:$0xff]  ;;  %v518_v8 = vld [vmem:[#allocation3 + $0x160] sm:$0xff] }
  0xa7   :  { %4494 = vmatpush1.bf16.msra.mxu0 %v4493_v36  ;;  %1595 = vmatprep.mubr.f32.mxu1 %v6013_v30  ;;  %v4533_v36 = vpack.c.bf16 %v494_v9, %v488_v5  ;;  %v1273_v30 = vld [vmem:[#allocation3 + $0x18f8] sm:$0xff] }
  0xa8   :  { %1917 = vmatprep.mubr.f32.mxu0 %v6018_v34  ;;  %4528 = vmatprep.subr.bf16.mxu1 %v4527_v43  ;;  %v500_v34 = vld [vmem:[#allocation3 + $0xd0] sm:$0xff]  ;;  %v4535_v43 = vpack.c.bf16 %v507_v20, %v501_v16  ;;  %v4503_v57 = vpack.c.bf16 %v1273_v30, %v1267_v37  ;;  %v525_v5 = vld [vmem:[#allocation3 + $0x198] sm:$0xff]  ;;  %v1278_v16 = vld [vmem:[#allocation3 + $0x1920] sm:$0xff] }
  0xa9   :  { %1596 = vmatmul.mubr.f32.vlgmr.msra.gmra.mrb[0].mxu1 %v104_v63  ;;  %4496 = vmatprep.subr.bf16.mxu0 %v4495_v50  ;;  %v513_v50 = vld [vmem:[#allocation3 + $0x138] sm:$0xff]  ;;  %v1272_v63 = vld [vmem:[#allocation3 + $0x18f0] sm:$0xff]  ;;  %v543_v30 = vld [vmem:[#allocation3 + $0x228] sm:$0xff] }
  0xaa   :  { %1918 = vmatmul.mubr.f32.vlgmr.msra.gmra.mrb[0].mxu0 %v6031_v45  ;;  %4530 = vmatpush1.bf16.msra.mxu1 %v4529_v1  ;;  %v1279_v1 = vld [vmem:[#allocation3 + $0x1928] sm:$0xff]  ;;  %v4505_v9 = vpack.c.bf16 %v1272_v63, %v1266_v58  ;;  %v1284_v20 = vld [vmem:[#allocation3 + $0x1950] sm:$0xff] }
  0xab   :  { %1601 = vmatprep.mubr.f32.mxu1 %v6031_v45  ;;  %1923 = vmatprep.mubr.f32.mxu0 %v6037_v49  ;;  %v4537_v45 = vpack.c.bf16 %v506_v38, %v500_v34  ;;  %v1285_v49 = vld [vmem:[#allocation3 + $0x1958] sm:$0xff]  ;;  %v4509_v37 = vpack.c.bf16 %v1284_v20, %v1278_v16  ;;  %v1290_v38 = vld [vmem:[#allocation3 + $0x1980] sm:$0xff]  ;;  %v555_v63 = vld [vmem:[#allocation3 + $0x288] sm:$0xff] }
  0xac   :  { %4498 = vmatpush1.bf16.msra.mxu0 %v4497_v13  ;;  %4532 = vmatprep.subr.bf16.mxu1 %v4531_v14  ;;  %v531_v13 = vld [vmem:[#allocation3 + $0x1c8] sm:$0xff]  ;;  %v4507_v14 = vpack.c.bf16 %v1285_v49, %v1279_v1  ;;  %v1302_v1 = vld [vmem:[#allocation3 + $0x19e0] sm:$0xff]  ;;  %v1308_v49 = vld [vmem:[#allocation3 + $0x1a10] sm:$0xff] }
  0xad   :  { %1602 = vmatmul.mubr.f32.gmra.mrb[2].mxu1 %v5996_v19  ;;  %4500 = vmatprep.subr.bf16.mxu0 %v4499_v24  ;;  %v4539_v19 = vpack.c.bf16 %v519_v54, %v513_v50  ;;  %v1291_v24 = vld [vmem:[#allocation3 + $0x1988] sm:$0xff]  ;;  %v536_v50 = vld [vmem:[#allocation3 + $0x1f0] sm:$0xff]  ;;  %v542_v54 = vld [vmem:[#allocation3 + $0x220] sm:$0xff] }
  0xae   :  { %1924 = vmatmul.mubr.f32.gmra.mrb[2].mxu0 %v6050_v60  ;;  %4534 = vmatpush1.bf16.msra.mxu1 %v4533_v36  ;;  %v4543_v36 = vpack.c.bf16 %v531_v13, %v525_v5  ;;  %v567_v13 = vld [vmem:[#allocation3 + $0x2e8] sm:$0xff]  ;;  %v1314_v16 = vld [vmem:[#allocation3 + $0x1a40] sm:$0xff]  ;;  %v1320_v20 = vld [vmem:[#allocation3 + $0x1a70] sm:$0xff] }
  0xaf   :  { %1607 = vmatprep.mubr.f32.mxu1 %v6050_v60  ;;  %1929 = vmatprep.mubr.f32.mxu0 %v6056_v0  ;;  %v4541_v60 = vpack.c.bf16 %v518_v8, %v512_v3  ;;  %v1297_v0 = vld [vmem:[#allocation3 + $0x19b8] sm:$0xff]  ;;  %v1315_v3 = vld [vmem:[#allocation3 + $0x1a48] sm:$0xff]  ;;  %v548_v8 = vld [vmem:[#allocation3 + $0x250] sm:$0xff] }
  0xb0   :  { %4536 = vmatprep.subr.bf16.mxu1 %v4535_v43  ;;  %4502 = vmatpush1.bf16.msra.mxu0 %v4501_v44  ;;  %v4511_v34 = vpack.c.bf16 %v1297_v0, %v1291_v24  ;;  %v1296_v43 = vld [vmem:[#allocation3 + $0x19b0] sm:$0xff]  ;;  %v1303_v44 = vld [vmem:[#allocation3 + $0x19e8] sm:$0xff]  ;;  %v4165_v24 = vld [vmem:[%s7936_s0 + $0x80] sm:$0xff] }
  0xb1   :  { %1608 = vmatmul.mubr.f32.gmra.mrb[4].mxu1 %v6008_v26  ;;  %4504 = vmatprep.subr.bf16.mxu0 %v4503_v57  ;;  %v537_v26 = vld [vmem:[#allocation3 + $0x1f8] sm:$0xff]  ;;  %v4513_v58 = vpack.c.bf16 %v1296_v43, %v1290_v38  ;;  %v566_v0 = vld [vmem:[#allocation3 + $0x2e0] sm:$0xff]  ;;  %v479_v38 = vld [vmem:[#allocation3 + $0x28] sm:$0xff] }
  0xb2   :  { %1930 = vmatmul.mubr.f32.gmra.mrb[4].mxu0 %v6069_v11  ;;  %4538 = vmatpush1.bf16.msra.mxu1 %v4537_v45  ;;  %v4547_v57 = vpack.c.bf16 %v543_v30, %v537_v26  ;;  %v4521_v26 = vpack.c.bf16 %v1320_v20, %v1314_v16  ;;  %v1332_v30 = vld [vmem:[#allocation3 + $0x1ad0] sm:$0xff]  ;;  %v485_v43 = vld [vmem:[#allocation3 + $0x58] sm:$0xff]  ;;  %v639_v20 = vld [vmem:[#allocation3 + $0x528] sm:$0xff] }
  0xb3   :  { %1613 = vmatprep.mubr.f32.mxu1 %v6069_v11  ;;  %1935 = vmatprep.mubr.f32.mxu0 %v6075_v15  ;;  %v4545_v11 = vpack.c.bf16 %v530_v31, %v524_v29  ;;  %v1309_v15 = vld [vmem:[#allocation3 + $0x1a18] sm:$0xff] }
  0xb4   :  { %4540 = vmatprep.subr.bf16.mxu1 %v4539_v19  ;;  %4506 = vmatpush1.bf16.msra.mxu0 %v4505_v9  ;;  %v4515_v45 = vpack.c.bf16 %v1309_v15, %v1303_v44  ;;  %v554_v19 = vld [vmem:[#allocation3 + $0x280] sm:$0xff]  ;;  %v4517_v9 = vpack.c.bf16 %v1308_v49, %v1302_v1  ;;  %v4182_v29 = vld [vmem:[%s7936_s0 + $0x91] sm:$0xff] }
  0xb5   :  { %1614 = vmatmul.mubr.f32.gmra.mrb[6].mxu1 %v6025_v41  ;;  %4508 = vmatprep.subr.bf16.mxu0 %v4507_v14  ;;  %v549_v41 = vld [vmem:[#allocation3 + $0x258] sm:$0xff]  ;;  %v572_v44 = vld [vmem:[#allocation3 + $0x310] sm:$0xff]  ;;  %v578_v15 = vld [vmem:[#allocation3 + $0x340] sm:$0xff] }
  0xb6   :  { %1936 = vmatmul.mubr.f32.gmra.mrb[6].mxu0 %v6088_v28  ;;  %4542 = vmatpush1.bf16.msra.mxu1 %v4541_v60  ;;  %v4551_v5 = vpack.c.bf16 %v555_v63, %v549_v41  ;;  %v1327_v60 = vld [vmem:[#allocation3 + $0x1aa8] sm:$0xff]  ;;  %v4815_v41 = vpack.c.bf16 %v485_v43, %v479_v38  ;;  %v4561_v63 = vpack.c.bf16 %v578_v15, %v572_v44  ;;  %v590_v1 = vld [vmem:[#allocation3 + $0x3a0] sm:$0xff]  ;;  %v633_v16 = vld [vmem:[#allocation3 + $0x4f8] sm:$0xff]  ;;  %v7940_v15 = vmov 0.0  }
  0xb7   :  { %1619 = vmatprep.mubr.f32.mxu1 %v6088_v28  ;;  %1941 = vmatprep.mubr.f32.mxu0 %v6094_v33  ;;  %v4549_v28 = vpack.c.bf16 %v542_v54, %v536_v50  ;;  %v1321_v33 = vld [vmem:[#allocation3 + $0x1a78] sm:$0xff]  ;;  %v687_v38 = vld [vmem:[#allocation3 + $0x6a8] sm:$0xff] }
  0xb8   :  { %4544 = vmatprep.subr.bf16.mxu1 %v4543_v36  ;;  %4510 = vmatpush1.bf16.msra.mxu0 %v4509_v37  ;;  %v4519_v14 = vpack.c.bf16 %v1321_v33, %v1315_v3  ;;  %v573_v36 = vld [vmem:[#allocation3 + $0x318] sm:$0xff]  ;;  %v1326_v37 = vld [vmem:[#allocation3 + $0x1aa0] sm:$0xff] }
  0xb9   :  { %1620 = vmatmul.mubr.f32.gmra.mrb[8].mxu1 %v6044_v56  ;;  %4512 = vmatprep.subr.bf16.mxu0 %v4511_v34  ;;  %v561_v56 = vld [vmem:[#allocation3 + $0x2b8] sm:$0xff]  ;;  %v4525_v50 = vpack.c.bf16 %v1332_v30, %v1326_v37  ;;  %v602_v33 = vld [vmem:[#allocation3 + $0x400] sm:$0xff] }
  0xba   :  { %1942 = vmatmul.mubr.f32.gmra.mrb[8].mxu0 %v6107_v47  ;;  %4546 = vmatpush1.bf16.msra.mxu1 %v4545_v11  ;;  %v4555_v31 = vpack.c.bf16 %v567_v13, %v561_v56  ;;  %v4166_v11 = vld [vmem:[%s7936_s0 + $0x90] sm:$0xff]  ;;  %v585_v54 = vld [vmem:[#allocation3 + $0x378] sm:$0xff]  ;;  %v627_v13 = vld [vmem:[#allocation3 + $0x4c8] sm:$0xff] }
  0xbb   :  { %1625 = vmatprep.mubr.f32.mxu1 %v6107_v47  ;;  %1947 = vmatprep.mubr.f32.mxu0 %v6113_v52  ;;  %v4553_v47 = vpack.c.bf16 %v554_v19, %v548_v8  ;;  %v1333_v52 = vld [vmem:[#allocation3 + $0x1ad8] sm:$0xff]  ;;  %v615_v19 = vld [vmem:[#allocation3 + $0x468] sm:$0xff]  ;;  %v608_v56 = vld [vmem:[#allocation3 + $0x430] sm:$0xff] }
  0xbc   :  { %4548 = vmatprep.subr.bf16.mxu1 %v4547_v57  ;;  %4514 = vmatpush1.bf16.msra.mxu0 %v4513_v58  ;;  %v591_v57 = vld [vmem:[#allocation3 + $0x3a8] sm:$0xff]  ;;  %v609_v8 = vld [vmem:[#allocation3 + $0x438] sm:$0xff]  ;;  %v478_v30 = vld [vmem:[#allocation3 + $0x20] sm:$0xff] }
  0xbd   :  { %1626 = vmatmul.mubr.f32.gmra.mrb[10].mxu1 %v6063_v7  ;;  %4516 = vmatprep.subr.bf16.mxu0 %v4515_v45  ;;  %v560_v7 = vld [vmem:[#allocation3 + $0x2b0] sm:$0xff]  ;;  %v112_v58 = vld [vmem:[%s7936_s0 + $0xa2] sm:$0xff]  ;;  %v4563_v49 = vpack.c.bf16 %v591_v57, %v585_v54  ;;  %v497_v44 = vld [vmem:[#allocation3 + $0xb8] sm:$0xff] }
  0xbe   :  { %1948 = vmatmul.mubr.f32.gmra.mrb[10].mxu0 %v6124_v2  ;;  %4550 = vmatpush1.bf16.msra.mxu1 %v4549_v28  ;;  %v4557_v34 = vpack.c.bf16 %v566_v0, %v560_v7  ;;  %v584_v45 = vld [vmem:[#allocation3 + $0x370] sm:$0xff]  ;;  %v603_v28 = vld [vmem:[#allocation3 + $0x408] sm:$0xff]  ;;  %v657_v7 = vld [vmem:[#allocation3 + $0x5b8] sm:$0xff] }
  0xbf   :  { %1631 = vmatprep.mubr.f32.mxu1 %v6124_v2  ;;  %1953 = vmatprep.mubr.f32.mxu0 %v6130_v6  ;;  %v579_v2 = vld [vmem:[#allocation3 + $0x348] sm:$0xff]  ;;  %v4523_v6 = vpack.c.bf16 %v1333_v52, %v1327_v60  ;;  %v4565_v3 = vpack.c.bf16 %v590_v1, %v584_v45  ;;  %v645_v60 = vld [vmem:[#allocation3 + $0x558] sm:$0xff]  ;;  %v680_v54 = vld [vmem:[#allocation3 + $0x670] sm:$0xff] }
  0xc0   :  { %4552 = vmatprep.subr.bf16.mxu1 %v4551_v5  ;;  %4518 = vmatpush1.bf16.msra.mxu0 %v4517_v9  ;;  %v621_v9 = vld [vmem:[#allocation3 + $0x498] sm:$0xff]  ;;  %v651_v52 = vld [vmem:[#allocation3 + $0x588] sm:$0xff]  ;;  %v686_v57 = vld [vmem:[#allocation3 + $0x6a0] sm:$0xff] }
  0xc1   :  { %1632 = vmatmul.mubr.f32.gmra.mrb[12].mxu1 %v6082_v23  ;;  %4520 = vmatprep.subr.bf16.mxu0 %v4519_v14  ;;  %v4559_v23 = vpack.c.bf16 %v579_v2, %v573_v36  ;;  %v620_v14 = vld [vmem:[#allocation3 + $0x490] sm:$0xff]  ;;  %v663_v0 = vld [vmem:[#allocation3 + $0x5e8] sm:$0xff]  ;;  %v669_v36 = vld [vmem:[#allocation3 + $0x618] sm:$0xff] }
  0xc2   :  { %1954 = vmatmul.mubr.f32.gmra.mrb[12].mxu0 %v4165_v24  ;;  %4554 = vmatpush1.bf16.msra.mxu1 %v4553_v47  ;;  %v632_v47 = vld [vmem:[#allocation3 + $0x4f0] sm:$0xff]  ;;  %v6369_v45 = vld [vmem:[%s7936_s0] sm:$0xff] }
  0xc3   :  { %1637 = vmatprep.mubr.f32.mxu1 %v4165_v24  ;;  %1959 = vmatprep.mubr.f32.mxu0 %v4182_v29  ;;  %v644_v24 = vld [vmem:[#allocation3 + $0x550] sm:$0xff]  ;;  %v662_v29 = vld [vmem:[#allocation3 + $0x5e0] sm:$0xff] }
  0xc4   :  { %4556 = vmatprep.subr.bf16.mxu1 %v4555_v31  ;;  %4522 = vmatpush1.bf16.msra.mxu0 %v4521_v26  ;;  %v4587_v31 = vpack.c.bf16 %v663_v0, %v657_v7  ;;  %v675_v26 = vld [vmem:[#allocation3 + $0x648] sm:$0xff]  ;;  %v668_v2 = vld [vmem:[#allocation3 + $0x610] sm:$0xff] }
  0xc5   :  { %1638 = vmatmul.mubr.f32.gmra.mrb[14].mxu1 %v6101_v42  ;;  %4524 = vmatprep.subr.bf16.mxu0 %v4523_v6  ;;  %v597_v42 = vld [vmem:[#allocation3 + $0x3d8] sm:$0xff]  ;;  %v674_v6 = vld [vmem:[#allocation3 + $0x640] sm:$0xff]  ;;  %v4591_v37 = vpack.c.bf16 %v675_v26, %v669_v36  ;;  %v723_v7 = vld [vmem:[#allocation3 + $0x7c8] sm:$0xff] }
  0xc6   :  { %1960 = vmatmul.mubr.f32.gmra.mrb[14].mxu0 %v4166_v11  ;;  %4558 = vmatpush1.bf16.msra.mxu1 %v4557_v34  ;;  %v484_v34 = vld [vmem:[#allocation3 + $0x50] sm:$0xff]  ;;  %v4593_v43 = vpack.c.bf16 %v674_v6, %v668_v2  ;;  %v491_v11 = vld [vmem:[#allocation3 + $0x88] sm:$0xff] }
  0xc7   :  { %1643 = vmatprep.mubr.f32.mxu1 %v6157_v46  ;;  %1965 = vmatprep.mubr.f32.mxu0 %v6162_v53  ;;  %v596_v46 = vld [vmem:[#allocation3 + $0x3d0] sm:$0xff]  ;;  %v4567_v53 = vpack.c.bf16 %v603_v28, %v597_v42  ;;  %v4819_v1 = vpack.c.bf16 %v497_v44, %v491_v11  ;;  %v699_v42 = vld [vmem:[#allocation3 + $0x708] sm:$0xff]  ;;  %v4597_v28 = vpack.c.bf16 %v686_v57, %v680_v54  ;;  %v538_v57 = vld [vmem:[#allocation3 + $0x200] sm:$0xff] }
  0xc8   :  { %4560 = vmatprep.subr.bf16.mxu1 %v4559_v23  ;;  %4526 = vmatpush1.bf16.msra.mxu0 %v4525_v50  ;;  %v4569_v5 = vpack.c.bf16 %v602_v33, %v596_v46  ;;  %v6360_v23 = vld [vmem:[%s7936_s0 + $0x1] sm:$0xff]  ;;  %v4817_v50 = vpack.c.bf16 %v484_v34, %v478_v30  ;;  %v509_v46 = vld [vmem:[#allocation3 + $0x118] sm:$0xff]  ;;  %v6417_v2 = vld [vmem:[%s7936_s0 + $0x30] sm:$0xff] }
  0xc9   :  { %1644 = vmatmul.mubr.f32.gmra.mrb[16].mxu1 %v112_v58  ;;  %4816 = vmatprep.subr.bf16.mxu0 %v4815_v41  ;;  %v490_v58 = vld [vmem:[#allocation3 + $0x80] sm:$0xff]  ;;  %v4192_v33 = vld [vmem:[%s7936_s0 + $0x32] sm:$0xff]  ;;  %v735_v30 = vld [vmem:[#allocation3 + $0x828] sm:$0xff] }
  0xca   :  { %1966 = vmatmul.mubr.f32.gmra.mrb[16].mxu0 %v6175_v4  ;;  %4562 = vmatpush1.bf16.msra.mxu1 %v4561_v63  ;;  %v496_v63 = vld [vmem:[#allocation3 + $0xb0] sm:$0xff] }
  0xcb   :  { %1649 = vmatprep.mubr.f32.mxu1 %v6175_v4  ;;  %1971 = vmatprep.mubr.f32.mxu0 %v6181_v10  ;;  %v614_v4 = vld [vmem:[#allocation3 + $0x460] sm:$0xff]  ;;  %v4571_v10 = vpack.c.bf16 %v615_v19, %v609_v8  ;;  %v692_v8 = vld [vmem:[#allocation3 + $0x6d0] sm:$0xff] }
  0xcc   :  { %4564 = vmatprep.subr.bf16.mxu1 %v4563_v49  ;;  %v693_v49 = vld [vmem:[#allocation3 + $0x6d8] sm:$0xff]  ;;  %v698_v19 = vld [vmem:[#allocation3 + $0x700] sm:$0xff]  ;;  %v728_v44 = vld [vmem:[#allocation3 + $0x7f0] sm:$0xff] }
  0xcd   :  { %1650 = vmatmul.mubr.f32.gmra.mrb[18].mxu1 %v6139_v17  ;;  %v4573_v17 = vpack.c.bf16 %v614_v4, %v608_v56  ;;  %v4599_v56 = vpack.c.bf16 %v699_v42, %v693_v49  ;;  %v502_v4 = vld [vmem:[#allocation3 + $0xe0] sm:$0xff]  ;;  %v6411_v36 = vld [vmem:[%s7936_s0 + $0x31] sm:$0xff]  ;;  %v747_v49 = vld [vmem:[#allocation3 + $0x888] sm:$0xff] }
  0xce   :  { %1972 = vmatmul.mubr.f32.gmra.mrb[18].mxu0 %v6194_v27  ;;  %4566 = vmatpush1.bf16.msra.mxu1 %v4565_v3  ;;  %v503_v3 = vld [vmem:[#allocation3 + $0xe8] sm:$0xff] }
  0xcf   :  { %1655 = vmatprep.mubr.f32.mxu1 %v6194_v27  ;;  %1977 = vmatprep.mubr.f32.mxu0 %v6200_v35  ;;  %v626_v27 = vld [vmem:[#allocation3 + $0x4c0] sm:$0xff]  ;;  %v4575_v35 = vpack.c.bf16 %v627_v13, %v621_v9  ;;  %v6385_v9 = vld [vmem:[%s7936_s0 + $0x10] sm:$0xff]  ;;  %v4823_v13 = vpack.c.bf16 %v509_v46, %v503_v3  ;;  %v557_v3 = vld [vmem:[#allocation3 + $0x298] sm:$0xff] }
  0xd0   :  { %4568 = vmatprep.subr.bf16.mxu1 %v4567_v53  ;;  %v4821_v53 = vpack.c.bf16 %v496_v63, %v490_v58  ;;  %v6433_v58 = vld [vmem:[%s7936_s0 + $0x40] sm:$0xff]  ;;  %v4196_v46 = vld [vmem:[%s7936_s0 + $0x72] sm:$0xff] }
  0xd1   :  { %1656 = vmatmul.mubr.f32.gmra.mrb[20].mxu1 %v6152_v39  ;;  %v4577_v39 = vpack.c.bf16 %v626_v27, %v620_v14  ;;  %v711_v14 = vld [vmem:[#allocation3 + $0x768] sm:$0xff]  ;;  %v4601_v27 = vpack.c.bf16 %v698_v19, %v692_v8  ;;  %v746_v8 = vld [vmem:[#allocation3 + $0x880] sm:$0xff]  ;;  %v6443_v19 = vld [vmem:[%s7936_s0 + $0x51] sm:$0xff] }
  0xd2   :  { %1978 = vmatmul.mubr.f32.gmra.mrb[20].mxu0 %v6213_v55  ;;  %4570 = vmatpush1.bf16.msra.mxu1 %v4569_v5  ;;  %v6379_v5 = vld [vmem:[%s7936_s0 + $0x11] sm:$0xff] }
  0xd3   :  { %1661 = vmatprep.mubr.f32.mxu1 %v6213_v55  ;;  %1983 = vmatprep.mubr.f32.mxu0 %v6219_v61  ;;  %v638_v55 = vld [vmem:[#allocation3 + $0x520] sm:$0xff]  ;;  %v4579_v61 = vpack.c.bf16 %v639_v20, %v633_v16  ;;  %v521_v16 = vld [vmem:[#allocation3 + $0x178] sm:$0xff] }
  0xd4   :  { %4572 = vmatprep.subr.bf16.mxu1 %v4571_v10  ;;  %v508_v10 = vld [vmem:[#allocation3 + $0x110] sm:$0xff]  ;;  %v4193_v20 = vld [vmem:[%s7936_s0 + $0x42] sm:$0xff] }
  0xd5   :  { %1662 = vmatmul.mubr.f32.gmra.mrb[22].mxu1 %v6169_v62  ;;  %v4581_v62 = vpack.c.bf16 %v638_v55, %v632_v47  ;;  %v704_v47 = vld [vmem:[#allocation3 + $0x730] sm:$0xff]  ;;  %v710_v55 = vld [vmem:[#allocation3 + $0x760] sm:$0xff] }
  0xd6   :  { %1984 = vmatmul.mubr.f32.gmra.mrb[22].mxu0 %v6232_v18  ;;  %4574 = vmatpush1.bf16.msra.mxu1 %v4573_v17  ;;  %v705_v17 = vld [vmem:[#allocation3 + $0x738] sm:$0xff]  ;;  %v4605_v0 = vpack.c.bf16 %v710_v55, %v704_v47  ;;  %v752_v55 = vld [vmem:[#allocation3 + $0x8b0] sm:$0xff] }
  0xd7   :  { %1667 = vmatprep.mubr.f32.mxu1 %v6232_v18  ;;  %1989 = vmatprep.mubr.f32.mxu0 %v6238_v25  ;;  %v650_v18 = vld [vmem:[#allocation3 + $0x580] sm:$0xff]  ;;  %v4583_v25 = vpack.c.bf16 %v651_v52, %v645_v60  ;;  %v4603_v60 = vpack.c.bf16 %v711_v14, %v705_v17  ;;  %v753_v14 = vld [vmem:[#allocation3 + $0x8b8] sm:$0xff] }
  0xd8   :  { %4576 = vmatprep.subr.bf16.mxu1 %v4575_v35  ;;  %v515_v35 = vld [vmem:[#allocation3 + $0x148] sm:$0xff]  ;;  %v514_v52 = vld [vmem:[#allocation3 + $0x140] sm:$0xff] }
  0xd9   :  { %1668 = vmatmul.mubr.f32.gmra.mrb[24].mxu1 %v6188_v21  ;;  %v4585_v21 = vpack.c.bf16 %v650_v18, %v644_v24  ;;  %v6401_v24 = vld [vmem:[%s7936_s0 + $0x20] sm:$0xff]  ;;  %v4827_v18 = vpack.c.bf16 %v521_v16, %v515_v35  ;;  %v563_v16 = vld [vmem:[#allocation3 + $0x2c8] sm:$0xff] }
  0xda   :  { %1990 = vmatmul.mubr.f32.gmra.mrb[24].mxu0 %v6251_v51  ;;  %4578 = vmatpush1.bf16.msra.mxu1 %v4577_v39  ;;  %v4825_v39 = vpack.c.bf16 %v508_v10, %v502_v4  ;;  %v550_v4 = vld [vmem:[#allocation3 + $0x260] sm:$0xff]  ;;  %v556_v10 = vld [vmem:[#allocation3 + $0x290] sm:$0xff] }
  0xdb   :  { %1673 = vmatprep.mubr.f32.mxu1 %v6251_v51  ;;  %1995 = vmatprep.mubr.f32.mxu0 %v6257_v59  ;;  %v4173_v51 = vld [vmem:[%s7936_s0 + $0x120] sm:$0xff]  ;;  %v656_v59 = vld [vmem:[#allocation3 + $0x5b0] sm:$0xff]  ;;  %v4841_v47 = vpack.c.bf16 %v556_v10, %v550_v4  ;;  %v599_v4 = vld [vmem:[#allocation3 + $0x3e8] sm:$0xff] }
  0xdc   :  { %4580 = vmatprep.subr.bf16.mxu1 %v4579_v61  ;;  %v6395_v61 = vld [vmem:[%s7936_s0 + $0x21] sm:$0xff]  ;;  %v605_v10 = vld [vmem:[#allocation3 + $0x418] sm:$0xff] }
  0xdd   :  { %1674 = vmatmul.mubr.f32.gmra.mrb[26].mxu1 %v6207_v48  ;;  %v4190_v48 = vld [vmem:[%s7936_s0 + $0x131] sm:$0xff] }
  0xde   :  { %1996 = vmatmul.mubr.f32.gmra.mrb[26].mxu0 %v6268_v22  ;;  %4582 = vmatpush1.bf16.msra.mxu1 %v4581_v62  ;;  %v520_v62 = vld [vmem:[#allocation3 + $0x170] sm:$0xff] }
  0xdf   :  { %1679 = vmatprep.mubr.f32.mxu1 %v6268_v22  ;;  %2001 = vmatprep.mubr.f32.mxu0 %v6274_v32  ;;  %v4589_v22 = vpack.c.bf16 %v662_v29, %v656_v59  ;;  %v4174_v32 = vld [vmem:[%s7936_s0 + $0x130] sm:$0xff]  ;;  %v4829_v29 = vpack.c.bf16 %v520_v62, %v514_v52  ;;  %v6459_v52 = vld [vmem:[%s7936_s0 + $0x61] sm:$0xff] }
  0xe0   :  { %4584 = vmatprep.subr.bf16.mxu1 %v4583_v25  ;;  %v717_v25 = vld [vmem:[#allocation3 + $0x798] sm:$0xff] }
  0xe1   :  { %1680 = vmatmul.mubr.f32.gmra.mrb[28].mxu1 %v6226_v12  ;;  %v681_v12 = vld [vmem:[#allocation3 + $0x678] sm:$0xff]  ;;  %v4607_v26 = vpack.c.bf16 %v723_v7, %v717_v25  ;;  %v568_v25 = vld [vmem:[#allocation3 + $0x2f0] sm:$0xff]  ;;  %v6465_v7 = vld [vmem:[%s7936_s0 + $0x60] sm:$0xff] }
  0xe2   :  { %2002 = vmatmul.mubr.f32.gmra.mrb[28].mxu0 %v4173_v51  ;;  %4586 = vmatpush1.bf16.msra.mxu1 %v4585_v21  ;;  %v4595_v41 = vpack.c.bf16 %v687_v38, %v681_v12  ;;  %v527_v21 = vld [vmem:[#allocation3 + $0x1a8] sm:$0xff]  ;;  %v4194_v59 = vld [vmem:[%s7936_s0 + $0x52] sm:$0xff] }
  0xe3   :  { %1685 = vmatprep.mubr.f32.mxu1 %v4173_v51  ;;  %2007 = vmatprep.mubr.f32.mxu0 %v4190_v48  ;;  %v533_v51 = vld [vmem:[#allocation3 + $0x1d8] sm:$0xff]  ;;  %v716_v48 = vld [vmem:[#allocation3 + $0x790] sm:$0xff]  ;;  %v539_v12 = vld [vmem:[#allocation3 + $0x208] sm:$0xff] }
  0xe4   :  { %4588 = vmatprep.subr.bf16.mxu1 %v4587_v31  ;;  %v722_v31 = vld [vmem:[#allocation3 + $0x7c0] sm:$0xff]  ;;  %v4831_v6 = vpack.c.bf16 %v533_v51, %v527_v21  ;;  %v545_v38 = vld [vmem:[#allocation3 + $0x238] sm:$0xff]  ;;  %v771_v51 = vld [vmem:[#allocation3 + $0x948] sm:$0xff] }
  0xe5   :  { %1686 = vmatmul.mubr.f32.gmra.mrb[30].mxu1 %v6245_v40  ;;  %v4191_v40 = vld [vmem:[%s7936_s0 + $0x22] sm:$0xff]  ;;  %v4609_v34 = vpack.c.bf16 %v722_v31, %v716_v48  ;;  %v4835_v63 = vpack.c.bf16 %v545_v38, %v539_v12  ;;  %v765_v21 = vld [vmem:[#allocation3 + $0x918] sm:$0xff]  ;;  %v6481_v12 = vld [vmem:[%s7936_s0 + $0x70] sm:$0xff] }
  0xe6   :  { %2008 = vmatmul.mubr.f32.gmra.mrb[30].mxu0 %v4174_v32  ;;  %4590 = vmatpush1.bf16.msra.mxu1 %v4589_v22  ;;  %v526_v22 = vld [vmem:[#allocation3 + $0x1a0] sm:$0xff]  ;;  %v532_v32 = vld [vmem:[#allocation3 + $0x1d0] sm:$0xff]  ;;  %v581_v48 = vld [vmem:[#allocation3 + $0x358] sm:$0xff] }
  0xe7   :  { %2078 = vmatprep.mubr.f32.mxu0 %v7940_v15  ;;  %2239 = vmatprep.mubr.f32.mxu1 %v6360_v23  ;;  %v4833_v11 = vpack.c.bf16 %v532_v32, %v526_v22  ;;  %v4198_v31 = vld [vmem:[%s7936_s0 + $0x92] sm:$0xff]  ;;  %v770_v32 = vld [vmem:[#allocation3 + $0x940] sm:$0xff] }
  0xe8   :  { %4592 = vmatprep.subr.bf16.mxu1 %v4591_v37  ;;  %v729_v37 = vld [vmem:[#allocation3 + $0x7f8] sm:$0xff]  ;;  %v764_v22 = vld [vmem:[#allocation3 + $0x910] sm:$0xff] }
  0xe9   :  { %2240 = vmatmul.mubr.f32.vlgmr.msra.gmra.mrb[32].mxu1 %v6369_v45  ;;  %v4611_v54 = vpack.c.bf16 %v735_v30, %v729_v37  ;;  %v4623_v37 = vpack.c.bf16 %v771_v51, %v765_v21  ;;  %v574_v30 = vld [vmem:[#allocation3 + $0x320] sm:$0xff]  ;;  %v617_v21 = vld [vmem:[#allocation3 + $0x478] sm:$0xff] }
  0xea   :  { %2079 = vmatmul.mubr.f32.vlgmr.msra.gmra.mrb[0].mxu0 %v4191_v40  ;;  %4594 = vmatpush1.bf16.msra.mxu1 %v4593_v43  ;;  %v4195_v43 = vld [vmem:[%s7936_s0 + $0x62] sm:$0xff] }
  0xeb   :  { %4818 = vmatpush1.bf16.msra.mxu0 %v4817_v50  ;;  %2084 = vmatprep.mubr.f32.mxu0 %v7940_v15  ;;  %v734_v40 = vld [vmem:[#allocation3 + $0x820] sm:$0xff] }
  0xec   :  { %2245 = vmatprep.mubr.f32.mxu1 %v6379_v5  ;;  %4596 = vmatprep.subr.bf16.mxu1 %v4595_v41  ;;  %v6427_v50 = vld [vmem:[%s7936_s0 + $0x41] sm:$0xff]  ;;  %v544_v41 = vld [vmem:[#allocation3 + $0x230] sm:$0xff]  ;;  %v4613_v42 = vpack.c.bf16 %v734_v40, %v728_v44  ;;  %v4625_v44 = vpack.c.bf16 %v770_v32, %v764_v22 }
  0xed   :  { %2246 = vmatmul.mubr.f32.gmra.mrb[34].mxu1 %v6385_v9  ;;  %4820 = vmatprep.subr.bf16.mxu0 %v4819_v1  ;;  %v741_v1 = vld [vmem:[#allocation3 + $0x858] sm:$0xff]  ;;  %v587_v40 = vld [vmem:[#allocation3 + $0x388] sm:$0xff]  ;;  %v610_v22 = vld [vmem:[#allocation3 + $0x440] sm:$0xff] }
  0xee   :  { %2085 = vmatmul.mubr.f32.gmra.mrb[2].mxu0 %v4192_v33  ;;  %4598 = vmatpush1.bf16.msra.mxu1 %v4597_v28  ;;  %v551_v28 = vld [vmem:[#allocation3 + $0x268] sm:$0xff]  ;;  %v4837_v33 = vpack.c.bf16 %v544_v41, %v538_v57  ;;  %v616_v32 = vld [vmem:[#allocation3 + $0x470] sm:$0xff] }
  0xef   :  { %4822 = vmatpush1.bf16.msra.mxu0 %v4821_v53  ;;  %2090 = vmatprep.mubr.f32.mxu0 %v7940_v15  ;;  %v740_v53 = vld [vmem:[#allocation3 + $0x850] sm:$0xff]  ;;  %v4839_v17 = vpack.c.bf16 %v557_v3, %v551_v28  ;;  %v4199_v57 = vld [vmem:[%s7936_s0 + $0xc2] sm:$0xff] }
  0xf0   :  { %2251 = vmatprep.mubr.f32.mxu1 %v6395_v61  ;;  %4600 = vmatprep.subr.bf16.mxu1 %v4599_v56  ;;  %v4615_v56 = vpack.c.bf16 %v747_v49, %v741_v1  ;;  %v4617_v35 = vpack.c.bf16 %v746_v8, %v740_v53  ;;  %v782_v1 = vld [vmem:[#allocation3 + $0x9a0] sm:$0xff]  ;;  %v592_v3 = vld [vmem:[#allocation3 + $0x3b0] sm:$0xff]  ;;  %v789_v53 = vld [vmem:[#allocation3 + $0x9d8] sm:$0xff] }
  0xf1   :  { %2252 = vmatmul.mubr.f32.gmra.mrb[36].mxu1 %v6401_v24  ;;  %4824 = vmatprep.subr.bf16.mxu0 %v4823_v13  ;;  %v6449_v13 = vld [vmem:[%s7936_s0 + $0x50] sm:$0xff]  ;;  %v6491_v49 = vld [vmem:[%s7936_s0 + $0xa1] sm:$0xff] }
  0xf2   :  { %2091 = vmatmul.mubr.f32.gmra.mrb[4].mxu0 %v4193_v20  ;;  %4602 = vmatpush1.bf16.msra.mxu1 %v4601_v27  ;;  %v759_v27 = vld [vmem:[#allocation3 + $0x8e8] sm:$0xff]  ;;  %v569_v20 = vld [vmem:[#allocation3 + $0x2f8] sm:$0xff]  ;;  %v586_v28 = vld [vmem:[#allocation3 + $0x380] sm:$0xff] }
  0xf3   :  { %4826 = vmatpush1.bf16.msra.mxu0 %v4825_v39  ;;  %2096 = vmatprep.mubr.f32.mxu0 %v7940_v15  ;;  %v4197_v39 = vld [vmem:[%s7936_s0 + $0x82] sm:$0xff]  ;;  %v4619_v62 = vpack.c.bf16 %v759_v27, %v753_v14  ;;  %v4853_v14 = vpack.c.bf16 %v592_v3, %v586_v28  ;;  %v788_v27 = vld [vmem:[#allocation3 + $0x9d0] sm:$0xff] }
  0xf4   :  { %2257 = vmatprep.mubr.f32.mxu1 %v6411_v36  ;;  %4604 = vmatprep.subr.bf16.mxu1 %v4603_v60  ;;  %v758_v60 = vld [vmem:[#allocation3 + $0x8e0] sm:$0xff]  ;;  %v795_v8 = vld [vmem:[#allocation3 + $0xa08] sm:$0xff]  ;;  %v628_v28 = vld [vmem:[#allocation3 + $0x4d0] sm:$0xff] }
  0xf5   :  { %2258 = vmatmul.mubr.f32.gmra.mrb[38].mxu1 %v6417_v2  ;;  %4828 = vmatprep.subr.bf16.mxu0 %v4827_v18  ;;  %v562_v18 = vld [vmem:[#allocation3 + $0x2c0] sm:$0xff]  ;;  %v6545_v3 = vld [vmem:[%s7936_s0 + $0xd0] sm:$0xff] }
  0xf6   :  { %2097 = vmatmul.mubr.f32.gmra.mrb[6].mxu0 %v4194_v59  ;;  %4606 = vmatpush1.bf16.msra.mxu1 %v4605_v0  ;;  %v4843_v0 = vpack.c.bf16 %v569_v20, %v563_v16  ;;  %v4621_v59 = vpack.c.bf16 %v758_v60, %v752_v55  ;;  %v6507_v16 = vld [vmem:[%s7936_s0 + $0xb1] sm:$0xff]  ;;  %v4631_v20 = vpack.c.bf16 %v795_v8, %v789_v53  ;;  %v4201_v51 = vld [vmem:[%s7936_s0 + $0xe2] sm:$0xff] }
  0xf7   :  { %4830 = vmatpush1.bf16.msra.mxu0 %v4829_v29  ;;  %2102 = vmatprep.mubr.f32.mxu0 %v7940_v15  ;;  %v575_v29 = vld [vmem:[#allocation3 + $0x328] sm:$0xff]  ;;  %v6513_v55 = vld [vmem:[%s7936_s0 + $0xb0] sm:$0xff]  ;;  %v4855_v60 = vpack.c.bf16 %v605_v10, %v599_v4  ;;  %v825_v53 = vld [vmem:[#allocation3 + $0xaf8] sm:$0xff] }
  0xf8   :  { %2263 = vmatprep.mubr.f32.mxu1 %v6427_v50  ;;  %4608 = vmatprep.subr.bf16.mxu1 %v4607_v26  ;;  %v4845_v26 = vpack.c.bf16 %v568_v25, %v562_v18  ;;  %v4847_v38 = vpack.c.bf16 %v581_v48, %v575_v29  ;;  %v807_v18 = vld [vmem:[#allocation3 + $0xa68] sm:$0xff]  ;;  %v800_v29 = vld [vmem:[#allocation3 + $0xa30] sm:$0xff]  ;;  %v806_v48 = vld [vmem:[#allocation3 + $0xa60] sm:$0xff] }
  0xf9   :  { %2264 = vmatmul.mubr.f32.gmra.mrb[40].mxu1 %v6433_v58  ;;  %4832 = vmatprep.subr.bf16.mxu0 %v4831_v6  ;;  %v6475_v6 = vld [vmem:[%s7936_s0 + $0x71] sm:$0xff]  ;;  %v831_v8 = vld [vmem:[#allocation3 + $0xb28] sm:$0xff] }
  0xfa   :  { %2103 = vmatmul.mubr.f32.gmra.mrb[8].mxu0 %v4195_v43  ;;  %4610 = vmatpush1.bf16.msra.mxu1 %v4609_v34  ;;  %v580_v34 = vld [vmem:[#allocation3 + $0x350] sm:$0xff]  ;;  %v777_v43 = vld [vmem:[#allocation3 + $0x978] sm:$0xff]  ;;  %v635_v4 = vld [vmem:[#allocation3 + $0x508] sm:$0xff] }
  0xfb   :  { %4834 = vmatpush1.bf16.msra.mxu0 %v4833_v11  ;;  %2108 = vmatprep.mubr.f32.mxu0 %v7940_v15  ;;  %v783_v11 = vld [vmem:[#allocation3 + $0x9a8] sm:$0xff]  ;;  %v4849_v41 = vpack.c.bf16 %v580_v34, %v574_v30  ;;  %v813_v34 = vld [vmem:[#allocation3 + $0xa98] sm:$0xff] }
  0xfc   :  { %2269 = vmatprep.mubr.f32.mxu1 %v6443_v19  ;;  %4612 = vmatprep.subr.bf16.mxu1 %v4611_v54  ;;  %v593_v54 = vld [vmem:[#allocation3 + $0x3b8] sm:$0xff] }
  0xfd   :  { %2270 = vmatmul.mubr.f32.gmra.mrb[42].mxu1 %v6449_v13  ;;  %4836 = vmatprep.subr.bf16.mxu0 %v4835_v63  ;;  %v776_v63 = vld [vmem:[#allocation3 + $0x970] sm:$0xff]  ;;  %v641_v10 = vld [vmem:[#allocation3 + $0x538] sm:$0xff] }
  0xfe   :  { %2109 = vmatmul.mubr.f32.gmra.mrb[10].mxu0 %v4196_v46  ;;  %4614 = vmatpush1.bf16.msra.mxu1 %v4613_v42  ;;  %v4627_v42 = vpack.c.bf16 %v783_v11, %v777_v43  ;;  %v6497_v46 = vld [vmem:[%s7936_s0 + $0xa0] sm:$0xff]  ;;  %v4637_v43 = vpack.c.bf16 %v806_v48, %v800_v29  ;;  %v623_v11 = vld [vmem:[#allocation3 + $0x4a8] sm:$0xff]  ;;  %v4204_v29 = vld [vmem:[%s7936_s0 + $0x112] sm:$0xff] }
  0xff   :  { %4838 = vmatpush1.bf16.msra.mxu0 %v4837_v33  ;;  %2114 = vmatprep.mubr.f32.mxu0 %v7940_v15  ;;  %v4851_v33 = vpack.c.bf16 %v593_v54, %v587_v40  ;;  %v4202_v40 = vld [vmem:[%s7936_s0 + $0xf2] sm:$0xff]  ;;  %v4861_v54 = vpack.c.bf16 %v616_v32, %v610_v22  ;;  %v842_v22 = vld [vmem:[#allocation3 + $0xb80] sm:$0xff] }
 0x100   :  { %2275 = vmatprep.mubr.f32.mxu1 %v6459_v52  ;;  %4616 = vmatprep.subr.bf16.mxu1 %v4615_v56  ;;  %v4629_v56 = vpack.c.bf16 %v782_v1, %v776_v63  ;;  %v6539_v63 = vld [vmem:[%s7936_s0 + $0xd1] sm:$0xff] }
 0x101   :  { %2276 = vmatmul.mubr.f32.gmra.mrb[44].mxu1 %v6465_v7  ;;  %4840 = vmatprep.subr.bf16.mxu0 %v4839_v17  ;;  %v4200_v17 = vld [vmem:[%s7936_s0 + $0xd2] sm:$0xff] }
 0x102   :  { %2115 = vmatmul.mubr.f32.gmra.mrb[12].mxu0 %v4197_v39  ;;  %4618 = vmatpush1.bf16.msra.mxu1 %v4617_v35  ;;  %v794_v35 = vld [vmem:[#allocation3 + $0xa00] sm:$0xff]  ;;  %v6571_v32 = vld [vmem:[%s7936_s0 + $0xf1] sm:$0xff] }
 0x103   :  { %4842 = vmatpush1.bf16.msra.mxu0 %v4841_v47  ;;  %2120 = vmatprep.mubr.f32.mxu0 %v7940_v15  ;;  %v598_v39 = vld [vmem:[#allocation3 + $0x3e0] sm:$0xff]  ;;  %v604_v47 = vld [vmem:[#allocation3 + $0x410] sm:$0xff]  ;;  %v4633_v25 = vpack.c.bf16 %v794_v35, %v788_v27 }
 0x104   :  { %2281 = vmatprep.mubr.f32.mxu1 %v6475_v6  ;;  %4620 = vmatprep.subr.bf16.mxu1 %v4619_v62  ;;  %v801_v62 = vld [vmem:[#allocation3 + $0xa38] sm:$0xff]  ;;  %v824_v27 = vld [vmem:[#allocation3 + $0xaf0] sm:$0xff]  ;;  %v830_v35 = vld [vmem:[#allocation3 + $0xb20] sm:$0xff] }
 0x105   :  { %2282 = vmatmul.mubr.f32.gmra.mrb[46].mxu1 %v6481_v12  ;;  %4844 = vmatprep.subr.bf16.mxu0 %v4843_v0  ;;  %v611_v0 = vld [vmem:[#allocation3 + $0x448] sm:$0xff] }
 0x106   :  { %2121 = vmatmul.mubr.f32.gmra.mrb[14].mxu0 %v4198_v31  ;;  %4622 = vmatpush1.bf16.msra.mxu1 %v4621_v59  ;;  %v4857_v59 = vpack.c.bf16 %v604_v47, %v598_v39  ;;  %v6523_v31 = vld [vmem:[%s7936_s0 + $0xc1] sm:$0xff]  ;;  %v4859_v30 = vpack.c.bf16 %v617_v21, %v611_v0  ;;  %v4643_v39 = vpack.c.bf16 %v831_v8, %v825_v53 }
 0x107   :  { %4846 = vmatpush1.bf16.msra.mxu0 %v4845_v26  ;;  %2126 = vmatprep.mubr.f32.mxu0 %v7940_v15  ;;  %v4635_v26 = vpack.c.bf16 %v807_v18, %v801_v62  ;;  %v634_v47 = vld [vmem:[#allocation3 + $0x500] sm:$0xff]  ;;  %v4867_v18 = vpack.c.bf16 %v641_v10, %v635_v4  ;;  %v843_v0 = vld [vmem:[#allocation3 + $0xb88] sm:$0xff]  ;;  %v4645_v21 = vpack.c.bf16 %v830_v35, %v824_v27  ;;  %v664_v4 = vld [vmem:[#allocation3 + $0x5f0] sm:$0xff] }
 0x108   :  { %2287 = vmatprep.mubr.f32.mxu1 %v6491_v49  ;;  %4624 = vmatprep.subr.bf16.mxu1 %v4623_v37  ;;  %v6529_v37 = vld [vmem:[%s7936_s0 + $0xc0] sm:$0xff]  ;;  %v867_v27 = vld [vmem:[#allocation3 + $0xc48] sm:$0xff] }
 0x109   :  { %2288 = vmatmul.mubr.f32.gmra.mrb[48].mxu1 %v6497_v46  ;;  %4848 = vmatprep.subr.bf16.mxu0 %v4847_v38  ;;  %v819_v38 = vld [vmem:[#allocation3 + $0xac8] sm:$0xff]  ;;  %v6561_v62 = vld [vmem:[%s7936_s0 + $0xe0] sm:$0xff] }
 0x10a   :  { %2127 = vmatmul.mubr.f32.gmra.mrb[16].mxu0 %v4199_v57  ;;  %4626 = vmatpush1.bf16.msra.mxu1 %v4625_v44  ;;  %v629_v44 = vld [vmem:[#allocation3 + $0x4d8] sm:$0xff]  ;;  %v812_v57 = vld [vmem:[#allocation3 + $0xa90] sm:$0xff]  ;;  %v4639_v1 = vpack.c.bf16 %v819_v38, %v813_v34  ;;  %v646_v34 = vld [vmem:[#allocation3 + $0x560] sm:$0xff] }
 0x10b   :  { %4850 = vmatpush1.bf16.msra.mxu0 %v4849_v41  ;;  %2132 = vmatprep.mubr.f32.mxu0 %v7940_v15  ;;  %v818_v41 = vld [vmem:[#allocation3 + $0xac0] sm:$0xff]  ;;  %v652_v38 = vld [vmem:[#allocation3 + $0x590] sm:$0xff] }
 0x10c   :  { %2293 = vmatprep.mubr.f32.mxu1 %v6507_v16  ;;  %4628 = vmatprep.subr.bf16.mxu1 %v4627_v42  ;;  %v622_v42 = vld [vmem:[#allocation3 + $0x4a0] sm:$0xff] }
 0x10d   :  { %2294 = vmatmul.mubr.f32.gmra.mrb[50].mxu1 %v6513_v55  ;;  %4852 = vmatprep.subr.bf16.mxu0 %v4851_v33  ;;  %v4863_v33 = vpack.c.bf16 %v629_v44, %v623_v11  ;;  %v849_v44 = vld [vmem:[#allocation3 + $0xbb8] sm:$0xff]  ;;  %v6587_v53 = vld [vmem:[%s7936_s0 + $0x101] sm:$0xff] }
 0x10e   :  { %2133 = vmatmul.mubr.f32.gmra.mrb[18].mxu0 %v4200_v17  ;;  %4630 = vmatpush1.bf16.msra.mxu1 %v4629_v56  ;;  %v4641_v56 = vpack.c.bf16 %v818_v41, %v812_v57  ;;  %v4203_v17 = vld [vmem:[%s7936_s0 + $0x102] sm:$0xff]  ;;  %v665_v41 = vld [vmem:[#allocation3 + $0x5f8] sm:$0xff] }
 0x10f   :  { %4854 = vmatpush1.bf16.msra.mxu0 %v4853_v14  ;;  %2138 = vmatprep.mubr.f32.mxu0 %v7940_v15  ;;  %v4865_v14 = vpack.c.bf16 %v628_v28, %v622_v42  ;;  %v659_v57 = vld [vmem:[#allocation3 + $0x5c8] sm:$0xff]  ;;  %v4873_v42 = vpack.c.bf16 %v652_v38, %v646_v34  ;;  %v848_v28 = vld [vmem:[#allocation3 + $0xbb0] sm:$0xff]  ;;  %v6593_v10 = vld [vmem:[%s7936_s0 + $0x100] sm:$0xff] }
 0x110   :  { %2299 = vmatprep.mubr.f32.mxu1 %v6523_v31  ;;  %4632 = vmatprep.subr.bf16.mxu1 %v4631_v20  ;;  %v6555_v20 = vld [vmem:[%s7936_s0 + $0xe1] sm:$0xff] }
 0x111   :  { %2300 = vmatmul.mubr.f32.gmra.mrb[52].mxu1 %v6529_v37  ;;  %4856 = vmatprep.subr.bf16.mxu0 %v4855_v60  ;;  %v640_v60 = vld [vmem:[#allocation3 + $0x530] sm:$0xff]  ;;  %v683_v38 = vld [vmem:[#allocation3 + $0x688] sm:$0xff] }
 0x112   :  { %2139 = vmatmul.mubr.f32.gmra.mrb[20].mxu0 %v4201_v51  ;;  %4634 = vmatpush1.bf16.msra.mxu1 %v4633_v25  ;;  %v837_v25 = vld [vmem:[#allocation3 + $0xb58] sm:$0xff]  ;;  %v647_v51 = vld [vmem:[#allocation3 + $0x568] sm:$0xff]  ;;  %v4869_v48 = vpack.c.bf16 %v640_v60, %v634_v47 }
 0x113   :  { %4858 = vmatpush1.bf16.msra.mxu0 %v4857_v59  ;;  %2144 = vmatprep.mubr.f32.mxu0 %v7940_v15  ;;  %v653_v59 = vld [vmem:[#allocation3 + $0x598] sm:$0xff] }
 0x114   :  { %2305 = vmatprep.mubr.f32.mxu1 %v6539_v63  ;;  %4636 = vmatprep.subr.bf16.mxu1 %v4635_v26  ;;  %v836_v26 = vld [vmem:[#allocation3 + $0xb50] sm:$0xff]  ;;  %v4871_v11 = vpack.c.bf16 %v653_v59, %v647_v51  ;;  %v677_v47 = vld [vmem:[#allocation3 + $0x658] sm:$0xff]  ;;  %v670_v59 = vld [vmem:[#allocation3 + $0x620] sm:$0xff] }
 0x115   :  { %2306 = vmatmul.mubr.f32.gmra.mrb[54].mxu1 %v6545_v3  ;;  %4860 = vmatprep.subr.bf16.mxu0 %v4859_v30  ;;  %v4647_v30 = vpack.c.bf16 %v843_v0, %v837_v25  ;;  %v4206_v60 = vld [vmem:[%s7936_s0 + $0x132] sm:$0xff]  ;;  %v866_v0 = vld [vmem:[#allocation3 + $0xc40] sm:$0xff] }
 0x116   :  { %2145 = vmatmul.mubr.f32.gmra.mrb[22].mxu0 %v4202_v40  ;;  %4638 = vmatpush1.bf16.msra.mxu1 %v4637_v43  ;;  %v6577_v43 = vld [vmem:[%s7936_s0 + $0xf0] sm:$0xff]  ;;  %v855_v40 = vld [vmem:[#allocation3 + $0xbe8] sm:$0xff] }
 0x117   :  { %4862 = vmatpush1.bf16.msra.mxu0 %v4861_v54  ;;  %2150 = vmatprep.mubr.f32.mxu0 %v7940_v15  ;;  %v4649_v54 = vpack.c.bf16 %v842_v22, %v836_v26  ;;  %v4651_v8 = vpack.c.bf16 %v855_v40, %v849_v44  ;;  %v860_v25 = vld [vmem:[#allocation3 + $0xc10] sm:$0xff]  ;;  %v873_v22 = vld [vmem:[#allocation3 + $0xc78] sm:$0xff] }
 0x118   :  { %2311 = vmatprep.mubr.f32.mxu1 %v6555_v20  ;;  %4640 = vmatprep.subr.bf16.mxu1 %v4639_v1  ;;  %v4205_v1 = vld [vmem:[%s7936_s0 + $0x122] sm:$0xff]  ;;  %v4657_v34 = vpack.c.bf16 %v866_v0, %v860_v25  ;;  %v872_v40 = vld [vmem:[#allocation3 + $0xc70] sm:$0xff] }
 0x119   :  { %2312 = vmatmul.mubr.f32.gmra.mrb[56].mxu1 %v6561_v62  ;;  %4864 = vmatprep.subr.bf16.mxu0 %v4863_v33  ;;  %v854_v33 = vld [vmem:[#allocation3 + $0xbe0] sm:$0xff]  ;;  %v903_v25 = vld [vmem:[#allocation3 + $0xd68] sm:$0xff] }
 0x11a   :  { %2151 = vmatmul.mubr.f32.gmra.mrb[24].mxu0 %v4203_v17  ;;  %4642 = vmatpush1.bf16.msra.mxu1 %v4641_v56  ;;  %v658_v56 = vld [vmem:[#allocation3 + $0x5c0] sm:$0xff]  ;;  %v4875_v17 = vpack.c.bf16 %v665_v41, %v659_v57  ;;  %v4653_v35 = vpack.c.bf16 %v854_v33, %v848_v28  ;;  %v885_v33 = vld [vmem:[#allocation3 + $0xcd8] sm:$0xff] }
 0x11b   :  { %4866 = vmatpush1.bf16.msra.mxu0 %v4865_v14  ;;  %2156 = vmatprep.mubr.f32.mxu0 %v7940_v15  ;;  %v861_v14 = vld [vmem:[#allocation3 + $0xc18] sm:$0xff]  ;;  %v682_v41 = vld [vmem:[#allocation3 + $0x680] sm:$0xff] }
 0x11c   :  { %2317 = vmatprep.mubr.f32.mxu1 %v6571_v32  ;;  %4644 = vmatprep.subr.bf16.mxu1 %v4643_v39  ;;  %v671_v39 = vld [vmem:[#allocation3 + $0x628] sm:$0xff]  ;;  %v4655_v51 = vpack.c.bf16 %v867_v27, %v861_v14  ;;  %v884_v14 = vld [vmem:[#allocation3 + $0xcd0] sm:$0xff]  ;;  %v890_v27 = vld [vmem:[#allocation3 + $0xd00] sm:$0xff] }
 0x11d   :  { %2318 = vmatmul.mubr.f32.gmra.mrb[58].mxu1 %v6577_v43  ;;  %4868 = vmatprep.subr.bf16.mxu0 %v4867_v18  ;;  %v4877_v18 = vpack.c.bf16 %v664_v4, %v658_v56  ;;  %v4879_v26 = vpack.c.bf16 %v677_v47, %v671_v39  ;;  %v701_v4 = vld [vmem:[#allocation3 + $0x718] sm:$0xff]  ;;  %v694_v39 = vld [vmem:[#allocation3 + $0x6e0] sm:$0xff]  ;;  %v700_v47 = vld [vmem:[#allocation3 + $0x710] sm:$0xff]  ;;  %v4665_v0 = vpack.c.bf16 %v890_v27, %v884_v14 }
 0x11e   :  { %2157 = vmatmul.mubr.f32.gmra.mrb[26].mxu0 %v4204_v29  ;;  %4646 = vmatpush1.bf16.msra.mxu1 %v4645_v21  ;;  %v6603_v21 = vld [vmem:[%s7936_s0 + $0x111] sm:$0xff] }
 0x11f   :  { %4870 = vmatpush1.bf16.msra.mxu0 %v4869_v48  ;;  %2162 = vmatprep.mubr.f32.mxu0 %v7940_v15  ;;  %v676_v29 = vld [vmem:[#allocation3 + $0x650] sm:$0xff]  ;;  %v737_v14 = vld [vmem:[#allocation3 + $0x838] sm:$0xff] }
 0x120   :  { %2323 = vmatprep.mubr.f32.mxu1 %v6587_v53  ;;  %4648 = vmatprep.subr.bf16.mxu1 %v4647_v30  ;;  %v6609_v48 = vld [vmem:[%s7936_s0 + $0x110] sm:$0xff]  ;;  %v879_v30 = vld [vmem:[#allocation3 + $0xca8] sm:$0xff]  ;;  %v4881_v44 = vpack.c.bf16 %v676_v29, %v670_v59  ;;  %v4889_v59 = vpack.c.bf16 %v700_v47, %v694_v39  ;;  %v926_v39 = vld [vmem:[#allocation3 + $0xe20] sm:$0xff] }
 0x121   :  { %2324 = vmatmul.mubr.f32.gmra.mrb[60].mxu1 %v6593_v10  ;;  %4872 = vmatprep.subr.bf16.mxu0 %v4871_v11  ;;  %v689_v11 = vld [vmem:[#allocation3 + $0x6b8] sm:$0xff]  ;;  %v4659_v57 = vpack.c.bf16 %v879_v30, %v873_v22  ;;  %v896_v29 = vld [vmem:[#allocation3 + $0xd30] sm:$0xff]  ;;  %v706_v30 = vld [vmem:[#allocation3 + $0x740] sm:$0xff] }
 0x122   :  { %2163 = vmatmul.mubr.f32.gmra.mrb[28].mxu0 %v4205_v1  ;;  %4650 = vmatpush1.bf16.msra.mxu1 %v4649_v54  ;;  %v878_v54 = vld [vmem:[#allocation3 + $0xca0] sm:$0xff]  ;;  %v688_v1 = vld [vmem:[#allocation3 + $0x6b0] sm:$0xff]  ;;  %v4883_v28 = vpack.c.bf16 %v689_v11, %v683_v38  ;;  %v909_v11 = vld [vmem:[#allocation3 + $0xd98] sm:$0xff] }
 0x123   :  { %4874 = vmatpush1.bf16.msra.mxu0 %v4873_v42  ;;  %2168 = vmatprep.mubr.f32.mxu0 %v7940_v15  ;;  %v6617_v42 = vld [vmem:[%s7936_s0 + $0x2] sm:$0xff]  ;;  %v4661_v56 = vpack.c.bf16 %v878_v54, %v872_v40  ;;  %v725_v54 = vld [vmem:[#allocation3 + $0x7d8] sm:$0xff] }
 0x124   :  { %2329 = vmatprep.mubr.f32.mxu1 %v6603_v21  ;;  %4652 = vmatprep.subr.bf16.mxu1 %v4651_v8  ;;  %v891_v8 = vld [vmem:[#allocation3 + $0xd08] sm:$0xff]  ;;  %v1226_v15 = vld [vmem:[#allocation3 + $0x1780] sm:$0xff] }
 0x125   :  { %2330 = vmatmul.mubr.f32.gmra.mrb[62].mxu1 %v6609_v48  ;;  %4876 = vmatprep.subr.bf16.mxu0 %v4875_v17  ;;  %v4885_v17 = vpack.c.bf16 %v688_v1, %v682_v41  ;;  %v908_v41 = vld [vmem:[#allocation3 + $0xd90] sm:$0xff]  ;;  %v914_v1 = vld [vmem:[#allocation3 + $0xdc0] sm:$0xff] }
 0x126   :  { %2169 = vmatmul.mubr.f32.gmra.mrb[30].mxu0 %v4206_v60  ;;  %4654 = vmatpush1.bf16.msra.mxu1 %v4653_v35  ;;  %v4663_v35 = vpack.c.bf16 %v891_v8, %v885_v33  ;;  %v718_v33 = vld [vmem:[#allocation3 + $0x7a0] sm:$0xff]  ;;  %v724_v8 = vld [vmem:[#allocation3 + $0x7d0] sm:$0xff] }
 0x127   :  { %4878 = vmatpush1.bf16.msra.mxu0 %v4877_v18  ;;  %2400 = vmatprep.mubr.f32.mxu1 %v6385_v9  ;;  %v897_v18 = vld [vmem:[#allocation3 + $0xd38] sm:$0xff]  ;;  %v4897_v27 = vpack.c.bf16 %v724_v8, %v718_v33  ;;  %v754_v33 = vld [vmem:[#allocation3 + $0x8c0] sm:$0xff]  ;;  %v760_v8 = vld [vmem:[#allocation3 + $0x8f0] sm:$0xff] }
 0x128   :  { %3044 = vmatprep.mubr.f32.mxu0 %v6360_v23  ;;  %4656 = vmatprep.subr.bf16.mxu1 %v4655_v51  ;;  %v695_v23 = vld [vmem:[#allocation3 + $0x6e8] sm:$0xff]  ;;  %v713_v51 = vld [vmem:[#allocation3 + $0x778] sm:$0xff]  ;;  %v4667_v22 = vpack.c.bf16 %v903_v25, %v897_v18  ;;  %v736_v18 = vld [vmem:[#allocation3 + $0x830] sm:$0xff] }
 0x129   :  { %2401 = vmatmul.mubr.f32.vlgmr.msra.gmra.mrb[32].mxu1 %v6617_v42  ;;  %4880 = vmatprep.subr.bf16.mxu0 %v4879_v26  ;;  %v4887_v60 = vpack.c.bf16 %v701_v4, %v695_v23  ;;  %v902_v26 = vld [vmem:[#allocation3 + $0xd60] sm:$0xff]  ;;  %v921_v23 = vld [vmem:[#allocation3 + $0xdf8] sm:$0xff]  ;;  %v927_v4 = vld [vmem:[#allocation3 + $0xe28] sm:$0xff] }
 0x12a   :  { %3045 = vmatmul.mubr.f32.vlgmr.msra.gmra.mrb[32].mxu0 %v6369_v45  ;;  %4658 = vmatpush1.bf16.msra.mxu1 %v4657_v34  ;;  %v6626_v45 = vld [vmem:[%s7936_s0 + $0x12] sm:$0xff]  ;;  %v4669_v40 = vpack.c.bf16 %v902_v26, %v896_v29  ;;  %v4675_v47 = vpack.c.bf16 %v927_v4, %v921_v23  ;;  %v963_v4 = vld [vmem:[#allocation3 + $0xf48] sm:$0xff] }
 0x12b   :  { %4882 = vmatpush1.bf16.msra.mxu0 %v4881_v44  ;;  %2406 = vmatprep.mubr.f32.mxu1 %v6401_v24  ;;  %v712_v34 = vld [vmem:[#allocation3 + $0x770] sm:$0xff]  ;;  %v915_v44 = vld [vmem:[#allocation3 + $0xdc8] sm:$0xff]  ;;  %v957_v23 = vld [vmem:[#allocation3 + $0xf18] sm:$0xff] }
 0x12c   :  { %3050 = vmatprep.mubr.f32.mxu0 %v6379_v5  ;;  %4660 = vmatprep.subr.bf16.mxu1 %v4659_v57  ;;  %v707_v5 = vld [vmem:[#allocation3 + $0x748] sm:$0xff]  ;;  %v4893_v57 = vpack.c.bf16 %v712_v34, %v706_v30  ;;  %v932_v26 = vld [vmem:[#allocation3 + $0xe50] sm:$0xff]  ;;  %v742_v34 = vld [vmem:[#allocation3 + $0x860] sm:$0xff] }
 0x12d   :  { %2407 = vmatmul.mubr.f32.gmra.mrb[34].mxu1 %v6626_v45  ;;  %4884 = vmatprep.subr.bf16.mxu0 %v4883_v28  ;;  %v4891_v38 = vpack.c.bf16 %v713_v51, %v707_v5  ;;  %v4671_v28 = vpack.c.bf16 %v915_v44, %v909_v11  ;;  %v939_v5 = vld [vmem:[#allocation3 + $0xe88] sm:$0xff]  ;;  %v945_v44 = vld [vmem:[#allocation3 + $0xeb8] sm:$0xff] }
 0x12e   :  { %3051 = vmatmul.mubr.f32.gmra.mrb[34].mxu0 %v6385_v9  ;;  %4662 = vmatpush1.bf16.msra.mxu1 %v4661_v56  ;;  %v6635_v9 = vld [vmem:[%s7936_s0 + $0x22] sm:$0xff] }
 0x12f   :  { %4886 = vmatpush1.bf16.msra.mxu0 %v4885_v17  ;;  %2412 = vmatprep.mubr.f32.mxu1 %v6417_v2  ;;  %v4673_v17 = vpack.c.bf16 %v914_v1, %v908_v41  ;;  %v944_v41 = vld [vmem:[#allocation3 + $0xeb0] sm:$0xff]  ;;  %v950_v1 = vld [vmem:[#allocation3 + $0xee0] sm:$0xff] }
 0x130   :  { %3056 = vmatprep.mubr.f32.mxu0 %v6395_v61  ;;  %4664 = vmatprep.subr.bf16.mxu1 %v4663_v35  ;;  %v719_v61 = vld [vmem:[#allocation3 + $0x7a8] sm:$0xff]  ;;  %v920_v35 = vld [vmem:[#allocation3 + $0xdf0] sm:$0xff] }
 0x131   :  { %2413 = vmatmul.mubr.f32.gmra.mrb[36].mxu1 %v6635_v9  ;;  %4888 = vmatprep.subr.bf16.mxu0 %v4887_v60  ;;  %v4895_v56 = vpack.c.bf16 %v725_v54, %v719_v61  ;;  %v730_v60 = vld [vmem:[#allocation3 + $0x800] sm:$0xff]  ;;  %v4677_v51 = vpack.c.bf16 %v926_v39, %v920_v35  ;;  %v761_v54 = vld [vmem:[#allocation3 + $0x8f8] sm:$0xff]  ;;  %v956_v35 = vld [vmem:[#allocation3 + $0xf10] sm:$0xff] }
 0x132   :  { %3057 = vmatmul.mubr.f32.gmra.mrb[36].mxu0 %v6401_v24  ;;  %4666 = vmatpush1.bf16.msra.mxu1 %v4665_v0  ;;  %v6644_v24 = vld [vmem:[%s7936_s0 + $0x32] sm:$0xff]  ;;  %v4901_v29 = vpack.c.bf16 %v736_v18, %v730_v60  ;;  %v962_v39 = vld [vmem:[#allocation3 + $0xf40] sm:$0xff] }
 0x133   :  { %4890 = vmatpush1.bf16.msra.mxu0 %v4889_v59  ;;  %2418 = vmatprep.mubr.f32.mxu1 %v6433_v58  ;;  %v933_v0 = vld [vmem:[#allocation3 + $0xe58] sm:$0xff]  ;;  %v772_v60 = vld [vmem:[#allocation3 + $0x950] sm:$0xff] }
 0x134   :  { %3062 = vmatprep.mubr.f32.mxu0 %v6411_v36  ;;  %4668 = vmatprep.subr.bf16.mxu1 %v4667_v22  ;;  %v731_v36 = vld [vmem:[#allocation3 + $0x808] sm:$0xff]  ;;  %v749_v59 = vld [vmem:[#allocation3 + $0x898] sm:$0xff]  ;;  %v938_v22 = vld [vmem:[#allocation3 + $0xe80] sm:$0xff]  ;;  %v4679_v30 = vpack.c.bf16 %v939_v5, %v933_v0 }
 0x135   :  { %2419 = vmatmul.mubr.f32.gmra.mrb[38].mxu1 %v6644_v24  ;;  %4892 = vmatprep.subr.bf16.mxu0 %v4891_v38  ;;  %v4899_v25 = vpack.c.bf16 %v737_v14, %v731_v36  ;;  %v748_v38 = vld [vmem:[#allocation3 + $0x890] sm:$0xff]  ;;  %v4681_v61 = vpack.c.bf16 %v938_v22, %v932_v26  ;;  %v773_v36 = vld [vmem:[#allocation3 + $0x958] sm:$0xff]  ;;  %v6678_v14 = vld [vmem:[%s7936_s0 + $0x80] sm:$0xff] }
 0x136   :  { %3063 = vmatmul.mubr.f32.gmra.mrb[38].mxu0 %v6417_v2  ;;  %4670 = vmatpush1.bf16.msra.mxu1 %v4669_v40  ;;  %v6653_v2 = vld [vmem:[%s7936_s0 + $0x42] sm:$0xff]  ;;  %v6685_v18 = vld [vmem:[%s7936_s0 + $0x72] sm:$0xff] }
 0x137   :  { %4894 = vmatpush1.bf16.msra.mxu0 %v4893_v57  ;;  %2424 = vmatprep.mubr.f32.mxu1 %v6449_v13  ;;  %v951_v40 = vld [vmem:[#allocation3 + $0xee8] sm:$0xff]  ;;  %v4905_v57 = vpack.c.bf16 %v748_v38, %v742_v34  ;;  %v969_v0 = vld [vmem:[#allocation3 + $0xf78] sm:$0xff]  ;;  %v974_v26 = vld [vmem:[#allocation3 + $0xfa0] sm:$0xff] }
 0x138   :  { %3068 = vmatprep.mubr.f32.mxu0 %v6427_v50  ;;  %4672 = vmatprep.subr.bf16.mxu1 %v4671_v28  ;;  %v743_v50 = vld [vmem:[#allocation3 + $0x868] sm:$0xff]  ;;  %v4683_v28 = vpack.c.bf16 %v951_v40, %v945_v44  ;;  %v784_v34 = vld [vmem:[#allocation3 + $0x9b0] sm:$0xff] }
 0x139   :  { %2425 = vmatmul.mubr.f32.gmra.mrb[40].mxu1 %v6653_v2  ;;  %4896 = vmatprep.subr.bf16.mxu0 %v4895_v56  ;;  %v4903_v11 = vpack.c.bf16 %v749_v59, %v743_v50  ;;  %v975_v5 = vld [vmem:[#allocation3 + $0xfa8] sm:$0xff]  ;;  %v785_v50 = vld [vmem:[#allocation3 + $0x9b8] sm:$0xff] }
 0x13a   :  { %3069 = vmatmul.mubr.f32.gmra.mrb[40].mxu0 %v6433_v58  ;;  %4674 = vmatpush1.bf16.msra.mxu1 %v4673_v17  ;;  %v6662_v58 = vld [vmem:[%s7936_s0 + $0x52] sm:$0xff]  ;;  %v4685_v17 = vpack.c.bf16 %v950_v1, %v944_v41  ;;  %v4691_v22 = vpack.c.bf16 %v975_v5, %v969_v0  ;;  %v987_v44 = vld [vmem:[#allocation3 + $0x1008] sm:$0xff]  ;;  %v790_v1 = vld [vmem:[#allocation3 + $0x9e0] sm:$0xff] }
 0x13b   :  { %4898 = vmatpush1.bf16.msra.mxu0 %v4897_v27  ;;  %2430 = vmatprep.mubr.f32.mxu1 %v6465_v7  ;;  %v4909_v27 = vpack.c.bf16 %v760_v8, %v754_v33  ;;  %v993_v8 = vld [vmem:[#allocation3 + $0x1038] sm:$0xff] }
 0x13c   :  { %3074 = vmatprep.mubr.f32.mxu0 %v6443_v19  ;;  %4676 = vmatprep.subr.bf16.mxu1 %v4675_v47  ;;  %v755_v19 = vld [vmem:[#allocation3 + $0x8c8] sm:$0xff]  ;;  %v4687_v47 = vpack.c.bf16 %v963_v4, %v957_v23  ;;  %v809_v4 = vld [vmem:[#allocation3 + $0xa78] sm:$0xff] }
 0x13d   :  { %2431 = vmatmul.mubr.f32.gmra.mrb[42].mxu1 %v6662_v58  ;;  %4900 = vmatprep.subr.bf16.mxu0 %v4899_v25  ;;  %v4907_v56 = vpack.c.bf16 %v761_v54, %v755_v19  ;;  %v980_v54 = vld [vmem:[#allocation3 + $0xfd0] sm:$0xff]  ;;  %v821_v0 = vld [vmem:[#allocation3 + $0xad8] sm:$0xff] }
 0x13e   :  { %3075 = vmatmul.mubr.f32.gmra.mrb[42].mxu0 %v6449_v13  ;;  %4678 = vmatpush1.bf16.msra.mxu1 %v4677_v51  ;;  %v6671_v13 = vld [vmem:[%s7936_s0 + $0x62] sm:$0xff]  ;;  %v4689_v51 = vpack.c.bf16 %v962_v39, %v956_v35  ;;  %v808_v39 = vld [vmem:[#allocation3 + $0xa70] sm:$0xff] }
 0x13f   :  { %4902 = vmatpush1.bf16.msra.mxu0 %v4901_v29  ;;  %2436 = vmatprep.mubr.f32.mxu1 %v6481_v12  ;;  %v968_v29 = vld [vmem:[#allocation3 + $0xf70] sm:$0xff]  ;;  %v802_v35 = vld [vmem:[#allocation3 + $0xa40] sm:$0xff] }
 0x140   :  { %3080 = vmatprep.mubr.f32.mxu0 %v6459_v52  ;;  %4680 = vmatprep.subr.bf16.mxu1 %v4679_v30  ;;  %v767_v52 = vld [vmem:[#allocation3 + $0x928] sm:$0xff]  ;;  %v778_v30 = vld [vmem:[#allocation3 + $0x980] sm:$0xff]  ;;  %v4693_v40 = vpack.c.bf16 %v974_v26, %v968_v29  ;;  %v4925_v5 = vpack.c.bf16 %v808_v39, %v802_v35  ;;  %v820_v29 = vld [vmem:[#allocation3 + $0xad0] sm:$0xff] }
 0x141   :  { %2437 = vmatmul.mubr.f32.gmra.mrb[44].mxu1 %v6671_v13  ;;  %4904 = vmatprep.subr.bf16.mxu0 %v4903_v11  ;;  %v4911_v25 = vpack.c.bf16 %v773_v36, %v767_v52  ;;  %v981_v11 = vld [vmem:[#allocation3 + $0xfd8] sm:$0xff]  ;;  %v4917_v19 = vpack.c.bf16 %v784_v34, %v778_v30  ;;  %v992_v52 = vld [vmem:[#allocation3 + $0x1030] sm:$0xff]  ;;  %v998_v36 = vld [vmem:[#allocation3 + $0x1060] sm:$0xff] }
 0x142   :  { %3081 = vmatmul.mubr.f32.gmra.mrb[44].mxu0 %v6465_v7  ;;  %4682 = vmatpush1.bf16.msra.mxu1 %v4681_v61  ;;  %v766_v7 = vld [vmem:[#allocation3 + $0x920] sm:$0xff]  ;;  %v797_v61 = vld [vmem:[#allocation3 + $0xa18] sm:$0xff]  ;;  %v4695_v41 = vpack.c.bf16 %v987_v44, %v981_v11  ;;  %v1023_v30 = vld [vmem:[#allocation3 + $0x1128] sm:$0xff] }
 0x143   :  { %4906 = vmatpush1.bf16.msra.mxu0 %v4905_v57  ;;  %2442 = vmatprep.mubr.f32.mxu1 %v6678_v14  ;;  %v4913_v59 = vpack.c.bf16 %v772_v60, %v766_v7  ;;  %v986_v57 = vld [vmem:[#allocation3 + $0x1000] sm:$0xff]  ;;  %v1005_v7 = vld [vmem:[#allocation3 + $0x1098] sm:$0xff]  ;;  %v1011_v60 = vld [vmem:[#allocation3 + $0x10c8] sm:$0xff] }
 0x144   :  { %3086 = vmatprep.mubr.f32.mxu0 %v6475_v6  ;;  %4684 = vmatprep.subr.bf16.mxu1 %v4683_v28  ;;  %v779_v6 = vld [vmem:[#allocation3 + $0x988] sm:$0xff]  ;;  %v796_v28 = vld [vmem:[#allocation3 + $0xa10] sm:$0xff]  ;;  %v4697_v23 = vpack.c.bf16 %v986_v57, %v980_v54  ;;  %v1029_v57 = vld [vmem:[#allocation3 + $0x1158] sm:$0xff] }
 0x145   :  { %2443 = vmatmul.mubr.f32.gmra.mrb[46].mxu1 %v6685_v18  ;;  %4908 = vmatprep.subr.bf16.mxu0 %v4907_v56  ;;  %v4915_v38 = vpack.c.bf16 %v785_v50, %v779_v6  ;;  %v999_v56 = vld [vmem:[#allocation3 + $0x1068] sm:$0xff]  ;;  %v1010_v6 = vld [vmem:[#allocation3 + $0x10c0] sm:$0xff]  ;;  %v4703_v50 = vpack.c.bf16 %v1011_v60, %v1005_v7  ;;  %v1016_v44 = vld [vmem:[#allocation3 + $0x10f0] sm:$0xff] }
 0x146   :  { %3087 = vmatmul.mubr.f32.gmra.mrb[46].mxu0 %v6481_v12  ;;  %4686 = vmatpush1.bf16.msra.mxu1 %v4685_v17  ;;  %v6694_v12 = vld [vmem:[%s7936_s0 + $0xa2] sm:$0xff]  ;;  %v4921_v17 = vpack.c.bf16 %v796_v28, %v790_v1  ;;  %v845_v28 = vld [vmem:[#allocation3 + $0xb98] sm:$0xff] }
 0x147   :  { %4910 = vmatpush1.bf16.msra.mxu0 %v4909_v27  ;;  %2448 = vmatprep.mubr.f32.mxu1 %v6513_v55  ;;  %v4699_v27 = vpack.c.bf16 %v999_v56, %v993_v8  ;;  %v1028_v8 = vld [vmem:[#allocation3 + $0x1150] sm:$0xff]  ;;  %v1034_v56 = vld [vmem:[#allocation3 + $0x1180] sm:$0xff]  ;;  %v857_v35 = vld [vmem:[#allocation3 + $0xbf8] sm:$0xff] }
 0x148   :  { %3092 = vmatprep.mubr.f32.mxu0 %v6491_v49  ;;  %4688 = vmatprep.subr.bf16.mxu1 %v4687_v47  ;;  %v791_v49 = vld [vmem:[#allocation3 + $0x9e8] sm:$0xff]  ;;  %v1046_v7 = vld [vmem:[#allocation3 + $0x11e0] sm:$0xff] }
 0x149   :  { %2449 = vmatmul.mubr.f32.gmra.mrb[48].mxu1 %v6694_v12  ;;  %4912 = vmatprep.subr.bf16.mxu0 %v4911_v25  ;;  %v4919_v33 = vpack.c.bf16 %v797_v61, %v791_v49  ;;  %v4701_v25 = vpack.c.bf16 %v998_v36, %v992_v52  ;;  %v826_v61 = vld [vmem:[#allocation3 + $0xb00] sm:$0xff]  ;;  %v1041_v52 = vld [vmem:[#allocation3 + $0x11b8] sm:$0xff]  ;;  %v1047_v36 = vld [vmem:[#allocation3 + $0x11e8] sm:$0xff] }
 0x14a   :  { %3093 = vmatmul.mubr.f32.gmra.mrb[48].mxu0 %v6497_v46  ;;  %4690 = vmatpush1.bf16.msra.mxu1 %v4689_v51  ;;  %v6703_v46 = vld [vmem:[%s7936_s0 + $0xb2] sm:$0xff]  ;;  %v4715_v60 = vpack.c.bf16 %v1047_v36, %v1041_v52  ;;  %v1082_v52 = vld [vmem:[#allocation3 + $0x1300] sm:$0xff] }
 0x14b   :  { %4914 = vmatpush1.bf16.msra.mxu0 %v4913_v59  ;;  %2454 = vmatprep.mubr.f32.mxu1 %v6529_v37  ;;  %v1004_v51 = vld [vmem:[#allocation3 + $0x1090] sm:$0xff]  ;;  %v814_v59 = vld [vmem:[#allocation3 + $0xaa0] sm:$0xff] }
 0x14c   :  { %3098 = vmatprep.mubr.f32.mxu0 %v6507_v16  ;;  %4692 = vmatprep.subr.bf16.mxu1 %v4691_v22  ;;  %v803_v16 = vld [vmem:[#allocation3 + $0xa48] sm:$0xff]  ;;  %v1017_v22 = vld [vmem:[#allocation3 + $0x10f8] sm:$0xff]  ;;  %v4705_v34 = vpack.c.bf16 %v1010_v6, %v1004_v51  ;;  %v4929_v11 = vpack.c.bf16 %v820_v29, %v814_v59  ;;  %v6755_v59 = vld [vmem:[%s7936_s0 + $0x120] sm:$0xff] }
 0x14d   :  { %2455 = vmatmul.mubr.f32.gmra.mrb[50].mxu1 %v6703_v46  ;;  %4916 = vmatprep.subr.bf16.mxu0 %v4915_v38  ;;  %v4923_v47 = vpack.c.bf16 %v809_v4, %v803_v16  ;;  %v833_v38 = vld [vmem:[#allocation3 + $0xb38] sm:$0xff]  ;;  %v4707_v49 = vpack.c.bf16 %v1023_v30, %v1017_v22  ;;  %v838_v16 = vld [vmem:[#allocation3 + $0xb60] sm:$0xff]  ;;  %v844_v4 = vld [vmem:[#allocation3 + $0xb90] sm:$0xff] }
 0x14e   :  { %3099 = vmatmul.mubr.f32.gmra.mrb[50].mxu0 %v6513_v55  ;;  %4694 = vmatpush1.bf16.msra.mxu1 %v4693_v40  ;;  %v6712_v55 = vld [vmem:[%s7936_s0 + $0xc2] sm:$0xff]  ;;  %v4937_v39 = vpack.c.bf16 %v844_v4, %v838_v16  ;;  %v893_v16 = vld [vmem:[#allocation3 + $0xd18] sm:$0xff] }
 0x14f   :  { %4918 = vmatpush1.bf16.msra.mxu0 %v4917_v19  ;;  %2460 = vmatprep.mubr.f32.mxu1 %v6545_v3  ;;  %v1022_v40 = vld [vmem:[#allocation3 + $0x1120] sm:$0xff]  ;;  %v832_v19 = vld [vmem:[#allocation3 + $0xb30] sm:$0xff]  ;;  %v1059_v51 = vld [vmem:[#allocation3 + $0x1248] sm:$0xff] }
 0x150   :  { %3104 = vmatprep.mubr.f32.mxu0 %v6523_v31  ;;  %4696 = vmatprep.subr.bf16.mxu1 %v4695_v41  ;;  %v815_v31 = vld [vmem:[#allocation3 + $0xaa8] sm:$0xff]  ;;  %v4709_v1 = vpack.c.bf16 %v1022_v40, %v1016_v44  ;;  %v1058_v22 = vld [vmem:[#allocation3 + $0x1240] sm:$0xff] }
 0x151   :  { %2461 = vmatmul.mubr.f32.gmra.mrb[52].mxu1 %v6712_v55  ;;  %4920 = vmatprep.subr.bf16.mxu0 %v4919_v33  ;;  %v4927_v26 = vpack.c.bf16 %v821_v0, %v815_v31  ;;  %v1035_v41 = vld [vmem:[#allocation3 + $0x1188] sm:$0xff]  ;;  %v4933_v33 = vpack.c.bf16 %v832_v19, %v826_v61  ;;  %v856_v31 = vld [vmem:[#allocation3 + $0xbf0] sm:$0xff]  ;;  %v6781_v36 = vld [vmem:[%s7936_s0 + $0x20] sm:$0xff] }
 0x152   :  { %3105 = vmatmul.mubr.f32.gmra.mrb[52].mxu0 %v6529_v37  ;;  %4698 = vmatpush1.bf16.msra.mxu1 %v4697_v23  ;;  %v6721_v37 = vld [vmem:[%s7936_s0 + $0xd2] sm:$0xff]  ;;  %v4711_v23 = vpack.c.bf16 %v1035_v41, %v1029_v57  ;;  %v1071_v44 = vld [vmem:[#allocation3 + $0x12a8] sm:$0xff] }
 0x153   :  { %4922 = vmatpush1.bf16.msra.mxu0 %v4921_v17  ;;  %2466 = vmatprep.mubr.f32.mxu1 %v6561_v62  ;;  %v1064_v19 = vld [vmem:[#allocation3 + $0x1270] sm:$0xff] }
 0x154   :  { %3110 = vmatprep.mubr.f32.mxu0 %v6539_v63  ;;  %4700 = vmatprep.subr.bf16.mxu1 %v4699_v27  ;;  %v827_v63 = vld [vmem:[#allocation3 + $0xb08] sm:$0xff]  ;;  %v4713_v27 = vpack.c.bf16 %v1034_v56, %v1028_v8  ;;  %v5798_v57 = vld [vmem:[%s7936_s0 + $0x10] sm:$0xff] }
 0x155   :  { %2467 = vmatmul.mubr.f32.gmra.mrb[54].mxu1 %v6721_v37  ;;  %4924 = vmatprep.subr.bf16.mxu0 %v4923_v47  ;;  %v4931_v54 = vpack.c.bf16 %v833_v38, %v827_v63  ;;  %v1040_v47 = vld [vmem:[#allocation3 + $0x11b0] sm:$0xff]  ;;  %v1083_v8 = vld [vmem:[#allocation3 + $0x1308] sm:$0xff] }
 0x156   :  { %3111 = vmatmul.mubr.f32.gmra.mrb[54].mxu0 %v6545_v3  ;;  %4702 = vmatpush1.bf16.msra.mxu1 %v4701_v25  ;;  %v6730_v3 = vld [vmem:[%s7936_s0 + $0xe2] sm:$0xff]  ;;  %v4717_v6 = vpack.c.bf16 %v1046_v7, %v1040_v47  ;;  %v6762_v63 = vld [vmem:[%s7936_s0 + $0x112] sm:$0xff] }
 0x157   :  { %4926 = vmatpush1.bf16.msra.mxu0 %v4925_v5  ;;  %2472 = vmatprep.mubr.f32.mxu1 %v6577_v43  ;;  %v850_v25 = vld [vmem:[#allocation3 + $0xbc0] sm:$0xff]  ;;  %v1053_v5 = vld [vmem:[#allocation3 + $0x1218] sm:$0xff]  ;;  %v1095_v7 = vld [vmem:[#allocation3 + $0x1368] sm:$0xff] }
 0x158   :  { %3116 = vmatprep.mubr.f32.mxu0 %v6555_v20  ;;  %4704 = vmatprep.subr.bf16.mxu1 %v4703_v50  ;;  %v839_v20 = vld [vmem:[#allocation3 + $0xb68] sm:$0xff]  ;;  %v869_v50 = vld [vmem:[#allocation3 + $0xc58] sm:$0xff]  ;;  %v4941_v29 = vpack.c.bf16 %v856_v31, %v850_v25  ;;  %v4719_v30 = vpack.c.bf16 %v1059_v51, %v1053_v5  ;;  %v1088_v5 = vld [vmem:[#allocation3 + $0x1330] sm:$0xff] }
 0x159   :  { %2473 = vmatmul.mubr.f32.gmra.mrb[56].mxu1 %v6730_v3  ;;  %4928 = vmatprep.subr.bf16.mxu0 %v4927_v26  ;;  %v4935_v17 = vpack.c.bf16 %v845_v28, %v839_v20  ;;  %v1052_v26 = vld [vmem:[#allocation3 + $0x1210] sm:$0xff]  ;;  %v1089_v47 = vld [vmem:[#allocation3 + $0x1338] sm:$0xff]  ;;  %v899_v25 = vld [vmem:[#allocation3 + $0xd48] sm:$0xff] }
 0x15a   :  { %3117 = vmatmul.mubr.f32.gmra.mrb[56].mxu0 %v6561_v62  ;;  %4706 = vmatpush1.bf16.msra.mxu1 %v4705_v34  ;;  %v6739_v62 = vld [vmem:[%s7936_s0 + $0xf2] sm:$0xff]  ;;  %v4721_v40 = vpack.c.bf16 %v1058_v22, %v1052_v26  ;;  %v1094_v51 = vld [vmem:[#allocation3 + $0x1360] sm:$0xff] }
 0x15b   :  { %4930 = vmatpush1.bf16.msra.mxu0 %v4929_v11  ;;  %2478 = vmatprep.mubr.f32.mxu1 %v6593_v10  ;;  %v868_v34 = vld [vmem:[#allocation3 + $0xc50] sm:$0xff]  ;;  %v1065_v11 = vld [vmem:[#allocation3 + $0x1278] sm:$0xff] }
 0x15c   :  { %3122 = vmatprep.mubr.f32.mxu0 %v6571_v32  ;;  %4708 = vmatprep.subr.bf16.mxu1 %v4707_v49  ;;  %v851_v32 = vld [vmem:[#allocation3 + $0xbc8] sm:$0xff]  ;;  %v881_v49 = vld [vmem:[#allocation3 + $0xcb8] sm:$0xff]  ;;  %v4723_v41 = vpack.c.bf16 %v1071_v44, %v1065_v11  ;;  %v880_v20 = vld [vmem:[#allocation3 + $0xcb0] sm:$0xff] }
 0x15d   :  { %2479 = vmatmul.mubr.f32.gmra.mrb[58].mxu1 %v6739_v62  ;;  %4932 = vmatprep.subr.bf16.mxu0 %v4931_v54  ;;  %v4939_v0 = vpack.c.bf16 %v857_v35, %v851_v32  ;;  %v1070_v54 = vld [vmem:[#allocation3 + $0x12a0] sm:$0xff]  ;;  %v892_v32 = vld [vmem:[#allocation3 + $0xd10] sm:$0xff]  ;;  %v905_v31 = vld [vmem:[#allocation3 + $0xd78] sm:$0xff] }
 0x15e   :  { %3123 = vmatmul.mubr.f32.gmra.mrb[58].mxu0 %v6577_v43  ;;  %4710 = vmatpush1.bf16.msra.mxu1 %v4709_v1  ;;  %v6748_v43 = vld [vmem:[%s7936_s0 + $0x102] sm:$0xff]  ;;  %v4725_v56 = vpack.c.bf16 %v1070_v54, %v1064_v19  ;;  %v4955_v26 = vpack.c.bf16 %v905_v31, %v899_v25  ;;  %v1101_v22 = vld [vmem:[#allocation3 + $0x1398] sm:$0xff]  ;;  %v1100_v44 = vld [vmem:[#allocation3 + $0x1390] sm:$0xff] }
 0x15f   :  { %4934 = vmatpush1.bf16.msra.mxu0 %v4933_v33  ;;  %2484 = vmatprep.mubr.f32.mxu1 %v6609_v48  ;;  %v874_v1 = vld [vmem:[#allocation3 + $0xc80] sm:$0xff]  ;;  %v1077_v33 = vld [vmem:[#allocation3 + $0x12d8] sm:$0xff] }
 0x160   :  { %3128 = vmatprep.mubr.f32.mxu0 %v6587_v53  ;;  %4712 = vmatprep.subr.bf16.mxu1 %v4711_v23  ;;  %v863_v53 = vld [vmem:[#allocation3 + $0xc28] sm:$0xff]  ;;  %v4949_v4 = vpack.c.bf16 %v880_v20, %v874_v1  ;;  %v1130_v25 = vld [vmem:[#allocation3 + $0x1480] sm:$0xff] }
 0x161   :  { %2485 = vmatmul.mubr.f32.gmra.mrb[60].mxu1 %v6748_v43  ;;  %4936 = vmatprep.subr.bf16.mxu0 %v4935_v17  ;;  %v4943_v38 = vpack.c.bf16 %v869_v50, %v863_v53  ;;  %v887_v23 = vld [vmem:[#allocation3 + $0xce8] sm:$0xff]  ;;  %v1076_v17 = vld [vmem:[#allocation3 + $0x12d0] sm:$0xff]  ;;  %v4731_v53 = vpack.c.bf16 %v1095_v7, %v1089_v47  ;;  %v941_v47 = vld [vmem:[#allocation3 + $0xe98] sm:$0xff] }
 0x162   :  { %3129 = vmatmul.mubr.f32.gmra.mrb[60].mxu0 %v6593_v10  ;;  %4714 = vmatpush1.bf16.msra.mxu1 %v4713_v27  ;;  %v862_v10 = vld [vmem:[#allocation3 + $0xc20] sm:$0xff]  ;;  %v4727_v27 = vpack.c.bf16 %v1083_v8, %v1077_v33  ;;  %v904_v50 = vld [vmem:[#allocation3 + $0xd70] sm:$0xff]  ;;  %v923_v20 = vld [vmem:[#allocation3 + $0xe08] sm:$0xff] }
 0x163   :  { %4938 = vmatpush1.bf16.msra.mxu0 %v4937_v39  ;;  %2490 = vmatprep.mubr.f32.mxu1 %v6755_v59  ;;  %v4945_v61 = vpack.c.bf16 %v868_v34, %v862_v10  ;;  %v6787_v35 = vld [vmem:[%s7936_s0 + $0x21] sm:$0xff]  ;;  %v4951_v39 = vpack.c.bf16 %v893_v16, %v887_v23  ;;  %v4733_v10 = vpack.c.bf16 %v1094_v51, %v1088_v5  ;;  %v1112_v8 = vld [vmem:[#allocation3 + $0x13f0] sm:$0xff] }
 0x164   :  { %3134 = vmatprep.mubr.f32.mxu0 %v6603_v21  ;;  %4716 = vmatprep.subr.bf16.mxu1 %v4715_v60  ;;  %v875_v21 = vld [vmem:[#allocation3 + $0xc88] sm:$0xff]  ;;  %v4729_v60 = vpack.c.bf16 %v1082_v52, %v1076_v17  ;;  %v6823_v23 = vld [vmem:[%s7936_s0 + $0x50] sm:$0xff]  ;;  %v934_v5 = vld [vmem:[#allocation3 + $0xe60] sm:$0xff] }
 0x165   :  { %2491 = vmatmul.mubr.f32.gmra.mrb[62].mxu1 %v6762_v63  ;;  %4940 = vmatprep.subr.bf16.mxu0 %v4939_v0  ;;  %v4947_v28 = vpack.c.bf16 %v881_v49, %v875_v21  ;;  %v911_v34 = vld [vmem:[#allocation3 + $0xda8] sm:$0xff]  ;;  %v6809_v21 = vld [vmem:[%s7936_s0 + $0x40] sm:$0xff]  ;;  %v6829_v17 = vld [vmem:[%s7936_s0 + $0x51] sm:$0xff] }
 0x166   :  { %3135 = vmatmul.mubr.f32.gmra.mrb[62].mxu0 %v6609_v48  ;;  %4718 = vmatpush1.bf16.msra.mxu1 %v4717_v6  ;;  %v6773_v48 = vld [vmem:[%s7936_s0 + $0x11] sm:$0xff]  ;;  %v6815_v19 = vld [vmem:[%s7936_s0 + $0x41] sm:$0xff] }
 0x167   :  { %4942 = vmatpush1.bf16.msra.mxu0 %v4941_v29  ;;  %2561 = vmatprep.mubr.f32.mxu1 %v6626_v45  ;;  %v6795_v6 = vld [vmem:[%s7936_s0 + $0x30] sm:$0xff] }
 0x168   :  { %3205 = vmatprep.mubr.f32.mxu0 %v5798_v57  ;;  %4720 = vmatprep.subr.bf16.mxu1 %v4719_v30  ;;  %v6801_v29 = vld [vmem:[%s7936_s0 + $0x31] sm:$0xff]  ;;  %v1107_v30 = vld [vmem:[#allocation3 + $0x13c8] sm:$0xff] }
 0x169   :  { %2562 = vmatmul.mubr.f32.vlgmr.msra.gmra.mrb[32].mxu1 %v6773_v48  ;;  %4944 = vmatprep.subr.bf16.mxu0 %v4943_v38  ;;  %v917_v38 = vld [vmem:[#allocation3 + $0xdd8] sm:$0xff]  ;;  %v4735_v49 = vpack.c.bf16 %v1107_v30, %v1101_v22  ;;  %v940_v51 = vld [vmem:[#allocation3 + $0xe90] sm:$0xff]  ;;  %v1143_v22 = vld [vmem:[#allocation3 + $0x14e8] sm:$0xff] }
 0x16a   :  { %3206 = vmatmul.mubr.f32.vlgmr.msra.gmra.mrb[32].mxu0 %v6617_v42  ;;  %4722 = vmatpush1.bf16.msra.mxu1 %v4721_v40  ;;  %v886_v42 = vld [vmem:[#allocation3 + $0xce0] sm:$0xff]  ;;  %v4959_v54 = vpack.c.bf16 %v917_v38, %v911_v34  ;;  %v1113_v57 = vld [vmem:[#allocation3 + $0x13f8] sm:$0xff]  ;;  %v4969_v38 = vpack.c.bf16 %v940_v51, %v934_v5  ;;  %v1160_v51 = vld [vmem:[#allocation3 + $0x1570] sm:$0xff] }
 0x16b   :  { %4946 = vmatpush1.bf16.msra.mxu0 %v4945_v61  ;;  %2567 = vmatprep.mubr.f32.mxu1 %v6635_v9  ;;  %v4953_v0 = vpack.c.bf16 %v892_v32, %v886_v42  ;;  %v1106_v40 = vld [vmem:[#allocation3 + $0x13c0] sm:$0xff]  ;;  %v916_v61 = vld [vmem:[#allocation3 + $0xdd0] sm:$0xff]  ;;  %v1131_v42 = vld [vmem:[#allocation3 + $0x1488] sm:$0xff] }
 0x16c   :  { %3211 = vmatprep.mubr.f32.mxu0 %v6781_v36  ;;  %4724 = vmatprep.subr.bf16.mxu1 %v4723_v41  ;;  %v1119_v41 = vld [vmem:[#allocation3 + $0x1428] sm:$0xff]  ;;  %v4737_v1 = vpack.c.bf16 %v1106_v40, %v1100_v44  ;;  %v953_v34 = vld [vmem:[#allocation3 + $0xef8] sm:$0xff]  ;;  %v1142_v44 = vld [vmem:[#allocation3 + $0x14e0] sm:$0xff] }
 0x16d   :  { %2568 = vmatmul.mubr.f32.gmra.mrb[34].mxu1 %v6787_v35  ;;  %4948 = vmatprep.subr.bf16.mxu0 %v4947_v28  ;;  %v929_v28 = vld [vmem:[#allocation3 + $0xe38] sm:$0xff]  ;;  %v4739_v16 = vpack.c.bf16 %v1119_v41, %v1113_v57 }
 0x16e   :  { %3212 = vmatmul.mubr.f32.gmra.mrb[34].mxu0 %v6626_v45  ;;  %4726 = vmatpush1.bf16.msra.mxu1 %v4725_v56  ;;  %v898_v45 = vld [vmem:[#allocation3 + $0xd40] sm:$0xff]  ;;  %v4963_v52 = vpack.c.bf16 %v929_v28, %v923_v20  ;;  %v6865_v57 = vld [vmem:[%s7936_s0 + $0x71] sm:$0xff]  ;;  %v1155_v20 = vld [vmem:[#allocation3 + $0x1548] sm:$0xff] }
 0x16f   :  { %4950 = vmatpush1.bf16.msra.mxu0 %v4949_v4  ;;  %2573 = vmatprep.mubr.f32.mxu1 %v6644_v24  ;;  %v4957_v11 = vpack.c.bf16 %v904_v50, %v898_v45  ;;  %v1118_v56 = vld [vmem:[#allocation3 + $0x1420] sm:$0xff]  ;;  %v928_v4 = vld [vmem:[#allocation3 + $0xe30] sm:$0xff] }
 0x170   :  { %3217 = vmatprep.mubr.f32.mxu0 %v6795_v6  ;;  %4728 = vmatprep.subr.bf16.mxu1 %v4727_v27  ;;  %v1125_v27 = vld [vmem:[#allocation3 + $0x1458] sm:$0xff]  ;;  %v4741_v32 = vpack.c.bf16 %v1118_v56, %v1112_v8  ;;  %v6847_v45 = vld [vmem:[%s7936_s0 + $0x61] sm:$0xff] }
 0x171   :  { %2574 = vmatmul.mubr.f32.gmra.mrb[36].mxu1 %v6801_v29  ;;  %4952 = vmatprep.subr.bf16.mxu0 %v4951_v39  ;;  %v935_v39 = vld [vmem:[#allocation3 + $0xe68] sm:$0xff]  ;;  %v965_v8 = vld [vmem:[#allocation3 + $0xf58] sm:$0xff] }
 0x172   :  { %3218 = vmatmul.mubr.f32.gmra.mrb[36].mxu0 %v6635_v9  ;;  %4730 = vmatpush1.bf16.msra.mxu1 %v4729_v60  ;;  %v910_v9 = vld [vmem:[#allocation3 + $0xda0] sm:$0xff]  ;;  %v1124_v60 = vld [vmem:[#allocation3 + $0x1450] sm:$0xff]  ;;  %v4967_v50 = vpack.c.bf16 %v941_v47, %v935_v39 }
 0x173   :  { %4954 = vmatpush1.bf16.msra.mxu0 %v4953_v0  ;;  %2579 = vmatprep.mubr.f32.mxu1 %v6653_v2  ;;  %v4961_v33 = vpack.c.bf16 %v916_v61, %v910_v9  ;;  %v6839_v0 = vld [vmem:[%s7936_s0 + $0x60] sm:$0xff]  ;;  %v4745_v30 = vpack.c.bf16 %v1130_v25, %v1124_v60  ;;  %v952_v61 = vld [vmem:[#allocation3 + $0xef0] sm:$0xff]  ;;  %v1167_v60 = vld [vmem:[#allocation3 + $0x15a8] sm:$0xff] }
 0x174   :  { %3223 = vmatprep.mubr.f32.mxu0 %v6809_v21  ;;  %4732 = vmatprep.subr.bf16.mxu1 %v4731_v53  ;;  %v946_v9 = vld [vmem:[#allocation3 + $0xec0] sm:$0xff]  ;;  %v971_v25 = vld [vmem:[#allocation3 + $0xf88] sm:$0xff] }
 0x175   :  { %2580 = vmatmul.mubr.f32.gmra.mrb[38].mxu1 %v6815_v19  ;;  %4956 = vmatprep.subr.bf16.mxu0 %v4955_v26  ;;  %v1137_v26 = vld [vmem:[#allocation3 + $0x14b8] sm:$0xff]  ;;  %v6872_v56 = vld [vmem:[%s7936_s0 + $0x82] sm:$0xff] }
 0x176   :  { %3224 = vmatmul.mubr.f32.gmra.mrb[38].mxu0 %v6644_v24  ;;  %4734 = vmatpush1.bf16.msra.mxu1 %v4733_v10  ;;  %v922_v24 = vld [vmem:[#allocation3 + $0xe00] sm:$0xff]  ;;  %v947_v10 = vld [vmem:[#allocation3 + $0xec8] sm:$0xff] }
 0x177   :  { %4958 = vmatpush1.bf16.msra.mxu0 %v4957_v11  ;;  %2585 = vmatprep.mubr.f32.mxu1 %v6662_v58  ;;  %v4965_v7 = vpack.c.bf16 %v928_v4, %v922_v24  ;;  %v1136_v11 = vld [vmem:[#allocation3 + $0x14b0] sm:$0xff]  ;;  %v4971_v41 = vpack.c.bf16 %v953_v34, %v947_v10  ;;  %v1154_v4 = vld [vmem:[#allocation3 + $0x1540] sm:$0xff] }
 0x178   :  { %3229 = vmatprep.mubr.f32.mxu0 %v6823_v23  ;;  %4736 = vmatprep.subr.bf16.mxu1 %v4735_v49  ;;  %v6857_v49 = vld [vmem:[%s7936_s0 + $0x70] sm:$0xff]  ;;  %v4749_v28 = vpack.c.bf16 %v1142_v44, %v1136_v11  ;;  %v6883_v39 = vld [vmem:[%s7936_s0 + $0x81] sm:$0xff]  ;;  %v1173_v44 = vld [vmem:[#allocation3 + $0x15d8] sm:$0xff] }
 0x179   :  { %2586 = vmatmul.mubr.f32.gmra.mrb[40].mxu1 %v6829_v17  ;;  %4960 = vmatprep.subr.bf16.mxu0 %v4959_v54  ;;  %v1148_v24 = vld [vmem:[#allocation3 + $0x1510] sm:$0xff] }
 0x17a   :  { %3230 = vmatmul.mubr.f32.gmra.mrb[40].mxu0 %v6653_v2  ;;  %4738 = vmatpush1.bf16.msra.mxu1 %v4737_v1  ;;  %v4743_v2 = vpack.c.bf16 %v1131_v42, %v1125_v27  ;;  %v1149_v1 = vld [vmem:[#allocation3 + $0x1518] sm:$0xff]  ;;  %v958_v27 = vld [vmem:[#allocation3 + $0xf20] sm:$0xff]  ;;  %v964_v42 = vld [vmem:[#allocation3 + $0xf50] sm:$0xff] }
 0x17b   :  { %4962 = vmatpush1.bf16.msra.mxu0 %v4961_v33  ;;  %2591 = vmatprep.mubr.f32.mxu1 %v6671_v13  ;;  %v959_v33 = vld [vmem:[#allocation3 + $0xf28] sm:$0xff]  ;;  %v4977_v5 = vpack.c.bf16 %v964_v42, %v958_v27  ;;  %v976_v10 = vld [vmem:[#allocation3 + $0xfb0] sm:$0xff]  ;;  %v1185_v42 = vld [vmem:[#allocation3 + $0x1638] sm:$0xff] }
 0x17c   :  { %v6834_v31 = vpop.f32.mrb[0].mxu1  ;;  %3235 = vmatprep.mubr.f32.mxu0 %v6839_v0  ;;  %4740 = vmatprep.subr.bf16.mxu1 %v4739_v16  ;;  %v4973_v16 = vpack.c.bf16 %v952_v61, %v946_v9  ;;  %v4975_v47 = vpack.c.bf16 %v965_v8, %v959_v33  ;;  %v983_v61 = vld [vmem:[#allocation3 + $0xfe8] sm:$0xff]  ;;  %v6908_v8 = vld [vmem:[%s7936_s0 + $0xc0] sm:$0xff] }
 0x17d   :  { %v6842_v53 = vpop.f32.mrb[1].mxu1  ;;  %2592 = vmatmul.mubr.f32.gmra.mrb[42].mxu1 %v6847_v45  ;;  %4964 = vmatprep.subr.bf16.mxu0 %v4963_v52 }
 0x17e   :  { %3236 = vmatmul.mubr.f32.gmra.mrb[42].mxu0 %v6662_v58  ;;  %4742 = vmatpush1.bf16.msra.mxu1 %v4741_v32  ;;  %v4747_v58 = vpack.c.bf16 %v1143_v22, %v1137_v26  ;;  %v5814_v22 = vld [vmem:[%s7936_s0 + $0xb0] sm:$0xff] }
 0x17f   :  { %4966 = vmatpush1.bf16.msra.mxu0 %v4965_v7  ;;  %2597 = vmatprep.mubr.f32.mxu1 %v6685_v18  ;;  %v1161_v7 = vld [vmem:[#allocation3 + $0x1578] sm:$0xff] }
 0x180   :  { %v6852_v40 = vpop.f32.mrb[2].mxu1  ;;  %3241 = vmatprep.mubr.f32.mxu0 %v6857_v49  ;;  %4744 = vmatprep.subr.bf16.mxu1 %v4743_v2  ;;  %v977_v2 = vld [vmem:[#allocation3 + $0xfb8] sm:$0xff] }
 0x181   :  { %v6860_v54 = vpop.f32.mrb[3].mxu1  ;;  %2598 = vmatmul.mubr.f32.gmra.mrb[44].mxu1 %v6865_v57  ;;  %4968 = vmatprep.subr.bf16.mxu0 %v4967_v50  ;;  %v1166_v50 = vld [vmem:[#allocation3 + $0x15a0] sm:$0xff]  ;;  %v4979_v11 = vpack.c.bf16 %v977_v2, %v971_v25  ;;  %v1184_v2 = vld [vmem:[#allocation3 + $0x1630] sm:$0xff] }
 0x182   :  { %3242 = vmatmul.mubr.f32.gmra.mrb[44].mxu0 %v6671_v13  ;;  %4746 = vmatpush1.bf16.msra.mxu1 %v4745_v30  ;;  %v4751_v13 = vpack.c.bf16 %v1155_v20, %v1149_v1  ;;  %v4755_v30 = vpack.c.bf16 %v1167_v60, %v1161_v7  ;;  %v4757_v9 = vpack.c.bf16 %v1166_v50, %v1160_v51  ;;  %v1172_v20 = vld [vmem:[#allocation3 + $0x15d0] sm:$0xff]  ;;  %v995_v60 = vld [vmem:[#allocation3 + $0x1048] sm:$0xff] }
 0x183   :  { %4970 = vmatpush1.bf16.msra.mxu0 %v4969_v38  ;;  %2603 = vmatprep.mubr.f32.mxu1 %v6872_v56  ;;  %v6898_v38 = vld [vmem:[%s7936_s0 + $0xb1] sm:$0xff] }
 0x184   :  { %v6875_v52 = vpop.f32.mrb[4].mxu1  ;;  %3247 = vmatprep.mubr.f32.mxu0 %v6678_v14  ;;  %4748 = vmatprep.subr.bf16.mxu1 %v4747_v58  ;;  %v4753_v14 = vpack.c.bf16 %v1154_v4, %v1148_v24  ;;  %v1179_v58 = vld [vmem:[#allocation3 + $0x1608] sm:$0xff]  ;;  %v988_v24 = vld [vmem:[#allocation3 + $0x1010] sm:$0xff] }
 0x185   :  { %v6878_v32 = vpop.f32.mrb[5].mxu1  ;;  %2604 = vmatmul.mubr.f32.gmra.mrb[46].mxu1 %v6883_v39  ;;  %4972 = vmatprep.subr.bf16.mxu0 %v4971_v41  ;;  %v989_v41 = vld [vmem:[#allocation3 + $0x1018] sm:$0xff]  ;;  %v6926_v50 = vld [vmem:[%s7936_s0 + $0xd0] sm:$0xff] }
 0x186   :  { %3248 = vmatmul.mubr.f32.gmra.mrb[46].mxu0 %v6685_v18  ;;  %4750 = vmatpush1.bf16.msra.mxu1 %v4749_v28  ;;  %v970_v18 = vld [vmem:[#allocation3 + $0xf80] sm:$0xff]  ;;  %v4983_v27 = vpack.c.bf16 %v989_v41, %v983_v61  ;;  %v1007_v61 = vld [vmem:[#allocation3 + $0x10a8] sm:$0xff]  ;;  %v1013_v41 = vld [vmem:[#allocation3 + $0x10d8] sm:$0xff] }
 0x187   :  { %4974 = vmatpush1.bf16.msra.mxu0 %v4973_v16  ;;  %2609 = vmatprep.mubr.f32.mxu1 %v6703_v46  ;;  %v4981_v1 = vpack.c.bf16 %v976_v10, %v970_v18  ;;  %v1178_v28 = vld [vmem:[#allocation3 + $0x1600] sm:$0xff]  ;;  %v6934_v10 = vld [vmem:[%s7936_s0 + $0xd1] sm:$0xff] }
 0x188   :  { %v6888_v26 = vpop.f32.mrb[6].mxu1  ;;  %3253 = vmatprep.mubr.f32.mxu0 %v5814_v22  ;;  %4752 = vmatprep.subr.bf16.mxu1 %v4751_v13  ;;  %v982_v16 = vld [vmem:[#allocation3 + $0xfe0] sm:$0xff]  ;;  %v4761_v7 = vpack.c.bf16 %v1178_v28, %v1172_v20  ;;  %v1196_v20 = vld [vmem:[#allocation3 + $0x1690] sm:$0xff] }
 0x189   :  { %v6893_v34 = vpop.f32.mrb[7].mxu1  ;;  %2610 = vmatmul.mubr.f32.gmra.mrb[48].mxu1 %v6898_v38  ;;  %4976 = vmatprep.subr.bf16.mxu0 %v4975_v47  ;;  %v6916_v13 = vld [vmem:[%s7936_s0 + $0xc1] sm:$0xff]  ;;  %v4985_v25 = vpack.c.bf16 %v988_v24, %v982_v16 }
 0x18a   :  { %3254 = vmatmul.mubr.f32.gmra.mrb[48].mxu0 %v6694_v12  ;;  %4754 = vmatpush1.bf16.msra.mxu1 %v4753_v14  ;;  %v4759_v12 = vpack.c.bf16 %v1179_v58, %v1173_v44  ;;  %v1191_v47 = vld [vmem:[#allocation3 + $0x1668] sm:$0xff]  ;;  %v1001_v14 = vld [vmem:[#allocation3 + $0x1078] sm:$0xff]  ;;  %v994_v22 = vld [vmem:[#allocation3 + $0x1040] sm:$0xff] }
 0x18b   :  { %4978 = vmatpush1.bf16.msra.mxu0 %v4977_v5  ;;  %2615 = vmatprep.mubr.f32.mxu1 %v6712_v55  ;;  %v1190_v5 = vld [vmem:[#allocation3 + $0x1660] sm:$0xff]  ;;  %v1197_v44 = vld [vmem:[#allocation3 + $0x1698] sm:$0xff]  ;;  %v1203_v58 = vld [vmem:[#allocation3 + $0x16c8] sm:$0xff] }
 0x18c   :  { %v6903_v33 = vpop.f32.mrb[8].mxu1  ;;  %3259 = vmatprep.mubr.f32.mxu0 %v6908_v8  ;;  %4756 = vmatprep.subr.bf16.mxu1 %v4755_v30  ;;  %v1000_v30 = vld [vmem:[#allocation3 + $0x1070] sm:$0xff]  ;;  %v1202_v28 = vld [vmem:[#allocation3 + $0x16c0] sm:$0xff] }
 0x18d   :  { %v6911_v4 = vpop.f32.mrb[9].mxu1  ;;  %2616 = vmatmul.mubr.f32.gmra.mrb[50].mxu1 %v6916_v13  ;;  %4980 = vmatprep.subr.bf16.mxu0 %v4979_v11  ;;  %v4987_v11 = vpack.c.bf16 %v1001_v14, %v995_v60  ;;  %v6944_v16 = vld [vmem:[%s7936_s0 + $0xe0] sm:$0xff]  ;;  %v1209_v60 = vld [vmem:[#allocation3 + $0x16f8] sm:$0xff]  ;;  %v1215_v14 = vld [vmem:[#allocation3 + $0x1728] sm:$0xff] }
 0x18e   :  { %3260 = vmatmul.mubr.f32.gmra.mrb[50].mxu0 %v6703_v46  ;;  %4758 = vmatpush1.bf16.msra.mxu1 %v4757_v9  ;;  %v4763_v46 = vpack.c.bf16 %v1191_v47, %v1185_v42  ;;  %v4765_v9 = vpack.c.bf16 %v1190_v5, %v1184_v2  ;;  %v1006_v24 = vld [vmem:[#allocation3 + $0x10a0] sm:$0xff]  ;;  %v1019_v2 = vld [vmem:[#allocation3 + $0x1108] sm:$0xff]  ;;  %v1025_v5 = vld [vmem:[#allocation3 + $0x1138] sm:$0xff] }
 0x18f   :  { %4982 = vmatpush1.bf16.msra.mxu0 %v4981_v1  ;;  %2621 = vmatprep.mubr.f32.mxu1 %v6721_v37  ;;  %v4989_v1 = vpack.c.bf16 %v1000_v30, %v994_v22  ;;  %v6952_v47 = vld [vmem:[%s7936_s0 + $0xe1] sm:$0xff]  ;;  %v1208_v22 = vld [vmem:[#allocation3 + $0x16f0] sm:$0xff] }
 0x190   :  { %v6921_v51 = vpop.f32.mrb[10].mxu1  ;;  %3265 = vmatprep.mubr.f32.mxu0 %v6926_v50  ;;  %4760 = vmatprep.subr.bf16.mxu1 %v4759_v12  ;;  %v1214_v30 = vld [vmem:[#allocation3 + $0x1720] sm:$0xff] }
 0x191   :  { %v6929_v18 = vpop.f32.mrb[11].mxu1  ;;  %2622 = vmatmul.mubr.f32.gmra.mrb[52].mxu1 %v6934_v10  ;;  %4984 = vmatprep.subr.bf16.mxu0 %v4983_v27  ;;  %v1012_v27 = vld [vmem:[#allocation3 + $0x10d0] sm:$0xff] }
 0x192   :  { %3266 = vmatmul.mubr.f32.gmra.mrb[52].mxu0 %v6712_v55  ;;  %4762 = vmatpush1.bf16.msra.mxu1 %v4761_v7  ;;  %v4767_v55 = vpack.c.bf16 %v1203_v58, %v1197_v44  ;;  %v4991_v7 = vpack.c.bf16 %v1013_v41, %v1007_v61  ;;  %v1018_v58 = vld [vmem:[#allocation3 + $0x1100] sm:$0xff]  ;;  %v6970_v41 = vld [vmem:[%s7936_s0 + $0xf1] sm:$0xff] }
 0x193   :  { %4986 = vmatpush1.bf16.msra.mxu0 %v4985_v25  ;;  %2627 = vmatprep.mubr.f32.mxu1 %v6730_v3  ;;  %v4769_v25 = vpack.c.bf16 %v1202_v28, %v1196_v20  ;;  %v1221_v20 = vld [vmem:[#allocation3 + $0x1758] sm:$0xff]  ;;  %v1227_v28 = vld [vmem:[#allocation3 + $0x1788] sm:$0xff] }
 0x194   :  { %v6939_v12 = vpop.f32.mrb[12].mxu1  ;;  %3271 = vmatprep.mubr.f32.mxu0 %v6944_v16  ;;  %4764 = vmatprep.subr.bf16.mxu1 %v4763_v46  ;;  %v4993_v46 = vpack.c.bf16 %v1012_v27, %v1006_v24  ;;  %v1031_v24 = vld [vmem:[#allocation3 + $0x1168] sm:$0xff]  ;;  %v1037_v27 = vld [vmem:[#allocation3 + $0x1198] sm:$0xff] }
 0x195   :  { %v6947_v42 = vpop.f32.mrb[13].mxu1  ;;  %2628 = vmatmul.mubr.f32.gmra.mrb[54].mxu1 %v6952_v47  ;;  %4988 = vmatprep.subr.bf16.mxu0 %v4987_v11  ;;  %v6962_v11 = vld [vmem:[%s7936_s0 + $0xf0] sm:$0xff] }
 0x196   :  { %3272 = vmatmul.mubr.f32.gmra.mrb[54].mxu0 %v6721_v37  ;;  %4766 = vmatpush1.bf16.msra.mxu1 %v4765_v9  ;;  %v4771_v37 = vpack.c.bf16 %v1215_v14, %v1209_v60  ;;  %v1024_v9 = vld [vmem:[#allocation3 + $0x1130] sm:$0xff] }
 0x197   :  { %4990 = vmatpush1.bf16.msra.mxu0 %v4989_v1  ;;  %2633 = vmatprep.mubr.f32.mxu1 %v6739_v62  ;;  %v4995_v1 = vpack.c.bf16 %v1025_v5, %v1019_v2  ;;  %v4997_v60 = vpack.c.bf16 %v1024_v9, %v1018_v58  ;;  %v1220_v14 = vld [vmem:[#allocation3 + $0x1750] sm:$0xff]  ;;  %v1239_v58 = vld [vmem:[#allocation3 + $0x17e8] sm:$0xff] }
 0x198   :  { %v6957_v44 = vpop.f32.mrb[14].mxu1  ;;  %3277 = vmatprep.mubr.f32.mxu0 %v6962_v11  ;;  %4768 = vmatprep.subr.bf16.mxu1 %v4767_v55  ;;  %v4773_v55 = vpack.c.bf16 %v1214_v30, %v1208_v22  ;;  %v1036_v2 = vld [vmem:[#allocation3 + $0x1190] sm:$0xff]  ;;  %v4999_v22 = vpack.c.bf16 %v1037_v27, %v1031_v24  ;;  %v1233_v30 = vld [vmem:[#allocation3 + $0x17b8] sm:$0xff]  ;;  %v1043_v9 = vld [vmem:[#allocation3 + $0x11c8] sm:$0xff] }
 0x199   :  { %v6965_v61 = vpop.f32.mrb[15].mxu1  ;;  %2634 = vmatmul.mubr.f32.gmra.mrb[56].mxu1 %v6970_v41  ;;  %4992 = vmatprep.subr.bf16.mxu0 %v4991_v7  ;;  %v6980_v7 = vld [vmem:[%s7936_s0 + $0x100] sm:$0xff]  ;;  %v7006_v27 = vld [vmem:[%s7936_s0 + $0x111] sm:$0xff] }
 0x19a   :  { %7966 = vst [vmem:[#allocation9_spill] sm:$0xff] %v6965_v61  ;;  %3278 = vmatmul.mubr.f32.gmra.mrb[56].mxu0 %v6730_v3  ;;  %4770 = vmatpush1.bf16.msra.mxu1 %v4769_v25  ;;  %7968 = vst [vmem:[#allocation11_spill] sm:$0xff] %v6980_v7  ;;  %v4775_v3 = vpack.c.bf16 %v1227_v28, %v1221_v20  ;;  %v1030_v25 = vld [vmem:[#allocation3 + $0x1160] sm:$0xff]  ;;  %v1049_v20 = vld [vmem:[#allocation3 + $0x11f8] sm:$0xff] }
 0x19b   :  { %4994 = vmatpush1.bf16.msra.mxu0 %v4993_v46  ;;  %2639 = vmatprep.mubr.f32.mxu1 %v6748_v43  ;;  %v6988_v46 = vld [vmem:[%s7936_s0 + $0x101] sm:$0xff]  ;;  %v5001_v28 = vpack.c.bf16 %v1036_v2, %v1030_v25 }
 0x19c   :  { %v6975_v61 = vpop.f32.mrb[16].mxu1  ;;  %3283 = vmatprep.mubr.f32.mxu0 %v6980_v7  ;;  %4772 = vmatprep.subr.bf16.mxu1 %v4771_v37  ;;  %v4777_v37 = vpack.c.bf16 %v1226_v15, %v1220_v14  ;;  %v1042_v15 = vld [vmem:[#allocation3 + $0x11c0] sm:$0xff]  ;;  %v1245_v14 = vld [vmem:[#allocation3 + $0x1818] sm:$0xff]  ;;  %v1251_v25 = vld [vmem:[#allocation3 + $0x1848] sm:$0xff] }
 0x19d   :  { %7967 = vst [vmem:[#allocation10_spill] sm:$0xff] %v6975_v61  ;;  %v6983_v5 = vpop.f32.mrb[17].mxu1  ;;  %2640 = vmatmul.mubr.f32.gmra.mrb[58].mxu1 %v6988_v46  ;;  %4996 = vmatprep.subr.bf16.mxu0 %v4995_v1  ;;  %v1238_v61 = vld [vmem:[#allocation3 + $0x17e0] sm:$0xff]  ;;  %v6998_v1 = vld [vmem:[%s7936_s0 + $0x110] sm:$0xff]  ;;  %v1055_v2 = vld [vmem:[#allocation3 + $0x1228] sm:$0xff] }
 0x19e   :  { %7969 = vst [vmem:[#allocation12_spill] sm:$0xff] %v6983_v5  ;;  %3284 = vmatmul.mubr.f32.gmra.mrb[58].mxu0 %v6739_v62  ;;  %4774 = vmatpush1.bf16.msra.mxu1 %v4773_v55  ;;  %v1232_v5 = vld [vmem:[#allocation3 + $0x17b0] sm:$0xff]  ;;  %v4779_v62 = vpack.c.bf16 %v1239_v58, %v1233_v30  ;;  %v1061_v30 = vld [vmem:[#allocation3 + $0x1258] sm:$0xff]  ;;  %v7013_v58 = vld [vmem:[%s7936_s0 + $0x122] sm:$0xff] }
 0x19f   :  { %4998 = vmatpush1.bf16.msra.mxu0 %v4997_v60  ;;  %2645 = vmatprep.mubr.f32.mxu1 %v6762_v63  ;;  %v1048_v55 = vld [vmem:[#allocation3 + $0x11f0] sm:$0xff]  ;;  %v5003_v60 = vpack.c.bf16 %v1049_v20, %v1043_v9  ;;  %v7024_v20 = vld [vmem:[%s7936_s0 + $0x121] sm:$0xff] }
 0x1a0   :  { %v6993_v7 = vpop.f32.mrb[18].mxu1  ;;  %3289 = vmatprep.mubr.f32.mxu0 %v6998_v1  ;;  %4776 = vmatprep.subr.bf16.mxu1 %v4775_v3  ;;  %v4781_v3 = vpack.c.bf16 %v1238_v61, %v1232_v5  ;;  %v1054_v61 = vld [vmem:[#allocation3 + $0x1220] sm:$0xff]  ;;  %v1060_v5 = vld [vmem:[#allocation3 + $0x1250] sm:$0xff] }
 0x1a1   :  { %7970 = vst [vmem:[#allocation13_spill] sm:$0xff] %v6993_v7  ;;  %v7001_v24 = vpop.f32.mrb[19].mxu1  ;;  %2646 = vmatmul.mubr.f32.gmra.mrb[60].mxu1 %v7006_v27  ;;  %5000 = vmatprep.subr.bf16.mxu0 %v4999_v22  ;;  %v1244_v7 = vld [vmem:[#allocation3 + $0x1810] sm:$0xff]  ;;  %v1250_v22 = vld [vmem:[#allocation3 + $0x1840] sm:$0xff] }
 0x1a2   :  { %7971 = vst [vmem:[#allocation14_spill] sm:$0xff] %v7001_v24  ;;  %3290 = vmatmul.mubr.f32.gmra.mrb[60].mxu0 %v6748_v43  ;;  %4778 = vmatpush1.bf16.msra.mxu1 %v4777_v37  ;;  %v5005_v24 = vpack.c.bf16 %v1048_v55, %v1042_v15  ;;  %v4783_v43 = vpack.c.bf16 %v1251_v25, %v1245_v14  ;;  %v1067_v15 = vld [vmem:[#allocation3 + $0x1288] sm:$0xff]  ;;  %v1073_v55 = vld [vmem:[#allocation3 + $0x12b8] sm:$0xff] }
 0x1a3   :  { %5002 = vmatpush1.bf16.msra.mxu0 %v5001_v28  ;;  %2651 = vmatprep.mubr.f32.mxu1 %v7013_v58  ;;  %v7027_v28 = vpack.c.bf16 %v1061_v30, %v1055_v2  ;;  %v1263_v14 = vld [vmem:[#allocation3 + $0x18a8] sm:$0xff]  ;;  %v7031_v25 = vpack.c.bf16 %v1060_v5, %v1054_v61  ;;  %v7038_v2 = vpack.c.bf16 %v1073_v55, %v1067_v15  ;;  %v1256_v61 = vld [vmem:[#allocation3 + $0x1870] sm:$0xff]  ;;  %v1262_v5 = vld [vmem:[#allocation3 + $0x18a0] sm:$0xff]  ;;  %v1340_v55 = vlaneseq }
 0x1a4   :  { %v7016_v9 = vpop.f32.mrb[20].mxu1  ;;  %3295 = vmatprep.mubr.f32.mxu0 %v6755_v59  ;;  %4780 = vmatprep.subr.bf16.mxu1 %v4779_v62  ;;  %v4785_v59 = vpack.c.bf16 %v1250_v22, %v1244_v7  ;;  %v1257_v62 = vld [vmem:[#allocation3 + $0x1878] sm:$0xff]  ;;  %v1079_v7 = vld [vmem:[#allocation3 + $0x12e8] sm:$0xff] }
 0x1a5   :  { %7972 = vst [vmem:[#allocation15_spill] sm:$0xff] %v7016_v9  ;;  %v7019_v37 = vpop.f32.mrb[21].mxu1  ;;  %2652 = vmatmul.mubr.f32.gmra.mrb[62].mxu1 %v7024_v20  ;;  %5004 = vmatprep.subr.bf16.mxu0 %v5003_v60  ;;  %7974 = vst [vmem:[#allocation17_spill] sm:$0xff] %v7031_v25  ;;  %v5830_v60 = vld [vmem:[%s7936_s0 + $0x12] sm:$0xff]  ;;  %v1274_v9 = vld [vmem:[#allocation3 + $0x1900] sm:$0xff] }
 0x1a6   :  { %7973 = vst [vmem:[#allocation16_spill] sm:$0xff] %v7019_v37  ;;  %3296 = vmatmul.mubr.f32.gmra.mrb[62].mxu0 %v6762_v63  ;;  %4782 = vmatpush1.bf16.msra.mxu1 %v4781_v3  ;;  %v1066_v63 = vld [vmem:[#allocation3 + $0x1280] sm:$0xff]  ;;  %v1072_v3 = vld [vmem:[#allocation3 + $0x12b0] sm:$0xff]  ;;  %v1085_v22 = vld [vmem:[#allocation3 + $0x1318] sm:$0xff] }
 0x1a7   :  { %5006 = vmatpush1.bf16.msra.mxu0 %v5005_v24  ;;  %2722 = vmatprep.mubr.f32.mxu1 %v6787_v35  ;;  %v4787_v24 = vpack.c.bf16 %v1263_v14, %v1257_v62  ;;  %v7047_v15 = vpack.c.bf16 %v1072_v3, %v1066_v63  ;;  %v1078_v62 = vld [vmem:[#allocation3 + $0x12e0] sm:$0xff]  ;;  %v1084_v14 = vld [vmem:[#allocation3 + $0x1310] sm:$0xff]  ;;  %v1097_v63 = vld [vmem:[#allocation3 + $0x1378] sm:$0xff] }
 0x1a8   :  { %v7033_v37 = vpop.f32.mrb[22].mxu1  ;;  %3366 = vmatprep.mubr.f32.mxu0 %v5830_v60  ;;  %4784 = vmatprep.subr.bf16.mxu1 %v4783_v43  ;;  %v1269_v60 = vld [vmem:[#allocation3 + $0x18d8] sm:$0xff]  ;;  %v1275_v43 = vld [vmem:[#allocation3 + $0x1908] sm:$0xff] }
 0x1a9   :  { %7975 = vst [vmem:[#allocation18_spill] sm:$0xff] %v7033_v37  ;;  %v7040_v30 = vpop.f32.mrb[23].mxu1  ;;  %2723 = vmatmul.mubr.f32.vlgmr.msra.gmra.mrb[32].mxu1 %v6781_v36  ;;  %5008 = vmatprep.subr.bf16.mxu0 %v7027_v28  ;;  %7977 = vst [vmem:[#allocation20_spill] sm:$0xff] %v7047_v15  ;;  %v5831_v36 = vld [vmem:[%s7936_s0 + $0x22] sm:$0xff]  ;;  %v4791_v3 = vpack.c.bf16 %v1275_v43, %v1269_v60  ;;  %v1096_v60 = vld [vmem:[#allocation3 + $0x1370] sm:$0xff] }
 0x1aa   :  { %7976 = vst [vmem:[#allocation19_spill] sm:$0xff] %v7040_v30  ;;  %3367 = vmatmul.mubr.f32.vlgmr.msra.gmra.mrb[32].mxu0 %v6773_v48  ;;  %4786 = vmatpush1.bf16.msra.mxu1 %v4785_v59  ;;  %v7055_v48 = vpack.c.bf16 %v1085_v22, %v1079_v7  ;;  %v4789_v59 = vpack.c.bf16 %v1262_v5, %v1256_v61  ;;  %v1287_v7 = vld [vmem:[#allocation3 + $0x1968] sm:$0xff]  ;;  %v5832_v22 = vld [vmem:[%s7936_s0 + $0x32] sm:$0xff]  ;;  %v1090_v5 = vld [vmem:[#allocation3 + $0x1340] sm:$0xff] }
 0x1ab   :  { %5010 = vmatpush1.bf16.msra.mxu0 %v7031_v25  ;;  %2728 = vmatprep.mubr.f32.mxu1 %v6801_v29  ;;  %v1091_v25 = vld [vmem:[#allocation3 + $0x1348] sm:$0xff]  ;;  %v7066_v61 = vpack.c.bf16 %v1084_v14, %v1078_v62  ;;  %v1109_v62 = vld [vmem:[#allocation3 + $0x13d8] sm:$0xff] }
 0x1ac   :  { %v7049_v30 = vpop.f32.mrb[24].mxu1  ;;  %3372 = vmatprep.mubr.f32.mxu0 %v5831_v36  ;;  %5012 = vmatprep.subr.bf16.mxu0 %v7038_v2  ;;  %7979 = vst [vmem:[#allocation22_spill] sm:$0xff] %v7055_v48  ;;  %v1281_v36 = vld [vmem:[#allocation3 + $0x1938] sm:$0xff]  ;;  %v1103_v43 = vld [vmem:[#allocation3 + $0x13a8] sm:$0xff] }
 0x1ad   :  { %7978 = vst [vmem:[#allocation21_spill] sm:$0xff] %v7049_v30  ;;  %v7057_v37 = vpop.f32.mrb[25].mxu1  ;;  %2729 = vmatmul.mubr.f32.gmra.mrb[34].mxu1 %v6795_v6  ;;  %4788 = vmatprep.subr.bf16.mxu1 %v4787_v24  ;;  %v1268_v30 = vld [vmem:[#allocation3 + $0x18d0] sm:$0xff]  ;;  %7981 = vst [vmem:[#allocation24_spill] sm:$0xff] %v7066_v61  ;;  %v7068_v6 = vshrl.u32 %v1340_v55, 7  ;;  %v4795_v14 = vpack.c.bf16 %v1287_v7, %v1281_v36  ;;  %v1102_v36 = vld [vmem:[#allocation3 + $0x13a0] sm:$0xff] }
 0x1ae   :  { %7980 = vst [vmem:[#allocation23_spill] sm:$0xff] %v7057_v37  ;;  %3373 = vmatmul.mubr.f32.gmra.mrb[34].mxu0 %v6787_v35  ;;  %2734 = vmatprep.mubr.f32.mxu1 %v6815_v19  ;;  %v7073_v35 = vpack.c.bf16 %v1097_v63, %v1091_v25  ;;  %v1280_v55 = vld [vmem:[#allocation3 + $0x1930] sm:$0xff]  ;;  %v1299_v25 = vld [vmem:[#allocation3 + $0x19c8] sm:$0xff]  ;;  %v7080_v63 = vld [vmem:[#allocation5] sm:$0x3f] }
 0x1af   :  { %5014 = vmatpush1.bf16.msra.mxu0 %v7047_v15  ;;  %3378 = vmatprep.mubr.f32.mxu0 %v5832_v22  ;;  %7982 = vst [vmem:[#allocation25_spill] sm:$0xff] %v7068_v6  ;;  %v4793_v15 = vpack.c.bf16 %v1274_v9, %v1268_v30  ;;  %v1286_v22 = vld [vmem:[#allocation3 + $0x1960] sm:$0xff]  ;;  %7985 = vst [vmem:[#allocation28_spill] sm:$0xff] %v7080_v63  ;;  %v1342_v30 = vsub.s32 0, %v7068_v6  ;;  %v1108_v7 = vld [vmem:[#allocation3 + $0x13d0] sm:$0xff] }
 0x1b0   :  { %v7070_v24 = vpop.f32.mrb[26].mxu1  ;;  %5016 = vmatprep.subr.bf16.mxu0 %v7055_v48  ;;  %4790 = vmatpush1.bf16.msra.mxu1 %v4789_v59  ;;  %v1293_v59 = vld [vmem:[#allocation3 + $0x1998] sm:$0xff]  ;;  %v5833_v9 = vld [vmem:[%s7936_s0 + $0x42] sm:$0xff]  ;;  %v1346_v48 = vsub.s32 1, %v7068_v6 }
 0x1b1   :  { %7983 = vst [vmem:[#allocation26_spill] sm:$0xff] %v7070_v24  ;;  %v7075_v37 = vpop.f32.mrb[27].mxu1  ;;  %2735 = vmatmul.mubr.f32.gmra.mrb[36].mxu1 %v6809_v21  ;;  %4792 = vmatprep.subr.bf16.mxu1 %v4791_v3  ;;  %v7086_v21 = vpack.c.bf16 %v1096_v60, %v1090_v5  ;;  %v1121_v5 = vld [vmem:[#allocation3 + $0x1438] sm:$0xff]  ;;  %v4799_v60 = vpack.c.bf16 %v1299_v25, %v1293_v59  ;;  %v1120_v59 = vld [vmem:[#allocation3 + $0x1430] sm:$0xff]  ;;  %v1127_v25 = vld [vmem:[#allocation3 + $0x1468] sm:$0xff] }
 0x1b2   :  { %7984 = vst [vmem:[#allocation27_spill] sm:$0xff] %v7075_v37  ;;  %3379 = vmatmul.mubr.f32.gmra.mrb[36].mxu0 %v6801_v29  ;;  %2740 = vmatprep.mubr.f32.mxu1 %v6829_v17  ;;  %v7092_v29 = vpack.c.bf16 %v1109_v62, %v1103_v43  ;;  %v1115_v37 = vld [vmem:[#allocation3 + $0x1408] sm:$0xff]  ;;  %v5834_v62 = vld [vmem:[%s7936_s0 + $0x52] sm:$0xff] }
 0x1b3   :  { %5018 = vmatpush1.bf16.msra.mxu0 %v7066_v61  ;;  %3384 = vmatprep.mubr.f32.mxu0 %v5833_v9  ;;  %7986 = vst [vmem:[#allocation29_spill] sm:$0xff] %v7086_v21  ;;  %v4797_v61 = vpack.c.bf16 %v1286_v22, %v1280_v55  ;;  %v1292_v9 = vld [vmem:[#allocation3 + $0x1990] sm:$0xff]  ;;  %v1311_v43 = vld [vmem:[#allocation3 + $0x1a28] sm:$0xff]  ;;  %v7104_v55 = vpack.c.bf16 %v1108_v7, %v1102_v36  ;;  %v1114_v22 = vld [vmem:[#allocation3 + $0x1400] sm:$0xff] }
 0x1b4   :  { %v7089_v3 = vpop.f32.mrb[28].mxu1  ;;  %5020 = vmatprep.subr.bf16.mxu0 %v7073_v35  ;;  %4794 = vmatpush1.bf16.msra.mxu1 %v4793_v15  ;;  %v1305_v15 = vld [vmem:[#allocation3 + $0x19f8] sm:$0xff]  ;;  %v1304_v7 = vld [vmem:[#allocation3 + $0x19f0] sm:$0xff] }
 0x1b5   :  { %7987 = vst [vmem:[#allocation30_spill] sm:$0xff] %v7089_v3  ;;  %v7095_v24 = vpop.f32.mrb[29].mxu1  ;;  %2741 = vmatmul.mubr.f32.gmra.mrb[38].mxu1 %v6823_v23  ;;  %4796 = vmatprep.subr.bf16.mxu1 %v4795_v14  ;;  %v1298_v3 = vld [vmem:[#allocation3 + $0x19c0] sm:$0xff]  ;;  %7988 = vst [vmem:[#allocation31_spill] sm:$0xff] %v7104_v55  ;;  %v7107_v23 = vrot.slane %v7080_v63, %v1342_v30  ;;  %v1133_v30 = vld [vmem:[#allocation3 + $0x1498] sm:$0xff]  ;;  %v4803_v36 = vpack.c.bf16 %v1311_v43, %v1305_v15 }
 0x1b6   :  { %3385 = vmatmul.mubr.f32.gmra.mrb[38].mxu0 %v6815_v19  ;;  %2746 = vmatprep.mubr.f32.mxu1 %v6847_v45  ;;  %v7112_v19 = vpack.c.bf16 %v1121_v5, %v1115_v37  ;;  %v4801_v6 = vpack.c.bf16 %v1298_v3, %v1292_v9  ;;  %v1317_v37 = vld [vmem:[#allocation3 + $0x1a58] sm:$0xff]  ;;  %v1323_v5 = vld [vmem:[#allocation3 + $0x1a88] sm:$0xff]  ;;  %v7131_v3 = vpack.c.bf16 %v1133_v30, %v1127_v25 }
 0x1b7   :  { %5022 = vmatpush1.bf16.msra.mxu0 %v7086_v21  ;;  %3390 = vmatprep.mubr.f32.mxu0 %v5834_v62  ;;  %v7115_v21 = vrot.slane %v7080_v63, %v1346_v48  ;;  %v5835_v48 = vld [vmem:[%s7936_s0 + $0x62] sm:$0xff] }
 0x1b8   :  { %v7109_v14 = vpop.f32.mrb[30].mxu1  ;;  %5024 = vmatprep.subr.bf16.mxu0 %v7092_v29  ;;  %4798 = vmatpush1.bf16.msra.mxu1 %v4797_v61  ;;  %v7126_v61 = vpack.c.bf16 %v1120_v59, %v1114_v22  ;;  %v1139_v9 = vld [vmem:[#allocation3 + $0x14c8] sm:$0xff]  ;;  %v1145_v22 = vld [vmem:[#allocation3 + $0x14f8] sm:$0xff]  ;;  %v4807_v59 = vpack.c.bf16 %v1323_v5, %v1317_v37 }
 0x1b9   :  { %7989 = vst [vmem:[#allocation32_spill] sm:$0xff] %v7109_v14  ;;  %v7117_v62 = vpop.f32.mrb[31].mxu1  ;;  %2747 = vmatmul.mubr.f32.gmra.mrb[40].mxu1 %v6839_v0  ;;  %4800 = vmatprep.subr.bf16.mxu1 %v4799_v60  ;;  %v1310_v14 = vld [vmem:[#allocation3 + $0x1a20] sm:$0xff]  ;;  %v5135_v0 = vadd.f32 %v6834_v31, %v7107_v23  ;;  %v1132_v60 = vld [vmem:[#allocation3 + $0x1490] sm:$0xff]  ;;  %v5137_v43 = vadd.f32 %v6842_v53, %v7115_v21  ;;  %v1151_v37 = vld [vmem:[#allocation3 + $0x1528] sm:$0xff] }
 0x1ba   :  { %3391 = vmatmul.mubr.f32.gmra.mrb[40].mxu0 %v6829_v17  ;;  %2752 = vmatprep.mubr.f32.mxu1 %v6865_v57  ;;  %v1126_v17 = vld [vmem:[#allocation3 + $0x1460] sm:$0xff]  ;;  %v4805_v15 = vpack.c.bf16 %v1310_v14, %v1304_v7  ;;  %v1335_v14 = vld [vmem:[#allocation3 + $0x1ae8] sm:$0xff]  ;;  %v5836_v53 = vld [vmem:[%s7936_s0 + $0x72] sm:$0xff] }
 0x1bb   :  { %5026 = vmatpush1.bf16.msra.mxu0 %v7104_v55  ;;  %3396 = vmatprep.mubr.f32.mxu0 %v5835_v48  ;;  %v1316_v48 = vld [vmem:[#allocation3 + $0x1a50] sm:$0xff]  ;;  %v1322_v31 = vld [vmem:[#allocation3 + $0x1a80] sm:$0xff] }
 0x1bc   :  { %5028 = vmatprep.subr.bf16.mxu0 %v7112_v19  ;;  %4802 = vmatpush1.bf16.msra.mxu1 %v4801_v6  ;;  %v1329_v6 = vld [vmem:[#allocation3 + $0x1ab8] sm:$0xff]  ;;  %v1144_v7 = vld [vmem:[#allocation3 + $0x14f0] sm:$0xff]  ;;  %v4809_v5 = vpack.c.bf16 %v1322_v31, %v1316_v48  ;;  %v5143_v31 = vadd.f32 %v6875_v52, %v7107_v23  ;;  %v1163_v52 = vld [vmem:[#allocation3 + $0x1588] sm:$0xff] }
 0x1bd   :  { %v2080_v63 = vpop.f32.mrb[0].mxu0  ;;  %2753 = vmatmul.mubr.f32.gmra.mrb[42].mxu1 %v6857_v49  ;;  %4804 = vmatprep.subr.bf16.mxu1 %v4803_v36  ;;  %v7146_v49 = vpack.c.bf16 %v1132_v60, %v1126_v17  ;;  %v1138_v36 = vld [vmem:[#allocation3 + $0x14c0] sm:$0xff]  ;;  %v4811_v60 = vpack.c.bf16 %v1335_v14, %v1329_v6  ;;  %v1156_v14 = vld [vmem:[#allocation3 + $0x1550] sm:$0xff] }
 0x1be   :  { %v7136_v55 = vadd.f32 %v5135_v0, %v2080_v63  ;;  %v2082_v25 = vpop.f32.mrb[1].mxu0  ;;  %3397 = vmatmul.mubr.f32.gmra.mrb[42].mxu0 %v6847_v45  ;;  %2758 = vmatprep.mubr.f32.mxu1 %v6883_v39  ;;  %v5139_v63 = vadd.f32 %v6852_v40, %v7107_v23  ;;  %v7151_v45 = vpack.c.bf16 %v1145_v22, %v1139_v9  ;;  %v7158_v17 = vld [vmem:[%s7936_s0 + $0x80] sm:$0xff]  ;;  %v1157_v40 = vld [vmem:[#allocation3 + $0x1558] sm:$0xff]  ;;  %v1328_v9 = vld [vmem:[#allocation3 + $0x1ab0] sm:$0xff] }
 0x1bf   :  { %v7140_v30 = vadd.f32 %v5137_v43, %v2082_v25  ;;  %5030 = vmatpush1.bf16.msra.mxu0 %v7126_v61  ;;  %3402 = vmatprep.mubr.f32.mxu0 %v5836_v53  ;;  %v5141_v0 = vadd.f32 %v6860_v54, %v7115_v21  ;;  %v1334_v22 = vld [vmem:[#allocation3 + $0x1ae0] sm:$0xff]  ;;  %v7167_v54 = vld [vmem:[%s7936_s0 + $0x91] sm:$0xff] }
 0x1c0   :  { %5032 = vmatprep.subr.bf16.mxu0 %v7131_v3  ;;  %4806 = vmatpush1.bf16.msra.mxu1 %v4805_v15  ;;  %v1150_v6 = vld [vmem:[#allocation3 + $0x1520] sm:$0xff]  ;;  %v4813_v53 = vpack.c.bf16 %v1334_v22, %v1328_v9  ;;  %v1168_v9 = vld [vmem:[#allocation3 + $0x15b0] sm:$0xff]  ;;  %v5149_v22 = vadd.f32 %v6893_v34, %v7115_v21 }
 0x1c1   :  { %v2086_v43 = vpop.f32.mrb[2].mxu0  ;;  %2759 = vmatmul.mubr.f32.gmra.mrb[44].mxu1 %v7158_v17  ;;  %4808 = vmatprep.subr.bf16.mxu1 %v4807_v59  ;;  %v7174_v59 = vpack.c.bf16 %v1144_v7, %v1138_v36  ;;  %v1169_v36 = vld [vmem:[#allocation3 + $0x15b8] sm:$0xff]  ;;  %v5841_v34 = vld [vmem:[%s7936_s0 + $0xc2] sm:$0xff] }
 0x1c2   :  { %v7161_v25 = vadd.f32 %v5139_v63, %v2086_v43  ;;  %v2088_v15 = vpop.f32.mrb[3].mxu0  ;;  %3403 = vmatmul.mubr.f32.gmra.mrb[44].mxu0 %v6865_v57  ;;  %2764 = vmatprep.mubr.f32.mxu1 %v7167_v54  ;;  %v7179_v57 = vpack.c.bf16 %v1157_v40, %v1151_v37  ;;  %v5145_v63 = vadd.f32 %v6878_v32, %v7115_v21  ;;  %v5840_v32 = vld [vmem:[%s7936_s0 + $0xb2] sm:$0xff] }
 0x1c3   :  { %v7170_v48 = vadd.f32 %v5141_v0, %v2088_v15  ;;  %5034 = vmatpush1.bf16.msra.mxu0 %v7146_v49  ;;  %3408 = vmatprep.mubr.f32.mxu0 %v6872_v56  ;;  %v7186_v56 = vld [vmem:[%s7936_s0 + $0x90] sm:$0xff]  ;;  %v7199_v43 = vpack.c.bf16 %v1156_v14, %v1150_v6  ;;  %v5147_v40 = vadd.f32 %v6888_v26, %v7107_v23 }
 0x1c4   :  { %5036 = vmatprep.subr.bf16.mxu0 %v7151_v45  ;;  %4810 = vmatpush1.bf16.msra.mxu1 %v4809_v5 }
 0x1c5   :  { %v2092_v0 = vpop.f32.mrb[4].mxu0  ;;  %2765 = vmatmul.mubr.f32.gmra.mrb[46].mxu1 %v7186_v56  ;;  %4812 = vmatprep.subr.bf16.mxu1 %v4811_v60  ;;  %v7204_v60 = vpack.c.bf16 %v1169_v36, %v1163_v52  ;;  %v5153_v52 = vadd.f32 %v6911_v4, %v7115_v21  ;;  %v5842_v4 = vld [vmem:[%s7936_s0 + $0xd2] sm:$0xff] }
 0x1c6   :  { %v7189_v7 = vadd.f32 %v5143_v31, %v2092_v0  ;;  %v2094_v37 = vpop.f32.mrb[5].mxu0  ;;  %3409 = vmatmul.mubr.f32.gmra.mrb[46].mxu0 %v6883_v39  ;;  %2770 = vmatprep.mubr.f32.mxu1 %v6916_v13  ;;  %v1162_v39 = vld [vmem:[#allocation3 + $0x1580] sm:$0xff]  ;;  %v1175_v31 = vld [vmem:[#allocation3 + $0x15e8] sm:$0xff]  ;;  %v1180_v0 = vld [vmem:[#allocation3 + $0x1610] sm:$0xff] }
 0x1c7   :  { %v7193_v5 = vadd.f32 %v5145_v63, %v2094_v37  ;;  %5038 = vmatpush1.bf16.msra.mxu0 %v7174_v59  ;;  %3414 = vmatprep.mubr.f32.mxu0 %v5840_v32  ;;  %v1181_v63 = vld [vmem:[#allocation3 + $0x1618] sm:$0xff]  ;;  %v1187_v37 = vld [vmem:[#allocation3 + $0x1648] sm:$0xff] }
 0x1c8   :  { %5040 = vmatprep.subr.bf16.mxu0 %v7179_v57  ;;  %4814 = vmatpush1.bf16.msra.mxu1 %v4813_v53  ;;  %v7225_v53 = vpack.c.bf16 %v1181_v63, %v1175_v31  ;;  %v1193_v32 = vld [vmem:[#allocation3 + $0x1678] sm:$0xff]  ;;  %v5157_v31 = vadd.f32 %v6929_v18, %v7115_v21  ;;  %v5843_v18 = vld [vmem:[%s7936_s0 + $0xe2] sm:$0xff] }
 0x1c9   :  { %v2098_v15 = vpop.f32.mrb[6].mxu0  ;;  %2771 = vmatmul.mubr.f32.gmra.mrb[48].mxu1 %v6908_v8  ;;  %5103 = vmatprep.subr.bf16.mxu1 %v7027_v28  ;;  %v7220_v8 = vpack.c.bf16 %v1168_v9, %v1162_v39  ;;  %v5151_v28 = vadd.f32 %v6903_v33, %v7107_v23 }
 0x1ca   :  { %v7210_v6 = vadd.f32 %v5147_v40, %v2098_v15  ;;  %v2100_v26 = vpop.f32.mrb[7].mxu0  ;;  %3415 = vmatmul.mubr.f32.gmra.mrb[48].mxu0 %v6898_v38  ;;  %2776 = vmatprep.mubr.f32.mxu1 %v6934_v10  ;;  %v1174_v38 = vld [vmem:[#allocation3 + $0x15e0] sm:$0xff]  ;;  %v1192_v15 = vld [vmem:[#allocation3 + $0x1670] sm:$0xff] }
 0x1cb   :  { %v7214_v14 = vadd.f32 %v5149_v22, %v2100_v26  ;;  %5042 = vmatpush1.bf16.msra.mxu0 %v7199_v43  ;;  %3420 = vmatprep.mubr.f32.mxu0 %v5841_v34  ;;  %v7240_v9 = vpack.c.bf16 %v1180_v0, %v1174_v38  ;;  %v7245_v22 = vpack.c.bf16 %v1193_v32, %v1187_v37  ;;  %v1199_v26 = vld [vmem:[#allocation3 + $0x16a8] sm:$0xff]  ;;  %v1205_v34 = vld [vmem:[#allocation3 + $0x16d8] sm:$0xff] }
 0x1cc   :  { %5044 = vmatprep.subr.bf16.mxu0 %v7204_v60  ;;  %v5161_v37 = vadd.f32 %v6947_v42, %v7115_v21  ;;  %v5844_v42 = vld [vmem:[%s7936_s0 + $0xf2] sm:$0xff] }
 0x1cd   :  { %v2104_v36 = vpop.f32.mrb[8].mxu0  ;;  %2777 = vmatmul.mubr.f32.gmra.mrb[50].mxu1 %v6926_v50  ;;  %v5155_v50 = vadd.f32 %v6921_v51, %v7107_v23 }
 0x1ce   :  { %v7230_v40 = vadd.f32 %v5151_v28, %v2104_v36  ;;  %v2106_v39 = vpop.f32.mrb[9].mxu0  ;;  %3421 = vmatmul.mubr.f32.gmra.mrb[50].mxu0 %v6916_v13  ;;  %2782 = vmatprep.mubr.f32.mxu1 %v6952_v47  ;;  %v1186_v13 = vld [vmem:[#allocation3 + $0x1640] sm:$0xff]  ;;  %v1204_v36 = vld [vmem:[#allocation3 + $0x16d0] sm:$0xff] }
 0x1cf   :  { %v7234_v33 = vadd.f32 %v5153_v52, %v2106_v39  ;;  %5046 = vmatpush1.bf16.msra.mxu0 %v7220_v8  ;;  %3426 = vmatprep.mubr.f32.mxu0 %v5842_v4  ;;  %v7260_v0 = vpack.c.bf16 %v1192_v15, %v1186_v13  ;;  %v7265_v52 = vpack.c.bf16 %v1205_v34, %v1199_v26  ;;  %v1211_v39 = vld [vmem:[#allocation3 + $0x1708] sm:$0xff]  ;;  %v1217_v4 = vld [vmem:[#allocation3 + $0x1738] sm:$0xff] }
 0x1d0   :  { %7990 = vst [vmem:[#allocation33_spill] sm:$0xff] %v7230_v40  ;;  %5048 = vmatprep.subr.bf16.mxu0 %v7225_v53  ;;  %v7996_v26 = vld [vmem:[#allocation9_spill] sm:$0xff] }
 0x1d1   :  { %7991 = vst [vmem:[#allocation34_spill] sm:$0xff] %v7234_v33  ;;  %v2110_v63 = vpop.f32.mrb[10].mxu0  ;;  %2783 = vmatmul.mubr.f32.gmra.mrb[52].mxu1 %v6944_v16  ;;  %v5159_v16 = vadd.f32 %v6939_v12, %v7107_v23  ;;  %v5165_v34 = vadd.f32 %v7996_v26, %v7115_v21  ;;  %v8001_v26 = vld [vmem:[#allocation12_spill] sm:$0xff] }
 0x1d2   :  { %v7250_v28 = vadd.f32 %v5155_v50, %v2110_v63  ;;  %v2112_v38 = vpop.f32.mrb[11].mxu0  ;;  %3427 = vmatmul.mubr.f32.gmra.mrb[52].mxu0 %v6934_v10  ;;  %2788 = vmatprep.mubr.f32.mxu1 %v6970_v41  ;;  %v1198_v10 = vld [vmem:[#allocation3 + $0x16a0] sm:$0xff]  ;;  %v1216_v63 = vld [vmem:[#allocation3 + $0x1730] sm:$0xff] }
 0x1d3   :  { %v7254_v51 = vadd.f32 %v5157_v31, %v2112_v38  ;;  %5050 = vmatpush1.bf16.msra.mxu0 %v7240_v9  ;;  %3432 = vmatprep.mubr.f32.mxu0 %v5843_v18  ;;  %v7280_v15 = vpack.c.bf16 %v1204_v36, %v1198_v10  ;;  %v7285_v31 = vpack.c.bf16 %v1217_v4, %v1211_v39  ;;  %v7997_v18 = vld [vmem:[#allocation11_spill] sm:$0xff]  ;;  %v5845_v36 = vld [vmem:[%s7936_s0 + $0x102] sm:$0xff]  ;;  %v8000_v4 = vld [vmem:[#allocation10_spill] sm:$0xff] }
 0x1d4   :  { %7992 = vst [vmem:[#allocation35_spill] sm:$0xff] %v7250_v28  ;;  %5052 = vmatprep.subr.bf16.mxu0 %v7245_v22 }
 0x1d5   :  { %7993 = vst [vmem:[#allocation36_spill] sm:$0xff] %v7254_v51  ;;  %v2116_v32 = vpop.f32.mrb[12].mxu0  ;;  %2789 = vmatmul.mubr.f32.gmra.mrb[54].mxu1 %v6962_v11  ;;  %v5163_v11 = vadd.f32 %v6957_v44, %v7107_v23 }
 0x1d6   :  { %v7270_v50 = vadd.f32 %v5159_v16, %v2116_v32  ;;  %v2118_v13 = vpop.f32.mrb[13].mxu0  ;;  %3433 = vmatmul.mubr.f32.gmra.mrb[54].mxu0 %v6952_v47  ;;  %2794 = vmatprep.mubr.f32.mxu1 %v6988_v46  ;;  %v1210_v47 = vld [vmem:[#allocation3 + $0x1700] sm:$0xff]  ;;  %v1223_v16 = vld [vmem:[#allocation3 + $0x1768] sm:$0xff] }
 0x1d7   :  { %v7274_v12 = vadd.f32 %v5161_v37, %v2118_v13  ;;  %5054 = vmatpush1.bf16.msra.mxu0 %v7260_v0  ;;  %3438 = vmatprep.mubr.f32.mxu0 %v5844_v42  ;;  %v1229_v37 = vld [vmem:[#allocation3 + $0x1798] sm:$0xff]  ;;  %v7300_v39 = vpack.c.bf16 %v1216_v63, %v1210_v47  ;;  %v5167_v13 = vadd.f32 %v8000_v4, %v7107_v23 }
 0x1d8   :  { %7994 = vst [vmem:[#allocation37_spill] sm:$0xff] %v7270_v50  ;;  %5056 = vmatprep.subr.bf16.mxu0 %v7265_v52  ;;  %v7305_v42 = vpack.c.bf16 %v1229_v37, %v1223_v16  ;;  %v5846_v16 = vld [vmem:[%s7936_s0 + $0x112] sm:$0xff] }
 0x1d9   :  { %7995 = vst [vmem:[#allocation38_spill] sm:$0xff] %v7274_v12  ;;  %v2122_v38 = vpop.f32.mrb[14].mxu0  ;;  %2795 = vmatmul.mubr.f32.gmra.mrb[56].mxu1 %v7997_v18  ;;  %v1235_v18 = vld [vmem:[#allocation3 + $0x17c8] sm:$0xff] }
 0x1da   :  { %v7290_v32 = vadd.f32 %v5163_v11, %v2122_v38  ;;  %v2124_v10 = vpop.f32.mrb[15].mxu0  ;;  %3439 = vmatmul.mubr.f32.gmra.mrb[56].mxu0 %v6970_v41  ;;  %2800 = vmatprep.mubr.f32.mxu1 %v7006_v27  ;;  %v1222_v41 = vld [vmem:[#allocation3 + $0x1760] sm:$0xff]  ;;  %v1228_v11 = vld [vmem:[#allocation3 + $0x1790] sm:$0xff] }
 0x1db   :  { %v7294_v44 = vadd.f32 %v5165_v34, %v2124_v10  ;;  %5058 = vmatpush1.bf16.msra.mxu0 %v7280_v15  ;;  %3444 = vmatprep.mubr.f32.mxu0 %v5845_v36  ;;  %v5169_v34 = vadd.f32 %v8001_v26, %v7115_v21  ;;  %v1241_v10 = vld [vmem:[#allocation3 + $0x17f8] sm:$0xff]  ;;  %v7320_v37 = vpack.c.bf16 %v1228_v11, %v1222_v41  ;;  %v1240_v26 = vld [vmem:[#allocation3 + $0x17f0] sm:$0xff]  ;;  %v1247_v41 = vld [vmem:[#allocation3 + $0x1828] sm:$0xff] }
 0x1dc   :  { %7998 = vst [vmem:[#allocation9_spill] sm:$0xff] %v7290_v32  ;;  %5060 = vmatprep.subr.bf16.mxu0 %v7285_v31  ;;  %v1253_v11 = vld [vmem:[#allocation3 + $0x1858] sm:$0xff] }
 0x1dd   :  { %7999 = vst [vmem:[#allocation11_spill] sm:$0xff] %v7294_v44  ;;  %v2128_v38 = vpop.f32.mrb[16].mxu0  ;;  %2801 = vmatmul.mubr.f32.gmra.mrb[58].mxu1 %v6998_v1  ;;  %v8004_v1 = vld [vmem:[#allocation13_spill] sm:$0xff]  ;;  %v8009_v44 = vld [vmem:[#allocation16_spill] sm:$0xff] }
 0x1de   :  { %v7310_v36 = vadd.f32 %v5167_v13, %v2128_v38  ;;  %v2130_v47 = vpop.f32.mrb[17].mxu0  ;;  %3445 = vmatmul.mubr.f32.gmra.mrb[58].mxu0 %v6988_v46  ;;  %2806 = vmatprep.mubr.f32.mxu1 %v7024_v20  ;;  %v5171_v4 = vadd.f32 %v8004_v1, %v7107_v23  ;;  %v7325_v13 = vpack.c.bf16 %v1241_v10, %v1235_v18  ;;  %v1234_v46 = vld [vmem:[#allocation3 + $0x17c0] sm:$0xff]  ;;  %v7341_v18 = vld [vmem:[%s7936_s0 + $0x131] sm:$0xff] }
 0x1df   :  { %v7314_v63 = vadd.f32 %v5169_v34, %v2130_v47  ;;  %5062 = vmatpush1.bf16.msra.mxu0 %v7300_v39  ;;  %3450 = vmatprep.mubr.f32.mxu0 %v5846_v16  ;;  %v8005_v34 = vld [vmem:[#allocation14_spill] sm:$0xff]  ;;  %v5177_v32 = vadd.f32 %v8009_v44, %v7115_v21  ;;  %v5850_v44 = vld [vmem:[%s7936_s0 + $0x21] sm:$0xff] }
 0x1e0   :  { %8002 = vst [vmem:[#allocation10_spill] sm:$0xff] %v7310_v36  ;;  %5064 = vmatprep.subr.bf16.mxu0 %v7305_v42  ;;  %v5173_v38 = vadd.f32 %v8005_v34, %v7115_v21  ;;  %v7348_v34 = vpack.c.bf16 %v1240_v26, %v1234_v46  ;;  %v1252_v36 = vld [vmem:[#allocation3 + $0x1850] sm:$0xff]  ;;  %v8011_v26 = vmov 0.0  }
 0x1e1   :  { %8003 = vst [vmem:[#allocation12_spill] sm:$0xff] %v7314_v63  ;;  %v2134_v47 = vpop.f32.mrb[18].mxu0  ;;  %v7332_v63 = vld [vmem:[%s7936_s0 + $0x120] sm:$0xff] }
 0x1e2   :  { %2807 = vmatmul.mubr.f32.gmra.mrb[60].mxu1 %v7332_v63  ;;  %v7335_v16 = vadd.f32 %v5171_v4, %v2134_v47  ;;  %v2136_v1 = vpop.f32.mrb[19].mxu0  ;;  %3451 = vmatmul.mubr.f32.gmra.mrb[60].mxu0 %v7006_v27  ;;  %v8008_v4 = vld [vmem:[#allocation15_spill] sm:$0xff]  ;;  %v5071_v27 = vpack.c.bf16 %v1253_v11, %v1247_v41  ;;  %v1259_v41 = vld [vmem:[#allocation3 + $0x1888] sm:$0xff] }
 0x1e3   :  { %2812 = vmatprep.mubr.f32.mxu1 %v7341_v18  ;;  %v7344_v10 = vadd.f32 %v5173_v38, %v2136_v1  ;;  %5066 = vmatpush1.bf16.msra.mxu0 %v7320_v37  ;;  %v5175_v47 = vadd.f32 %v8008_v4, %v7107_v23  ;;  %v7358_v38 = vld [vmem:[%s7936_s0 + $0x130] sm:$0xff]  ;;  %v1265_v11 = vld [vmem:[#allocation3 + $0x18b8] sm:$0xff] }
 0x1e4   :  { %8006 = vst [vmem:[#allocation13_spill] sm:$0xff] %v7335_v16  ;;  %3456 = vmatprep.mubr.f32.mxu0 %v7013_v58  ;;  %5068 = vmatprep.subr.bf16.mxu0 %v7325_v13  ;;  %v1246_v16 = vld [vmem:[#allocation3 + $0x1820] sm:$0xff] }
 0x1e5   :  { %8007 = vst [vmem:[#allocation14_spill] sm:$0xff] %v7344_v10  ;;  %v2140_v12 = vpop.f32.mrb[20].mxu0  ;;  %v5073_v4 = vpack.c.bf16 %v1252_v36, %v1246_v16  ;;  %v8014_v10 = vld [vmem:[#allocation19_spill] sm:$0xff]  ;;  %v5852_v16 = vld [vmem:[%s7936_s0 + $0x20] sm:$0xff] }
 0x1e6   :  { %2813 = vmatmul.mubr.f32.gmra.mrb[62].mxu1 %v7358_v38  ;;  %v7361_v58 = vadd.f32 %v5175_v47, %v2140_v12  ;;  %v2142_v46 = vpop.f32.mrb[21].mxu0  ;;  %3457 = vmatmul.mubr.f32.gmra.mrb[62].mxu0 %v7024_v20  ;;  %v8013_v12 = vld [vmem:[#allocation18_spill] sm:$0xff]  ;;  %v5181_v50 = vadd.f32 %v8014_v10, %v7115_v21 }
 0x1e7   :  { %2883 = vmatprep.mubr.f32.mxu1 %v8011_v26  ;;  %v7365_v1 = vadd.f32 %v5177_v32, %v2142_v46  ;;  %5070 = vmatpush1.bf16.msra.mxu0 %v7348_v34  ;;  %v5179_v47 = vadd.f32 %v8013_v12, %v7107_v23  ;;  %v1264_v20 = vld [vmem:[#allocation3 + $0x18b0] sm:$0xff]  ;;  %v7378_v32 = vld [vmem:[%s7936_s0 + $0x22] sm:$0xff]  ;;  %v5075_v46 = vpack.c.bf16 %v1265_v11, %v1259_v41  ;;  %v1277_v12 = vld [vmem:[#allocation3 + $0x1918] sm:$0xff] }
 0x1e8   :  { %8010 = vst [vmem:[#allocation15_spill] sm:$0xff] %v7361_v58  ;;  %3527 = vmatprep.mubr.f32.mxu0 %v5850_v44  ;;  %5072 = vmatprep.subr.bf16.mxu0 %v5071_v27  ;;  %v1258_v58 = vld [vmem:[#allocation3 + $0x1880] sm:$0xff]  ;;  %v1271_v10 = vld [vmem:[#allocation3 + $0x18e8] sm:$0xff]  ;;  %v5853_v11 = vld [vmem:[%s7936_s0 + $0x31] sm:$0xff] }
 0x1e9   :  { %8012 = vst [vmem:[#allocation16_spill] sm:$0xff] %v7365_v1  ;;  %v2146_v51 = vpop.f32.mrb[22].mxu0  ;;  %v8016_v27 = vld [vmem:[#allocation17_spill] sm:$0xff]  ;;  %v5077_v28 = vpack.c.bf16 %v1264_v20, %v1258_v58  ;;  %v7401_v58 = vld [vmem:[%s7936_s0 + $0x32] sm:$0xff] }
 0x1ea   :  { %2884 = vmatmul.mubr.f32.vlgmr.msra.gmra.mrb[32].mxu1 %v7378_v32  ;;  %v7381_v44 = vadd.f32 %v5179_v47, %v2146_v51  ;;  %v2148_v36 = vpop.f32.mrb[23].mxu0  ;;  %3528 = vmatmul.mubr.f32.vlgmr.msra.gmra.mrb[32].mxu0 %v5852_v16  ;;  %v8018_v41 = vld [vmem:[#allocation21_spill] sm:$0xff]  ;;  %v1276_v16 = vld [vmem:[#allocation3 + $0x1910] sm:$0xff] }
 0x1eb   :  { %5119 = vmatpush1.bf16.msra.mxu1 %v8016_v27  ;;  %v7387_v1 = vadd.f32 %v5181_v50, %v2148_v36  ;;  %5074 = vmatpush1.bf16.msra.mxu0 %v5073_v4  ;;  %v5183_v51 = vadd.f32 %v8018_v41, %v7107_v23  ;;  %v1270_v47 = vld [vmem:[#allocation3 + $0x18e0] sm:$0xff]  ;;  %v8019_v27 = vld [vmem:[#allocation23_spill] sm:$0xff]  ;;  %v5079_v4 = vpack.c.bf16 %v1277_v12, %v1271_v10 }
 0x1ec   :  { %8015 = vst [vmem:[#allocation18_spill] sm:$0xff] %v7381_v44  ;;  %2889 = vmatprep.mubr.f32.mxu1 %v8011_v26  ;;  %3533 = vmatprep.mubr.f32.mxu0 %v5853_v11  ;;  %v5185_v50 = vadd.f32 %v8019_v27, %v7115_v21  ;;  %v8021_v11 = vld [vmem:[#allocation20_spill] sm:$0xff]  ;;  %v1283_v27 = vld [vmem:[#allocation3 + $0x1948] sm:$0xff]  ;;  %v5081_v33 = vpack.c.bf16 %v1276_v16, %v1270_v47 }
 0x1ed   :  { %8017 = vst [vmem:[#allocation19_spill] sm:$0xff] %v7387_v1  ;;  %5104 = vmatprep.subr.bf16.mxu1 %v7038_v2  ;;  %v2152_v36 = vpop.f32.mrb[24].mxu0  ;;  %5076 = vmatprep.subr.bf16.mxu0 %v5075_v46  ;;  %v5855_v2 = vld [vmem:[%s7936_s0 + $0x30] sm:$0xff]  ;;  %v1289_v1 = vld [vmem:[#allocation3 + $0x1978] sm:$0xff]  ;;  %v5856_v12 = vld [vmem:[%s7936_s0 + $0x41] sm:$0xff] }
 0x1ee   :  { %2890 = vmatmul.mubr.f32.gmra.mrb[34].mxu1 %v7401_v58  ;;  %v7404_v20 = vadd.f32 %v5183_v51, %v2152_v36  ;;  %v2154_v41 = vpop.f32.mrb[25].mxu0  ;;  %3534 = vmatmul.mubr.f32.gmra.mrb[34].mxu0 %v5855_v2  ;;  %v8023_v46 = vld [vmem:[#allocation26_spill] sm:$0xff]  ;;  %v1282_v36 = vld [vmem:[#allocation3 + $0x1940] sm:$0xff]  ;;  %v5083_v47 = vpack.c.bf16 %v1289_v1, %v1283_v27 }
 0x1ef   :  { %5120 = vmatpush1.bf16.msra.mxu1 %v8021_v11  ;;  %v7410_v44 = vadd.f32 %v5185_v50, %v2154_v41  ;;  %5078 = vmatpush1.bf16.msra.mxu0 %v5077_v28  ;;  %v5187_v10 = vadd.f32 %v8023_v46, %v7107_v23  ;;  %v8024_v51 = vld [vmem:[#allocation22_spill] sm:$0xff]  ;;  %v8025_v11 = vld [vmem:[#allocation27_spill] sm:$0xff]  ;;  %v7424_v28 = vld [vmem:[%s7936_s0 + $0x42] sm:$0xff] }
 0x1f0   :  { %8020 = vst [vmem:[#allocation17_spill] sm:$0xff] %v7404_v20  ;;  %2895 = vmatprep.mubr.f32.mxu1 %v8011_v26  ;;  %3539 = vmatprep.mubr.f32.mxu0 %v5856_v12  ;;  %v1288_v2 = vld [vmem:[#allocation3 + $0x1970] sm:$0xff]  ;;  %v5189_v50 = vadd.f32 %v8025_v11, %v7115_v21  ;;  %v5858_v12 = vld [vmem:[%s7936_s0 + $0x40] sm:$0xff]  ;;  %v1295_v11 = vld [vmem:[#allocation3 + $0x19a8] sm:$0xff] }
 0x1f1   :  { %8022 = vst [vmem:[#allocation21_spill] sm:$0xff] %v7410_v44  ;;  %5105 = vmatprep.subr.bf16.mxu1 %v8024_v51  ;;  %v2158_v41 = vpop.f32.mrb[26].mxu0  ;;  %5080 = vmatprep.subr.bf16.mxu0 %v5079_v4  ;;  %v8026_v51 = vld [vmem:[#allocation24_spill] sm:$0xff]  ;;  %v5085_v40 = vpack.c.bf16 %v1288_v2, %v1282_v36  ;;  %v8028_v1 = vld [vmem:[#allocation30_spill] sm:$0xff] }
 0x1f2   :  { %2896 = vmatmul.mubr.f32.gmra.mrb[36].mxu1 %v7424_v28  ;;  %v7427_v16 = vadd.f32 %v5187_v10, %v2158_v41  ;;  %v2160_v46 = vpop.f32.mrb[27].mxu0  ;;  %3540 = vmatmul.mubr.f32.gmra.mrb[36].mxu0 %v5858_v12  ;;  %v1301_v44 = vld [vmem:[#allocation3 + $0x19d8] sm:$0xff]  ;;  %v5191_v4 = vadd.f32 %v8028_v1, %v7107_v23  ;;  %v1294_v10 = vld [vmem:[#allocation3 + $0x19a0] sm:$0xff]  ;;  %v1300_v41 = vld [vmem:[#allocation3 + $0x19d0] sm:$0xff] }
 0x1f3   :  { %5121 = vmatpush1.bf16.msra.mxu1 %v8026_v51  ;;  %v7433_v20 = vadd.f32 %v5189_v50, %v2160_v46  ;;  %5082 = vmatpush1.bf16.msra.mxu0 %v5081_v33  ;;  %v5859_v27 = vld [vmem:[%s7936_s0 + $0x51] sm:$0xff]  ;;  %v5193_v50 = vadd.f32 %v7095_v24, %v7115_v21  ;;  %v5087_v36 = vpack.c.bf16 %v1301_v44, %v1295_v11  ;;  %v8029_v51 = vld [vmem:[#allocation29_spill] sm:$0xff]  ;;  %v8030_v44 = vld [vmem:[#allocation32_spill] sm:$0xff] }
 0x1f4   :  { %2901 = vmatprep.mubr.f32.mxu1 %v8011_v26  ;;  %3545 = vmatprep.mubr.f32.mxu0 %v5859_v27  ;;  %v7447_v33 = vld [vmem:[%s7936_s0 + $0x52] sm:$0xff]  ;;  %v1307_v24 = vld [vmem:[#allocation3 + $0x1a08] sm:$0xff] }
 0x1f5   :  { %8027 = vst [vmem:[#allocation23_spill] sm:$0xff] %v7433_v20  ;;  %5106 = vmatprep.subr.bf16.mxu1 %v7073_v35  ;;  %v2164_v46 = vpop.f32.mrb[28].mxu0  ;;  %5084 = vmatprep.subr.bf16.mxu0 %v5083_v47  ;;  %v5861_v35 = vld [vmem:[%s7936_s0 + $0x50] sm:$0xff]  ;;  %v1313_v1 = vld [vmem:[#allocation3 + $0x1a38] sm:$0xff]  ;;  %v5089_v20 = vpack.c.bf16 %v1300_v41, %v1294_v10  ;;  %v5195_v47 = vadd.f32 %v8030_v44, %v7107_v23  ;;  %v5862_v11 = vld [vmem:[%s7936_s0 + $0x61] sm:$0xff] }
 0x1f6   :  { %2902 = vmatmul.mubr.f32.gmra.mrb[38].mxu1 %v7447_v33  ;;  %v7450_v2 = vadd.f32 %v5191_v4, %v2164_v46  ;;  %v2166_v12 = vpop.f32.mrb[29].mxu0  ;;  %3546 = vmatmul.mubr.f32.gmra.mrb[38].mxu0 %v5861_v35  ;;  %v1306_v4 = vld [vmem:[#allocation3 + $0x1a00] sm:$0xff]  ;;  %v1312_v46 = vld [vmem:[#allocation3 + $0x1a30] sm:$0xff]  ;;  %v5091_v23 = vpack.c.bf16 %v1313_v1, %v1307_v24 }
 0x1f7   :  { %5122 = vmatpush1.bf16.msra.mxu1 %v8029_v51  ;;  %v7456_v27 = vadd.f32 %v5193_v50, %v2166_v12  ;;  %5086 = vmatpush1.bf16.msra.mxu0 %v5085_v40  ;;  %v5197_v50 = vadd.f32 %v7117_v62, %v7115_v21  ;;  %v7470_v40 = vld [vmem:[%s7936_s0 + $0x62] sm:$0xff]  ;;  %v8032_v35 = vld [vmem:[#allocation31_spill] sm:$0xff]  ;;  %v5093_v44 = vpack.c.bf16 %v1312_v46, %v1306_v4 }
 0x1f8   :  { %2907 = vmatprep.mubr.f32.mxu1 %v8011_v26  ;;  %3551 = vmatprep.mubr.f32.mxu0 %v5862_v11  ;;  %v1319_v21 = vld [vmem:[#allocation3 + $0x1a68] sm:$0xff]  ;;  %v1325_v62 = vld [vmem:[#allocation3 + $0x1a98] sm:$0xff]  ;;  %v1318_v24 = vld [vmem:[#allocation3 + $0x1a60] sm:$0xff] }
 0x1f9   :  { %5107 = vmatprep.subr.bf16.mxu1 %v7092_v29  ;;  %v2170_v12 = vpop.f32.mrb[30].mxu0  ;;  %5088 = vmatprep.subr.bf16.mxu0 %v5087_v36  ;;  %v5864_v29 = vld [vmem:[%s7936_s0 + $0x60] sm:$0xff]  ;;  %v5865_v36 = vld [vmem:[%s7936_s0 + $0x71] sm:$0xff]  ;;  %v1331_v4 = vld [vmem:[#allocation3 + $0x1ac8] sm:$0xff] }
 0x1fa   :  { %2908 = vmatmul.mubr.f32.gmra.mrb[40].mxu1 %v7470_v40  ;;  %v7473_v10 = vadd.f32 %v5195_v47, %v2170_v12  ;;  %v2172_v41 = vpop.f32.mrb[31].mxu0  ;;  %3552 = vmatmul.mubr.f32.gmra.mrb[40].mxu0 %v5864_v29  ;;  %v1324_v1 = vld [vmem:[#allocation3 + $0x1a90] sm:$0xff]  ;;  %v1330_v12 = vld [vmem:[#allocation3 + $0x1ac0] sm:$0xff] }
 0x1fb   :  { %5123 = vmatpush1.bf16.msra.mxu1 %v8032_v35  ;;  %v7479_v51 = vadd.f32 %v5197_v50, %v2172_v41  ;;  %5090 = vmatpush1.bf16.msra.mxu0 %v5089_v20  ;;  %v7489_v47 = vld [vmem:[%s7936_s0 + $0x72] sm:$0xff]  ;;  %v5095_v20 = vpack.c.bf16 %v1325_v62, %v1319_v21  ;;  %v5097_v46 = vpack.c.bf16 %v1324_v1, %v1318_v24  ;;  %v5868_v50 = vld [vmem:[%s7936_s0 + $0x81] sm:$0xff] }
 0x1fc   :  { %8031 = vst [vmem:[#allocation20_spill] sm:$0xff] %v7473_v10  ;;  %2913 = vmatprep.mubr.f32.mxu1 %v8011_v26  ;;  %3557 = vmatprep.mubr.f32.mxu0 %v5865_v36  ;;  %v5867_v11 = vld [vmem:[%s7936_s0 + $0x70] sm:$0xff]  ;;  %v7504_v41 = vld [vmem:[%s7936_s0 + $0x82] sm:$0xff] }
 0x1fd   :  { %8033 = vst [vmem:[#allocation26_spill] sm:$0xff] %v7479_v51  ;;  %5108 = vmatprep.subr.bf16.mxu1 %v7112_v19  ;;  %5092 = vmatprep.subr.bf16.mxu0 %v5091_v23  ;;  %v1337_v19 = vld [vmem:[#allocation3 + $0x1af8] sm:$0xff]  ;;  %v1336_v23 = vld [vmem:[#allocation3 + $0x1af0] sm:$0xff] }
 0x1fe   :  { %2914 = vmatmul.mubr.f32.gmra.mrb[42].mxu1 %v7489_v47  ;;  %3558 = vmatmul.mubr.f32.gmra.mrb[42].mxu0 %v5867_v11  ;;  %v5101_v29 = vpack.c.bf16 %v1336_v23, %v1330_v12 }
 0x1ff   :  { %5124 = vmatpush1.bf16.msra.mxu1 %v7126_v61  ;;  %5094 = vmatpush1.bf16.msra.mxu0 %v5093_v44  ;;  %v5099_v61 = vpack.c.bf16 %v1337_v19, %v1331_v4  ;;  %v8034_v44 = vld [vmem:[#allocation25_spill] sm:$0xff] }
 0x200   :  { %2919 = vmatprep.mubr.f32.mxu1 %v8011_v26  ;;  %3563 = vmatprep.mubr.f32.mxu0 %v5868_v50  ;;  %v1350_v36 = vsub.s32 2, %v8034_v44  ;;  %v1354_v1 = vsub.s32 3, %v8034_v44 }
 0x201   :  { %5109 = vmatprep.subr.bf16.mxu1 %v7131_v3  ;;  %5096 = vmatprep.subr.bf16.mxu0 %v5095_v20  ;;  %v5870_v3 = vld [vmem:[%s7936_s0 + $0x92] sm:$0xff]  ;;  %v8037_v20 = vld [vmem:[#allocation28_spill] sm:$0xff] }
 0x202   :  { %2920 = vmatmul.mubr.f32.gmra.mrb[44].mxu1 %v7504_v41  ;;  %3564 = vmatmul.mubr.f32.gmra.mrb[44].mxu0 %v7158_v17  ;;  %v5873_v17 = vld [vmem:[%s7936_s0 + $0xe2] sm:$0xff]  ;;  %v7663_v11 = vrot.slane %v8037_v20, %v1350_v36  ;;  %v7668_v19 = vrot.slane %v8037_v20, %v1354_v1  ;;  %v3786_v1 = vmax.f32 %v7140_v30, 0.0 }
 0x203   :  { %5125 = vmatpush1.bf16.msra.mxu1 %v7146_v49  ;;  %5098 = vmatpush1.bf16.msra.mxu0 %v5097_v46  ;;  %v5871_v49 = vld [vmem:[%s7936_s0 + $0xc2] sm:$0xff] }
 0x204   :  { %2925 = vmatprep.mubr.f32.mxu1 %v8011_v26  ;;  %3569 = vmatprep.mubr.f32.mxu0 %v7167_v54  ;;  %v5874_v54 = vld [vmem:[%s7936_s0 + $0xf2] sm:$0xff] }
 0x205   :  { %5110 = vmatprep.subr.bf16.mxu1 %v7151_v45  ;;  %5100 = vmatprep.subr.bf16.mxu0 %v5099_v61  ;;  %v5872_v45 = vld [vmem:[%s7936_s0 + $0xd2] sm:$0xff] }
 0x206   :  { %2926 = vmatmul.mubr.f32.gmra.mrb[46].mxu1 %v5870_v3  ;;  %3570 = vmatmul.mubr.f32.gmra.mrb[46].mxu0 %v7186_v56  ;;  %v5877_v56 = vld [vmem:[%s7936_s0 + $0x122] sm:$0xff] }
 0x207   :  { %5126 = vmatpush1.bf16.msra.mxu1 %v7174_v59  ;;  %5102 = vmatpush1.bf16.msra.mxu0 %v5101_v29  ;;  %v5875_v59 = vld [vmem:[%s7936_s0 + $0x102] sm:$0xff] }
 0x208   :  { %2931 = vmatprep.mubr.f32.mxu1 %v8011_v26  ;;  %3688 = vmatprep.mubr.f32.mxu0 %v8011_v26 }
 0x209   :  { %5111 = vmatprep.subr.bf16.mxu1 %v7179_v57  ;;  %v5876_v57 = vld [vmem:[%s7936_s0 + $0x112] sm:$0xff] }
 0x20a   :  { %2932 = vmatmul.mubr.f32.gmra.mrb[48].mxu1 %v5871_v49  ;;  %3689 = vmatmul.mubr.f32.vlgmr.msra.gmra.mrb[32].mxu0 %v7378_v32 }
 0x20b   :  { %5127 = vmatpush1.bf16.msra.mxu1 %v7199_v43  ;;  %2937 = vmatprep.mubr.f32.mxu1 %v8011_v26  ;;  %v5878_v43 = vld [vmem:[%s7936_s0 + $0x132] sm:$0xff] }
 0x20c   :  { %3694 = vmatprep.mubr.f32.mxu0 %v8011_v26  ;;  %5112 = vmatprep.subr.bf16.mxu1 %v7204_v60  ;;  %v5879_v60 = vld [vmem:[%s7936_s0 + $0xc1] sm:$0xff] }
 0x20e   :  { %2938 = vmatmul.mubr.f32.gmra.mrb[50].mxu1 %v5872_v45  ;;  %3695 = vmatmul.mubr.f32.gmra.mrb[34].mxu0 %v7401_v58 }
 0x20f   :  { %5128 = vmatpush1.bf16.msra.mxu1 %v7220_v8  ;;  %2943 = vmatprep.mubr.f32.mxu1 %v8011_v26  ;;  %v5880_v8 = vld [vmem:[%s7936_s0 + $0xc0] sm:$0xff] }
 0x210   :  { %3700 = vmatprep.mubr.f32.mxu0 %v8011_v26  ;;  %5113 = vmatprep.subr.bf16.mxu1 %v7225_v53  ;;  %v5881_v53 = vld [vmem:[%s7936_s0 + $0xd1] sm:$0xff] }
 0x212   :  { %2944 = vmatmul.mubr.f32.gmra.mrb[52].mxu1 %v5873_v17  ;;  %3701 = vmatmul.mubr.f32.gmra.mrb[36].mxu0 %v7424_v28 }
 0x213   :  { %5129 = vmatpush1.bf16.msra.mxu1 %v7240_v9  ;;  %2949 = vmatprep.mubr.f32.mxu1 %v8011_v26  ;;  %v5882_v9 = vld [vmem:[%s7936_s0 + $0xd0] sm:$0xff] }
 0x214   :  { %3706 = vmatprep.mubr.f32.mxu0 %v8011_v26  ;;  %5114 = vmatprep.subr.bf16.mxu1 %v7245_v22  ;;  %v5883_v22 = vld [vmem:[%s7936_s0 + $0xe1] sm:$0xff] }
 0x216   :  { %2950 = vmatmul.mubr.f32.gmra.mrb[54].mxu1 %v5874_v54  ;;  %3707 = vmatmul.mubr.f32.gmra.mrb[38].mxu0 %v7447_v33 }
 0x217   :  { %5130 = vmatpush1.bf16.msra.mxu1 %v7260_v0  ;;  %2955 = vmatprep.mubr.f32.mxu1 %v8011_v26  ;;  %v5884_v0 = vld [vmem:[%s7936_s0 + $0xe0] sm:$0xff] }
 0x218   :  { %3712 = vmatprep.mubr.f32.mxu0 %v8011_v26  ;;  %5115 = vmatprep.subr.bf16.mxu1 %v7265_v52  ;;  %v5885_v52 = vld [vmem:[%s7936_s0 + $0xf1] sm:$0xff] }
 0x21a   :  { %2956 = vmatmul.mubr.f32.gmra.mrb[56].mxu1 %v5875_v59  ;;  %3713 = vmatmul.mubr.f32.gmra.mrb[40].mxu0 %v7470_v40 }
 0x21b   :  { %5131 = vmatpush1.bf16.msra.mxu1 %v7280_v15  ;;  %2961 = vmatprep.mubr.f32.mxu1 %v8011_v26  ;;  %v5886_v15 = vld [vmem:[%s7936_s0 + $0xf0] sm:$0xff] }
 0x21c   :  { %3718 = vmatprep.mubr.f32.mxu0 %v8011_v26  ;;  %5116 = vmatprep.subr.bf16.mxu1 %v7285_v31  ;;  %v5887_v31 = vld [vmem:[%s7936_s0 + $0x101] sm:$0xff] }
 0x21e   :  { %2962 = vmatmul.mubr.f32.gmra.mrb[58].mxu1 %v5876_v57  ;;  %3719 = vmatmul.mubr.f32.gmra.mrb[42].mxu0 %v7489_v47 }
 0x21f   :  { %5132 = vmatpush1.bf16.msra.mxu1 %v7300_v39  ;;  %2967 = vmatprep.mubr.f32.mxu1 %v8011_v26  ;;  %v5888_v39 = vld [vmem:[%s7936_s0 + $0x100] sm:$0xff] }
 0x220   :  { %3724 = vmatprep.mubr.f32.mxu0 %v8011_v26  ;;  %5117 = vmatprep.subr.bf16.mxu1 %v7305_v42  ;;  %v5889_v42 = vld [vmem:[%s7936_s0 + $0x111] sm:$0xff] }
 0x222   :  { %2968 = vmatmul.mubr.f32.gmra.mrb[60].mxu1 %v5877_v56  ;;  %3725 = vmatmul.mubr.f32.gmra.mrb[44].mxu0 %v7504_v41 }
 0x223   :  { %5133 = vmatpush1.bf16.msra.mxu1 %v7320_v37  ;;  %2973 = vmatprep.mubr.f32.mxu1 %v8011_v26  ;;  %v5890_v37 = vld [vmem:[%s7936_s0 + $0x110] sm:$0xff] }
 0x224   :  { %3730 = vmatprep.mubr.f32.mxu0 %v8011_v26  ;;  %5118 = vmatprep.subr.bf16.mxu1 %v7325_v13  ;;  %v5891_v13 = vld [vmem:[%s7936_s0 + $0x121] sm:$0xff] }
 0x226   :  { %2974 = vmatmul.mubr.f32.gmra.mrb[62].mxu1 %v5878_v43  ;;  %3731 = vmatmul.mubr.f32.gmra.mrb[46].mxu0 %v5870_v3 }
 0x227   :  { %5134 = vmatpush1.bf16.msra.mxu1 %v7348_v34  ;;  %3575 = vmatprep.mubr.f32.mxu1 %v5879_v60 }
 0x228   :  { %3736 = vmatprep.mubr.f32.mxu0 %v8011_v26 }
 0x22a   :  { %3576 = vmatmul.mubr.f32.vlgmr.msra.gmra.mrb[64].mxu1 %v5880_v8  ;;  %3737 = vmatmul.mubr.f32.gmra.mrb[64].mxu0 %v5871_v49 }
 0x22b   :  { %3581 = vmatprep.mubr.f32.mxu1 %v5881_v53  ;;  %3742 = vmatprep.mubr.f32.mxu0 %v8011_v26 }
 0x22e   :  { %3582 = vmatmul.mubr.f32.gmra.mrb[66].mxu1 %v5882_v9  ;;  %3743 = vmatmul.mubr.f32.gmra.mrb[66].mxu0 %v5872_v45 }
 0x22f   :  { %3587 = vmatprep.mubr.f32.mxu1 %v5883_v22  ;;  %3748 = vmatprep.mubr.f32.mxu0 %v8011_v26 }
 0x232   :  { %3588 = vmatmul.mubr.f32.gmra.mrb[68].mxu1 %v5884_v0  ;;  %3749 = vmatmul.mubr.f32.gmra.mrb[68].mxu0 %v5873_v17 }
 0x233   :  { %3593 = vmatprep.mubr.f32.mxu1 %v5885_v52  ;;  %3754 = vmatprep.mubr.f32.mxu0 %v8011_v26 }
 0x236   :  { %3594 = vmatmul.mubr.f32.gmra.mrb[70].mxu1 %v5886_v15  ;;  %3755 = vmatmul.mubr.f32.gmra.mrb[70].mxu0 %v5874_v54  ;;  %v1358_v15 = vsub.s32 4, %v8034_v44 }
 0x237   :  { %3599 = vmatprep.mubr.f32.mxu1 %v5887_v31  ;;  %3760 = vmatprep.mubr.f32.mxu0 %v8011_v26 }
 0x23a   :  { %3600 = vmatmul.mubr.f32.gmra.mrb[72].mxu1 %v5888_v39  ;;  %3761 = vmatmul.mubr.f32.gmra.mrb[72].mxu0 %v5875_v59 }
 0x23b   :  { %3605 = vmatprep.mubr.f32.mxu1 %v5889_v42  ;;  %3766 = vmatprep.mubr.f32.mxu0 %v8011_v26  ;;  %v3785_v42 = vmax.f32 %v7136_v55, 0.0 }
 0x23e   :  { %3606 = vmatmul.mubr.f32.gmra.mrb[74].mxu1 %v5890_v37  ;;  %3767 = vmatmul.mubr.f32.gmra.mrb[74].mxu0 %v5876_v57 }
 0x23f   :  { %3611 = vmatprep.mubr.f32.mxu1 %v5891_v13  ;;  %3772 = vmatprep.mubr.f32.mxu0 %v8011_v26 }
 0x242   :  { %3612 = vmatmul.mubr.f32.gmra.mrb[76].mxu1 %v7332_v63  ;;  %3773 = vmatmul.mubr.f32.gmra.mrb[76].mxu0 %v5877_v56 }
 0x243   :  { %3617 = vmatprep.mubr.f32.mxu1 %v7341_v18  ;;  %3778 = vmatprep.mubr.f32.mxu0 %v8011_v26 }
 0x246   :  { %3618 = vmatmul.mubr.f32.gmra.mrb[78].mxu1 %v7358_v38  ;;  %3779 = vmatmul.mubr.f32.gmra.mrb[78].mxu0 %v5878_v43 }
 0x29d   :  { %v7630_v34 = vpop.f32.mrb[48].mxu0 }
 0x29e   :  { %v7632_v32 = vpop.f32.mrb[49].mxu0 }
 0x2a1   :  { %v7634_v58 = vpop.f32.mrb[50].mxu0 }
 0x2a2   :  { %v7636_v28 = vpop.f32.mrb[51].mxu0 }
 0x2a5   :  { %v7638_v33 = vpop.f32.mrb[52].mxu0 }
 0x2a6   :  { %v7640_v40 = vpop.f32.mrb[53].mxu0 }
 0x2a9   :  { %v7642_v63 = vpop.f32.mrb[54].mxu0 }
 0x2aa   :  { %v7644_v18 = vpop.f32.mrb[55].mxu0 }
 0x2ad   :  { %v7646_v26 = vpop.f32.mrb[56].mxu0 }
 0x2ae   :  { %v7648_v38 = vpop.f32.mrb[57].mxu0 }
 0x2b1   :  { %v7650_v35 = vpop.f32.mrb[58].mxu0 }
 0x2b2   :  { %v7652_v21 = vpop.f32.mrb[59].mxu0 }
 0x2b5   :  { %v7654_v62 = vpop.f32.mrb[60].mxu0 }
 0x2b6   :  { %v7657_v24 = vpop.f32.mrb[61].mxu0 }
 0x2b7   :  { %8035 = vst [vmem:[#allocation22_spill] sm:$0xff] %v7657_v24 }
 0x2b9   :  { %v7660_v47 = vpop.f32.mrb[62].mxu0 }
 0x2ba   :  { %8036 = vst [vmem:[#allocation27_spill] sm:$0xff] %v7660_v47  ;;  %v7665_v4 = vpop.f32.mrb[63].mxu0 }
 0x2bb   :  { %8038 = vst [vmem:[#allocation24_spill] sm:$0xff] %v7665_v4  ;;  %v8051_v4 = vld [vmem:[#allocation15_spill] sm:$0xff] }
 0x2bd   :  { %v2885_v46 = vpop.f32.mrb[32].mxu1 }
 0x2be   :  { %v5199_v50 = vadd.f32 %v2885_v46, %v7663_v11  ;;  %v2887_v12 = vpop.f32.mrb[33].mxu1 }
 0x2bf   :  { %v5200_v23 = vadd.f32 %v2887_v12, %v7668_v19 }
 0x2c0   :  { %v4207_v41 = vmul.f32 -1.442695, %v5199_v50 }
 0x2c1   :  { %v4208_v61 = vmul.f32 -1.442695, %v5200_v23  ;;  %v2891_v29 = vpop.f32.mrb[34].mxu1  ;;  %v8048_v23 = vld [vmem:[#allocation12_spill] sm:$0xff] }
 0x2c2   :  { %5620 = vpow2.f32 %v4207_v41  ;;  %v5201_v3 = vadd.f32 %v2891_v29, %v7663_v11  ;;  %v2893_v49 = vpop.f32.mrb[35].mxu1 }
 0x2c3   :  { %5622 = vpow2.f32 %v4208_v61  ;;  %v5202_v45 = vadd.f32 %v2893_v49, %v7668_v19 }
 0x2c4   :  { %v4209_v17 = vmul.f32 -1.442695, %v5201_v3  ;;  %v7686_v3 = vld [vmem:[#allocation5] sm:$0x3f] }
 0x2c5   :  { %v4210_v54 = vmul.f32 -1.442695, %v5202_v45  ;;  %v2897_v59 = vpop.f32.mrb[36].mxu1  ;;  %v7689_v49 = vrot.slane %v7686_v3, %v1358_v15 }
 0x2c6   :  { %5624 = vpow2.f32 %v4209_v17  ;;  %v5203_v57 = vadd.f32 %v2897_v59, %v7663_v11  ;;  %v2899_v56 = vpop.f32.mrb[37].mxu1 }
 0x2c7   :  { %5626 = vpow2.f32 %v4210_v54  ;;  %v5204_v43 = vadd.f32 %v2899_v56, %v7668_v19  ;;  %v7723_v30 = vadd.f32 %v7630_v34, %v7689_v49 }
 0x2c8   :  { %v4211_v60 = vmul.f32 -1.442695, %v5203_v57 }
 0x2c9   :  { %v4212_v8 = vmul.f32 -1.442695, %v5204_v43  ;;  %v2903_v53 = vpop.f32.mrb[38].mxu1  ;;  %v8045_v43 = vld [vmem:[#allocation9_spill] sm:$0xff] }
 0x2ca   :  { %5628 = vpow2.f32 %v4211_v60  ;;  %v5205_v9 = vadd.f32 %v2903_v53, %v7663_v11  ;;  %v2905_v22 = vpop.f32.mrb[39].mxu1 }
 0x2cb   :  { %5630 = vpow2.f32 %v4212_v8  ;;  %v5206_v0 = vadd.f32 %v2905_v22, %v7668_v19  ;;  %v8039_v22 = vld [vmem:[#allocation33_spill] sm:$0xff] }
 0x2cc   :  { %v5621_v52 = vpop.eup %5620  ;;  %v4213_v31 = vmul.f32 -1.442695, %v5205_v9  ;;  %v8044_v9 = vld [vmem:[#allocation38_spill] sm:$0xff] }
 0x2cd   :  { %v5623_v39 = vpop.eup %5622  ;;  %v3913_v37 = vadd.f32 1.0, %v5621_v52  ;;  %v4214_v13 = vmul.f32 -1.442695, %v5206_v0  ;;  %v2909_v36 = vpop.f32.mrb[40].mxu1 }
 0x2ce   :  { %v3914_v20 = vadd.f32 1.0, %v5623_v39  ;;  %5632 = vpow2.f32 %v4213_v31  ;;  %v5207_v46 = vadd.f32 %v2909_v36, %v7663_v11  ;;  %v2911_v50 = vpop.f32.mrb[41].mxu1  ;;  %v8040_v31 = vld [vmem:[#allocation34_spill] sm:$0xff] }
 0x2cf   :  { %5634 = vrcp.f32 %v3913_v37  ;;  %v5208_v41 = vadd.f32 %v2911_v50, %v7668_v19  ;;  %v8041_v37 = vld [vmem:[#allocation35_spill] sm:$0xff] }
 0x2d0   :  { %v5625_v61 = vpop.eup %5624  ;;  %5636 = vrcp.f32 %v3914_v20  ;;  %v4215_v45 = vmul.f32 -1.442695, %v5207_v46  ;;  %v8042_v46 = vld [vmem:[#allocation36_spill] sm:$0xff]  ;;  %v8046_v50 = vld [vmem:[#allocation11_spill] sm:$0xff] }
 0x2d1   :  { %v5627_v17 = vpop.eup %5626  ;;  %v3915_v59 = vadd.f32 1.0, %v5625_v61  ;;  %5638 = vpow2.f32 %v4214_v13  ;;  %v4216_v57 = vmul.f32 -1.442695, %v5208_v41  ;;  %v2915_v56 = vpop.f32.mrb[42].mxu1 }
 0x2d2   :  { %v3916_v60 = vadd.f32 1.0, %v5627_v17  ;;  %5640 = vpow2.f32 %v4215_v45  ;;  %v5209_v8 = vadd.f32 %v2915_v56, %v7663_v11  ;;  %v2917_v53 = vpop.f32.mrb[43].mxu1  ;;  %v8043_v17 = vld [vmem:[#allocation37_spill] sm:$0xff] }
 0x2d3   :  { %5642 = vrcp.f32 %v3915_v59  ;;  %v5210_v52 = vadd.f32 %v2917_v53, %v7668_v19 }
 0x2d4   :  { %v5629_v15 = vpop.eup %5628  ;;  %5644 = vrcp.f32 %v3916_v60  ;;  %v4217_v36 = vmul.f32 -1.442695, %v5209_v8 }
 0x2d5   :  { %v5631_v20 = vpop.eup %5630  ;;  %v3917_v41 = vadd.f32 1.0, %v5629_v15  ;;  %5646 = vpow2.f32 %v4216_v57  ;;  %v4218_v61 = vmul.f32 -1.442695, %v5210_v52  ;;  %v2921_v45 = vpop.f32.mrb[44].mxu1  ;;  %v8047_v57 = vld [vmem:[#allocation10_spill] sm:$0xff] }
 0x2d6   :  { %v3918_v0 = vadd.f32 1.0, %v5631_v20  ;;  %5648 = vpow2.f32 %v4217_v36  ;;  %v5211_v59 = vadd.f32 %v2921_v45, %v7663_v11  ;;  %v2923_v53 = vpop.f32.mrb[45].mxu1  ;;  %v1362_v36 = vsub.s32 5, %v8034_v44 }
 0x2d7   :  { %5650 = vrcp.f32 %v3917_v41  ;;  %v5212_v60 = vadd.f32 %v2923_v53, %v7668_v19 }
 0x2d8   :  { %v5633_v8 = vpop.eup %5632  ;;  %5652 = vrcp.f32 %v3918_v0  ;;  %v4219_v54 = vmul.f32 -1.442695, %v5211_v59  ;;  %v8049_v0 = vld [vmem:[#allocation13_spill] sm:$0xff]  ;;  %v7719_v55 = vrot.slane %v7686_v3, %v1362_v36 }
 0x2d9   :  { %v5635_v56 = vpop.eup %5634  ;;  %v3919_v20 = vadd.f32 1.0, %v5633_v8  ;;  %5654 = vpow2.f32 %v4218_v61  ;;  %v4220_v45 = vmul.f32 -1.442695, %v5212_v60  ;;  %v2927_v29 = vpop.f32.mrb[46].mxu1  ;;  %v8050_v8 = vld [vmem:[#allocation14_spill] sm:$0xff] }
 0x2da   :  { %v5637_v39 = vpop.eup %5636  ;;  %5656 = vpow2.f32 %v4219_v54  ;;  %v5213_v41 = vadd.f32 %v2927_v29, %v7663_v11  ;;  %v2929_v53 = vpop.f32.mrb[47].mxu1  ;;  %v4009_v15 = vmul.f32 %v5635_v56, %v3785_v42 }
 0x2db   :  { %v5639_v52 = vpop.eup %5638  ;;  %5658 = vrcp.f32 %v3919_v20  ;;  %v5214_v44 = vadd.f32 %v2929_v53, %v7668_v19  ;;  %v4010_v61 = vmul.f32 %v5637_v39, %v3786_v1 }
 0x2dc   :  { %v5641_v60 = vpop.eup %5640  ;;  %v3920_v13 = vadd.f32 1.0, %v5639_v52  ;;  %5660 = vpow2.f32 %v4220_v45  ;;  %v4221_v54 = vmul.f32 -1.442695, %v5213_v41  ;;  %v8052_v45 = vmax.f32 %v7161_v25, 0.0 }
 0x2dd   :  { %v5643_v29 = vpop.eup %5642  ;;  %v3921_v42 = vadd.f32 1.0, %v5641_v60  ;;  %v4222_v56 = vmul.f32 -1.442695, %v5214_v44  ;;  %v2933_v20 = vpop.f32.mrb[48].mxu1  ;;  %v8053_v60 = vmax.f32 %v7170_v48, 0.0 }
 0x2de   :  { %v5645_v59 = vpop.eup %5644  ;;  %5662 = vrcp.f32 %v3920_v13  ;;  %v5215_v1 = vadd.f32 %v2933_v20, %v7663_v11  ;;  %v3690_v39 = vpop.f32.mrb[32].mxu0  ;;  %v4011_v41 = vmul.f32 %v5643_v29, %v8052_v45 }
 0x2df   :  { %v2935_v52 = vpop.f32.mrb[49].mxu1  ;;  %v5647_v53 = vpop.eup %5646  ;;  %5664 = vrcp.f32 %v3921_v42  ;;  %v5231_v3 = vadd.f32 %v3690_v39, %v7689_v49  ;;  %v4012_v47 = vmul.f32 %v5645_v59, %v8053_v60  ;;  %v8054_v59 = vmax.f32 %v7189_v7, 0.0 }
 0x2e0   :  { %v5216_v36 = vadd.f32 %v2935_v52, %v7668_v19  ;;  %v3692_v44 = vpop.f32.mrb[33].mxu0  ;;  %v5649_v34 = vpop.eup %5648  ;;  %v3922_v12 = vadd.f32 1.0, %v5647_v53  ;;  %5666 = vpow2.f32 %v4221_v54  ;;  %v4223_v13 = vmul.f32 -1.442695, %v5215_v1 }
 0x2e1   :  { %v5232_v20 = vadd.f32 %v3692_v44, %v7719_v55  ;;  %v5651_v51 = vpop.eup %5650  ;;  %v3923_v24 = vadd.f32 1.0, %v5649_v34  ;;  %5668 = vpow2.f32 %v4222_v56  ;;  %v4041_v25 = vadd.f32 %v5231_v3, %v4009_v15  ;;  %v2939_v42 = vpop.f32.mrb[50].mxu1 }
 0x2e2   :  { %v4224_v29 = vmul.f32 -1.442695, %v5216_v36  ;;  %v5653_v45 = vpop.eup %5652  ;;  %5670 = vrcp.f32 %v3922_v12  ;;  %v5217_v52 = vadd.f32 %v2939_v42, %v7663_v11  ;;  %v3696_v10 = vpop.f32.mrb[34].mxu0  ;;  %v4013_v53 = vmul.f32 %v5651_v51, %v8054_v59 }
 0x2e3   :  { %v4042_v39 = vadd.f32 %v5232_v20, %v4010_v61  ;;  %v2941_v48 = vpop.f32.mrb[51].mxu1  ;;  %v5655_v54 = vpop.eup %5654  ;;  %5672 = vrcp.f32 %v3923_v24  ;;  %4073 = vst [vmem:[%s7939_s3] sm:$0xff] %v4041_v25  ;;  %v5233_v15 = vadd.f32 %v3696_v10, %v7689_v49  ;;  %v8055_v12 = vmax.f32 %v7193_v5, 0.0 }
 0x2e4   :  { %v5218_v56 = vadd.f32 %v2941_v48, %v7668_v19  ;;  %v3698_v1 = vpop.f32.mrb[35].mxu0  ;;  %v5657_v3 = vpop.eup %5656  ;;  %v3924_v36 = vadd.f32 1.0, %v5655_v54  ;;  %5674 = vpow2.f32 %v4223_v13  ;;  %v4225_v7 = vmul.f32 -1.442695, %v5217_v52 }
 0x2e5   :  { %v4014_v61 = vmul.f32 %v5653_v45, %v8055_v12  ;;  %4074 = vst [vmem:[%s7939_s3 + $0x8] sm:$0xff] %v4042_v39  ;;  %v5234_v51 = vadd.f32 %v3698_v1, %v7719_v55  ;;  %v5659_v24 = vpop.eup %5658  ;;  %v3925_v44 = vadd.f32 1.0, %v5657_v3  ;;  %5676 = vpow2.f32 %v4224_v29  ;;  %v2945_v34 = vpop.f32.mrb[52].mxu1 }
 0x2e6   :  { %v4043_v10 = vadd.f32 %v5233_v15, %v4011_v41  ;;  %v4226_v60 = vmul.f32 -1.442695, %v5218_v56  ;;  %v5661_v20 = vpop.eup %5660  ;;  %5678 = vrcp.f32 %v3924_v36  ;;  %v5219_v25 = vadd.f32 %v2945_v34, %v7663_v11  ;;  %v3702_v42 = vpop.f32.mrb[36].mxu0 }
 0x2e7   :  { %v4044_v5 = vadd.f32 %v5234_v51, %v4012_v47  ;;  %v2947_v13 = vpop.f32.mrb[53].mxu1  ;;  %v8056_v45 = vmax.f32 %v7210_v6, 0.0  ;;  %5680 = vrcp.f32 %v3925_v44  ;;  %v3926_v39 = vadd.f32 1.0, %v5661_v20  ;;  %v3704_v52 = vpop.f32.mrb[37].mxu0 }
 0x2e8   :  { %4075 = vst [vmem:[%s7939_s3 + $0x10] sm:$0xff] %v4043_v10  ;;  %v5235_v41 = vadd.f32 %v3702_v42, %v7689_v49  ;;  %v5220_v29 = vadd.f32 %v2947_v13, %v7668_v19  ;;  %v5663_v59 = vpop.eup %5662  ;;  %v7757_v47 = vadd.f32 %v7632_v32, %v7719_v55  ;;  %5682 = vpow2.f32 %v4225_v7 }
 0x2e9   :  { %v4015_v48 = vmul.f32 %v5659_v24, %v8056_v45  ;;  %4076 = vst [vmem:[%s7939_s3 + $0x18] sm:$0xff] %v4044_v5  ;;  %v4227_v6 = vmul.f32 -1.442695, %v5219_v25  ;;  %v5236_v54 = vadd.f32 %v3704_v52, %v7719_v55  ;;  %v5665_v15 = vpop.eup %5664  ;;  %5684 = vrcp.f32 %v3926_v39  ;;  %v2951_v12 = vpop.f32.mrb[54].mxu1 }
 0x2ea   :  { %v4045_v56 = vadd.f32 %v5235_v41, %v4013_v53  ;;  %v4228_v1 = vmul.f32 -1.442695, %v5220_v29  ;;  %v8057_v3 = vmax.f32 %v7214_v14, 0.0  ;;  %v5667_v51 = vpop.eup %5666  ;;  %5686 = vpow2.f32 %v4226_v60  ;;  %v3708_v24 = vpop.f32.mrb[38].mxu0 }
 0x2eb   :  { %v4046_v32 = vadd.f32 %v5236_v54, %v4014_v61  ;;  %v5221_v7 = vadd.f32 %v2951_v12, %v7663_v11  ;;  %v2953_v44 = vpop.f32.mrb[55].mxu1  ;;  %v8058_v10 = vmax.f32 %v8039_v22, 0.0  ;;  %v5669_v20 = vpop.eup %5668  ;;  %v3927_v5 = vadd.f32 1.0, %v5667_v51 }
 0x2ec   :  { %v4016_v36 = vmul.f32 %v5663_v59, %v8057_v3  ;;  %5688 = vpow2.f32 %v4227_v6  ;;  %4077 = vst [vmem:[%s7939_s3 + $0x20] sm:$0xff] %v4045_v56  ;;  %v5237_v14 = vadd.f32 %v3708_v24, %v7689_v49  ;;  %v5222_v53 = vadd.f32 %v2953_v44, %v7668_v19  ;;  %v3710_v60 = vpop.f32.mrb[39].mxu0  ;;  %v5671_v61 = vpop.eup %5670 }
 0x2ed   :  { %v4017_v34 = vmul.f32 %v5665_v15, %v8058_v10  ;;  %v3928_v25 = vadd.f32 1.0, %v5669_v20  ;;  %5690 = vpow2.f32 %v4228_v1  ;;  %4078 = vst [vmem:[%s7939_s3 + $0x28] sm:$0xff] %v4046_v32  ;;  %v4229_v22 = vmul.f32 -1.442695, %v5221_v7  ;;  %v5673_v13 = vpop.eup %5672  ;;  %v2957_v41 = vpop.f32.mrb[56].mxu1 }
 0x2ee   :  { %v5238_v42 = vadd.f32 %v3710_v60, %v7719_v55  ;;  %5692 = vrcp.f32 %v3927_v5  ;;  %v4047_v45 = vadd.f32 %v5237_v14, %v4015_v48  ;;  %v4230_v39 = vmul.f32 -1.442695, %v5222_v53  ;;  %v5675_v59 = vpop.eup %5674  ;;  %v3714_v15 = vpop.f32.mrb[40].mxu0 }
 0x2ef   :  { %v8059_v29 = vmax.f32 %v8040_v31, 0.0  ;;  %5694 = vrcp.f32 %v3928_v25  ;;  %v5223_v54 = vadd.f32 %v2957_v41, %v7663_v11  ;;  %v2959_v56 = vpop.f32.mrb[57].mxu1  ;;  %v8060_v1 = vmax.f32 %v8041_v37, 0.0  ;;  %v5677_v3 = vpop.eup %5676 }
 0x2f0   :  { %v4048_v6 = vadd.f32 %v5238_v42, %v4016_v36  ;;  %v3929_v51 = vadd.f32 1.0, %v5675_v59  ;;  %5696 = vpow2.f32 %v4229_v22  ;;  %4079 = vst [vmem:[%s7939_s3 + $0x30] sm:$0xff] %v4047_v45  ;;  %v5239_v31 = vadd.f32 %v3714_v15, %v7689_v49  ;;  %v3716_v32 = vpop.f32.mrb[41].mxu0  ;;  %v5679_v36 = vpop.eup %5678 }
 0x2f1   :  { %v4018_v52 = vmul.f32 %v5671_v61, %v8059_v29  ;;  %v4019_v12 = vmul.f32 %v5673_v13, %v8060_v1  ;;  %v5224_v48 = vadd.f32 %v2959_v56, %v7668_v19  ;;  %v3930_v7 = vadd.f32 1.0, %v5677_v3  ;;  %v5681_v44 = vpop.eup %5680  ;;  %v2963_v5 = vpop.f32.mrb[58].mxu1 }
 0x2f2   :  { %5698 = vpow2.f32 %v4230_v39  ;;  %4080 = vst [vmem:[%s7939_s3 + $0x38] sm:$0xff] %v4048_v6  ;;  %v4231_v37 = vmul.f32 -1.442695, %v5223_v54  ;;  %v5240_v24 = vadd.f32 %v3716_v32, %v7719_v55  ;;  %v4049_v10 = vadd.f32 %v5239_v31, %v4017_v34  ;;  %v5683_v60 = vpop.eup %5682  ;;  %v3720_v22 = vpop.f32.mrb[42].mxu0 }
 0x2f3   :  { %5700 = vrcp.f32 %v3929_v51  ;;  %v4232_v20 = vmul.f32 -1.442695, %v5224_v48  ;;  %v8061_v14 = vmax.f32 %v8042_v46, 0.0  ;;  %v5225_v25 = vadd.f32 %v2963_v5, %v7663_v11  ;;  %v2965_v42 = vpop.f32.mrb[59].mxu1  ;;  %v5685_v39 = vpop.eup %5684 }
 0x2f4   :  { %5702 = vrcp.f32 %v3930_v7  ;;  %v4050_v61 = vadd.f32 %v5240_v24, %v4018_v52  ;;  %v8062_v13 = vmax.f32 %v8043_v17, 0.0  ;;  %v3931_v41 = vadd.f32 1.0, %v5683_v60  ;;  %4081 = vst [vmem:[%s7939_s3 + $0x40] sm:$0xff] %v4049_v10  ;;  %v3722_v29 = vpop.f32.mrb[43].mxu0  ;;  %v5687_v52 = vpop.eup %5686 }
 0x2f5   :  { %v4020_v53 = vmul.f32 %v5679_v36, %v8061_v14  ;;  %5704 = vpow2.f32 %v4231_v37  ;;  %v5241_v46 = vadd.f32 %v3720_v22, %v7689_v49  ;;  %v5226_v34 = vadd.f32 %v2965_v42, %v7668_v19  ;;  %v2969_v51 = vpop.f32.mrb[60].mxu1  ;;  %v3726_v7 = vpop.f32.mrb[44].mxu0 }
 0x2f6   :  { %v4021_v45 = vmul.f32 %v5681_v44, %v8062_v13  ;;  %5706 = vpow2.f32 %v4232_v20  ;;  %4082 = vst [vmem:[%s7939_s3 + $0x48] sm:$0xff] %v4050_v61  ;;  %v4233_v17 = vmul.f32 -1.442695, %v5225_v25  ;;  %v5242_v59 = vadd.f32 %v3722_v29, %v7719_v55  ;;  %v5689_v15 = vpop.eup %5688  ;;  %v2971_v37 = vpop.f32.mrb[61].mxu1 }
 0x2f7   :  { %v8063_v6 = vmax.f32 %v8044_v9, 0.0  ;;  %5708 = vrcp.f32 %v3931_v41  ;;  %v3932_v56 = vadd.f32 1.0, %v5687_v52  ;;  %v4051_v1 = vadd.f32 %v5241_v46, %v4019_v12  ;;  %v5691_v31 = vpop.eup %5690  ;;  %v3728_v10 = vpop.f32.mrb[45].mxu0 }
 0x2f8   :  { %v4234_v3 = vmul.f32 -1.442695, %v5226_v34  ;;  %v3933_v48 = vadd.f32 1.0, %v5689_v15  ;;  %5710 = vpow2.f32 %v4233_v17  ;;  %v4052_v32 = vadd.f32 %v5242_v59, %v4020_v53  ;;  %v5693_v24 = vpop.eup %5692 }
 0x2f9   :  { %v4022_v54 = vmul.f32 %v5685_v39, %v8063_v6  ;;  %v5227_v36 = vadd.f32 %v2969_v51, %v7663_v11  ;;  %5712 = vrcp.f32 %v3932_v56  ;;  %v3934_v44 = vadd.f32 1.0, %v5691_v31  ;;  %4083 = vst [vmem:[%s7939_s3 + $0x50] sm:$0xff] %v4051_v1  ;;  %v5695_v20 = vpop.eup %5694  ;;  %v2975_v42 = vpop.f32.mrb[62].mxu1 }
 0x2fa   :  { %v5243_v9 = vadd.f32 %v3726_v7, %v7689_v49  ;;  %v5228_v12 = vadd.f32 %v2971_v37, %v7668_v19  ;;  %5714 = vrcp.f32 %v3933_v48  ;;  %4084 = vst [vmem:[%s7939_s3 + $0x58] sm:$0xff] %v4052_v32  ;;  %v5244_v14 = vadd.f32 %v3728_v10, %v7719_v55  ;;  %v5697_v61 = vpop.eup %5696  ;;  %v3732_v52 = vpop.f32.mrb[46].mxu0  ;;  %v8068_v10 = vld [vmem:[#allocation16_spill] sm:$0xff] }
 0x2fb   :  { %v4235_v5 = vmul.f32 -1.442695, %v5227_v36  ;;  %v8064_v53 = vmax.f32 %v8045_v43, 0.0  ;;  %5716 = vrcp.f32 %v3934_v44  ;;  %v8065_v13 = vmax.f32 %v8046_v50, 0.0  ;;  %v2977_v17 = vpop.f32.mrb[63].mxu1 }
 0x2fc   :  { %v4053_v25 = vadd.f32 %v5243_v9, %v4021_v45  ;;  %v4236_v22 = vmul.f32 -1.442695, %v5228_v12  ;;  %v5699_v41 = vpop.eup %5698  ;;  %v3935_v46 = vadd.f32 1.0, %v5697_v61  ;;  %5718 = vpow2.f32 %v4234_v3  ;;  %v3734_v45 = vpop.f32.mrb[47].mxu0 }
 0x2fd   :  { %v4023_v60 = vmul.f32 %v5693_v24, %v8064_v53  ;;  %v4024_v39 = vmul.f32 %v5695_v20, %v8065_v13  ;;  %v4054_v34 = vadd.f32 %v5244_v14, %v4022_v54  ;;  %v5229_v29 = vadd.f32 %v2975_v42, %v7663_v11  ;;  %v5701_v59 = vpop.eup %5700  ;;  %v3577_v48 = vpop.f32.mrb[64].mxu1 }
 0x2fe   :  { %v3936_v6 = vadd.f32 1.0, %v5699_v41  ;;  %5720 = vpow2.f32 %v4235_v5  ;;  %4085 = vst [vmem:[%s7939_s3 + $0x60] sm:$0xff] %v4053_v25  ;;  %v5245_v43 = vadd.f32 %v3732_v52, %v7689_v49  ;;  %v5230_v50 = vadd.f32 %v2977_v17, %v7668_v19  ;;  %v5703_v15 = vpop.eup %5702  ;;  %v3579_v44 = vpop.f32.mrb[65].mxu1 }
 0x2ff   :  { %5722 = vrcp.f32 %v3935_v46  ;;  %4086 = vst [vmem:[%s7939_s3 + $0x68] sm:$0xff] %v4054_v34  ;;  %v4237_v11 = vmul.f32 -1.442695, %v5229_v29  ;;  %v5246_v54 = vadd.f32 %v3734_v45, %v7719_v55  ;;  %v8066_v56 = vmax.f32 %v8047_v57, 0.0  ;;  %v5705_v3 = vpop.eup %5704  ;;  %v3738_v9 = vpop.f32.mrb[64].mxu0  ;;  %v8072_v45 = vld [vmem:[#allocation18_spill] sm:$0xff] }
 0x300   :  { %5724 = vrcp.f32 %v3936_v6  ;;  %v4055_v51 = vadd.f32 %v5245_v43, %v4023_v60  ;;  %v4238_v31 = vmul.f32 -1.442695, %v5230_v50  ;;  %v8067_v19 = vmax.f32 %v8048_v23, 0.0  ;;  %v5707_v36 = vpop.eup %5706  ;;  %v3740_v5 = vpop.f32.mrb[65].mxu0 }
 0x301   :  { %v4025_v1 = vmul.f32 %v5701_v59, %v8066_v56  ;;  %v3937_v7 = vadd.f32 1.0, %v5705_v3  ;;  %5726 = vpow2.f32 %v4236_v22  ;;  %v4056_v37 = vadd.f32 %v5246_v54, %v4024_v39  ;;  %v5709_v12 = vpop.eup %5708  ;;  %v3583_v13 = vpop.f32.mrb[66].mxu1 }
 0x302   :  { %v4026_v32 = vmul.f32 %v5703_v15, %v8067_v19  ;;  %v5248_v24 = vadd.f32 %v7723_v30, %v3577_v48  ;;  %v3806_v57 = vmax.f32 %v8068_v10, 0.0  ;;  %v3938_v20 = vadd.f32 1.0, %v5707_v36  ;;  %4087 = vst [vmem:[%s7939_s3 + $0x70] sm:$0xff] %v4055_v51  ;;  %v5711_v14 = vpop.eup %5710  ;;  %v3585_v46 = vpop.f32.mrb[67].mxu1  ;;  %v8074_v19 = vld [vmem:[#allocation17_spill] sm:$0xff] }
 0x303   :  { %5728 = vpow2.f32 %v4237_v11  ;;  %v5251_v23 = vadd.f32 %v7757_v47, %v3579_v44  ;;  %v5253_v53 = vadd.f32 %v7634_v58, %v7689_v49  ;;  %4088 = vst [vmem:[%s7939_s3 + $0x78] sm:$0xff] %v4056_v37  ;;  %v8069_v60 = vmax.f32 %v8049_v0, 0.0  ;;  %v5713_v25 = vpop.eup %5712  ;;  %v3744_v34 = vpop.f32.mrb[66].mxu0 }
 0x304   :  { %5730 = vrcp.f32 %v3937_v7  ;;  %v5249_v30 = vadd.f32 %v5248_v24, %v3738_v9  ;;  %v5256_v22 = vadd.f32 %v7636_v28, %v7719_v55  ;;  %v3939_v47 = vadd.f32 1.0, %v5711_v14  ;;  %v5715_v39 = vpop.eup %5714  ;;  %v3746_v6 = vpop.f32.mrb[67].mxu0 }
 0x305   :  { %v4027_v61 = vmul.f32 %v5709_v12, %v8069_v60  ;;  %5732 = vrcp.f32 %v3938_v20  ;;  %v5252_v42 = vadd.f32 %v5251_v23, %v3740_v5  ;;  %v5254_v41 = vadd.f32 %v5253_v53, %v3583_v13  ;;  %v5717_v17 = vpop.eup %5716  ;;  %v3589_v48 = vpop.f32.mrb[68].mxu1 }
 0x306   :  { %5734 = vpow2.f32 %v4238_v31  ;;  %v4057_v58 = vadd.f32 %v5249_v30, %v4025_v1  ;;  %v8070_v29 = vmax.f32 %v8050_v8, 0.0  ;;  %v5257_v59 = vadd.f32 %v5256_v22, %v3585_v46  ;;  %v5719_v50 = vpop.eup %5718  ;;  %v8073_v1 = vld [vmem:[#allocation19_spill] sm:$0xff]  ;;  %v3591_v24 = vpop.f32.mrb[69].mxu1  ;;  %v8075_v30 = vld [vmem:[#allocation21_spill] sm:$0xff] }
 0x307   :  { %5736 = vrcp.f32 %v3939_v47  ;;  %v4058_v0 = vadd.f32 %v5252_v42, %v4026_v32  ;;  %v8071_v28 = vmax.f32 %v8051_v4, 0.0  ;;  %v3807_v15 = vmax.f32 %v8072_v45, 0.0  ;;  %v3750_v44 = vpop.f32.mrb[68].mxu0 }
 0x308   :  { %v4028_v52 = vmul.f32 %v5713_v25, %v8070_v29  ;;  %v5259_v11 = vadd.f32 %v7638_v33, %v7689_v49  ;;  %4089 = vst [vmem:[%s7939_s3 + $0x80] sm:$0xff] %v4057_v58  ;;  %v5255_v8 = vadd.f32 %v5254_v41, %v3744_v34  ;;  %v4030_v54 = vmul.f32 %v5717_v17, %v3806_v57  ;;  %v5721_v56 = vpop.eup %5720 }
 0x309   :  { %v4029_v43 = vmul.f32 %v5715_v39, %v8071_v28  ;;  %v3808_v3 = vmax.f32 %v8073_v1, 0.0  ;;  %v5262_v51 = vadd.f32 %v7640_v40, %v7719_v55  ;;  %v3940_v4 = vadd.f32 1.0, %v5719_v50  ;;  %4090 = vst [vmem:[%s7939_s3 + $0x88] sm:$0xff] %v4058_v0  ;;  %v5723_v33 = vpop.eup %5722  ;;  %v3752_v40 = vpop.f32.mrb[69].mxu0 }
 0x30a   :  { %v5258_v31 = vadd.f32 %v5257_v59, %v3746_v6  ;;  %v3809_v32 = vmax.f32 %v8074_v19, 0.0  ;;  %v3941_v36 = vadd.f32 1.0, %v5721_v56  ;;  %v4059_v7 = vadd.f32 %v5255_v8, %v4027_v61  ;;  %v5725_v9 = vpop.eup %5724  ;;  %v3756_v46 = vpop.f32.mrb[70].mxu0 }
 0x30b   :  { %v5260_v37 = vadd.f32 %v5259_v11, %v3589_v48  ;;  %5738 = vrcp.f32 %v3940_v4  ;;  %v5263_v10 = vadd.f32 %v5262_v51, %v3591_v24  ;;  %v4031_v57 = vmul.f32 %v5723_v33, %v3807_v15  ;;  %v5727_v20 = vpop.eup %5726  ;;  %v8076_v4 = vld [vmem:[#allocation23_spill] sm:$0xff] }
 0x30c   :  { %v4060_v12 = vadd.f32 %v5258_v31, %v4028_v52  ;;  %v5265_v23 = vadd.f32 %v7642_v63, %v7689_v49  ;;  %5740 = vrcp.f32 %v3941_v36  ;;  %4091 = vst [vmem:[%s7939_s3 + $0x90] sm:$0xff] %v4059_v7  ;;  %v4032_v14 = vmul.f32 %v5725_v9, %v3808_v3  ;;  %v3595_v63 = vpop.f32.mrb[70].mxu1 }
 0x30d   :  { %v5261_v5 = vadd.f32 %v5260_v37, %v3750_v44  ;;  %v5729_v53 = vpop.eup %5728  ;;  %v3810_v60 = vmax.f32 %v8075_v30, 0.0  ;;  %v5268_v61 = vadd.f32 %v7644_v18, %v7719_v55  ;;  %v3942_v25 = vadd.f32 1.0, %v5727_v20  ;;  %v3597_v41 = vpop.f32.mrb[71].mxu1  ;;  %v8078_v30 = vld [vmem:[#allocation22_spill] sm:$0xff] }
 0x30e   :  { %4092 = vst [vmem:[%s7939_s3 + $0x98] sm:$0xff] %v4060_v12  ;;  %v5264_v22 = vadd.f32 %v5263_v10, %v3752_v40  ;;  %v5731_v47 = vpop.eup %5730  ;;  %v3811_v42 = vmax.f32 %v7427_v16, 0.0  ;;  %v3943_v13 = vadd.f32 1.0, %v5729_v53  ;;  %v5266_v58 = vadd.f32 %v5265_v23, %v3595_v63  ;;  %v3758_v18 = vpop.f32.mrb[71].mxu0 }
 0x30f   :  { %v4061_v39 = vadd.f32 %v5261_v5, %v4029_v43  ;;  %v5733_v34 = vpop.eup %5732  ;;  %5742 = vrcp.f32 %v3942_v25  ;;  %v5269_v52 = vadd.f32 %v5268_v61, %v3597_v41  ;;  %v4033_v17 = vmul.f32 %v5731_v47, %v3809_v32  ;;  %v3601_v15 = vpop.f32.mrb[72].mxu1 }
 0x310   :  { %v4062_v29 = vadd.f32 %v5264_v22, %v4030_v54  ;;  %v5735_v0 = vpop.eup %5734  ;;  %v5271_v59 = vadd.f32 %v7646_v26, %v7689_v49  ;;  %5744 = vrcp.f32 %v3943_v13  ;;  %v5267_v16 = vadd.f32 %v5266_v58, %v3756_v46  ;;  %v3603_v8 = vpop.f32.mrb[73].mxu1  ;;  %v8079_v46 = vld [vmem:[#allocation26_spill] sm:$0xff] }
 0x311   :  { %4093 = vst [vmem:[%s7939_s3 + $0xa0] sm:$0xff] %v4061_v39  ;;  %v4034_v6 = vmul.f32 %v5733_v34, %v3810_v60  ;;  %v5737_v28 = vpop.eup %5736  ;;  %v5274_v43 = vadd.f32 %v7648_v38, %v7719_v55  ;;  %v3944_v50 = vadd.f32 1.0, %v5735_v0  ;;  %v5270_v45 = vadd.f32 %v5269_v52, %v3758_v18  ;;  %v3762_v54 = vpop.f32.mrb[72].mxu0  ;;  %v8081_v0 = vld [vmem:[#allocation24_spill] sm:$0xff] }
 0x312   :  { %4094 = vst [vmem:[%s7939_s3 + $0xa8] sm:$0xff] %v4062_v29  ;;  %v4063_v11 = vadd.f32 %v5267_v16, %v4031_v57  ;;  %v5272_v26 = vadd.f32 %v5271_v59, %v3601_v15  ;;  %v4035_v56 = vmul.f32 %v5737_v28, %v3811_v42  ;;  %v3764_v51 = vpop.f32.mrb[73].mxu0  ;;  %v3812_v31 = vmax.f32 %v8076_v4, 0.0  ;;  %v3607_v7 = vpop.f32.mrb[74].mxu1  ;;  %v8080_v29 = vld [vmem:[#allocation27_spill] sm:$0xff] }
 0x313   :  { %5746 = vrcp.f32 %v3944_v50  ;;  %v4064_v1 = vadd.f32 %v5270_v45, %v4032_v14  ;;  %v5275_v3 = vadd.f32 %v5274_v43, %v3603_v8  ;;  %v5277_v38 = vadd.f32 %v7650_v35, %v7689_v49  ;;  %v3609_v44 = vpop.f32.mrb[75].mxu1  ;;  %v3768_v9 = vpop.f32.mrb[74].mxu0  ;;  %v8077_v14 = vld [vmem:[#allocation20_spill] sm:$0xff] }
 0x314   :  { %4095 = vst [vmem:[%s7939_s3 + $0xb0] sm:$0xff] %v4063_v11  ;;  %v5273_v48 = vadd.f32 %v5272_v26, %v3762_v54  ;;  %v3813_v19 = vmax.f32 %v7450_v2, 0.0  ;;  %v5280_v32 = vadd.f32 %v7652_v21, %v7719_v55  ;;  %v3770_v57 = vpop.f32.mrb[75].mxu0  ;;  %v3814_v2 = vmax.f32 %v7456_v27, 0.0 }
 0x315   :  { %v5739_v33 = vpop.eup %5738  ;;  %4096 = vst [vmem:[%s7939_s3 + $0xb8] sm:$0xff] %v4064_v1  ;;  %v5276_v36 = vadd.f32 %v5275_v3, %v3764_v51  ;;  %v5278_v35 = vadd.f32 %v5277_v38, %v3607_v7  ;;  %v5283_v21 = vadd.f32 %v7654_v62, %v7689_v49  ;;  %v3815_v53 = vmax.f32 %v8077_v14, 0.0  ;;  %v3613_v27 = vpop.f32.mrb[76].mxu1 }
 0x316   :  { %v5741_v37 = vpop.eup %5740  ;;  %v4065_v24 = vadd.f32 %v5273_v48, %v4033_v17  ;;  %v4036_v12 = vmul.f32 %v5739_v33, %v3812_v31  ;;  %v5281_v40 = vadd.f32 %v5280_v32, %v3609_v44  ;;  %v5286_v60 = vadd.f32 %v8078_v30, %v7719_v55  ;;  %v3615_v63 = vpop.f32.mrb[77].mxu1 }
 0x317   :  { %v4066_v10 = vadd.f32 %v5276_v36, %v4034_v6  ;;  %v4037_v20 = vmul.f32 %v5741_v37, %v3813_v19  ;;  %v5279_v23 = vadd.f32 %v5278_v35, %v3768_v9  ;;  %v5284_v62 = vadd.f32 %v5283_v21, %v3613_v27  ;;  %v3774_v47 = vpop.f32.mrb[76].mxu0 }
 0x318   :  { %4097 = vst [vmem:[%s7939_s3 + $0xc0] sm:$0xff] %v4065_v24  ;;  %v5282_v61 = vadd.f32 %v5281_v40, %v3770_v57  ;;  %v5287_v39 = vadd.f32 %v5286_v60, %v3615_v63  ;;  %v3776_v58 = vpop.f32.mrb[77].mxu0  ;;  %v3816_v34 = vmax.f32 %v8079_v46, 0.0  ;;  %v5289_v52 = vadd.f32 %v8080_v29, %v7689_v49 }
 0x319   :  { %v5743_v5 = vpop.eup %5742  ;;  %4098 = vst [vmem:[%s7939_s3 + $0xc8] sm:$0xff] %v4066_v10  ;;  %v4067_v22 = vadd.f32 %v5279_v23, %v4035_v56  ;;  %v5285_v18 = vadd.f32 %v5284_v62, %v3774_v47  ;;  %v5292_v59 = vadd.f32 %v8081_v0, %v7719_v55  ;;  %v3619_v6 = vpop.f32.mrb[78].mxu1 }
 0x31a   :  { %v5745_v25 = vpop.eup %5744  ;;  %v4038_v42 = vmul.f32 %v5743_v5, %v3814_v2  ;;  %v4068_v13 = vadd.f32 %v5282_v61, %v4036_v12  ;;  %v5288_v16 = vadd.f32 %v5287_v39, %v3776_v58  ;;  %v5290_v43 = vadd.f32 %v5289_v52, %v3619_v6  ;;  %v3621_v50 = vpop.f32.mrb[79].mxu1 }
 0x31b   :  { %v4039_v41 = vmul.f32 %v5745_v25, %v3815_v53  ;;  %4099 = vst [vmem:[%s7939_s3 + $0xd0] sm:$0xff] %v4067_v22  ;;  %v4069_v28 = vadd.f32 %v5285_v18, %v4037_v20  ;;  %v3780_v45 = vpop.f32.mrb[78].mxu0  ;;  %v5293_v11 = vadd.f32 %v5292_v59, %v3621_v50 }
 0x31c   :  { %4100 = vst [vmem:[%s7939_s3 + $0xd8] sm:$0xff] %v4068_v13  ;;  %v4070_v15 = vadd.f32 %v5288_v16, %v4038_v42  ;;  %v3782_v26 = vpop.f32.mrb[79].mxu0  ;;  %v5291_v8 = vadd.f32 %v5290_v43, %v3780_v45 }
 0x31d   :  { %v5747_v17 = vpop.eup %5746  ;;  %4101 = vst [vmem:[%s7939_s3 + $0xe0] sm:$0xff] %v4069_v28  ;;  %v5294_v55 = vadd.f32 %v5293_v11, %v3782_v26 }
 0x31e   :  { %v4040_v49 = vmul.f32 %v5747_v17, %v3816_v34  ;;  %4102 = vst [vmem:[%s7939_s3 + $0xe8] sm:$0xff] %v4070_v15  ;;  %v4071_v54 = vadd.f32 %v5291_v8, %v4039_v41 }
 0x320   :  { %v4072_v56 = vadd.f32 %v5294_v55, %v4040_v49  ;;  %4103 = vst [vmem:[%s7939_s3 + $0xf0] sm:$0xff] %v4071_v54 }
 0x322   :  { %4104 = vst [vmem:[%s7939_s3 + $0xf8] sm:$0xff] %v4072_v56 }
 0x323   :  { %4109 = vsyncpa [#allocation4], 1 }
 0x324   :  { %4110 = vsyncpa [#allocation6], 1 }

</bundles_post_ra>
